<compile_context>
chip_gen: v7x
topology: tpu7x:2x2x1
jax: 0.10.0
libtpu: 0.0.40
codegen_flags: <defaults>
</compile_context>

<pallas_src>
import math

import jax
import jax.numpy as jnp
from jax.experimental import pallas as pl
from jax.experimental.pallas import tpu as pltpu

# ---------------- model hyperparameters (small, consistent with the module) -------------
VOCAB = 128          # vocab_size
HIDDEN = 32          # n_embd
N_LAYERS = 4         # n_layer
N_HEADS = 4          # n_head
HEAD_DIM = HIDDEN // N_HEADS
N_POSITIONS = 512    # n_positions / n_ctx
LN_EPS = 1e-5
MASK_VALUE = -1e30   # large finite additive mask (finfo.min can overflow to -inf -> NaN)


def _layer_norm(h, w_row, b_row):
    # torch.nn.LayerNorm semantics: biased variance over last dim, eps inside sqrt.
    mu = jnp.mean(h, axis=-1, keepdims=True)
    var = jnp.mean((h - mu) ** 2, axis=-1, keepdims=True)
    return (h - mu) * jax.lax.rsqrt(var + LN_EPS) * w_row + b_row


def _gelu_new(x):
    # HF "gelu_new" activation (tanh approximation) -- EUP tanh.
    return 0.5 * x * (1.0 + jnp.tanh(
        jnp.sqrt(2.0 / jnp.pi) * (x + 0.044715 * x * x * x)))


# ---------------- fused Pallas kernel ----------------------------------------------------

def gpt2_fused_kernel(ids_ref,     # (NB, T, 1) int32   token ids
                      wte_ref,     # (V, H)     f32     token embedding table
                      wpe_ref,     # (P, H)     f32     position embedding table
                      ln_ref,      # (L, 4, H)  f32     [ln1_w, ln1_b, ln2_w, ln2_b]
                      wq_ref,      # (L, NH, H, HD) bf16  (1/sqrt(HD) pre-folded)
                      wk_ref,      # (L, NH, H, HD) bf16
                      wv_ref,      # (L, NH, H, HD) bf16
                      wao_ref,     # (L, NH, HD, H) bf16  attn c_proj, per-head rows
                      wfc_ref,     # (L, H, 4H) bf16
                      wmp_ref,     # (L, 4H, H) bf16
                      bqkv_ref,    # (L, 3, NH, HD) f32   c_attn bias (q scaled)
                      brow_ref,    # (L, 3, 4H) f32  row0=attn c_proj, row1=c_fc, row2=mlp c_proj
                      lnf_ref,     # (2, H)     f32     [ln_f_w, ln_f_b]
                      wtet_ref,    # (H, V)     bf16    tied lm_head (wte transposed)
                      o_ref):      # (NB, T, V) f32     logits
    """Entire GPT-2 forward (embedding + all layers + ln_f + lm_head) for one batch block."""
    f32, bf16 = jnp.float32, jnp.bfloat16
    NB, T, _ = ids_ref.shape
    M = NB * T

    # ---- token + position embedding, fused: one-hot(ids) @ wte on the MXU ----------
    ids = ids_ref[...].reshape(M, 1)                                    # (M, 1) int32
    viota = jax.lax.broadcasted_iota(jnp.int32, (M, VOCAB), 1)
    onehot = (viota == ids).astype(f32)                                 # (M, V)
    emb = jnp.dot(onehot, wte_ref[...], preferred_element_type=f32)     # (M, H)
    x = (emb.reshape(NB, T, HIDDEN) + wpe_ref[0:T, :][None]).reshape(M, HIDDEN)

    # ---- causal mask bias: built once; broadcast hoisted out of the layer loop -----
    qi = jax.lax.broadcasted_iota(jnp.int32, (T, T), 0)
    ki = jax.lax.broadcasted_iota(jnp.int32, (T, T), 1)
    mask = jnp.where(ki <= qi, 0.0, MASK_VALUE).astype(f32)             # (T, T)
    mask3 = jnp.broadcast_to(mask[None], (NB, T, T))                    # (NB, T, T)

    for l in range(N_LAYERS):                       # static unrolled layer loop
        # --- ln_1 + causal multi-head self-attention -----------------------------
        h1 = _layer_norm(x, ln_ref[l, 0], ln_ref[l, 1]).astype(bf16)    # (M, H)
        attn = jnp.zeros((M, HIDDEN), f32)
        for n in range(N_HEADS):                    # per-head slabs: lane-0 aligned tiles,
                                                    # no head reshapes / lane slices
            q = jnp.dot(h1, wq_ref[l, n], preferred_element_type=f32) + bqkv_ref[l, 0, n]
            k = jnp.dot(h1, wk_ref[l, n], preferred_element_type=f32) + bqkv_ref[l, 1, n]
            v = jnp.dot(h1, wv_ref[l, n], preferred_element_type=f32) + bqkv_ref[l, 2, n]
            q3 = q.reshape(NB, T, HEAD_DIM)         # leading-dim regroup only
            k3 = k.reshape(NB, T, HEAD_DIM)
            v3 = v.reshape(NB, T, HEAD_DIM)
            # 1/sqrt(HEAD_DIM) already folded into wq / q-bias at pack time.
            s = jnp.einsum('btd,bsd->bts', q3, k3,
                           preferred_element_type=f32) + mask3          # (NB, T, T)
            s_max = jnp.max(s, axis=-1, keepdims=True)
            p = jnp.exp(s - s_max)
            p = p * pl.reciprocal(jnp.sum(p, axis=-1, keepdims=True), approx=True)
            ctx = jnp.einsum('bts,bsd->btd', p, v3,
                             preferred_element_type=f32)                # (NB, T, HD)
            attn = attn + jnp.dot(ctx.reshape(M, HEAD_DIM).astype(bf16), wao_ref[l, n],
                                  preferred_element_type=f32)           # Σ_heads -> (M, H)
        x = x + attn + brow_ref[l, 0, :HIDDEN]                          # residual + c_proj bias

        # --- ln_2 + MLP (gelu_new) ------------------------------------------------
        h2 = _layer_norm(x, ln_ref[l, 2], ln_ref[l, 3]).astype(bf16)
        ff = jnp.dot(h2, wfc_ref[l], preferred_element_type=f32) + brow_ref[l, 1]
        ff = _gelu_new(ff)
        ff = jnp.dot(ff.astype(bf16), wmp_ref[l],
                     preferred_element_type=f32) + brow_ref[l, 2, :HIDDEN]
        x = x + ff                                                      # residual

    # ---- final ln_f + tied lm_head: lane-dense (M, 128) logits store ---------------
    hf = _layer_norm(x, lnf_ref[0], lnf_ref[1]).astype(bf16)
    logits = jnp.dot(hf, wtet_ref[...], preferred_element_type=f32)     # (M, V)
    o_ref[...] = logits.reshape(NB, T, VOCAB)


# ---------------- wrappers ---------------------------------------------------------------

def _const_spec(arr):
    # Parameter slab: block == full array, same block for every grid step.
    # TODO(synk): pipeline_mode=pl.Buffered(1) would halve these slabs' resident VMEM
    #             (constant index map); omitted -- immaterial at ~0.3 MiB total.
    nd = arr.ndim
    return pl.BlockSpec(arr.shape, lambda i, _nd=nd: (0,) * _nd)


def run_gpt2_fused(input_ids, params, *, batch_block=None):
    """Whole GPT-2 forward as a single pallas_call.

    batch_block=None -> one grid step over the whole batch (optimal on single-TC v5e/v6e).
    batch_block=1    -> grid=(B,) with "parallel" semantics so on v7x each TensorCore
                        takes one batch row (use when B >= 2 and per-row work is non-trivial).
    """
    B, T = input_ids.shape
    nb = B if batch_block is None else max(1, min(batch_block, B))
    assert B % nb == 0
    steps = B // nb
    ids3 = input_ids.astype(jnp.int32).reshape(B, T, 1)   # ids on sublanes, lane dim = 1

    slabs = (params["wte"], params["wpe"], params["ln_stack"],
             params["w_q"], params["w_k"], params["w_v"], params["w_ao"],
             params["w_fc"], params["w_mp"],
             params["b_qkv"], params["b_rows"], params["ln_f"], params["wte_t"])

    return pl.pallas_call(
        gpt2_fused_kernel,
        out_shape=jax.ShapeDtypeStruct((B, T, VOCAB), jnp.float32),
        grid=(steps,),
        in_specs=[pl.BlockSpec((nb, T, 1), lambda i: (i, 0, 0))]
                 + [_const_spec(s) for s in slabs],
        out_specs=pl.BlockSpec((nb, T, VOCAB), lambda i: (i, 0, 0)),
        compiler_params=pltpu.CompilerParams(dimension_semantics=("parallel",)),
    )(ids3, *slabs)


def init_reference_params(key):
    """Canonical HF-GPT-2-like f32 parameters (std=0.02 normals, zero biases, unit LN)."""
    std = 0.02
    ks = jax.random.split(key, 6)
    L, H = N_LAYERS, HIDDEN
    return {
        "wte": jax.random.normal(ks[0], (VOCAB, H), jnp.float32) * std,
        "wpe": jax.random.normal(ks[1], (N_POSITIONS, H), jnp.float32) * std,
        "ln1_w": jnp.ones((L, H), jnp.float32), "ln1_b": jnp.zeros((L, H), jnp.float32),
        "ln2_w": jnp.ones((L, H), jnp.float32), "ln2_b": jnp.zeros((L, H), jnp.float32),
        "c_attn_w": jax.random.normal(ks[2], (L, H, 3 * H), jnp.float32) * std,
        "c_attn_b": jnp.zeros((L, 3 * H), jnp.float32),
        "attn_proj_w": jax.random.normal(ks[3], (L, H, H), jnp.float32) * std,
        "attn_proj_b": jnp.zeros((L, H), jnp.float32),
        "c_fc_w": jax.random.normal(ks[4], (L, H, 4 * H), jnp.float32) * std,
        "c_fc_b": jnp.zeros((L, 4 * H), jnp.float32),
        "mlp_proj_w": jax.random.normal(ks[5], (L, 4 * H, H), jnp.float32) * std,
        "mlp_proj_b": jnp.zeros((L, H), jnp.float32),
        "lnf_w": jnp.ones((H,), jnp.float32), "lnf_b": jnp.zeros((H,), jnp.float32),
    }


def pack_params(p):
    """Repack canonical HF-layout params into the kernel's lane-friendly slabs."""
    L, H, NH, HD = N_LAYERS, HIDDEN, N_HEADS, HEAD_DIM
    inv_scale = 1.0 / math.sqrt(HD)

    # c_attn weight columns are [q | k | v], each head-major; split per head and
    # fold the attention scale into the query projection.
    caw = p["c_attn_w"].reshape(L, H, 3, NH, HD)
    w_q = jnp.transpose(caw[:, :, 0], (0, 2, 1, 3)) * inv_scale         # (L, NH, H, HD)
    w_k = jnp.transpose(caw[:, :, 1], (0, 2, 1, 3))
    w_v = jnp.transpose(caw[:, :, 2], (0, 2, 1, 3))
    b_qkv = p["c_attn_b"].reshape(L, 3, NH, HD)
    b_qkv = b_qkv.at[:, 0].multiply(inv_scale)                          # scale q bias too
    w_ao = p["attn_proj_w"].reshape(L, NH, HD, H)                       # per-head rows

    # Remaining biases packed as sublane rows so every read starts at lane 0.
    b_rows = jnp.zeros((L, 3, 4 * H), jnp.float32)
    b_rows = b_rows.at[:, 0, :H].set(p["attn_proj_b"])
    b_rows = b_rows.at[:, 1, :].set(p["c_fc_b"])
    b_rows = b_rows.at[:, 2, :H].set(p["mlp_proj_b"])

    ln_stack = jnp.stack([p["ln1_w"], p["ln1_b"], p["ln2_w"], p["ln2_b"]], axis=1)  # (L,4,H)

    return {
        "wte": p["wte"],                                    # f32 embedding matmul operand
        "wpe": p["wpe"],                                    # f32 (P, H)
        "ln_stack": ln_stack,
        "w_q": w_q.astype(jnp.bfloat16),
        "w_k": w_k.astype(jnp.bfloat16),
        "w_v": w_v.astype(jnp.bfloat16),
        "w_ao": w_ao.astype(jnp.bfloat16),
        "w_fc": p["c_fc_w"].astype(jnp.bfloat16),
        "w_mp": p["mlp_proj_w"].astype(jnp.bfloat16),
        "b_qkv": b_qkv,
        "b_rows": b_rows,
        "ln_f": jnp.stack([p["lnf_w"], p["lnf_b"]]),        # (2, H)
        "wte_t": jnp.transpose(p["wte"]).astype(jnp.bfloat16),   # (H, V) tied lm_head
    }


@jax.jit
def lightweight_gpt2_forward(input_ids, packed_params):
    """Equivalent of LightweightGPT2.forward(input_ids) -> logits (B, T, vocab)."""
    return run_gpt2_fused(input_ids, packed_params)


if __name__ == "__main__":
    key = jax.random.PRNGKey(0)
    pkey, dkey = jax.random.split(key)
    packed = pack_params(init_reference_params(pkey))

    B, T = 2, 8
    input_ids = jax.random.randint(dkey, (B, T), 0, VOCAB, dtype=jnp.int32)

    logits = lightweight_gpt2_forward(input_ids, packed)
    jax.block_until_ready(logits)

    assert logits.shape == (B, T, VOCAB), logits.shape
    assert logits.dtype == jnp.float32
    assert bool(jnp.all(jnp.isfinite(logits)))
    print("KERNEL_OK")
</pallas_src>

<mosaic_0001>
module attributes {stable_mosaic.version = 11 : i64} {
  func.func @gpt2_fused_kernel(%arg0: i32, %arg1: memref<2x8x1xi32, #tpu.memory_space<vmem>>, %arg2: memref<128x32xf32, #tpu.memory_space<vmem>>, %arg3: memref<512x32xf32, #tpu.memory_space<vmem>>, %arg4: memref<4x4x32xf32, #tpu.memory_space<vmem>>, %arg5: memref<4x4x32x8xbf16, #tpu.memory_space<vmem>>, %arg6: memref<4x4x32x8xbf16, #tpu.memory_space<vmem>>, %arg7: memref<4x4x32x8xbf16, #tpu.memory_space<vmem>>, %arg8: memref<4x4x8x32xbf16, #tpu.memory_space<vmem>>, %arg9: memref<4x32x128xbf16, #tpu.memory_space<vmem>>, %arg10: memref<4x128x32xbf16, #tpu.memory_space<vmem>>, %arg11: memref<4x3x4x8xf32, #tpu.memory_space<vmem>>, %arg12: memref<4x3x128xf32, #tpu.memory_space<vmem>>, %arg13: memref<2x32xf32, #tpu.memory_space<vmem>>, %arg14: memref<32x128xbf16, #tpu.memory_space<vmem>>, %arg15: memref<2x8x128xf32, #tpu.memory_space<vmem>>) attributes {dimension_semantics = [#tpu.dimension_semantics<parallel>], iteration_bounds = array<i64: 1>, scalar_prefetch = 0 : i64, scratch_operands = 0 : i64, tpu.core_type = #tpu.core_type<tc>, window_params = [{transform_indices = @transform_0, window_bounds = array<i64: 2, 8, 1>}, {pipeline_mode = #tpu.pipeline_mode<synchronous>, transform_indices = @transform_1, window_bounds = array<i64: 128, 32>}, {pipeline_mode = #tpu.pipeline_mode<synchronous>, transform_indices = @transform_2, window_bounds = array<i64: 512, 32>}, {pipeline_mode = #tpu.pipeline_mode<synchronous>, transform_indices = @transform_3, window_bounds = array<i64: 4, 4, 32>}, {pipeline_mode = #tpu.pipeline_mode<synchronous>, transform_indices = @transform_4, window_bounds = array<i64: 4, 4, 32, 8>}, {pipeline_mode = #tpu.pipeline_mode<synchronous>, transform_indices = @transform_5, window_bounds = array<i64: 4, 4, 32, 8>}, {pipeline_mode = #tpu.pipeline_mode<synchronous>, transform_indices = @transform_6, window_bounds = array<i64: 4, 4, 32, 8>}, {pipeline_mode = #tpu.pipeline_mode<synchronous>, transform_indices = @transform_7, window_bounds = array<i64: 4, 4, 8, 32>}, {pipeline_mode = #tpu.pipeline_mode<synchronous>, transform_indices = @transform_8, window_bounds = array<i64: 4, 32, 128>}, {pipeline_mode = #tpu.pipeline_mode<synchronous>, transform_indices = @transform_9, window_bounds = array<i64: 4, 128, 32>}, {pipeline_mode = #tpu.pipeline_mode<synchronous>, transform_indices = @transform_10, window_bounds = array<i64: 4, 3, 4, 8>}, {pipeline_mode = #tpu.pipeline_mode<synchronous>, transform_indices = @transform_11, window_bounds = array<i64: 4, 3, 128>}, {pipeline_mode = #tpu.pipeline_mode<synchronous>, transform_indices = @transform_12, window_bounds = array<i64: 2, 32>}, {pipeline_mode = #tpu.pipeline_mode<synchronous>, transform_indices = @transform_13, window_bounds = array<i64: 32, 128>}, {transform_indices = @transform_14, window_bounds = array<i64: 2, 8, 128>}]} {
    %c0 = arith.constant 0 : index
    %c0_0 = arith.constant 0 : index
    %c0_1 = arith.constant 0 : index
    %0 = vector.load %arg1[%c0, %c0_0, %c0_1] : memref<2x8x1xi32, #tpu.memory_space<vmem>>, vector<2x8x1xi32>
    %1 = vector.shape_cast %0 : vector<2x8x1xi32> to vector<16x1xi32>
    %2 = tpu.iota {dimensions = array<i32: 1>} : vector<16x128xi32>
    %3 = vector.broadcast %1 : vector<16x1xi32> to vector<16x128xi32>
    %4 = arith.cmpi eq, %2, %3 : vector<16x128xi32>
    %5 = arith.extui %4 : vector<16x128xi1> to vector<16x128xi32>
    %6 = arith.sitofp %5 : vector<16x128xi32> to vector<16x128xf32>
    %c0_2 = arith.constant 0 : index
    %c0_3 = arith.constant 0 : index
    %7 = vector.load %arg2[%c0_2, %c0_3] : memref<128x32xf32, #tpu.memory_space<vmem>>, vector<128x32xf32>
    %cst = arith.constant dense<0.000000e+00> : vector<16x32xf32>
    %8 = tpu.matmul %6, %7, %cst {dimension_numbers = #tpu.dot_dimension_numbers<[1], [0], [0], [1], [0, 0, 1, 1], [], []>} : vector<16x128xf32>, vector<128x32xf32>, vector<16x32xf32> -> vector<16x32xf32>
    %9 = vector.shape_cast %8 : vector<16x32xf32> to vector<2x8x32xf32>
    %c0_4 = arith.constant 0 : index
    %c0_5 = arith.constant 0 : index
    %10 = vector.load %arg3[%c0_4, %c0_5] : memref<512x32xf32, #tpu.memory_space<vmem>>, vector<8x32xf32>
    %11 = vector.shape_cast %10 : vector<8x32xf32> to vector<1x8x32xf32>
    %12 = vector.broadcast %11 : vector<1x8x32xf32> to vector<2x8x32xf32>
    %13 = arith.addf %9, %12 : vector<2x8x32xf32>
    %14 = vector.shape_cast %13 : vector<2x8x32xf32> to vector<16x32xf32>
    %15 = tpu.iota {dimensions = array<i32: 0>} : vector<8x8xi32>
    %16 = tpu.iota {dimensions = array<i32: 1>} : vector<8x8xi32>
    %17 = arith.cmpi sle, %16, %15 : vector<8x8xi32>
    %cst_6 = arith.constant 0.000000e+00 : f32
    %cst_7 = arith.constant -1.000000e+30 : f32
    %18 = vector.broadcast %cst_6 : f32 to vector<8x8xf32>
    %19 = vector.broadcast %cst_7 : f32 to vector<8x8xf32>
    %20 = arith.select %17, %18, %19 : vector<8x8xi1>, vector<8x8xf32>
    %21 = vector.shape_cast %20 : vector<8x8xf32> to vector<1x8x8xf32>
    %22 = vector.shape_cast %21 : vector<1x8x8xf32> to vector<1x8x8xf32>
    %23 = vector.broadcast %22 : vector<1x8x8xf32> to vector<2x8x8xf32>
    %c0_8 = arith.constant 0 : index
    %c0_9 = arith.constant 0 : index
    %c0_10 = arith.constant 0 : index
    %24 = vector.load %arg4[%c0_8, %c0_9, %c0_10] : memref<4x4x32xf32, #tpu.memory_space<vmem>>, vector<1x1x32xf32>
    %25 = vector.shape_cast %24 : vector<1x1x32xf32> to vector<32xf32>
    %c0_11 = arith.constant 0 : index
    %c1 = arith.constant 1 : index
    %c0_12 = arith.constant 0 : index
    %26 = vector.load %arg4[%c0_11, %c1, %c0_12] : memref<4x4x32xf32, #tpu.memory_space<vmem>>, vector<1x1x32xf32>
    %27 = vector.shape_cast %26 : vector<1x1x32xf32> to vector<32xf32>
    %cst_13 = arith.constant dense<0.000000e+00> : vector<16xf32>
    %28 = vector.multi_reduction <add>, %14, %cst_13 [1] : vector<16x32xf32> to vector<16xf32>
    %29 = vector.shape_cast %28 : vector<16xf32> to vector<16x1xf32>
    %cst_14 = arith.constant 3.200000e+01 : f32
    %30 = vector.broadcast %cst_14 : f32 to vector<16x1xf32>
    %31 = arith.divf %29, %30 : vector<16x1xf32>
    %32 = vector.broadcast %31 : vector<16x1xf32> to vector<16x32xf32>
    %33 = arith.subf %14, %32 : vector<16x32xf32>
    %34 = arith.mulf %33, %33 : vector<16x32xf32>
    %cst_15 = arith.constant dense<0.000000e+00> : vector<16xf32>
    %35 = vector.multi_reduction <add>, %34, %cst_15 [1] : vector<16x32xf32> to vector<16xf32>
    %36 = vector.shape_cast %35 : vector<16xf32> to vector<16x1xf32>
    %cst_16 = arith.constant 3.200000e+01 : f32
    %37 = vector.broadcast %cst_16 : f32 to vector<16x1xf32>
    %38 = arith.divf %36, %37 : vector<16x1xf32>
    %39 = vector.broadcast %31 : vector<16x1xf32> to vector<16x32xf32>
    %40 = arith.subf %14, %39 : vector<16x32xf32>
    %cst_17 = arith.constant 9.99999974E-6 : f32
    %41 = vector.broadcast %cst_17 : f32 to vector<16x1xf32>
    %42 = arith.addf %38, %41 : vector<16x1xf32>
    %43 = math.rsqrt %42 : vector<16x1xf32>
    %44 = vector.broadcast %43 : vector<16x1xf32> to vector<16x32xf32>
    %45 = arith.mulf %40, %44 : vector<16x32xf32>
    %46 = vector.shape_cast %25 : vector<32xf32> to vector<1x32xf32>
    %47 = vector.broadcast %46 : vector<1x32xf32> to vector<16x32xf32>
    %48 = arith.mulf %45, %47 : vector<16x32xf32>
    %49 = vector.shape_cast %27 : vector<32xf32> to vector<1x32xf32>
    %50 = vector.broadcast %49 : vector<1x32xf32> to vector<16x32xf32>
    %51 = arith.addf %48, %50 : vector<16x32xf32>
    %52 = arith.truncf %51 : vector<16x32xf32> to vector<16x32xbf16>
    %cst_18 = arith.constant 0.000000e+00 : f32
    %53 = vector.broadcast %cst_18 : f32 to vector<16x32xf32>
    %c0_19 = arith.constant 0 : index
    %c0_20 = arith.constant 0 : index
    %c0_21 = arith.constant 0 : index
    %c0_22 = arith.constant 0 : index
    %54 = vector.load %arg5[%c0_19, %c0_20, %c0_21, %c0_22] : memref<4x4x32x8xbf16, #tpu.memory_space<vmem>>, vector<1x1x32x8xbf16>
    %55 = vector.shape_cast %54 : vector<1x1x32x8xbf16> to vector<32x8xbf16>
    %cst_23 = arith.constant dense<0.000000e+00> : vector<16x8xf32>
    %56 = tpu.matmul %52, %55, %cst_23 {dimension_numbers = #tpu.dot_dimension_numbers<[1], [0], [0], [1], [0, 0, 1, 1], [], []>} : vector<16x32xbf16>, vector<32x8xbf16>, vector<16x8xf32> -> vector<16x8xf32>
    %c0_24 = arith.constant 0 : index
    %c0_25 = arith.constant 0 : index
    %c0_26 = arith.constant 0 : index
    %c0_27 = arith.constant 0 : index
    %57 = vector.load %arg11[%c0_24, %c0_25, %c0_26, %c0_27] : memref<4x3x4x8xf32, #tpu.memory_space<vmem>>, vector<1x1x1x8xf32>
    %58 = vector.shape_cast %57 : vector<1x1x1x8xf32> to vector<8xf32>
    %59 = vector.shape_cast %58 : vector<8xf32> to vector<1x8xf32>
    %60 = vector.broadcast %59 : vector<1x8xf32> to vector<16x8xf32>
    %61 = arith.addf %56, %60 : vector<16x8xf32>
    %c0_28 = arith.constant 0 : index
    %c0_29 = arith.constant 0 : index
    %c0_30 = arith.constant 0 : index
    %c0_31 = arith.constant 0 : index
    %62 = vector.load %arg6[%c0_28, %c0_29, %c0_30, %c0_31] : memref<4x4x32x8xbf16, #tpu.memory_space<vmem>>, vector<1x1x32x8xbf16>
    %63 = vector.shape_cast %62 : vector<1x1x32x8xbf16> to vector<32x8xbf16>
    %cst_32 = arith.constant dense<0.000000e+00> : vector<16x8xf32>
    %64 = tpu.matmul %52, %63, %cst_32 {dimension_numbers = #tpu.dot_dimension_numbers<[1], [0], [0], [1], [0, 0, 1, 1], [], []>} : vector<16x32xbf16>, vector<32x8xbf16>, vector<16x8xf32> -> vector<16x8xf32>
    %c0_33 = arith.constant 0 : index
    %c1_34 = arith.constant 1 : index
    %c0_35 = arith.constant 0 : index
    %c0_36 = arith.constant 0 : index
    %65 = vector.load %arg11[%c0_33, %c1_34, %c0_35, %c0_36] : memref<4x3x4x8xf32, #tpu.memory_space<vmem>>, vector<1x1x1x8xf32>
    %66 = vector.shape_cast %65 : vector<1x1x1x8xf32> to vector<8xf32>
    %67 = vector.shape_cast %66 : vector<8xf32> to vector<1x8xf32>
    %68 = vector.broadcast %67 : vector<1x8xf32> to vector<16x8xf32>
    %69 = arith.addf %64, %68 : vector<16x8xf32>
    %c0_37 = arith.constant 0 : index
    %c0_38 = arith.constant 0 : index
    %c0_39 = arith.constant 0 : index
    %c0_40 = arith.constant 0 : index
    %70 = vector.load %arg7[%c0_37, %c0_38, %c0_39, %c0_40] : memref<4x4x32x8xbf16, #tpu.memory_space<vmem>>, vector<1x1x32x8xbf16>
    %71 = vector.shape_cast %70 : vector<1x1x32x8xbf16> to vector<32x8xbf16>
    %cst_41 = arith.constant dense<0.000000e+00> : vector<16x8xf32>
    %72 = tpu.matmul %52, %71, %cst_41 {dimension_numbers = #tpu.dot_dimension_numbers<[1], [0], [0], [1], [0, 0, 1, 1], [], []>} : vector<16x32xbf16>, vector<32x8xbf16>, vector<16x8xf32> -> vector<16x8xf32>
    %c0_42 = arith.constant 0 : index
    %c2 = arith.constant 2 : index
    %c0_43 = arith.constant 0 : index
    %c0_44 = arith.constant 0 : index
    %73 = vector.load %arg11[%c0_42, %c2, %c0_43, %c0_44] : memref<4x3x4x8xf32, #tpu.memory_space<vmem>>, vector<1x1x1x8xf32>
    %74 = vector.shape_cast %73 : vector<1x1x1x8xf32> to vector<8xf32>
    %75 = vector.shape_cast %74 : vector<8xf32> to vector<1x8xf32>
    %76 = vector.broadcast %75 : vector<1x8xf32> to vector<16x8xf32>
    %77 = arith.addf %72, %76 : vector<16x8xf32>
    %78 = vector.shape_cast %61 : vector<16x8xf32> to vector<2x8x8xf32>
    %79 = vector.shape_cast %69 : vector<16x8xf32> to vector<2x8x8xf32>
    %80 = vector.shape_cast %77 : vector<16x8xf32> to vector<2x8x8xf32>
    "tpu.trace_start"() <{level = 10 : i32, message = "btd,bsd->bts"}> : () -> ()
    %cst_45 = arith.constant dense<0.000000e+00> : vector<2x8x8xf32>
    %81 = tpu.matmul %78, %79, %cst_45 {dimension_numbers = #tpu.dot_dimension_numbers<[2], [2], [1], [1], [0, 0, 0, 1, 1, 1], [0], [0]>} : vector<2x8x8xf32>, vector<2x8x8xf32>, vector<2x8x8xf32> -> vector<2x8x8xf32>
    "tpu.trace_stop"() : () -> ()
    %82 = arith.addf %81, %23 : vector<2x8x8xf32>
    %cst_46 = arith.constant dense<0xFF800000> : vector<2x8xf32>
    %83 = vector.multi_reduction <maximumf>, %82, %cst_46 [2] : vector<2x8x8xf32> to vector<2x8xf32>
    %84 = vector.shape_cast %83 : vector<2x8xf32> to vector<2x8x1xf32>
    %85 = vector.broadcast %84 : vector<2x8x1xf32> to vector<2x8x8xf32>
    %86 = arith.subf %82, %85 : vector<2x8x8xf32>
    %87 = math.exp %86 : vector<2x8x8xf32>
    %cst_47 = arith.constant dense<0.000000e+00> : vector<2x8xf32>
    %88 = vector.multi_reduction <add>, %87, %cst_47 [2] : vector<2x8x8xf32> to vector<2x8xf32>
    %89 = vector.shape_cast %88 : vector<2x8xf32> to vector<2x8x1xf32>
    %90 = tpu.reciprocal %89 {approx = true} : vector<2x8x1xf32> -> vector<2x8x1xf32>
    %91 = vector.broadcast %90 : vector<2x8x1xf32> to vector<2x8x8xf32>
    %92 = arith.mulf %87, %91 : vector<2x8x8xf32>
    "tpu.trace_start"() <{level = 10 : i32, message = "bts,bsd->btd"}> : () -> ()
    %cst_48 = arith.constant dense<0.000000e+00> : vector<2x8x8xf32>
    %93 = tpu.matmul %92, %80, %cst_48 {dimension_numbers = #tpu.dot_dimension_numbers<[2], [1], [1], [2], [0, 0, 0, 1, 1, 2], [0], [0]>} : vector<2x8x8xf32>, vector<2x8x8xf32>, vector<2x8x8xf32> -> vector<2x8x8xf32>
    "tpu.trace_stop"() : () -> ()
    %94 = vector.shape_cast %93 : vector<2x8x8xf32> to vector<16x8xf32>
    %95 = arith.truncf %94 : vector<16x8xf32> to vector<16x8xbf16>
    %c0_49 = arith.constant 0 : index
    %c0_50 = arith.constant 0 : index
    %c0_51 = arith.constant 0 : index
    %c0_52 = arith.constant 0 : index
    %96 = vector.load %arg8[%c0_49, %c0_50, %c0_51, %c0_52] : memref<4x4x8x32xbf16, #tpu.memory_space<vmem>>, vector<1x1x8x32xbf16>
    %97 = vector.shape_cast %96 : vector<1x1x8x32xbf16> to vector<8x32xbf16>
    %cst_53 = arith.constant dense<0.000000e+00> : vector<16x32xf32>
    %98 = tpu.matmul %95, %97, %cst_53 {dimension_numbers = #tpu.dot_dimension_numbers<[1], [0], [0], [1], [0, 0, 1, 1], [], []>} : vector<16x8xbf16>, vector<8x32xbf16>, vector<16x32xf32> -> vector<16x32xf32>
    %99 = arith.addf %53, %98 : vector<16x32xf32>
    %c0_54 = arith.constant 0 : index
    %c1_55 = arith.constant 1 : index
    %c0_56 = arith.constant 0 : index
    %c0_57 = arith.constant 0 : index
    %100 = vector.load %arg5[%c0_54, %c1_55, %c0_56, %c0_57] : memref<4x4x32x8xbf16, #tpu.memory_space<vmem>>, vector<1x1x32x8xbf16>
    %101 = vector.shape_cast %100 : vector<1x1x32x8xbf16> to vector<32x8xbf16>
    %cst_58 = arith.constant dense<0.000000e+00> : vector<16x8xf32>
    %102 = tpu.matmul %52, %101, %cst_58 {dimension_numbers = #tpu.dot_dimension_numbers<[1], [0], [0], [1], [0, 0, 1, 1], [], []>} : vector<16x32xbf16>, vector<32x8xbf16>, vector<16x8xf32> -> vector<16x8xf32>
    %c0_59 = arith.constant 0 : index
    %c0_60 = arith.constant 0 : index
    %c1_61 = arith.constant 1 : index
    %c0_62 = arith.constant 0 : index
    %103 = vector.load %arg11[%c0_59, %c0_60, %c1_61, %c0_62] : memref<4x3x4x8xf32, #tpu.memory_space<vmem>>, vector<1x1x1x8xf32>
    %104 = vector.shape_cast %103 : vector<1x1x1x8xf32> to vector<8xf32>
    %105 = vector.shape_cast %104 : vector<8xf32> to vector<1x8xf32>
    %106 = vector.broadcast %105 : vector<1x8xf32> to vector<16x8xf32>
    %107 = arith.addf %102, %106 : vector<16x8xf32>
    %c0_63 = arith.constant 0 : index
    %c1_64 = arith.constant 1 : index
    %c0_65 = arith.constant 0 : index
    %c0_66 = arith.constant 0 : index
    %108 = vector.load %arg6[%c0_63, %c1_64, %c0_65, %c0_66] : memref<4x4x32x8xbf16, #tpu.memory_space<vmem>>, vector<1x1x32x8xbf16>
    %109 = vector.shape_cast %108 : vector<1x1x32x8xbf16> to vector<32x8xbf16>
    %cst_67 = arith.constant dense<0.000000e+00> : vector<16x8xf32>
    %110 = tpu.matmul %52, %109, %cst_67 {dimension_numbers = #tpu.dot_dimension_numbers<[1], [0], [0], [1], [0, 0, 1, 1], [], []>} : vector<16x32xbf16>, vector<32x8xbf16>, vector<16x8xf32> -> vector<16x8xf32>
    %c0_68 = arith.constant 0 : index
    %c1_69 = arith.constant 1 : index
    %c1_70 = arith.constant 1 : index
    %c0_71 = arith.constant 0 : index
    %111 = vector.load %arg11[%c0_68, %c1_69, %c1_70, %c0_71] : memref<4x3x4x8xf32, #tpu.memory_space<vmem>>, vector<1x1x1x8xf32>
    %112 = vector.shape_cast %111 : vector<1x1x1x8xf32> to vector<8xf32>
    %113 = vector.shape_cast %112 : vector<8xf32> to vector<1x8xf32>
    %114 = vector.broadcast %113 : vector<1x8xf32> to vector<16x8xf32>
    %115 = arith.addf %110, %114 : vector<16x8xf32>
    %c0_72 = arith.constant 0 : index
    %c1_73 = arith.constant 1 : index
    %c0_74 = arith.constant 0 : index
    %c0_75 = arith.constant 0 : index
    %116 = vector.load %arg7[%c0_72, %c1_73, %c0_74, %c0_75] : memref<4x4x32x8xbf16, #tpu.memory_space<vmem>>, vector<1x1x32x8xbf16>
    %117 = vector.shape_cast %116 : vector<1x1x32x8xbf16> to vector<32x8xbf16>
    %cst_76 = arith.constant dense<0.000000e+00> : vector<16x8xf32>
    %118 = tpu.matmul %52, %117, %cst_76 {dimension_numbers = #tpu.dot_dimension_numbers<[1], [0], [0], [1], [0, 0, 1, 1], [], []>} : vector<16x32xbf16>, vector<32x8xbf16>, vector<16x8xf32> -> vector<16x8xf32>
    %c0_77 = arith.constant 0 : index
    %c2_78 = arith.constant 2 : index
    %c1_79 = arith.constant 1 : index
    %c0_80 = arith.constant 0 : index
    %119 = vector.load %arg11[%c0_77, %c2_78, %c1_79, %c0_80] : memref<4x3x4x8xf32, #tpu.memory_space<vmem>>, vector<1x1x1x8xf32>
    %120 = vector.shape_cast %119 : vector<1x1x1x8xf32> to vector<8xf32>
    %121 = vector.shape_cast %120 : vector<8xf32> to vector<1x8xf32>
    %122 = vector.broadcast %121 : vector<1x8xf32> to vector<16x8xf32>
    %123 = arith.addf %118, %122 : vector<16x8xf32>
    %124 = vector.shape_cast %107 : vector<16x8xf32> to vector<2x8x8xf32>
    %125 = vector.shape_cast %115 : vector<16x8xf32> to vector<2x8x8xf32>
    %126 = vector.shape_cast %123 : vector<16x8xf32> to vector<2x8x8xf32>
    "tpu.trace_start"() <{level = 10 : i32, message = "btd,bsd->bts"}> : () -> ()
    %cst_81 = arith.constant dense<0.000000e+00> : vector<2x8x8xf32>
    %127 = tpu.matmul %124, %125, %cst_81 {dimension_numbers = #tpu.dot_dimension_numbers<[2], [2], [1], [1], [0, 0, 0, 1, 1, 1], [0], [0]>} : vector<2x8x8xf32>, vector<2x8x8xf32>, vector<2x8x8xf32> -> vector<2x8x8xf32>
    "tpu.trace_stop"() : () -> ()
    %128 = arith.addf %127, %23 : vector<2x8x8xf32>
    %cst_82 = arith.constant dense<0xFF800000> : vector<2x8xf32>
    %129 = vector.multi_reduction <maximumf>, %128, %cst_82 [2] : vector<2x8x8xf32> to vector<2x8xf32>
    %130 = vector.shape_cast %129 : vector<2x8xf32> to vector<2x8x1xf32>
    %131 = vector.broadcast %130 : vector<2x8x1xf32> to vector<2x8x8xf32>
    %132 = arith.subf %128, %131 : vector<2x8x8xf32>
    %133 = math.exp %132 : vector<2x8x8xf32>
    %cst_83 = arith.constant dense<0.000000e+00> : vector<2x8xf32>
    %134 = vector.multi_reduction <add>, %133, %cst_83 [2] : vector<2x8x8xf32> to vector<2x8xf32>
    %135 = vector.shape_cast %134 : vector<2x8xf32> to vector<2x8x1xf32>
    %136 = tpu.reciprocal %135 {approx = true} : vector<2x8x1xf32> -> vector<2x8x1xf32>
    %137 = vector.broadcast %136 : vector<2x8x1xf32> to vector<2x8x8xf32>
    %138 = arith.mulf %133, %137 : vector<2x8x8xf32>
    "tpu.trace_start"() <{level = 10 : i32, message = "bts,bsd->btd"}> : () -> ()
    %cst_84 = arith.constant dense<0.000000e+00> : vector<2x8x8xf32>
    %139 = tpu.matmul %138, %126, %cst_84 {dimension_numbers = #tpu.dot_dimension_numbers<[2], [1], [1], [2], [0, 0, 0, 1, 1, 2], [0], [0]>} : vector<2x8x8xf32>, vector<2x8x8xf32>, vector<2x8x8xf32> -> vector<2x8x8xf32>
    "tpu.trace_stop"() : () -> ()
    %140 = vector.shape_cast %139 : vector<2x8x8xf32> to vector<16x8xf32>
    %141 = arith.truncf %140 : vector<16x8xf32> to vector<16x8xbf16>
    %c0_85 = arith.constant 0 : index
    %c1_86 = arith.constant 1 : index
    %c0_87 = arith.constant 0 : index
    %c0_88 = arith.constant 0 : index
    %142 = vector.load %arg8[%c0_85, %c1_86, %c0_87, %c0_88] : memref<4x4x8x32xbf16, #tpu.memory_space<vmem>>, vector<1x1x8x32xbf16>
    %143 = vector.shape_cast %142 : vector<1x1x8x32xbf16> to vector<8x32xbf16>
    %cst_89 = arith.constant dense<0.000000e+00> : vector<16x32xf32>
    %144 = tpu.matmul %141, %143, %cst_89 {dimension_numbers = #tpu.dot_dimension_numbers<[1], [0], [0], [1], [0, 0, 1, 1], [], []>} : vector<16x8xbf16>, vector<8x32xbf16>, vector<16x32xf32> -> vector<16x32xf32>
    %145 = arith.addf %99, %144 : vector<16x32xf32>
    %c0_90 = arith.constant 0 : index
    %c2_91 = arith.constant 2 : index
    %c0_92 = arith.constant 0 : index
    %c0_93 = arith.constant 0 : index
    %146 = vector.load %arg5[%c0_90, %c2_91, %c0_92, %c0_93] : memref<4x4x32x8xbf16, #tpu.memory_space<vmem>>, vector<1x1x32x8xbf16>
    %147 = vector.shape_cast %146 : vector<1x1x32x8xbf16> to vector<32x8xbf16>
    %cst_94 = arith.constant dense<0.000000e+00> : vector<16x8xf32>
    %148 = tpu.matmul %52, %147, %cst_94 {dimension_numbers = #tpu.dot_dimension_numbers<[1], [0], [0], [1], [0, 0, 1, 1], [], []>} : vector<16x32xbf16>, vector<32x8xbf16>, vector<16x8xf32> -> vector<16x8xf32>
    %c0_95 = arith.constant 0 : index
    %c0_96 = arith.constant 0 : index
    %c2_97 = arith.constant 2 : index
    %c0_98 = arith.constant 0 : index
    %149 = vector.load %arg11[%c0_95, %c0_96, %c2_97, %c0_98] : memref<4x3x4x8xf32, #tpu.memory_space<vmem>>, vector<1x1x1x8xf32>
    %150 = vector.shape_cast %149 : vector<1x1x1x8xf32> to vector<8xf32>
    %151 = vector.shape_cast %150 : vector<8xf32> to vector<1x8xf32>
    %152 = vector.broadcast %151 : vector<1x8xf32> to vector<16x8xf32>
    %153 = arith.addf %148, %152 : vector<16x8xf32>
    %c0_99 = arith.constant 0 : index
    %c2_100 = arith.constant 2 : index
    %c0_101 = arith.constant 0 : index
    %c0_102 = arith.constant 0 : index
    %154 = vector.load %arg6[%c0_99, %c2_100, %c0_101, %c0_102] : memref<4x4x32x8xbf16, #tpu.memory_space<vmem>>, vector<1x1x32x8xbf16>
    %155 = vector.shape_cast %154 : vector<1x1x32x8xbf16> to vector<32x8xbf16>
    %cst_103 = arith.constant dense<0.000000e+00> : vector<16x8xf32>
    %156 = tpu.matmul %52, %155, %cst_103 {dimension_numbers = #tpu.dot_dimension_numbers<[1], [0], [0], [1], [0, 0, 1, 1], [], []>} : vector<16x32xbf16>, vector<32x8xbf16>, vector<16x8xf32> -> vector<16x8xf32>
    %c0_104 = arith.constant 0 : index
    %c1_105 = arith.constant 1 : index
    %c2_106 = arith.constant 2 : index
    %c0_107 = arith.constant 0 : index
    %157 = vector.load %arg11[%c0_104, %c1_105, %c2_106, %c0_107] : memref<4x3x4x8xf32, #tpu.memory_space<vmem>>, vector<1x1x1x8xf32>
    %158 = vector.shape_cast %157 : vector<1x1x1x8xf32> to vector<8xf32>
    %159 = vector.shape_cast %158 : vector<8xf32> to vector<1x8xf32>
    %160 = vector.broadcast %159 : vector<1x8xf32> to vector<16x8xf32>
    %161 = arith.addf %156, %160 : vector<16x8xf32>
    %c0_108 = arith.constant 0 : index
    %c2_109 = arith.constant 2 : index
    %c0_110 = arith.constant 0 : index
    %c0_111 = arith.constant 0 : index
    %162 = vector.load %arg7[%c0_108, %c2_109, %c0_110, %c0_111] : memref<4x4x32x8xbf16, #tpu.memory_space<vmem>>, vector<1x1x32x8xbf16>
    %163 = vector.shape_cast %162 : vector<1x1x32x8xbf16> to vector<32x8xbf16>
    %cst_112 = arith.constant dense<0.000000e+00> : vector<16x8xf32>
    %164 = tpu.matmul %52, %163, %cst_112 {dimension_numbers = #tpu.dot_dimension_numbers<[1], [0], [0], [1], [0, 0, 1, 1], [], []>} : vector<16x32xbf16>, vector<32x8xbf16>, vector<16x8xf32> -> vector<16x8xf32>
    %c0_113 = arith.constant 0 : index
    %c2_114 = arith.constant 2 : index
    %c2_115 = arith.constant 2 : index
    %c0_116 = arith.constant 0 : index
    %165 = vector.load %arg11[%c0_113, %c2_114, %c2_115, %c0_116] : memref<4x3x4x8xf32, #tpu.memory_space<vmem>>, vector<1x1x1x8xf32>
    %166 = vector.shape_cast %165 : vector<1x1x1x8xf32> to vector<8xf32>
    %167 = vector.shape_cast %166 : vector<8xf32> to vector<1x8xf32>
    %168 = vector.broadcast %167 : vector<1x8xf32> to vector<16x8xf32>
    %169 = arith.addf %164, %168 : vector<16x8xf32>
    %170 = vector.shape_cast %153 : vector<16x8xf32> to vector<2x8x8xf32>
    %171 = vector.shape_cast %161 : vector<16x8xf32> to vector<2x8x8xf32>
    %172 = vector.shape_cast %169 : vector<16x8xf32> to vector<2x8x8xf32>
    "tpu.trace_start"() <{level = 10 : i32, message = "btd,bsd->bts"}> : () -> ()
    %cst_117 = arith.constant dense<0.000000e+00> : vector<2x8x8xf32>
    %173 = tpu.matmul %170, %171, %cst_117 {dimension_numbers = #tpu.dot_dimension_numbers<[2], [2], [1], [1], [0, 0, 0, 1, 1, 1], [0], [0]>} : vector<2x8x8xf32>, vector<2x8x8xf32>, vector<2x8x8xf32> -> vector<2x8x8xf32>
    "tpu.trace_stop"() : () -> ()
    %174 = arith.addf %173, %23 : vector<2x8x8xf32>
    %cst_118 = arith.constant dense<0xFF800000> : vector<2x8xf32>
    %175 = vector.multi_reduction <maximumf>, %174, %cst_118 [2] : vector<2x8x8xf32> to vector<2x8xf32>
    %176 = vector.shape_cast %175 : vector<2x8xf32> to vector<2x8x1xf32>
    %177 = vector.broadcast %176 : vector<2x8x1xf32> to vector<2x8x8xf32>
    %178 = arith.subf %174, %177 : vector<2x8x8xf32>
    %179 = math.exp %178 : vector<2x8x8xf32>
    %cst_119 = arith.constant dense<0.000000e+00> : vector<2x8xf32>
    %180 = vector.multi_reduction <add>, %179, %cst_119 [2] : vector<2x8x8xf32> to vector<2x8xf32>
    %181 = vector.shape_cast %180 : vector<2x8xf32> to vector<2x8x1xf32>
    %182 = tpu.reciprocal %181 {approx = true} : vector<2x8x1xf32> -> vector<2x8x1xf32>
    %183 = vector.broadcast %182 : vector<2x8x1xf32> to vector<2x8x8xf32>
    %184 = arith.mulf %179, %183 : vector<2x8x8xf32>
    "tpu.trace_start"() <{level = 10 : i32, message = "bts,bsd->btd"}> : () -> ()
    %cst_120 = arith.constant dense<0.000000e+00> : vector<2x8x8xf32>
    %185 = tpu.matmul %184, %172, %cst_120 {dimension_numbers = #tpu.dot_dimension_numbers<[2], [1], [1], [2], [0, 0, 0, 1, 1, 2], [0], [0]>} : vector<2x8x8xf32>, vector<2x8x8xf32>, vector<2x8x8xf32> -> vector<2x8x8xf32>
    "tpu.trace_stop"() : () -> ()
    %186 = vector.shape_cast %185 : vector<2x8x8xf32> to vector<16x8xf32>
    %187 = arith.truncf %186 : vector<16x8xf32> to vector<16x8xbf16>
    %c0_121 = arith.constant 0 : index
    %c2_122 = arith.constant 2 : index
    %c0_123 = arith.constant 0 : index
    %c0_124 = arith.constant 0 : index
    %188 = vector.load %arg8[%c0_121, %c2_122, %c0_123, %c0_124] : memref<4x4x8x32xbf16, #tpu.memory_space<vmem>>, vector<1x1x8x32xbf16>
    %189 = vector.shape_cast %188 : vector<1x1x8x32xbf16> to vector<8x32xbf16>
    %cst_125 = arith.constant dense<0.000000e+00> : vector<16x32xf32>
    %190 = tpu.matmul %187, %189, %cst_125 {dimension_numbers = #tpu.dot_dimension_numbers<[1], [0], [0], [1], [0, 0, 1, 1], [], []>} : vector<16x8xbf16>, vector<8x32xbf16>, vector<16x32xf32> -> vector<16x32xf32>
    %191 = arith.addf %145, %190 : vector<16x32xf32>
    %c0_126 = arith.constant 0 : index
    %c3 = arith.constant 3 : index
    %c0_127 = arith.constant 0 : index
    %c0_128 = arith.constant 0 : index
    %192 = vector.load %arg5[%c0_126, %c3, %c0_127, %c0_128] : memref<4x4x32x8xbf16, #tpu.memory_space<vmem>>, vector<1x1x32x8xbf16>
    %193 = vector.shape_cast %192 : vector<1x1x32x8xbf16> to vector<32x8xbf16>
    %cst_129 = arith.constant dense<0.000000e+00> : vector<16x8xf32>
    %194 = tpu.matmul %52, %193, %cst_129 {dimension_numbers = #tpu.dot_dimension_numbers<[1], [0], [0], [1], [0, 0, 1, 1], [], []>} : vector<16x32xbf16>, vector<32x8xbf16>, vector<16x8xf32> -> vector<16x8xf32>
    %c0_130 = arith.constant 0 : index
    %c0_131 = arith.constant 0 : index
    %c3_132 = arith.constant 3 : index
    %c0_133 = arith.constant 0 : index
    %195 = vector.load %arg11[%c0_130, %c0_131, %c3_132, %c0_133] : memref<4x3x4x8xf32, #tpu.memory_space<vmem>>, vector<1x1x1x8xf32>
    %196 = vector.shape_cast %195 : vector<1x1x1x8xf32> to vector<8xf32>
    %197 = vector.shape_cast %196 : vector<8xf32> to vector<1x8xf32>
    %198 = vector.broadcast %197 : vector<1x8xf32> to vector<16x8xf32>
    %199 = arith.addf %194, %198 : vector<16x8xf32>
    %c0_134 = arith.constant 0 : index
    %c3_135 = arith.constant 3 : index
    %c0_136 = arith.constant 0 : index
    %c0_137 = arith.constant 0 : index
    %200 = vector.load %arg6[%c0_134, %c3_135, %c0_136, %c0_137] : memref<4x4x32x8xbf16, #tpu.memory_space<vmem>>, vector<1x1x32x8xbf16>
    %201 = vector.shape_cast %200 : vector<1x1x32x8xbf16> to vector<32x8xbf16>
    %cst_138 = arith.constant dense<0.000000e+00> : vector<16x8xf32>
    %202 = tpu.matmul %52, %201, %cst_138 {dimension_numbers = #tpu.dot_dimension_numbers<[1], [0], [0], [1], [0, 0, 1, 1], [], []>} : vector<16x32xbf16>, vector<32x8xbf16>, vector<16x8xf32> -> vector<16x8xf32>
    %c0_139 = arith.constant 0 : index
    %c1_140 = arith.constant 1 : index
    %c3_141 = arith.constant 3 : index
    %c0_142 = arith.constant 0 : index
    %203 = vector.load %arg11[%c0_139, %c1_140, %c3_141, %c0_142] : memref<4x3x4x8xf32, #tpu.memory_space<vmem>>, vector<1x1x1x8xf32>
    %204 = vector.shape_cast %203 : vector<1x1x1x8xf32> to vector<8xf32>
    %205 = vector.shape_cast %204 : vector<8xf32> to vector<1x8xf32>
    %206 = vector.broadcast %205 : vector<1x8xf32> to vector<16x8xf32>
    %207 = arith.addf %202, %206 : vector<16x8xf32>
    %c0_143 = arith.constant 0 : index
    %c3_144 = arith.constant 3 : index
    %c0_145 = arith.constant 0 : index
    %c0_146 = arith.constant 0 : index
    %208 = vector.load %arg7[%c0_143, %c3_144, %c0_145, %c0_146] : memref<4x4x32x8xbf16, #tpu.memory_space<vmem>>, vector<1x1x32x8xbf16>
    %209 = vector.shape_cast %208 : vector<1x1x32x8xbf16> to vector<32x8xbf16>
    %cst_147 = arith.constant dense<0.000000e+00> : vector<16x8xf32>
    %210 = tpu.matmul %52, %209, %cst_147 {dimension_numbers = #tpu.dot_dimension_numbers<[1], [0], [0], [1], [0, 0, 1, 1], [], []>} : vector<16x32xbf16>, vector<32x8xbf16>, vector<16x8xf32> -> vector<16x8xf32>
    %c0_148 = arith.constant 0 : index
    %c2_149 = arith.constant 2 : index
    %c3_150 = arith.constant 3 : index
    %c0_151 = arith.constant 0 : index
    %211 = vector.load %arg11[%c0_148, %c2_149, %c3_150, %c0_151] : memref<4x3x4x8xf32, #tpu.memory_space<vmem>>, vector<1x1x1x8xf32>
    %212 = vector.shape_cast %211 : vector<1x1x1x8xf32> to vector<8xf32>
    %213 = vector.shape_cast %212 : vector<8xf32> to vector<1x8xf32>
    %214 = vector.broadcast %213 : vector<1x8xf32> to vector<16x8xf32>
    %215 = arith.addf %210, %214 : vector<16x8xf32>
    %216 = vector.shape_cast %199 : vector<16x8xf32> to vector<2x8x8xf32>
    %217 = vector.shape_cast %207 : vector<16x8xf32> to vector<2x8x8xf32>
    %218 = vector.shape_cast %215 : vector<16x8xf32> to vector<2x8x8xf32>
    "tpu.trace_start"() <{level = 10 : i32, message = "btd,bsd->bts"}> : () -> ()
    %cst_152 = arith.constant dense<0.000000e+00> : vector<2x8x8xf32>
    %219 = tpu.matmul %216, %217, %cst_152 {dimension_numbers = #tpu.dot_dimension_numbers<[2], [2], [1], [1], [0, 0, 0, 1, 1, 1], [0], [0]>} : vector<2x8x8xf32>, vector<2x8x8xf32>, vector<2x8x8xf32> -> vector<2x8x8xf32>
    "tpu.trace_stop"() : () -> ()
    %220 = arith.addf %219, %23 : vector<2x8x8xf32>
    %cst_153 = arith.constant dense<0xFF800000> : vector<2x8xf32>
    %221 = vector.multi_reduction <maximumf>, %220, %cst_153 [2] : vector<2x8x8xf32> to vector<2x8xf32>
    %222 = vector.shape_cast %221 : vector<2x8xf32> to vector<2x8x1xf32>
    %223 = vector.broadcast %222 : vector<2x8x1xf32> to vector<2x8x8xf32>
    %224 = arith.subf %220, %223 : vector<2x8x8xf32>
    %225 = math.exp %224 : vector<2x8x8xf32>
    %cst_154 = arith.constant dense<0.000000e+00> : vector<2x8xf32>
    %226 = vector.multi_reduction <add>, %225, %cst_154 [2] : vector<2x8x8xf32> to vector<2x8xf32>
    %227 = vector.shape_cast %226 : vector<2x8xf32> to vector<2x8x1xf32>
    %228 = tpu.reciprocal %227 {approx = true} : vector<2x8x1xf32> -> vector<2x8x1xf32>
    %229 = vector.broadcast %228 : vector<2x8x1xf32> to vector<2x8x8xf32>
    %230 = arith.mulf %225, %229 : vector<2x8x8xf32>
    "tpu.trace_start"() <{level = 10 : i32, message = "bts,bsd->btd"}> : () -> ()
    %cst_155 = arith.constant dense<0.000000e+00> : vector<2x8x8xf32>
    %231 = tpu.matmul %230, %218, %cst_155 {dimension_numbers = #tpu.dot_dimension_numbers<[2], [1], [1], [2], [0, 0, 0, 1, 1, 2], [0], [0]>} : vector<2x8x8xf32>, vector<2x8x8xf32>, vector<2x8x8xf32> -> vector<2x8x8xf32>
    "tpu.trace_stop"() : () -> ()
    %232 = vector.shape_cast %231 : vector<2x8x8xf32> to vector<16x8xf32>
    %233 = arith.truncf %232 : vector<16x8xf32> to vector<16x8xbf16>
    %c0_156 = arith.constant 0 : index
    %c3_157 = arith.constant 3 : index
    %c0_158 = arith.constant 0 : index
    %c0_159 = arith.constant 0 : index
    %234 = vector.load %arg8[%c0_156, %c3_157, %c0_158, %c0_159] : memref<4x4x8x32xbf16, #tpu.memory_space<vmem>>, vector<1x1x8x32xbf16>
    %235 = vector.shape_cast %234 : vector<1x1x8x32xbf16> to vector<8x32xbf16>
    %cst_160 = arith.constant dense<0.000000e+00> : vector<16x32xf32>
    %236 = tpu.matmul %233, %235, %cst_160 {dimension_numbers = #tpu.dot_dimension_numbers<[1], [0], [0], [1], [0, 0, 1, 1], [], []>} : vector<16x8xbf16>, vector<8x32xbf16>, vector<16x32xf32> -> vector<16x32xf32>
    %237 = arith.addf %191, %236 : vector<16x32xf32>
    %238 = arith.addf %14, %237 : vector<16x32xf32>
    %c0_161 = arith.constant 0 : index
    %c0_162 = arith.constant 0 : index
    %c0_163 = arith.constant 0 : index
    %239 = vector.load %arg12[%c0_161, %c0_162, %c0_163] : memref<4x3x128xf32, #tpu.memory_space<vmem>>, vector<1x1x32xf32>
    %240 = vector.shape_cast %239 : vector<1x1x32xf32> to vector<32xf32>
    %241 = vector.shape_cast %240 : vector<32xf32> to vector<1x32xf32>
    %242 = vector.broadcast %241 : vector<1x32xf32> to vector<16x32xf32>
    %243 = arith.addf %238, %242 : vector<16x32xf32>
    %c0_164 = arith.constant 0 : index
    %c2_165 = arith.constant 2 : index
    %c0_166 = arith.constant 0 : index
    %244 = vector.load %arg4[%c0_164, %c2_165, %c0_166] : memref<4x4x32xf32, #tpu.memory_space<vmem>>, vector<1x1x32xf32>
    %245 = vector.shape_cast %244 : vector<1x1x32xf32> to vector<32xf32>
    %c0_167 = arith.constant 0 : index
    %c3_168 = arith.constant 3 : index
    %c0_169 = arith.constant 0 : index
    %246 = vector.load %arg4[%c0_167, %c3_168, %c0_169] : memref<4x4x32xf32, #tpu.memory_space<vmem>>, vector<1x1x32xf32>
    %247 = vector.shape_cast %246 : vector<1x1x32xf32> to vector<32xf32>
    %cst_170 = arith.constant dense<0.000000e+00> : vector<16xf32>
    %248 = vector.multi_reduction <add>, %243, %cst_170 [1] : vector<16x32xf32> to vector<16xf32>
    %249 = vector.shape_cast %248 : vector<16xf32> to vector<16x1xf32>
    %cst_171 = arith.constant 3.200000e+01 : f32
    %250 = vector.broadcast %cst_171 : f32 to vector<16x1xf32>
    %251 = arith.divf %249, %250 : vector<16x1xf32>
    %252 = vector.broadcast %251 : vector<16x1xf32> to vector<16x32xf32>
    %253 = arith.subf %243, %252 : vector<16x32xf32>
    %254 = arith.mulf %253, %253 : vector<16x32xf32>
    %cst_172 = arith.constant dense<0.000000e+00> : vector<16xf32>
    %255 = vector.multi_reduction <add>, %254, %cst_172 [1] : vector<16x32xf32> to vector<16xf32>
    %256 = vector.shape_cast %255 : vector<16xf32> to vector<16x1xf32>
    %cst_173 = arith.constant 3.200000e+01 : f32
    %257 = vector.broadcast %cst_173 : f32 to vector<16x1xf32>
    %258 = arith.divf %256, %257 : vector<16x1xf32>
    %259 = vector.broadcast %251 : vector<16x1xf32> to vector<16x32xf32>
    %260 = arith.subf %243, %259 : vector<16x32xf32>
    %cst_174 = arith.constant 9.99999974E-6 : f32
    %261 = vector.broadcast %cst_174 : f32 to vector<16x1xf32>
    %262 = arith.addf %258, %261 : vector<16x1xf32>
    %263 = math.rsqrt %262 : vector<16x1xf32>
    %264 = vector.broadcast %263 : vector<16x1xf32> to vector<16x32xf32>
    %265 = arith.mulf %260, %264 : vector<16x32xf32>
    %266 = vector.shape_cast %245 : vector<32xf32> to vector<1x32xf32>
    %267 = vector.broadcast %266 : vector<1x32xf32> to vector<16x32xf32>
    %268 = arith.mulf %265, %267 : vector<16x32xf32>
    %269 = vector.shape_cast %247 : vector<32xf32> to vector<1x32xf32>
    %270 = vector.broadcast %269 : vector<1x32xf32> to vector<16x32xf32>
    %271 = arith.addf %268, %270 : vector<16x32xf32>
    %272 = arith.truncf %271 : vector<16x32xf32> to vector<16x32xbf16>
    %c0_175 = arith.constant 0 : index
    %c0_176 = arith.constant 0 : index
    %c0_177 = arith.constant 0 : index
    %273 = vector.load %arg9[%c0_175, %c0_176, %c0_177] : memref<4x32x128xbf16, #tpu.memory_space<vmem>>, vector<1x32x128xbf16>
    %274 = vector.shape_cast %273 : vector<1x32x128xbf16> to vector<32x128xbf16>
    %cst_178 = arith.constant dense<0.000000e+00> : vector<16x128xf32>
    %275 = tpu.matmul %272, %274, %cst_178 {dimension_numbers = #tpu.dot_dimension_numbers<[1], [0], [0], [1], [0, 0, 1, 1], [], []>} : vector<16x32xbf16>, vector<32x128xbf16>, vector<16x128xf32> -> vector<16x128xf32>
    %c0_179 = arith.constant 0 : index
    %c1_180 = arith.constant 1 : index
    %c0_181 = arith.constant 0 : index
    %276 = vector.load %arg12[%c0_179, %c1_180, %c0_181] : memref<4x3x128xf32, #tpu.memory_space<vmem>>, vector<1x1x128xf32>
    %277 = vector.shape_cast %276 : vector<1x1x128xf32> to vector<128xf32>
    %278 = vector.shape_cast %277 : vector<128xf32> to vector<1x128xf32>
    %279 = vector.broadcast %278 : vector<1x128xf32> to vector<16x128xf32>
    %280 = arith.addf %275, %279 : vector<16x128xf32>
    %cst_182 = arith.constant 5.000000e-01 : f32
    %281 = vector.broadcast %cst_182 : f32 to vector<16x128xf32>
    %282 = arith.mulf %281, %280 : vector<16x128xf32>
    %cst_183 = arith.constant 0.636619746 : f32
    %283 = math.sqrt %cst_183 : f32
    %cst_184 = arith.constant 4.471500e-02 : f32
    %284 = vector.broadcast %cst_184 : f32 to vector<16x128xf32>
    %285 = arith.mulf %284, %280 : vector<16x128xf32>
    %286 = arith.mulf %285, %280 : vector<16x128xf32>
    %287 = arith.mulf %286, %280 : vector<16x128xf32>
    %288 = arith.addf %280, %287 : vector<16x128xf32>
    %289 = vector.broadcast %283 : f32 to vector<16x128xf32>
    %290 = arith.mulf %289, %288 : vector<16x128xf32>
    %291 = math.tanh %290 : vector<16x128xf32>
    %cst_185 = arith.constant 1.000000e+00 : f32
    %292 = vector.broadcast %cst_185 : f32 to vector<16x128xf32>
    %293 = arith.addf %292, %291 : vector<16x128xf32>
    %294 = arith.mulf %282, %293 : vector<16x128xf32>
    %295 = arith.truncf %294 : vector<16x128xf32> to vector<16x128xbf16>
    %c0_186 = arith.constant 0 : index
    %c0_187 = arith.constant 0 : index
    %c0_188 = arith.constant 0 : index
    %296 = vector.load %arg10[%c0_186, %c0_187, %c0_188] : memref<4x128x32xbf16, #tpu.memory_space<vmem>>, vector<1x128x32xbf16>
    %297 = vector.shape_cast %296 : vector<1x128x32xbf16> to vector<128x32xbf16>
    %cst_189 = arith.constant dense<0.000000e+00> : vector<16x32xf32>
    %298 = tpu.matmul %295, %297, %cst_189 {dimension_numbers = #tpu.dot_dimension_numbers<[1], [0], [0], [1], [0, 0, 1, 1], [], []>} : vector<16x128xbf16>, vector<128x32xbf16>, vector<16x32xf32> -> vector<16x32xf32>
    %c0_190 = arith.constant 0 : index
    %c2_191 = arith.constant 2 : index
    %c0_192 = arith.constant 0 : index
    %299 = vector.load %arg12[%c0_190, %c2_191, %c0_192] : memref<4x3x128xf32, #tpu.memory_space<vmem>>, vector<1x1x32xf32>
    %300 = vector.shape_cast %299 : vector<1x1x32xf32> to vector<32xf32>
    %301 = vector.shape_cast %300 : vector<32xf32> to vector<1x32xf32>
    %302 = vector.broadcast %301 : vector<1x32xf32> to vector<16x32xf32>
    %303 = arith.addf %298, %302 : vector<16x32xf32>
    %304 = arith.addf %243, %303 : vector<16x32xf32>
    %c1_193 = arith.constant 1 : index
    %c0_194 = arith.constant 0 : index
    %c0_195 = arith.constant 0 : index
    %305 = vector.load %arg4[%c1_193, %c0_194, %c0_195] : memref<4x4x32xf32, #tpu.memory_space<vmem>>, vector<1x1x32xf32>
    %306 = vector.shape_cast %305 : vector<1x1x32xf32> to vector<32xf32>
    %c1_196 = arith.constant 1 : index
    %c1_197 = arith.constant 1 : index
    %c0_198 = arith.constant 0 : index
    %307 = vector.load %arg4[%c1_196, %c1_197, %c0_198] : memref<4x4x32xf32, #tpu.memory_space<vmem>>, vector<1x1x32xf32>
    %308 = vector.shape_cast %307 : vector<1x1x32xf32> to vector<32xf32>
    %cst_199 = arith.constant dense<0.000000e+00> : vector<16xf32>
    %309 = vector.multi_reduction <add>, %304, %cst_199 [1] : vector<16x32xf32> to vector<16xf32>
    %310 = vector.shape_cast %309 : vector<16xf32> to vector<16x1xf32>
    %cst_200 = arith.constant 3.200000e+01 : f32
    %311 = vector.broadcast %cst_200 : f32 to vector<16x1xf32>
    %312 = arith.divf %310, %311 : vector<16x1xf32>
    %313 = vector.broadcast %312 : vector<16x1xf32> to vector<16x32xf32>
    %314 = arith.subf %304, %313 : vector<16x32xf32>
    %315 = arith.mulf %314, %314 : vector<16x32xf32>
    %cst_201 = arith.constant dense<0.000000e+00> : vector<16xf32>
    %316 = vector.multi_reduction <add>, %315, %cst_201 [1] : vector<16x32xf32> to vector<16xf32>
    %317 = vector.shape_cast %316 : vector<16xf32> to vector<16x1xf32>
    %cst_202 = arith.constant 3.200000e+01 : f32
    %318 = vector.broadcast %cst_202 : f32 to vector<16x1xf32>
    %319 = arith.divf %317, %318 : vector<16x1xf32>
    %320 = vector.broadcast %312 : vector<16x1xf32> to vector<16x32xf32>
    %321 = arith.subf %304, %320 : vector<16x32xf32>
    %cst_203 = arith.constant 9.99999974E-6 : f32
    %322 = vector.broadcast %cst_203 : f32 to vector<16x1xf32>
    %323 = arith.addf %319, %322 : vector<16x1xf32>
    %324 = math.rsqrt %323 : vector<16x1xf32>
    %325 = vector.broadcast %324 : vector<16x1xf32> to vector<16x32xf32>
    %326 = arith.mulf %321, %325 : vector<16x32xf32>
    %327 = vector.shape_cast %306 : vector<32xf32> to vector<1x32xf32>
    %328 = vector.broadcast %327 : vector<1x32xf32> to vector<16x32xf32>
    %329 = arith.mulf %326, %328 : vector<16x32xf32>
    %330 = vector.shape_cast %308 : vector<32xf32> to vector<1x32xf32>
    %331 = vector.broadcast %330 : vector<1x32xf32> to vector<16x32xf32>
    %332 = arith.addf %329, %331 : vector<16x32xf32>
    %333 = arith.truncf %332 : vector<16x32xf32> to vector<16x32xbf16>
    %cst_204 = arith.constant 0.000000e+00 : f32
    %334 = vector.broadcast %cst_204 : f32 to vector<16x32xf32>
    %c1_205 = arith.constant 1 : index
    %c0_206 = arith.constant 0 : index
    %c0_207 = arith.constant 0 : index
    %c0_208 = arith.constant 0 : index
    %335 = vector.load %arg5[%c1_205, %c0_206, %c0_207, %c0_208] : memref<4x4x32x8xbf16, #tpu.memory_space<vmem>>, vector<1x1x32x8xbf16>
    %336 = vector.shape_cast %335 : vector<1x1x32x8xbf16> to vector<32x8xbf16>
    %cst_209 = arith.constant dense<0.000000e+00> : vector<16x8xf32>
    %337 = tpu.matmul %333, %336, %cst_209 {dimension_numbers = #tpu.dot_dimension_numbers<[1], [0], [0], [1], [0, 0, 1, 1], [], []>} : vector<16x32xbf16>, vector<32x8xbf16>, vector<16x8xf32> -> vector<16x8xf32>
    %c1_210 = arith.constant 1 : index
    %c0_211 = arith.constant 0 : index
    %c0_212 = arith.constant 0 : index
    %c0_213 = arith.constant 0 : index
    %338 = vector.load %arg11[%c1_210, %c0_211, %c0_212, %c0_213] : memref<4x3x4x8xf32, #tpu.memory_space<vmem>>, vector<1x1x1x8xf32>
    %339 = vector.shape_cast %338 : vector<1x1x1x8xf32> to vector<8xf32>
    %340 = vector.shape_cast %339 : vector<8xf32> to vector<1x8xf32>
    %341 = vector.broadcast %340 : vector<1x8xf32> to vector<16x8xf32>
    %342 = arith.addf %337, %341 : vector<16x8xf32>
    %c1_214 = arith.constant 1 : index
    %c0_215 = arith.constant 0 : index
    %c0_216 = arith.constant 0 : index
    %c0_217 = arith.constant 0 : index
    %343 = vector.load %arg6[%c1_214, %c0_215, %c0_216, %c0_217] : memref<4x4x32x8xbf16, #tpu.memory_space<vmem>>, vector<1x1x32x8xbf16>
    %344 = vector.shape_cast %343 : vector<1x1x32x8xbf16> to vector<32x8xbf16>
    %cst_218 = arith.constant dense<0.000000e+00> : vector<16x8xf32>
    %345 = tpu.matmul %333, %344, %cst_218 {dimension_numbers = #tpu.dot_dimension_numbers<[1], [0], [0], [1], [0, 0, 1, 1], [], []>} : vector<16x32xbf16>, vector<32x8xbf16>, vector<16x8xf32> -> vector<16x8xf32>
    %c1_219 = arith.constant 1 : index
    %c1_220 = arith.constant 1 : index
    %c0_221 = arith.constant 0 : index
    %c0_222 = arith.constant 0 : index
    %346 = vector.load %arg11[%c1_219, %c1_220, %c0_221, %c0_222] : memref<4x3x4x8xf32, #tpu.memory_space<vmem>>, vector<1x1x1x8xf32>
    %347 = vector.shape_cast %346 : vector<1x1x1x8xf32> to vector<8xf32>
    %348 = vector.shape_cast %347 : vector<8xf32> to vector<1x8xf32>
    %349 = vector.broadcast %348 : vector<1x8xf32> to vector<16x8xf32>
    %350 = arith.addf %345, %349 : vector<16x8xf32>
    %c1_223 = arith.constant 1 : index
    %c0_224 = arith.constant 0 : index
    %c0_225 = arith.constant 0 : index
    %c0_226 = arith.constant 0 : index
    %351 = vector.load %arg7[%c1_223, %c0_224, %c0_225, %c0_226] : memref<4x4x32x8xbf16, #tpu.memory_space<vmem>>, vector<1x1x32x8xbf16>
    %352 = vector.shape_cast %351 : vector<1x1x32x8xbf16> to vector<32x8xbf16>
    %cst_227 = arith.constant dense<0.000000e+00> : vector<16x8xf32>
    %353 = tpu.matmul %333, %352, %cst_227 {dimension_numbers = #tpu.dot_dimension_numbers<[1], [0], [0], [1], [0, 0, 1, 1], [], []>} : vector<16x32xbf16>, vector<32x8xbf16>, vector<16x8xf32> -> vector<16x8xf32>
    %c1_228 = arith.constant 1 : index
    %c2_229 = arith.constant 2 : index
    %c0_230 = arith.constant 0 : index
    %c0_231 = arith.constant 0 : index
    %354 = vector.load %arg11[%c1_228, %c2_229, %c0_230, %c0_231] : memref<4x3x4x8xf32, #tpu.memory_space<vmem>>, vector<1x1x1x8xf32>
    %355 = vector.shape_cast %354 : vector<1x1x1x8xf32> to vector<8xf32>
    %356 = vector.shape_cast %355 : vector<8xf32> to vector<1x8xf32>
    %357 = vector.broadcast %356 : vector<1x8xf32> to vector<16x8xf32>
    %358 = arith.addf %353, %357 : vector<16x8xf32>
    %359 = vector.shape_cast %342 : vector<16x8xf32> to vector<2x8x8xf32>
    %360 = vector.shape_cast %350 : vector<16x8xf32> to vector<2x8x8xf32>
    %361 = vector.shape_cast %358 : vector<16x8xf32> to vector<2x8x8xf32>
    "tpu.trace_start"() <{level = 10 : i32, message = "btd,bsd->bts"}> : () -> ()
    %cst_232 = arith.constant dense<0.000000e+00> : vector<2x8x8xf32>
    %362 = tpu.matmul %359, %360, %cst_232 {dimension_numbers = #tpu.dot_dimension_numbers<[2], [2], [1], [1], [0, 0, 0, 1, 1, 1], [0], [0]>} : vector<2x8x8xf32>, vector<2x8x8xf32>, vector<2x8x8xf32> -> vector<2x8x8xf32>
    "tpu.trace_stop"() : () -> ()
    %363 = arith.addf %362, %23 : vector<2x8x8xf32>
    %cst_233 = arith.constant dense<0xFF800000> : vector<2x8xf32>
    %364 = vector.multi_reduction <maximumf>, %363, %cst_233 [2] : vector<2x8x8xf32> to vector<2x8xf32>
    %365 = vector.shape_cast %364 : vector<2x8xf32> to vector<2x8x1xf32>
    %366 = vector.broadcast %365 : vector<2x8x1xf32> to vector<2x8x8xf32>
    %367 = arith.subf %363, %366 : vector<2x8x8xf32>
    %368 = math.exp %367 : vector<2x8x8xf32>
    %cst_234 = arith.constant dense<0.000000e+00> : vector<2x8xf32>
    %369 = vector.multi_reduction <add>, %368, %cst_234 [2] : vector<2x8x8xf32> to vector<2x8xf32>
    %370 = vector.shape_cast %369 : vector<2x8xf32> to vector<2x8x1xf32>
    %371 = tpu.reciprocal %370 {approx = true} : vector<2x8x1xf32> -> vector<2x8x1xf32>
    %372 = vector.broadcast %371 : vector<2x8x1xf32> to vector<2x8x8xf32>
    %373 = arith.mulf %368, %372 : vector<2x8x8xf32>
    "tpu.trace_start"() <{level = 10 : i32, message = "bts,bsd->btd"}> : () -> ()
    %cst_235 = arith.constant dense<0.000000e+00> : vector<2x8x8xf32>
    %374 = tpu.matmul %373, %361, %cst_235 {dimension_numbers = #tpu.dot_dimension_numbers<[2], [1], [1], [2], [0, 0, 0, 1, 1, 2], [0], [0]>} : vector<2x8x8xf32>, vector<2x8x8xf32>, vector<2x8x8xf32> -> vector<2x8x8xf32>
    "tpu.trace_stop"() : () -> ()
    %375 = vector.shape_cast %374 : vector<2x8x8xf32> to vector<16x8xf32>
    %376 = arith.truncf %375 : vector<16x8xf32> to vector<16x8xbf16>
    %c1_236 = arith.constant 1 : index
    %c0_237 = arith.constant 0 : index
    %c0_238 = arith.constant 0 : index
    %c0_239 = arith.constant 0 : index
    %377 = vector.load %arg8[%c1_236, %c0_237, %c0_238, %c0_239] : memref<4x4x8x32xbf16, #tpu.memory_space<vmem>>, vector<1x1x8x32xbf16>
    %378 = vector.shape_cast %377 : vector<1x1x8x32xbf16> to vector<8x32xbf16>
    %cst_240 = arith.constant dense<0.000000e+00> : vector<16x32xf32>
    %379 = tpu.matmul %376, %378, %cst_240 {dimension_numbers = #tpu.dot_dimension_numbers<[1], [0], [0], [1], [0, 0, 1, 1], [], []>} : vector<16x8xbf16>, vector<8x32xbf16>, vector<16x32xf32> -> vector<16x32xf32>
    %380 = arith.addf %334, %379 : vector<16x32xf32>
    %c1_241 = arith.constant 1 : index
    %c1_242 = arith.constant 1 : index
    %c0_243 = arith.constant 0 : index
    %c0_244 = arith.constant 0 : index
    %381 = vector.load %arg5[%c1_241, %c1_242, %c0_243, %c0_244] : memref<4x4x32x8xbf16, #tpu.memory_space<vmem>>, vector<1x1x32x8xbf16>
    %382 = vector.shape_cast %381 : vector<1x1x32x8xbf16> to vector<32x8xbf16>
    %cst_245 = arith.constant dense<0.000000e+00> : vector<16x8xf32>
    %383 = tpu.matmul %333, %382, %cst_245 {dimension_numbers = #tpu.dot_dimension_numbers<[1], [0], [0], [1], [0, 0, 1, 1], [], []>} : vector<16x32xbf16>, vector<32x8xbf16>, vector<16x8xf32> -> vector<16x8xf32>
    %c1_246 = arith.constant 1 : index
    %c0_247 = arith.constant 0 : index
    %c1_248 = arith.constant 1 : index
    %c0_249 = arith.constant 0 : index
    %384 = vector.load %arg11[%c1_246, %c0_247, %c1_248, %c0_249] : memref<4x3x4x8xf32, #tpu.memory_space<vmem>>, vector<1x1x1x8xf32>
    %385 = vector.shape_cast %384 : vector<1x1x1x8xf32> to vector<8xf32>
    %386 = vector.shape_cast %385 : vector<8xf32> to vector<1x8xf32>
    %387 = vector.broadcast %386 : vector<1x8xf32> to vector<16x8xf32>
    %388 = arith.addf %383, %387 : vector<16x8xf32>
    %c1_250 = arith.constant 1 : index
    %c1_251 = arith.constant 1 : index
    %c0_252 = arith.constant 0 : index
    %c0_253 = arith.constant 0 : index
    %389 = vector.load %arg6[%c1_250, %c1_251, %c0_252, %c0_253] : memref<4x4x32x8xbf16, #tpu.memory_space<vmem>>, vector<1x1x32x8xbf16>
    %390 = vector.shape_cast %389 : vector<1x1x32x8xbf16> to vector<32x8xbf16>
    %cst_254 = arith.constant dense<0.000000e+00> : vector<16x8xf32>
    %391 = tpu.matmul %333, %390, %cst_254 {dimension_numbers = #tpu.dot_dimension_numbers<[1], [0], [0], [1], [0, 0, 1, 1], [], []>} : vector<16x32xbf16>, vector<32x8xbf16>, vector<16x8xf32> -> vector<16x8xf32>
    %c1_255 = arith.constant 1 : index
    %c1_256 = arith.constant 1 : index
    %c1_257 = arith.constant 1 : index
    %c0_258 = arith.constant 0 : index
    %392 = vector.load %arg11[%c1_255, %c1_256, %c1_257, %c0_258] : memref<4x3x4x8xf32, #tpu.memory_space<vmem>>, vector<1x1x1x8xf32>
    %393 = vector.shape_cast %392 : vector<1x1x1x8xf32> to vector<8xf32>
    %394 = vector.shape_cast %393 : vector<8xf32> to vector<1x8xf32>
    %395 = vector.broadcast %394 : vector<1x8xf32> to vector<16x8xf32>
    %396 = arith.addf %391, %395 : vector<16x8xf32>
    %c1_259 = arith.constant 1 : index
    %c1_260 = arith.constant 1 : index
    %c0_261 = arith.constant 0 : index
    %c0_262 = arith.constant 0 : index
    %397 = vector.load %arg7[%c1_259, %c1_260, %c0_261, %c0_262] : memref<4x4x32x8xbf16, #tpu.memory_space<vmem>>, vector<1x1x32x8xbf16>
    %398 = vector.shape_cast %397 : vector<1x1x32x8xbf16> to vector<32x8xbf16>
    %cst_263 = arith.constant dense<0.000000e+00> : vector<16x8xf32>
    %399 = tpu.matmul %333, %398, %cst_263 {dimension_numbers = #tpu.dot_dimension_numbers<[1], [0], [0], [1], [0, 0, 1, 1], [], []>} : vector<16x32xbf16>, vector<32x8xbf16>, vector<16x8xf32> -> vector<16x8xf32>
    %c1_264 = arith.constant 1 : index
    %c2_265 = arith.constant 2 : index
    %c1_266 = arith.constant 1 : index
    %c0_267 = arith.constant 0 : index
    %400 = vector.load %arg11[%c1_264, %c2_265, %c1_266, %c0_267] : memref<4x3x4x8xf32, #tpu.memory_space<vmem>>, vector<1x1x1x8xf32>
    %401 = vector.shape_cast %400 : vector<1x1x1x8xf32> to vector<8xf32>
    %402 = vector.shape_cast %401 : vector<8xf32> to vector<1x8xf32>
    %403 = vector.broadcast %402 : vector<1x8xf32> to vector<16x8xf32>
    %404 = arith.addf %399, %403 : vector<16x8xf32>
    %405 = vector.shape_cast %388 : vector<16x8xf32> to vector<2x8x8xf32>
    %406 = vector.shape_cast %396 : vector<16x8xf32> to vector<2x8x8xf32>
    %407 = vector.shape_cast %404 : vector<16x8xf32> to vector<2x8x8xf32>
    "tpu.trace_start"() <{level = 10 : i32, message = "btd,bsd->bts"}> : () -> ()
    %cst_268 = arith.constant dense<0.000000e+00> : vector<2x8x8xf32>
    %408 = tpu.matmul %405, %406, %cst_268 {dimension_numbers = #tpu.dot_dimension_numbers<[2], [2], [1], [1], [0, 0, 0, 1, 1, 1], [0], [0]>} : vector<2x8x8xf32>, vector<2x8x8xf32>, vector<2x8x8xf32> -> vector<2x8x8xf32>
    "tpu.trace_stop"() : () -> ()
    %409 = arith.addf %408, %23 : vector<2x8x8xf32>
    %cst_269 = arith.constant dense<0xFF800000> : vector<2x8xf32>
    %410 = vector.multi_reduction <maximumf>, %409, %cst_269 [2] : vector<2x8x8xf32> to vector<2x8xf32>
    %411 = vector.shape_cast %410 : vector<2x8xf32> to vector<2x8x1xf32>
    %412 = vector.broadcast %411 : vector<2x8x1xf32> to vector<2x8x8xf32>
    %413 = arith.subf %409, %412 : vector<2x8x8xf32>
    %414 = math.exp %413 : vector<2x8x8xf32>
    %cst_270 = arith.constant dense<0.000000e+00> : vector<2x8xf32>
    %415 = vector.multi_reduction <add>, %414, %cst_270 [2] : vector<2x8x8xf32> to vector<2x8xf32>
    %416 = vector.shape_cast %415 : vector<2x8xf32> to vector<2x8x1xf32>
    %417 = tpu.reciprocal %416 {approx = true} : vector<2x8x1xf32> -> vector<2x8x1xf32>
    %418 = vector.broadcast %417 : vector<2x8x1xf32> to vector<2x8x8xf32>
    %419 = arith.mulf %414, %418 : vector<2x8x8xf32>
    "tpu.trace_start"() <{level = 10 : i32, message = "bts,bsd->btd"}> : () -> ()
    %cst_271 = arith.constant dense<0.000000e+00> : vector<2x8x8xf32>
    %420 = tpu.matmul %419, %407, %cst_271 {dimension_numbers = #tpu.dot_dimension_numbers<[2], [1], [1], [2], [0, 0, 0, 1, 1, 2], [0], [0]>} : vector<2x8x8xf32>, vector<2x8x8xf32>, vector<2x8x8xf32> -> vector<2x8x8xf32>
    "tpu.trace_stop"() : () -> ()
    %421 = vector.shape_cast %420 : vector<2x8x8xf32> to vector<16x8xf32>
    %422 = arith.truncf %421 : vector<16x8xf32> to vector<16x8xbf16>
    %c1_272 = arith.constant 1 : index
    %c1_273 = arith.constant 1 : index
    %c0_274 = arith.constant 0 : index
    %c0_275 = arith.constant 0 : index
    %423 = vector.load %arg8[%c1_272, %c1_273, %c0_274, %c0_275] : memref<4x4x8x32xbf16, #tpu.memory_space<vmem>>, vector<1x1x8x32xbf16>
    %424 = vector.shape_cast %423 : vector<1x1x8x32xbf16> to vector<8x32xbf16>
    %cst_276 = arith.constant dense<0.000000e+00> : vector<16x32xf32>
    %425 = tpu.matmul %422, %424, %cst_276 {dimension_numbers = #tpu.dot_dimension_numbers<[1], [0], [0], [1], [0, 0, 1, 1], [], []>} : vector<16x8xbf16>, vector<8x32xbf16>, vector<16x32xf32> -> vector<16x32xf32>
    %426 = arith.addf %380, %425 : vector<16x32xf32>
    %c1_277 = arith.constant 1 : index
    %c2_278 = arith.constant 2 : index
    %c0_279 = arith.constant 0 : index
    %c0_280 = arith.constant 0 : index
    %427 = vector.load %arg5[%c1_277, %c2_278, %c0_279, %c0_280] : memref<4x4x32x8xbf16, #tpu.memory_space<vmem>>, vector<1x1x32x8xbf16>
    %428 = vector.shape_cast %427 : vector<1x1x32x8xbf16> to vector<32x8xbf16>
    %cst_281 = arith.constant dense<0.000000e+00> : vector<16x8xf32>
    %429 = tpu.matmul %333, %428, %cst_281 {dimension_numbers = #tpu.dot_dimension_numbers<[1], [0], [0], [1], [0, 0, 1, 1], [], []>} : vector<16x32xbf16>, vector<32x8xbf16>, vector<16x8xf32> -> vector<16x8xf32>
    %c1_282 = arith.constant 1 : index
    %c0_283 = arith.constant 0 : index
    %c2_284 = arith.constant 2 : index
    %c0_285 = arith.constant 0 : index
    %430 = vector.load %arg11[%c1_282, %c0_283, %c2_284, %c0_285] : memref<4x3x4x8xf32, #tpu.memory_space<vmem>>, vector<1x1x1x8xf32>
    %431 = vector.shape_cast %430 : vector<1x1x1x8xf32> to vector<8xf32>
    %432 = vector.shape_cast %431 : vector<8xf32> to vector<1x8xf32>
    %433 = vector.broadcast %432 : vector<1x8xf32> to vector<16x8xf32>
    %434 = arith.addf %429, %433 : vector<16x8xf32>
    %c1_286 = arith.constant 1 : index
    %c2_287 = arith.constant 2 : index
    %c0_288 = arith.constant 0 : index
    %c0_289 = arith.constant 0 : index
    %435 = vector.load %arg6[%c1_286, %c2_287, %c0_288, %c0_289] : memref<4x4x32x8xbf16, #tpu.memory_space<vmem>>, vector<1x1x32x8xbf16>
    %436 = vector.shape_cast %435 : vector<1x1x32x8xbf16> to vector<32x8xbf16>
    %cst_290 = arith.constant dense<0.000000e+00> : vector<16x8xf32>
    %437 = tpu.matmul %333, %436, %cst_290 {dimension_numbers = #tpu.dot_dimension_numbers<[1], [0], [0], [1], [0, 0, 1, 1], [], []>} : vector<16x32xbf16>, vector<32x8xbf16>, vector<16x8xf32> -> vector<16x8xf32>
    %c1_291 = arith.constant 1 : index
    %c1_292 = arith.constant 1 : index
    %c2_293 = arith.constant 2 : index
    %c0_294 = arith.constant 0 : index
    %438 = vector.load %arg11[%c1_291, %c1_292, %c2_293, %c0_294] : memref<4x3x4x8xf32, #tpu.memory_space<vmem>>, vector<1x1x1x8xf32>
    %439 = vector.shape_cast %438 : vector<1x1x1x8xf32> to vector<8xf32>
    %440 = vector.shape_cast %439 : vector<8xf32> to vector<1x8xf32>
    %441 = vector.broadcast %440 : vector<1x8xf32> to vector<16x8xf32>
    %442 = arith.addf %437, %441 : vector<16x8xf32>
    %c1_295 = arith.constant 1 : index
    %c2_296 = arith.constant 2 : index
    %c0_297 = arith.constant 0 : index
    %c0_298 = arith.constant 0 : index
    %443 = vector.load %arg7[%c1_295, %c2_296, %c0_297, %c0_298] : memref<4x4x32x8xbf16, #tpu.memory_space<vmem>>, vector<1x1x32x8xbf16>
    %444 = vector.shape_cast %443 : vector<1x1x32x8xbf16> to vector<32x8xbf16>
    %cst_299 = arith.constant dense<0.000000e+00> : vector<16x8xf32>
    %445 = tpu.matmul %333, %444, %cst_299 {dimension_numbers = #tpu.dot_dimension_numbers<[1], [0], [0], [1], [0, 0, 1, 1], [], []>} : vector<16x32xbf16>, vector<32x8xbf16>, vector<16x8xf32> -> vector<16x8xf32>
    %c1_300 = arith.constant 1 : index
    %c2_301 = arith.constant 2 : index
    %c2_302 = arith.constant 2 : index
    %c0_303 = arith.constant 0 : index
    %446 = vector.load %arg11[%c1_300, %c2_301, %c2_302, %c0_303] : memref<4x3x4x8xf32, #tpu.memory_space<vmem>>, vector<1x1x1x8xf32>
    %447 = vector.shape_cast %446 : vector<1x1x1x8xf32> to vector<8xf32>
    %448 = vector.shape_cast %447 : vector<8xf32> to vector<1x8xf32>
    %449 = vector.broadcast %448 : vector<1x8xf32> to vector<16x8xf32>
    %450 = arith.addf %445, %449 : vector<16x8xf32>
    %451 = vector.shape_cast %434 : vector<16x8xf32> to vector<2x8x8xf32>
    %452 = vector.shape_cast %442 : vector<16x8xf32> to vector<2x8x8xf32>
    %453 = vector.shape_cast %450 : vector<16x8xf32> to vector<2x8x8xf32>
    "tpu.trace_start"() <{level = 10 : i32, message = "btd,bsd->bts"}> : () -> ()
    %cst_304 = arith.constant dense<0.000000e+00> : vector<2x8x8xf32>
    %454 = tpu.matmul %451, %452, %cst_304 {dimension_numbers = #tpu.dot_dimension_numbers<[2], [2], [1], [1], [0, 0, 0, 1, 1, 1], [0], [0]>} : vector<2x8x8xf32>, vector<2x8x8xf32>, vector<2x8x8xf32> -> vector<2x8x8xf32>
    "tpu.trace_stop"() : () -> ()
    %455 = arith.addf %454, %23 : vector<2x8x8xf32>
    %cst_305 = arith.constant dense<0xFF800000> : vector<2x8xf32>
    %456 = vector.multi_reduction <maximumf>, %455, %cst_305 [2] : vector<2x8x8xf32> to vector<2x8xf32>
    %457 = vector.shape_cast %456 : vector<2x8xf32> to vector<2x8x1xf32>
    %458 = vector.broadcast %457 : vector<2x8x1xf32> to vector<2x8x8xf32>
    %459 = arith.subf %455, %458 : vector<2x8x8xf32>
    %460 = math.exp %459 : vector<2x8x8xf32>
    %cst_306 = arith.constant dense<0.000000e+00> : vector<2x8xf32>
    %461 = vector.multi_reduction <add>, %460, %cst_306 [2] : vector<2x8x8xf32> to vector<2x8xf32>
    %462 = vector.shape_cast %461 : vector<2x8xf32> to vector<2x8x1xf32>
    %463 = tpu.reciprocal %462 {approx = true} : vector<2x8x1xf32> -> vector<2x8x1xf32>
    %464 = vector.broadcast %463 : vector<2x8x1xf32> to vector<2x8x8xf32>
    %465 = arith.mulf %460, %464 : vector<2x8x8xf32>
    "tpu.trace_start"() <{level = 10 : i32, message = "bts,bsd->btd"}> : () -> ()
    %cst_307 = arith.constant dense<0.000000e+00> : vector<2x8x8xf32>
    %466 = tpu.matmul %465, %453, %cst_307 {dimension_numbers = #tpu.dot_dimension_numbers<[2], [1], [1], [2], [0, 0, 0, 1, 1, 2], [0], [0]>} : vector<2x8x8xf32>, vector<2x8x8xf32>, vector<2x8x8xf32> -> vector<2x8x8xf32>
    "tpu.trace_stop"() : () -> ()
    %467 = vector.shape_cast %466 : vector<2x8x8xf32> to vector<16x8xf32>
    %468 = arith.truncf %467 : vector<16x8xf32> to vector<16x8xbf16>
    %c1_308 = arith.constant 1 : index
    %c2_309 = arith.constant 2 : index
    %c0_310 = arith.constant 0 : index
    %c0_311 = arith.constant 0 : index
    %469 = vector.load %arg8[%c1_308, %c2_309, %c0_310, %c0_311] : memref<4x4x8x32xbf16, #tpu.memory_space<vmem>>, vector<1x1x8x32xbf16>
    %470 = vector.shape_cast %469 : vector<1x1x8x32xbf16> to vector<8x32xbf16>
    %cst_312 = arith.constant dense<0.000000e+00> : vector<16x32xf32>
    %471 = tpu.matmul %468, %470, %cst_312 {dimension_numbers = #tpu.dot_dimension_numbers<[1], [0], [0], [1], [0, 0, 1, 1], [], []>} : vector<16x8xbf16>, vector<8x32xbf16>, vector<16x32xf32> -> vector<16x32xf32>
    %472 = arith.addf %426, %471 : vector<16x32xf32>
    %c1_313 = arith.constant 1 : index
    %c3_314 = arith.constant 3 : index
    %c0_315 = arith.constant 0 : index
    %c0_316 = arith.constant 0 : index
    %473 = vector.load %arg5[%c1_313, %c3_314, %c0_315, %c0_316] : memref<4x4x32x8xbf16, #tpu.memory_space<vmem>>, vector<1x1x32x8xbf16>
    %474 = vector.shape_cast %473 : vector<1x1x32x8xbf16> to vector<32x8xbf16>
    %cst_317 = arith.constant dense<0.000000e+00> : vector<16x8xf32>
    %475 = tpu.matmul %333, %474, %cst_317 {dimension_numbers = #tpu.dot_dimension_numbers<[1], [0], [0], [1], [0, 0, 1, 1], [], []>} : vector<16x32xbf16>, vector<32x8xbf16>, vector<16x8xf32> -> vector<16x8xf32>
    %c1_318 = arith.constant 1 : index
    %c0_319 = arith.constant 0 : index
    %c3_320 = arith.constant 3 : index
    %c0_321 = arith.constant 0 : index
    %476 = vector.load %arg11[%c1_318, %c0_319, %c3_320, %c0_321] : memref<4x3x4x8xf32, #tpu.memory_space<vmem>>, vector<1x1x1x8xf32>
    %477 = vector.shape_cast %476 : vector<1x1x1x8xf32> to vector<8xf32>
    %478 = vector.shape_cast %477 : vector<8xf32> to vector<1x8xf32>
    %479 = vector.broadcast %478 : vector<1x8xf32> to vector<16x8xf32>
    %480 = arith.addf %475, %479 : vector<16x8xf32>
    %c1_322 = arith.constant 1 : index
    %c3_323 = arith.constant 3 : index
    %c0_324 = arith.constant 0 : index
    %c0_325 = arith.constant 0 : index
    %481 = vector.load %arg6[%c1_322, %c3_323, %c0_324, %c0_325] : memref<4x4x32x8xbf16, #tpu.memory_space<vmem>>, vector<1x1x32x8xbf16>
    %482 = vector.shape_cast %481 : vector<1x1x32x8xbf16> to vector<32x8xbf16>
    %cst_326 = arith.constant dense<0.000000e+00> : vector<16x8xf32>
    %483 = tpu.matmul %333, %482, %cst_326 {dimension_numbers = #tpu.dot_dimension_numbers<[1], [0], [0], [1], [0, 0, 1, 1], [], []>} : vector<16x32xbf16>, vector<32x8xbf16>, vector<16x8xf32> -> vector<16x8xf32>
    %c1_327 = arith.constant 1 : index
    %c1_328 = arith.constant 1 : index
    %c3_329 = arith.constant 3 : index
    %c0_330 = arith.constant 0 : index
    %484 = vector.load %arg11[%c1_327, %c1_328, %c3_329, %c0_330] : memref<4x3x4x8xf32, #tpu.memory_space<vmem>>, vector<1x1x1x8xf32>
    %485 = vector.shape_cast %484 : vector<1x1x1x8xf32> to vector<8xf32>
    %486 = vector.shape_cast %485 : vector<8xf32> to vector<1x8xf32>
    %487 = vector.broadcast %486 : vector<1x8xf32> to vector<16x8xf32>
    %488 = arith.addf %483, %487 : vector<16x8xf32>
    %c1_331 = arith.constant 1 : index
    %c3_332 = arith.constant 3 : index
    %c0_333 = arith.constant 0 : index
    %c0_334 = arith.constant 0 : index
    %489 = vector.load %arg7[%c1_331, %c3_332, %c0_333, %c0_334] : memref<4x4x32x8xbf16, #tpu.memory_space<vmem>>, vector<1x1x32x8xbf16>
    %490 = vector.shape_cast %489 : vector<1x1x32x8xbf16> to vector<32x8xbf16>
    %cst_335 = arith.constant dense<0.000000e+00> : vector<16x8xf32>
    %491 = tpu.matmul %333, %490, %cst_335 {dimension_numbers = #tpu.dot_dimension_numbers<[1], [0], [0], [1], [0, 0, 1, 1], [], []>} : vector<16x32xbf16>, vector<32x8xbf16>, vector<16x8xf32> -> vector<16x8xf32>
    %c1_336 = arith.constant 1 : index
    %c2_337 = arith.constant 2 : index
    %c3_338 = arith.constant 3 : index
    %c0_339 = arith.constant 0 : index
    %492 = vector.load %arg11[%c1_336, %c2_337, %c3_338, %c0_339] : memref<4x3x4x8xf32, #tpu.memory_space<vmem>>, vector<1x1x1x8xf32>
    %493 = vector.shape_cast %492 : vector<1x1x1x8xf32> to vector<8xf32>
    %494 = vector.shape_cast %493 : vector<8xf32> to vector<1x8xf32>
    %495 = vector.broadcast %494 : vector<1x8xf32> to vector<16x8xf32>
    %496 = arith.addf %491, %495 : vector<16x8xf32>
    %497 = vector.shape_cast %480 : vector<16x8xf32> to vector<2x8x8xf32>
    %498 = vector.shape_cast %488 : vector<16x8xf32> to vector<2x8x8xf32>
    %499 = vector.shape_cast %496 : vector<16x8xf32> to vector<2x8x8xf32>
    "tpu.trace_start"() <{level = 10 : i32, message = "btd,bsd->bts"}> : () -> ()
    %cst_340 = arith.constant dense<0.000000e+00> : vector<2x8x8xf32>
    %500 = tpu.matmul %497, %498, %cst_340 {dimension_numbers = #tpu.dot_dimension_numbers<[2], [2], [1], [1], [0, 0, 0, 1, 1, 1], [0], [0]>} : vector<2x8x8xf32>, vector<2x8x8xf32>, vector<2x8x8xf32> -> vector<2x8x8xf32>
    "tpu.trace_stop"() : () -> ()
    %501 = arith.addf %500, %23 : vector<2x8x8xf32>
    %cst_341 = arith.constant dense<0xFF800000> : vector<2x8xf32>
    %502 = vector.multi_reduction <maximumf>, %501, %cst_341 [2] : vector<2x8x8xf32> to vector<2x8xf32>
    %503 = vector.shape_cast %502 : vector<2x8xf32> to vector<2x8x1xf32>
    %504 = vector.broadcast %503 : vector<2x8x1xf32> to vector<2x8x8xf32>
    %505 = arith.subf %501, %504 : vector<2x8x8xf32>
    %506 = math.exp %505 : vector<2x8x8xf32>
    %cst_342 = arith.constant dense<0.000000e+00> : vector<2x8xf32>
    %507 = vector.multi_reduction <add>, %506, %cst_342 [2] : vector<2x8x8xf32> to vector<2x8xf32>
    %508 = vector.shape_cast %507 : vector<2x8xf32> to vector<2x8x1xf32>
    %509 = tpu.reciprocal %508 {approx = true} : vector<2x8x1xf32> -> vector<2x8x1xf32>
    %510 = vector.broadcast %509 : vector<2x8x1xf32> to vector<2x8x8xf32>
    %511 = arith.mulf %506, %510 : vector<2x8x8xf32>
    "tpu.trace_start"() <{level = 10 : i32, message = "bts,bsd->btd"}> : () -> ()
    %cst_343 = arith.constant dense<0.000000e+00> : vector<2x8x8xf32>
    %512 = tpu.matmul %511, %499, %cst_343 {dimension_numbers = #tpu.dot_dimension_numbers<[2], [1], [1], [2], [0, 0, 0, 1, 1, 2], [0], [0]>} : vector<2x8x8xf32>, vector<2x8x8xf32>, vector<2x8x8xf32> -> vector<2x8x8xf32>
    "tpu.trace_stop"() : () -> ()
    %513 = vector.shape_cast %512 : vector<2x8x8xf32> to vector<16x8xf32>
    %514 = arith.truncf %513 : vector<16x8xf32> to vector<16x8xbf16>
    %c1_344 = arith.constant 1 : index
    %c3_345 = arith.constant 3 : index
    %c0_346 = arith.constant 0 : index
    %c0_347 = arith.constant 0 : index
    %515 = vector.load %arg8[%c1_344, %c3_345, %c0_346, %c0_347] : memref<4x4x8x32xbf16, #tpu.memory_space<vmem>>, vector<1x1x8x32xbf16>
    %516 = vector.shape_cast %515 : vector<1x1x8x32xbf16> to vector<8x32xbf16>
    %cst_348 = arith.constant dense<0.000000e+00> : vector<16x32xf32>
    %517 = tpu.matmul %514, %516, %cst_348 {dimension_numbers = #tpu.dot_dimension_numbers<[1], [0], [0], [1], [0, 0, 1, 1], [], []>} : vector<16x8xbf16>, vector<8x32xbf16>, vector<16x32xf32> -> vector<16x32xf32>
    %518 = arith.addf %472, %517 : vector<16x32xf32>
    %519 = arith.addf %304, %518 : vector<16x32xf32>
    %c1_349 = arith.constant 1 : index
    %c0_350 = arith.constant 0 : index
    %c0_351 = arith.constant 0 : index
    %520 = vector.load %arg12[%c1_349, %c0_350, %c0_351] : memref<4x3x128xf32, #tpu.memory_space<vmem>>, vector<1x1x32xf32>
    %521 = vector.shape_cast %520 : vector<1x1x32xf32> to vector<32xf32>
    %522 = vector.shape_cast %521 : vector<32xf32> to vector<1x32xf32>
    %523 = vector.broadcast %522 : vector<1x32xf32> to vector<16x32xf32>
    %524 = arith.addf %519, %523 : vector<16x32xf32>
    %c1_352 = arith.constant 1 : index
    %c2_353 = arith.constant 2 : index
    %c0_354 = arith.constant 0 : index
    %525 = vector.load %arg4[%c1_352, %c2_353, %c0_354] : memref<4x4x32xf32, #tpu.memory_space<vmem>>, vector<1x1x32xf32>
    %526 = vector.shape_cast %525 : vector<1x1x32xf32> to vector<32xf32>
    %c1_355 = arith.constant 1 : index
    %c3_356 = arith.constant 3 : index
    %c0_357 = arith.constant 0 : index
    %527 = vector.load %arg4[%c1_355, %c3_356, %c0_357] : memref<4x4x32xf32, #tpu.memory_space<vmem>>, vector<1x1x32xf32>
    %528 = vector.shape_cast %527 : vector<1x1x32xf32> to vector<32xf32>
    %cst_358 = arith.constant dense<0.000000e+00> : vector<16xf32>
    %529 = vector.multi_reduction <add>, %524, %cst_358 [1] : vector<16x32xf32> to vector<16xf32>
    %530 = vector.shape_cast %529 : vector<16xf32> to vector<16x1xf32>
    %cst_359 = arith.constant 3.200000e+01 : f32
    %531 = vector.broadcast %cst_359 : f32 to vector<16x1xf32>
    %532 = arith.divf %530, %531 : vector<16x1xf32>
    %533 = vector.broadcast %532 : vector<16x1xf32> to vector<16x32xf32>
    %534 = arith.subf %524, %533 : vector<16x32xf32>
    %535 = arith.mulf %534, %534 : vector<16x32xf32>
    %cst_360 = arith.constant dense<0.000000e+00> : vector<16xf32>
    %536 = vector.multi_reduction <add>, %535, %cst_360 [1] : vector<16x32xf32> to vector<16xf32>
    %537 = vector.shape_cast %536 : vector<16xf32> to vector<16x1xf32>
    %cst_361 = arith.constant 3.200000e+01 : f32
    %538 = vector.broadcast %cst_361 : f32 to vector<16x1xf32>
    %539 = arith.divf %537, %538 : vector<16x1xf32>
    %540 = vector.broadcast %532 : vector<16x1xf32> to vector<16x32xf32>
    %541 = arith.subf %524, %540 : vector<16x32xf32>
    %cst_362 = arith.constant 9.99999974E-6 : f32
    %542 = vector.broadcast %cst_362 : f32 to vector<16x1xf32>
    %543 = arith.addf %539, %542 : vector<16x1xf32>
    %544 = math.rsqrt %543 : vector<16x1xf32>
    %545 = vector.broadcast %544 : vector<16x1xf32> to vector<16x32xf32>
    %546 = arith.mulf %541, %545 : vector<16x32xf32>
    %547 = vector.shape_cast %526 : vector<32xf32> to vector<1x32xf32>
    %548 = vector.broadcast %547 : vector<1x32xf32> to vector<16x32xf32>
    %549 = arith.mulf %546, %548 : vector<16x32xf32>
    %550 = vector.shape_cast %528 : vector<32xf32> to vector<1x32xf32>
    %551 = vector.broadcast %550 : vector<1x32xf32> to vector<16x32xf32>
    %552 = arith.addf %549, %551 : vector<16x32xf32>
    %553 = arith.truncf %552 : vector<16x32xf32> to vector<16x32xbf16>
    %c1_363 = arith.constant 1 : index
    %c0_364 = arith.constant 0 : index
    %c0_365 = arith.constant 0 : index
    %554 = vector.load %arg9[%c1_363, %c0_364, %c0_365] : memref<4x32x128xbf16, #tpu.memory_space<vmem>>, vector<1x32x128xbf16>
    %555 = vector.shape_cast %554 : vector<1x32x128xbf16> to vector<32x128xbf16>
    %cst_366 = arith.constant dense<0.000000e+00> : vector<16x128xf32>
    %556 = tpu.matmul %553, %555, %cst_366 {dimension_numbers = #tpu.dot_dimension_numbers<[1], [0], [0], [1], [0, 0, 1, 1], [], []>} : vector<16x32xbf16>, vector<32x128xbf16>, vector<16x128xf32> -> vector<16x128xf32>
    %c1_367 = arith.constant 1 : index
    %c1_368 = arith.constant 1 : index
    %c0_369 = arith.constant 0 : index
    %557 = vector.load %arg12[%c1_367, %c1_368, %c0_369] : memref<4x3x128xf32, #tpu.memory_space<vmem>>, vector<1x1x128xf32>
    %558 = vector.shape_cast %557 : vector<1x1x128xf32> to vector<128xf32>
    %559 = vector.shape_cast %558 : vector<128xf32> to vector<1x128xf32>
    %560 = vector.broadcast %559 : vector<1x128xf32> to vector<16x128xf32>
    %561 = arith.addf %556, %560 : vector<16x128xf32>
    %cst_370 = arith.constant 5.000000e-01 : f32
    %562 = vector.broadcast %cst_370 : f32 to vector<16x128xf32>
    %563 = arith.mulf %562, %561 : vector<16x128xf32>
    %cst_371 = arith.constant 0.636619746 : f32
    %564 = math.sqrt %cst_371 : f32
    %cst_372 = arith.constant 4.471500e-02 : f32
    %565 = vector.broadcast %cst_372 : f32 to vector<16x128xf32>
    %566 = arith.mulf %565, %561 : vector<16x128xf32>
    %567 = arith.mulf %566, %561 : vector<16x128xf32>
    %568 = arith.mulf %567, %561 : vector<16x128xf32>
    %569 = arith.addf %561, %568 : vector<16x128xf32>
    %570 = vector.broadcast %564 : f32 to vector<16x128xf32>
    %571 = arith.mulf %570, %569 : vector<16x128xf32>
    %572 = math.tanh %571 : vector<16x128xf32>
    %cst_373 = arith.constant 1.000000e+00 : f32
    %573 = vector.broadcast %cst_373 : f32 to vector<16x128xf32>
    %574 = arith.addf %573, %572 : vector<16x128xf32>
    %575 = arith.mulf %563, %574 : vector<16x128xf32>
    %576 = arith.truncf %575 : vector<16x128xf32> to vector<16x128xbf16>
    %c1_374 = arith.constant 1 : index
    %c0_375 = arith.constant 0 : index
    %c0_376 = arith.constant 0 : index
    %577 = vector.load %arg10[%c1_374, %c0_375, %c0_376] : memref<4x128x32xbf16, #tpu.memory_space<vmem>>, vector<1x128x32xbf16>
    %578 = vector.shape_cast %577 : vector<1x128x32xbf16> to vector<128x32xbf16>
    %cst_377 = arith.constant dense<0.000000e+00> : vector<16x32xf32>
    %579 = tpu.matmul %576, %578, %cst_377 {dimension_numbers = #tpu.dot_dimension_numbers<[1], [0], [0], [1], [0, 0, 1, 1], [], []>} : vector<16x128xbf16>, vector<128x32xbf16>, vector<16x32xf32> -> vector<16x32xf32>
    %c1_378 = arith.constant 1 : index
    %c2_379 = arith.constant 2 : index
    %c0_380 = arith.constant 0 : index
    %580 = vector.load %arg12[%c1_378, %c2_379, %c0_380] : memref<4x3x128xf32, #tpu.memory_space<vmem>>, vector<1x1x32xf32>
    %581 = vector.shape_cast %580 : vector<1x1x32xf32> to vector<32xf32>
    %582 = vector.shape_cast %581 : vector<32xf32> to vector<1x32xf32>
    %583 = vector.broadcast %582 : vector<1x32xf32> to vector<16x32xf32>
    %584 = arith.addf %579, %583 : vector<16x32xf32>
    %585 = arith.addf %524, %584 : vector<16x32xf32>
    %c2_381 = arith.constant 2 : index
    %c0_382 = arith.constant 0 : index
    %c0_383 = arith.constant 0 : index
    %586 = vector.load %arg4[%c2_381, %c0_382, %c0_383] : memref<4x4x32xf32, #tpu.memory_space<vmem>>, vector<1x1x32xf32>
    %587 = vector.shape_cast %586 : vector<1x1x32xf32> to vector<32xf32>
    %c2_384 = arith.constant 2 : index
    %c1_385 = arith.constant 1 : index
    %c0_386 = arith.constant 0 : index
    %588 = vector.load %arg4[%c2_384, %c1_385, %c0_386] : memref<4x4x32xf32, #tpu.memory_space<vmem>>, vector<1x1x32xf32>
    %589 = vector.shape_cast %588 : vector<1x1x32xf32> to vector<32xf32>
    %cst_387 = arith.constant dense<0.000000e+00> : vector<16xf32>
    %590 = vector.multi_reduction <add>, %585, %cst_387 [1] : vector<16x32xf32> to vector<16xf32>
    %591 = vector.shape_cast %590 : vector<16xf32> to vector<16x1xf32>
    %cst_388 = arith.constant 3.200000e+01 : f32
    %592 = vector.broadcast %cst_388 : f32 to vector<16x1xf32>
    %593 = arith.divf %591, %592 : vector<16x1xf32>
    %594 = vector.broadcast %593 : vector<16x1xf32> to vector<16x32xf32>
    %595 = arith.subf %585, %594 : vector<16x32xf32>
    %596 = arith.mulf %595, %595 : vector<16x32xf32>
    %cst_389 = arith.constant dense<0.000000e+00> : vector<16xf32>
    %597 = vector.multi_reduction <add>, %596, %cst_389 [1] : vector<16x32xf32> to vector<16xf32>
    %598 = vector.shape_cast %597 : vector<16xf32> to vector<16x1xf32>
    %cst_390 = arith.constant 3.200000e+01 : f32
    %599 = vector.broadcast %cst_390 : f32 to vector<16x1xf32>
    %600 = arith.divf %598, %599 : vector<16x1xf32>
    %601 = vector.broadcast %593 : vector<16x1xf32> to vector<16x32xf32>
    %602 = arith.subf %585, %601 : vector<16x32xf32>
    %cst_391 = arith.constant 9.99999974E-6 : f32
    %603 = vector.broadcast %cst_391 : f32 to vector<16x1xf32>
    %604 = arith.addf %600, %603 : vector<16x1xf32>
    %605 = math.rsqrt %604 : vector<16x1xf32>
    %606 = vector.broadcast %605 : vector<16x1xf32> to vector<16x32xf32>
    %607 = arith.mulf %602, %606 : vector<16x32xf32>
    %608 = vector.shape_cast %587 : vector<32xf32> to vector<1x32xf32>
    %609 = vector.broadcast %608 : vector<1x32xf32> to vector<16x32xf32>
    %610 = arith.mulf %607, %609 : vector<16x32xf32>
    %611 = vector.shape_cast %589 : vector<32xf32> to vector<1x32xf32>
    %612 = vector.broadcast %611 : vector<1x32xf32> to vector<16x32xf32>
    %613 = arith.addf %610, %612 : vector<16x32xf32>
    %614 = arith.truncf %613 : vector<16x32xf32> to vector<16x32xbf16>
    %cst_392 = arith.constant 0.000000e+00 : f32
    %615 = vector.broadcast %cst_392 : f32 to vector<16x32xf32>
    %c2_393 = arith.constant 2 : index
    %c0_394 = arith.constant 0 : index
    %c0_395 = arith.constant 0 : index
    %c0_396 = arith.constant 0 : index
    %616 = vector.load %arg5[%c2_393, %c0_394, %c0_395, %c0_396] : memref<4x4x32x8xbf16, #tpu.memory_space<vmem>>, vector<1x1x32x8xbf16>
    %617 = vector.shape_cast %616 : vector<1x1x32x8xbf16> to vector<32x8xbf16>
    %cst_397 = arith.constant dense<0.000000e+00> : vector<16x8xf32>
    %618 = tpu.matmul %614, %617, %cst_397 {dimension_numbers = #tpu.dot_dimension_numbers<[1], [0], [0], [1], [0, 0, 1, 1], [], []>} : vector<16x32xbf16>, vector<32x8xbf16>, vector<16x8xf32> -> vector<16x8xf32>
    %c2_398 = arith.constant 2 : index
    %c0_399 = arith.constant 0 : index
    %c0_400 = arith.constant 0 : index
    %c0_401 = arith.constant 0 : index
    %619 = vector.load %arg11[%c2_398, %c0_399, %c0_400, %c0_401] : memref<4x3x4x8xf32, #tpu.memory_space<vmem>>, vector<1x1x1x8xf32>
    %620 = vector.shape_cast %619 : vector<1x1x1x8xf32> to vector<8xf32>
    %621 = vector.shape_cast %620 : vector<8xf32> to vector<1x8xf32>
    %622 = vector.broadcast %621 : vector<1x8xf32> to vector<16x8xf32>
    %623 = arith.addf %618, %622 : vector<16x8xf32>
    %c2_402 = arith.constant 2 : index
    %c0_403 = arith.constant 0 : index
    %c0_404 = arith.constant 0 : index
    %c0_405 = arith.constant 0 : index
    %624 = vector.load %arg6[%c2_402, %c0_403, %c0_404, %c0_405] : memref<4x4x32x8xbf16, #tpu.memory_space<vmem>>, vector<1x1x32x8xbf16>
    %625 = vector.shape_cast %624 : vector<1x1x32x8xbf16> to vector<32x8xbf16>
    %cst_406 = arith.constant dense<0.000000e+00> : vector<16x8xf32>
    %626 = tpu.matmul %614, %625, %cst_406 {dimension_numbers = #tpu.dot_dimension_numbers<[1], [0], [0], [1], [0, 0, 1, 1], [], []>} : vector<16x32xbf16>, vector<32x8xbf16>, vector<16x8xf32> -> vector<16x8xf32>
    %c2_407 = arith.constant 2 : index
    %c1_408 = arith.constant 1 : index
    %c0_409 = arith.constant 0 : index
    %c0_410 = arith.constant 0 : index
    %627 = vector.load %arg11[%c2_407, %c1_408, %c0_409, %c0_410] : memref<4x3x4x8xf32, #tpu.memory_space<vmem>>, vector<1x1x1x8xf32>
    %628 = vector.shape_cast %627 : vector<1x1x1x8xf32> to vector<8xf32>
    %629 = vector.shape_cast %628 : vector<8xf32> to vector<1x8xf32>
    %630 = vector.broadcast %629 : vector<1x8xf32> to vector<16x8xf32>
    %631 = arith.addf %626, %630 : vector<16x8xf32>
    %c2_411 = arith.constant 2 : index
    %c0_412 = arith.constant 0 : index
    %c0_413 = arith.constant 0 : index
    %c0_414 = arith.constant 0 : index
    %632 = vector.load %arg7[%c2_411, %c0_412, %c0_413, %c0_414] : memref<4x4x32x8xbf16, #tpu.memory_space<vmem>>, vector<1x1x32x8xbf16>
    %633 = vector.shape_cast %632 : vector<1x1x32x8xbf16> to vector<32x8xbf16>
    %cst_415 = arith.constant dense<0.000000e+00> : vector<16x8xf32>
    %634 = tpu.matmul %614, %633, %cst_415 {dimension_numbers = #tpu.dot_dimension_numbers<[1], [0], [0], [1], [0, 0, 1, 1], [], []>} : vector<16x32xbf16>, vector<32x8xbf16>, vector<16x8xf32> -> vector<16x8xf32>
    %c2_416 = arith.constant 2 : index
    %c2_417 = arith.constant 2 : index
    %c0_418 = arith.constant 0 : index
    %c0_419 = arith.constant 0 : index
    %635 = vector.load %arg11[%c2_416, %c2_417, %c0_418, %c0_419] : memref<4x3x4x8xf32, #tpu.memory_space<vmem>>, vector<1x1x1x8xf32>
    %636 = vector.shape_cast %635 : vector<1x1x1x8xf32> to vector<8xf32>
    %637 = vector.shape_cast %636 : vector<8xf32> to vector<1x8xf32>
    %638 = vector.broadcast %637 : vector<1x8xf32> to vector<16x8xf32>
    %639 = arith.addf %634, %638 : vector<16x8xf32>
    %640 = vector.shape_cast %623 : vector<16x8xf32> to vector<2x8x8xf32>
    %641 = vector.shape_cast %631 : vector<16x8xf32> to vector<2x8x8xf32>
    %642 = vector.shape_cast %639 : vector<16x8xf32> to vector<2x8x8xf32>
    "tpu.trace_start"() <{level = 10 : i32, message = "btd,bsd->bts"}> : () -> ()
    %cst_420 = arith.constant dense<0.000000e+00> : vector<2x8x8xf32>
    %643 = tpu.matmul %640, %641, %cst_420 {dimension_numbers = #tpu.dot_dimension_numbers<[2], [2], [1], [1], [0, 0, 0, 1, 1, 1], [0], [0]>} : vector<2x8x8xf32>, vector<2x8x8xf32>, vector<2x8x8xf32> -> vector<2x8x8xf32>
    "tpu.trace_stop"() : () -> ()
    %644 = arith.addf %643, %23 : vector<2x8x8xf32>
    %cst_421 = arith.constant dense<0xFF800000> : vector<2x8xf32>
    %645 = vector.multi_reduction <maximumf>, %644, %cst_421 [2] : vector<2x8x8xf32> to vector<2x8xf32>
    %646 = vector.shape_cast %645 : vector<2x8xf32> to vector<2x8x1xf32>
    %647 = vector.broadcast %646 : vector<2x8x1xf32> to vector<2x8x8xf32>
    %648 = arith.subf %644, %647 : vector<2x8x8xf32>
    %649 = math.exp %648 : vector<2x8x8xf32>
    %cst_422 = arith.constant dense<0.000000e+00> : vector<2x8xf32>
    %650 = vector.multi_reduction <add>, %649, %cst_422 [2] : vector<2x8x8xf32> to vector<2x8xf32>
    %651 = vector.shape_cast %650 : vector<2x8xf32> to vector<2x8x1xf32>
    %652 = tpu.reciprocal %651 {approx = true} : vector<2x8x1xf32> -> vector<2x8x1xf32>
    %653 = vector.broadcast %652 : vector<2x8x1xf32> to vector<2x8x8xf32>
    %654 = arith.mulf %649, %653 : vector<2x8x8xf32>
    "tpu.trace_start"() <{level = 10 : i32, message = "bts,bsd->btd"}> : () -> ()
    %cst_423 = arith.constant dense<0.000000e+00> : vector<2x8x8xf32>
    %655 = tpu.matmul %654, %642, %cst_423 {dimension_numbers = #tpu.dot_dimension_numbers<[2], [1], [1], [2], [0, 0, 0, 1, 1, 2], [0], [0]>} : vector<2x8x8xf32>, vector<2x8x8xf32>, vector<2x8x8xf32> -> vector<2x8x8xf32>
    "tpu.trace_stop"() : () -> ()
    %656 = vector.shape_cast %655 : vector<2x8x8xf32> to vector<16x8xf32>
    %657 = arith.truncf %656 : vector<16x8xf32> to vector<16x8xbf16>
    %c2_424 = arith.constant 2 : index
    %c0_425 = arith.constant 0 : index
    %c0_426 = arith.constant 0 : index
    %c0_427 = arith.constant 0 : index
    %658 = vector.load %arg8[%c2_424, %c0_425, %c0_426, %c0_427] : memref<4x4x8x32xbf16, #tpu.memory_space<vmem>>, vector<1x1x8x32xbf16>
    %659 = vector.shape_cast %658 : vector<1x1x8x32xbf16> to vector<8x32xbf16>
    %cst_428 = arith.constant dense<0.000000e+00> : vector<16x32xf32>
    %660 = tpu.matmul %657, %659, %cst_428 {dimension_numbers = #tpu.dot_dimension_numbers<[1], [0], [0], [1], [0, 0, 1, 1], [], []>} : vector<16x8xbf16>, vector<8x32xbf16>, vector<16x32xf32> -> vector<16x32xf32>
    %661 = arith.addf %615, %660 : vector<16x32xf32>
    %c2_429 = arith.constant 2 : index
    %c1_430 = arith.constant 1 : index
    %c0_431 = arith.constant 0 : index
    %c0_432 = arith.constant 0 : index
    %662 = vector.load %arg5[%c2_429, %c1_430, %c0_431, %c0_432] : memref<4x4x32x8xbf16, #tpu.memory_space<vmem>>, vector<1x1x32x8xbf16>
    %663 = vector.shape_cast %662 : vector<1x1x32x8xbf16> to vector<32x8xbf16>
    %cst_433 = arith.constant dense<0.000000e+00> : vector<16x8xf32>
    %664 = tpu.matmul %614, %663, %cst_433 {dimension_numbers = #tpu.dot_dimension_numbers<[1], [0], [0], [1], [0, 0, 1, 1], [], []>} : vector<16x32xbf16>, vector<32x8xbf16>, vector<16x8xf32> -> vector<16x8xf32>
    %c2_434 = arith.constant 2 : index
    %c0_435 = arith.constant 0 : index
    %c1_436 = arith.constant 1 : index
    %c0_437 = arith.constant 0 : index
    %665 = vector.load %arg11[%c2_434, %c0_435, %c1_436, %c0_437] : memref<4x3x4x8xf32, #tpu.memory_space<vmem>>, vector<1x1x1x8xf32>
    %666 = vector.shape_cast %665 : vector<1x1x1x8xf32> to vector<8xf32>
    %667 = vector.shape_cast %666 : vector<8xf32> to vector<1x8xf32>
    %668 = vector.broadcast %667 : vector<1x8xf32> to vector<16x8xf32>
    %669 = arith.addf %664, %668 : vector<16x8xf32>
    %c2_438 = arith.constant 2 : index
    %c1_439 = arith.constant 1 : index
    %c0_440 = arith.constant 0 : index
    %c0_441 = arith.constant 0 : index
    %670 = vector.load %arg6[%c2_438, %c1_439, %c0_440, %c0_441] : memref<4x4x32x8xbf16, #tpu.memory_space<vmem>>, vector<1x1x32x8xbf16>
    %671 = vector.shape_cast %670 : vector<1x1x32x8xbf16> to vector<32x8xbf16>
    %cst_442 = arith.constant dense<0.000000e+00> : vector<16x8xf32>
    %672 = tpu.matmul %614, %671, %cst_442 {dimension_numbers = #tpu.dot_dimension_numbers<[1], [0], [0], [1], [0, 0, 1, 1], [], []>} : vector<16x32xbf16>, vector<32x8xbf16>, vector<16x8xf32> -> vector<16x8xf32>
    %c2_443 = arith.constant 2 : index
    %c1_444 = arith.constant 1 : index
    %c1_445 = arith.constant 1 : index
    %c0_446 = arith.constant 0 : index
    %673 = vector.load %arg11[%c2_443, %c1_444, %c1_445, %c0_446] : memref<4x3x4x8xf32, #tpu.memory_space<vmem>>, vector<1x1x1x8xf32>
    %674 = vector.shape_cast %673 : vector<1x1x1x8xf32> to vector<8xf32>
    %675 = vector.shape_cast %674 : vector<8xf32> to vector<1x8xf32>
    %676 = vector.broadcast %675 : vector<1x8xf32> to vector<16x8xf32>
    %677 = arith.addf %672, %676 : vector<16x8xf32>
    %c2_447 = arith.constant 2 : index
    %c1_448 = arith.constant 1 : index
    %c0_449 = arith.constant 0 : index
    %c0_450 = arith.constant 0 : index
    %678 = vector.load %arg7[%c2_447, %c1_448, %c0_449, %c0_450] : memref<4x4x32x8xbf16, #tpu.memory_space<vmem>>, vector<1x1x32x8xbf16>
    %679 = vector.shape_cast %678 : vector<1x1x32x8xbf16> to vector<32x8xbf16>
    %cst_451 = arith.constant dense<0.000000e+00> : vector<16x8xf32>
    %680 = tpu.matmul %614, %679, %cst_451 {dimension_numbers = #tpu.dot_dimension_numbers<[1], [0], [0], [1], [0, 0, 1, 1], [], []>} : vector<16x32xbf16>, vector<32x8xbf16>, vector<16x8xf32> -> vector<16x8xf32>
    %c2_452 = arith.constant 2 : index
    %c2_453 = arith.constant 2 : index
    %c1_454 = arith.constant 1 : index
    %c0_455 = arith.constant 0 : index
    %681 = vector.load %arg11[%c2_452, %c2_453, %c1_454, %c0_455] : memref<4x3x4x8xf32, #tpu.memory_space<vmem>>, vector<1x1x1x8xf32>
    %682 = vector.shape_cast %681 : vector<1x1x1x8xf32> to vector<8xf32>
    %683 = vector.shape_cast %682 : vector<8xf32> to vector<1x8xf32>
    %684 = vector.broadcast %683 : vector<1x8xf32> to vector<16x8xf32>
    %685 = arith.addf %680, %684 : vector<16x8xf32>
    %686 = vector.shape_cast %669 : vector<16x8xf32> to vector<2x8x8xf32>
    %687 = vector.shape_cast %677 : vector<16x8xf32> to vector<2x8x8xf32>
    %688 = vector.shape_cast %685 : vector<16x8xf32> to vector<2x8x8xf32>
    "tpu.trace_start"() <{level = 10 : i32, message = "btd,bsd->bts"}> : () -> ()
    %cst_456 = arith.constant dense<0.000000e+00> : vector<2x8x8xf32>
    %689 = tpu.matmul %686, %687, %cst_456 {dimension_numbers = #tpu.dot_dimension_numbers<[2], [2], [1], [1], [0, 0, 0, 1, 1, 1], [0], [0]>} : vector<2x8x8xf32>, vector<2x8x8xf32>, vector<2x8x8xf32> -> vector<2x8x8xf32>
    "tpu.trace_stop"() : () -> ()
    %690 = arith.addf %689, %23 : vector<2x8x8xf32>
    %cst_457 = arith.constant dense<0xFF800000> : vector<2x8xf32>
    %691 = vector.multi_reduction <maximumf>, %690, %cst_457 [2] : vector<2x8x8xf32> to vector<2x8xf32>
    %692 = vector.shape_cast %691 : vector<2x8xf32> to vector<2x8x1xf32>
    %693 = vector.broadcast %692 : vector<2x8x1xf32> to vector<2x8x8xf32>
    %694 = arith.subf %690, %693 : vector<2x8x8xf32>
    %695 = math.exp %694 : vector<2x8x8xf32>
    %cst_458 = arith.constant dense<0.000000e+00> : vector<2x8xf32>
    %696 = vector.multi_reduction <add>, %695, %cst_458 [2] : vector<2x8x8xf32> to vector<2x8xf32>
    %697 = vector.shape_cast %696 : vector<2x8xf32> to vector<2x8x1xf32>
    %698 = tpu.reciprocal %697 {approx = true} : vector<2x8x1xf32> -> vector<2x8x1xf32>
    %699 = vector.broadcast %698 : vector<2x8x1xf32> to vector<2x8x8xf32>
    %700 = arith.mulf %695, %699 : vector<2x8x8xf32>
    "tpu.trace_start"() <{level = 10 : i32, message = "bts,bsd->btd"}> : () -> ()
    %cst_459 = arith.constant dense<0.000000e+00> : vector<2x8x8xf32>
    %701 = tpu.matmul %700, %688, %cst_459 {dimension_numbers = #tpu.dot_dimension_numbers<[2], [1], [1], [2], [0, 0, 0, 1, 1, 2], [0], [0]>} : vector<2x8x8xf32>, vector<2x8x8xf32>, vector<2x8x8xf32> -> vector<2x8x8xf32>
    "tpu.trace_stop"() : () -> ()
    %702 = vector.shape_cast %701 : vector<2x8x8xf32> to vector<16x8xf32>
    %703 = arith.truncf %702 : vector<16x8xf32> to vector<16x8xbf16>
    %c2_460 = arith.constant 2 : index
    %c1_461 = arith.constant 1 : index
    %c0_462 = arith.constant 0 : index
    %c0_463 = arith.constant 0 : index
    %704 = vector.load %arg8[%c2_460, %c1_461, %c0_462, %c0_463] : memref<4x4x8x32xbf16, #tpu.memory_space<vmem>>, vector<1x1x8x32xbf16>
    %705 = vector.shape_cast %704 : vector<1x1x8x32xbf16> to vector<8x32xbf16>
    %cst_464 = arith.constant dense<0.000000e+00> : vector<16x32xf32>
    %706 = tpu.matmul %703, %705, %cst_464 {dimension_numbers = #tpu.dot_dimension_numbers<[1], [0], [0], [1], [0, 0, 1, 1], [], []>} : vector<16x8xbf16>, vector<8x32xbf16>, vector<16x32xf32> -> vector<16x32xf32>
    %707 = arith.addf %661, %706 : vector<16x32xf32>
    %c2_465 = arith.constant 2 : index
    %c2_466 = arith.constant 2 : index
    %c0_467 = arith.constant 0 : index
    %c0_468 = arith.constant 0 : index
    %708 = vector.load %arg5[%c2_465, %c2_466, %c0_467, %c0_468] : memref<4x4x32x8xbf16, #tpu.memory_space<vmem>>, vector<1x1x32x8xbf16>
    %709 = vector.shape_cast %708 : vector<1x1x32x8xbf16> to vector<32x8xbf16>
    %cst_469 = arith.constant dense<0.000000e+00> : vector<16x8xf32>
    %710 = tpu.matmul %614, %709, %cst_469 {dimension_numbers = #tpu.dot_dimension_numbers<[1], [0], [0], [1], [0, 0, 1, 1], [], []>} : vector<16x32xbf16>, vector<32x8xbf16>, vector<16x8xf32> -> vector<16x8xf32>
    %c2_470 = arith.constant 2 : index
    %c0_471 = arith.constant 0 : index
    %c2_472 = arith.constant 2 : index
    %c0_473 = arith.constant 0 : index
    %711 = vector.load %arg11[%c2_470, %c0_471, %c2_472, %c0_473] : memref<4x3x4x8xf32, #tpu.memory_space<vmem>>, vector<1x1x1x8xf32>
    %712 = vector.shape_cast %711 : vector<1x1x1x8xf32> to vector<8xf32>
    %713 = vector.shape_cast %712 : vector<8xf32> to vector<1x8xf32>
    %714 = vector.broadcast %713 : vector<1x8xf32> to vector<16x8xf32>
    %715 = arith.addf %710, %714 : vector<16x8xf32>
    %c2_474 = arith.constant 2 : index
    %c2_475 = arith.constant 2 : index
    %c0_476 = arith.constant 0 : index
    %c0_477 = arith.constant 0 : index
    %716 = vector.load %arg6[%c2_474, %c2_475, %c0_476, %c0_477] : memref<4x4x32x8xbf16, #tpu.memory_space<vmem>>, vector<1x1x32x8xbf16>
    %717 = vector.shape_cast %716 : vector<1x1x32x8xbf16> to vector<32x8xbf16>
    %cst_478 = arith.constant dense<0.000000e+00> : vector<16x8xf32>
    %718 = tpu.matmul %614, %717, %cst_478 {dimension_numbers = #tpu.dot_dimension_numbers<[1], [0], [0], [1], [0, 0, 1, 1], [], []>} : vector<16x32xbf16>, vector<32x8xbf16>, vector<16x8xf32> -> vector<16x8xf32>
    %c2_479 = arith.constant 2 : index
    %c1_480 = arith.constant 1 : index
    %c2_481 = arith.constant 2 : index
    %c0_482 = arith.constant 0 : index
    %719 = vector.load %arg11[%c2_479, %c1_480, %c2_481, %c0_482] : memref<4x3x4x8xf32, #tpu.memory_space<vmem>>, vector<1x1x1x8xf32>
    %720 = vector.shape_cast %719 : vector<1x1x1x8xf32> to vector<8xf32>
    %721 = vector.shape_cast %720 : vector<8xf32> to vector<1x8xf32>
    %722 = vector.broadcast %721 : vector<1x8xf32> to vector<16x8xf32>
    %723 = arith.addf %718, %722 : vector<16x8xf32>
    %c2_483 = arith.constant 2 : index
    %c2_484 = arith.constant 2 : index
    %c0_485 = arith.constant 0 : index
    %c0_486 = arith.constant 0 : index
    %724 = vector.load %arg7[%c2_483, %c2_484, %c0_485, %c0_486] : memref<4x4x32x8xbf16, #tpu.memory_space<vmem>>, vector<1x1x32x8xbf16>
    %725 = vector.shape_cast %724 : vector<1x1x32x8xbf16> to vector<32x8xbf16>
    %cst_487 = arith.constant dense<0.000000e+00> : vector<16x8xf32>
    %726 = tpu.matmul %614, %725, %cst_487 {dimension_numbers = #tpu.dot_dimension_numbers<[1], [0], [0], [1], [0, 0, 1, 1], [], []>} : vector<16x32xbf16>, vector<32x8xbf16>, vector<16x8xf32> -> vector<16x8xf32>
    %c2_488 = arith.constant 2 : index
    %c2_489 = arith.constant 2 : index
    %c2_490 = arith.constant 2 : index
    %c0_491 = arith.constant 0 : index
    %727 = vector.load %arg11[%c2_488, %c2_489, %c2_490, %c0_491] : memref<4x3x4x8xf32, #tpu.memory_space<vmem>>, vector<1x1x1x8xf32>
    %728 = vector.shape_cast %727 : vector<1x1x1x8xf32> to vector<8xf32>
    %729 = vector.shape_cast %728 : vector<8xf32> to vector<1x8xf32>
    %730 = vector.broadcast %729 : vector<1x8xf32> to vector<16x8xf32>
    %731 = arith.addf %726, %730 : vector<16x8xf32>
    %732 = vector.shape_cast %715 : vector<16x8xf32> to vector<2x8x8xf32>
    %733 = vector.shape_cast %723 : vector<16x8xf32> to vector<2x8x8xf32>
    %734 = vector.shape_cast %731 : vector<16x8xf32> to vector<2x8x8xf32>
    "tpu.trace_start"() <{level = 10 : i32, message = "btd,bsd->bts"}> : () -> ()
    %cst_492 = arith.constant dense<0.000000e+00> : vector<2x8x8xf32>
    %735 = tpu.matmul %732, %733, %cst_492 {dimension_numbers = #tpu.dot_dimension_numbers<[2], [2], [1], [1], [0, 0, 0, 1, 1, 1], [0], [0]>} : vector<2x8x8xf32>, vector<2x8x8xf32>, vector<2x8x8xf32> -> vector<2x8x8xf32>
    "tpu.trace_stop"() : () -> ()
    %736 = arith.addf %735, %23 : vector<2x8x8xf32>
    %cst_493 = arith.constant dense<0xFF800000> : vector<2x8xf32>
    %737 = vector.multi_reduction <maximumf>, %736, %cst_493 [2] : vector<2x8x8xf32> to vector<2x8xf32>
    %738 = vector.shape_cast %737 : vector<2x8xf32> to vector<2x8x1xf32>
    %739 = vector.broadcast %738 : vector<2x8x1xf32> to vector<2x8x8xf32>
    %740 = arith.subf %736, %739 : vector<2x8x8xf32>
    %741 = math.exp %740 : vector<2x8x8xf32>
    %cst_494 = arith.constant dense<0.000000e+00> : vector<2x8xf32>
    %742 = vector.multi_reduction <add>, %741, %cst_494 [2] : vector<2x8x8xf32> to vector<2x8xf32>
    %743 = vector.shape_cast %742 : vector<2x8xf32> to vector<2x8x1xf32>
    %744 = tpu.reciprocal %743 {approx = true} : vector<2x8x1xf32> -> vector<2x8x1xf32>
    %745 = vector.broadcast %744 : vector<2x8x1xf32> to vector<2x8x8xf32>
    %746 = arith.mulf %741, %745 : vector<2x8x8xf32>
    "tpu.trace_start"() <{level = 10 : i32, message = "bts,bsd->btd"}> : () -> ()
    %cst_495 = arith.constant dense<0.000000e+00> : vector<2x8x8xf32>
    %747 = tpu.matmul %746, %734, %cst_495 {dimension_numbers = #tpu.dot_dimension_numbers<[2], [1], [1], [2], [0, 0, 0, 1, 1, 2], [0], [0]>} : vector<2x8x8xf32>, vector<2x8x8xf32>, vector<2x8x8xf32> -> vector<2x8x8xf32>
    "tpu.trace_stop"() : () -> ()
    %748 = vector.shape_cast %747 : vector<2x8x8xf32> to vector<16x8xf32>
    %749 = arith.truncf %748 : vector<16x8xf32> to vector<16x8xbf16>
    %c2_496 = arith.constant 2 : index
    %c2_497 = arith.constant 2 : index
    %c0_498 = arith.constant 0 : index
    %c0_499 = arith.constant 0 : index
    %750 = vector.load %arg8[%c2_496, %c2_497, %c0_498, %c0_499] : memref<4x4x8x32xbf16, #tpu.memory_space<vmem>>, vector<1x1x8x32xbf16>
    %751 = vector.shape_cast %750 : vector<1x1x8x32xbf16> to vector<8x32xbf16>
    %cst_500 = arith.constant dense<0.000000e+00> : vector<16x32xf32>
    %752 = tpu.matmul %749, %751, %cst_500 {dimension_numbers = #tpu.dot_dimension_numbers<[1], [0], [0], [1], [0, 0, 1, 1], [], []>} : vector<16x8xbf16>, vector<8x32xbf16>, vector<16x32xf32> -> vector<16x32xf32>
    %753 = arith.addf %707, %752 : vector<16x32xf32>
    %c2_501 = arith.constant 2 : index
    %c3_502 = arith.constant 3 : index
    %c0_503 = arith.constant 0 : index
    %c0_504 = arith.constant 0 : index
    %754 = vector.load %arg5[%c2_501, %c3_502, %c0_503, %c0_504] : memref<4x4x32x8xbf16, #tpu.memory_space<vmem>>, vector<1x1x32x8xbf16>
    %755 = vector.shape_cast %754 : vector<1x1x32x8xbf16> to vector<32x8xbf16>
    %cst_505 = arith.constant dense<0.000000e+00> : vector<16x8xf32>
    %756 = tpu.matmul %614, %755, %cst_505 {dimension_numbers = #tpu.dot_dimension_numbers<[1], [0], [0], [1], [0, 0, 1, 1], [], []>} : vector<16x32xbf16>, vector<32x8xbf16>, vector<16x8xf32> -> vector<16x8xf32>
    %c2_506 = arith.constant 2 : index
    %c0_507 = arith.constant 0 : index
    %c3_508 = arith.constant 3 : index
    %c0_509 = arith.constant 0 : index
    %757 = vector.load %arg11[%c2_506, %c0_507, %c3_508, %c0_509] : memref<4x3x4x8xf32, #tpu.memory_space<vmem>>, vector<1x1x1x8xf32>
    %758 = vector.shape_cast %757 : vector<1x1x1x8xf32> to vector<8xf32>
    %759 = vector.shape_cast %758 : vector<8xf32> to vector<1x8xf32>
    %760 = vector.broadcast %759 : vector<1x8xf32> to vector<16x8xf32>
    %761 = arith.addf %756, %760 : vector<16x8xf32>
    %c2_510 = arith.constant 2 : index
    %c3_511 = arith.constant 3 : index
    %c0_512 = arith.constant 0 : index
    %c0_513 = arith.constant 0 : index
    %762 = vector.load %arg6[%c2_510, %c3_511, %c0_512, %c0_513] : memref<4x4x32x8xbf16, #tpu.memory_space<vmem>>, vector<1x1x32x8xbf16>
    %763 = vector.shape_cast %762 : vector<1x1x32x8xbf16> to vector<32x8xbf16>
    %cst_514 = arith.constant dense<0.000000e+00> : vector<16x8xf32>
    %764 = tpu.matmul %614, %763, %cst_514 {dimension_numbers = #tpu.dot_dimension_numbers<[1], [0], [0], [1], [0, 0, 1, 1], [], []>} : vector<16x32xbf16>, vector<32x8xbf16>, vector<16x8xf32> -> vector<16x8xf32>
    %c2_515 = arith.constant 2 : index
    %c1_516 = arith.constant 1 : index
    %c3_517 = arith.constant 3 : index
    %c0_518 = arith.constant 0 : index
    %765 = vector.load %arg11[%c2_515, %c1_516, %c3_517, %c0_518] : memref<4x3x4x8xf32, #tpu.memory_space<vmem>>, vector<1x1x1x8xf32>
    %766 = vector.shape_cast %765 : vector<1x1x1x8xf32> to vector<8xf32>
    %767 = vector.shape_cast %766 : vector<8xf32> to vector<1x8xf32>
    %768 = vector.broadcast %767 : vector<1x8xf32> to vector<16x8xf32>
    %769 = arith.addf %764, %768 : vector<16x8xf32>
    %c2_519 = arith.constant 2 : index
    %c3_520 = arith.constant 3 : index
    %c0_521 = arith.constant 0 : index
    %c0_522 = arith.constant 0 : index
    %770 = vector.load %arg7[%c2_519, %c3_520, %c0_521, %c0_522] : memref<4x4x32x8xbf16, #tpu.memory_space<vmem>>, vector<1x1x32x8xbf16>
    %771 = vector.shape_cast %770 : vector<1x1x32x8xbf16> to vector<32x8xbf16>
    %cst_523 = arith.constant dense<0.000000e+00> : vector<16x8xf32>
    %772 = tpu.matmul %614, %771, %cst_523 {dimension_numbers = #tpu.dot_dimension_numbers<[1], [0], [0], [1], [0, 0, 1, 1], [], []>} : vector<16x32xbf16>, vector<32x8xbf16>, vector<16x8xf32> -> vector<16x8xf32>
    %c2_524 = arith.constant 2 : index
    %c2_525 = arith.constant 2 : index
    %c3_526 = arith.constant 3 : index
    %c0_527 = arith.constant 0 : index
    %773 = vector.load %arg11[%c2_524, %c2_525, %c3_526, %c0_527] : memref<4x3x4x8xf32, #tpu.memory_space<vmem>>, vector<1x1x1x8xf32>
    %774 = vector.shape_cast %773 : vector<1x1x1x8xf32> to vector<8xf32>
    %775 = vector.shape_cast %774 : vector<8xf32> to vector<1x8xf32>
    %776 = vector.broadcast %775 : vector<1x8xf32> to vector<16x8xf32>
    %777 = arith.addf %772, %776 : vector<16x8xf32>
    %778 = vector.shape_cast %761 : vector<16x8xf32> to vector<2x8x8xf32>
    %779 = vector.shape_cast %769 : vector<16x8xf32> to vector<2x8x8xf32>
    %780 = vector.shape_cast %777 : vector<16x8xf32> to vector<2x8x8xf32>
    "tpu.trace_start"() <{level = 10 : i32, message = "btd,bsd->bts"}> : () -> ()
    %cst_528 = arith.constant dense<0.000000e+00> : vector<2x8x8xf32>
    %781 = tpu.matmul %778, %779, %cst_528 {dimension_numbers = #tpu.dot_dimension_numbers<[2], [2], [1], [1], [0, 0, 0, 1, 1, 1], [0], [0]>} : vector<2x8x8xf32>, vector<2x8x8xf32>, vector<2x8x8xf32> -> vector<2x8x8xf32>
    "tpu.trace_stop"() : () -> ()
    %782 = arith.addf %781, %23 : vector<2x8x8xf32>
    %cst_529 = arith.constant dense<0xFF800000> : vector<2x8xf32>
    %783 = vector.multi_reduction <maximumf>, %782, %cst_529 [2] : vector<2x8x8xf32> to vector<2x8xf32>
    %784 = vector.shape_cast %783 : vector<2x8xf32> to vector<2x8x1xf32>
    %785 = vector.broadcast %784 : vector<2x8x1xf32> to vector<2x8x8xf32>
    %786 = arith.subf %782, %785 : vector<2x8x8xf32>
    %787 = math.exp %786 : vector<2x8x8xf32>
    %cst_530 = arith.constant dense<0.000000e+00> : vector<2x8xf32>
    %788 = vector.multi_reduction <add>, %787, %cst_530 [2] : vector<2x8x8xf32> to vector<2x8xf32>
    %789 = vector.shape_cast %788 : vector<2x8xf32> to vector<2x8x1xf32>
    %790 = tpu.reciprocal %789 {approx = true} : vector<2x8x1xf32> -> vector<2x8x1xf32>
    %791 = vector.broadcast %790 : vector<2x8x1xf32> to vector<2x8x8xf32>
    %792 = arith.mulf %787, %791 : vector<2x8x8xf32>
    "tpu.trace_start"() <{level = 10 : i32, message = "bts,bsd->btd"}> : () -> ()
    %cst_531 = arith.constant dense<0.000000e+00> : vector<2x8x8xf32>
    %793 = tpu.matmul %792, %780, %cst_531 {dimension_numbers = #tpu.dot_dimension_numbers<[2], [1], [1], [2], [0, 0, 0, 1, 1, 2], [0], [0]>} : vector<2x8x8xf32>, vector<2x8x8xf32>, vector<2x8x8xf32> -> vector<2x8x8xf32>
    "tpu.trace_stop"() : () -> ()
    %794 = vector.shape_cast %793 : vector<2x8x8xf32> to vector<16x8xf32>
    %795 = arith.truncf %794 : vector<16x8xf32> to vector<16x8xbf16>
    %c2_532 = arith.constant 2 : index
    %c3_533 = arith.constant 3 : index
    %c0_534 = arith.constant 0 : index
    %c0_535 = arith.constant 0 : index
    %796 = vector.load %arg8[%c2_532, %c3_533, %c0_534, %c0_535] : memref<4x4x8x32xbf16, #tpu.memory_space<vmem>>, vector<1x1x8x32xbf16>
    %797 = vector.shape_cast %796 : vector<1x1x8x32xbf16> to vector<8x32xbf16>
    %cst_536 = arith.constant dense<0.000000e+00> : vector<16x32xf32>
    %798 = tpu.matmul %795, %797, %cst_536 {dimension_numbers = #tpu.dot_dimension_numbers<[1], [0], [0], [1], [0, 0, 1, 1], [], []>} : vector<16x8xbf16>, vector<8x32xbf16>, vector<16x32xf32> -> vector<16x32xf32>
    %799 = arith.addf %753, %798 : vector<16x32xf32>
    %800 = arith.addf %585, %799 : vector<16x32xf32>
    %c2_537 = arith.constant 2 : index
    %c0_538 = arith.constant 0 : index
    %c0_539 = arith.constant 0 : index
    %801 = vector.load %arg12[%c2_537, %c0_538, %c0_539] : memref<4x3x128xf32, #tpu.memory_space<vmem>>, vector<1x1x32xf32>
    %802 = vector.shape_cast %801 : vector<1x1x32xf32> to vector<32xf32>
    %803 = vector.shape_cast %802 : vector<32xf32> to vector<1x32xf32>
    %804 = vector.broadcast %803 : vector<1x32xf32> to vector<16x32xf32>
    %805 = arith.addf %800, %804 : vector<16x32xf32>
    %c2_540 = arith.constant 2 : index
    %c2_541 = arith.constant 2 : index
    %c0_542 = arith.constant 0 : index
    %806 = vector.load %arg4[%c2_540, %c2_541, %c0_542] : memref<4x4x32xf32, #tpu.memory_space<vmem>>, vector<1x1x32xf32>
    %807 = vector.shape_cast %806 : vector<1x1x32xf32> to vector<32xf32>
    %c2_543 = arith.constant 2 : index
    %c3_544 = arith.constant 3 : index
    %c0_545 = arith.constant 0 : index
    %808 = vector.load %arg4[%c2_543, %c3_544, %c0_545] : memref<4x4x32xf32, #tpu.memory_space<vmem>>, vector<1x1x32xf32>
    %809 = vector.shape_cast %808 : vector<1x1x32xf32> to vector<32xf32>
    %cst_546 = arith.constant dense<0.000000e+00> : vector<16xf32>
    %810 = vector.multi_reduction <add>, %805, %cst_546 [1] : vector<16x32xf32> to vector<16xf32>
    %811 = vector.shape_cast %810 : vector<16xf32> to vector<16x1xf32>
    %cst_547 = arith.constant 3.200000e+01 : f32
    %812 = vector.broadcast %cst_547 : f32 to vector<16x1xf32>
    %813 = arith.divf %811, %812 : vector<16x1xf32>
    %814 = vector.broadcast %813 : vector<16x1xf32> to vector<16x32xf32>
    %815 = arith.subf %805, %814 : vector<16x32xf32>
    %816 = arith.mulf %815, %815 : vector<16x32xf32>
    %cst_548 = arith.constant dense<0.000000e+00> : vector<16xf32>
    %817 = vector.multi_reduction <add>, %816, %cst_548 [1] : vector<16x32xf32> to vector<16xf32>
    %818 = vector.shape_cast %817 : vector<16xf32> to vector<16x1xf32>
    %cst_549 = arith.constant 3.200000e+01 : f32
    %819 = vector.broadcast %cst_549 : f32 to vector<16x1xf32>
    %820 = arith.divf %818, %819 : vector<16x1xf32>
    %821 = vector.broadcast %813 : vector<16x1xf32> to vector<16x32xf32>
    %822 = arith.subf %805, %821 : vector<16x32xf32>
    %cst_550 = arith.constant 9.99999974E-6 : f32
    %823 = vector.broadcast %cst_550 : f32 to vector<16x1xf32>
    %824 = arith.addf %820, %823 : vector<16x1xf32>
    %825 = math.rsqrt %824 : vector<16x1xf32>
    %826 = vector.broadcast %825 : vector<16x1xf32> to vector<16x32xf32>
    %827 = arith.mulf %822, %826 : vector<16x32xf32>
    %828 = vector.shape_cast %807 : vector<32xf32> to vector<1x32xf32>
    %829 = vector.broadcast %828 : vector<1x32xf32> to vector<16x32xf32>
    %830 = arith.mulf %827, %829 : vector<16x32xf32>
    %831 = vector.shape_cast %809 : vector<32xf32> to vector<1x32xf32>
    %832 = vector.broadcast %831 : vector<1x32xf32> to vector<16x32xf32>
    %833 = arith.addf %830, %832 : vector<16x32xf32>
    %834 = arith.truncf %833 : vector<16x32xf32> to vector<16x32xbf16>
    %c2_551 = arith.constant 2 : index
    %c0_552 = arith.constant 0 : index
    %c0_553 = arith.constant 0 : index
    %835 = vector.load %arg9[%c2_551, %c0_552, %c0_553] : memref<4x32x128xbf16, #tpu.memory_space<vmem>>, vector<1x32x128xbf16>
    %836 = vector.shape_cast %835 : vector<1x32x128xbf16> to vector<32x128xbf16>
    %cst_554 = arith.constant dense<0.000000e+00> : vector<16x128xf32>
    %837 = tpu.matmul %834, %836, %cst_554 {dimension_numbers = #tpu.dot_dimension_numbers<[1], [0], [0], [1], [0, 0, 1, 1], [], []>} : vector<16x32xbf16>, vector<32x128xbf16>, vector<16x128xf32> -> vector<16x128xf32>
    %c2_555 = arith.constant 2 : index
    %c1_556 = arith.constant 1 : index
    %c0_557 = arith.constant 0 : index
    %838 = vector.load %arg12[%c2_555, %c1_556, %c0_557] : memref<4x3x128xf32, #tpu.memory_space<vmem>>, vector<1x1x128xf32>
    %839 = vector.shape_cast %838 : vector<1x1x128xf32> to vector<128xf32>
    %840 = vector.shape_cast %839 : vector<128xf32> to vector<1x128xf32>
    %841 = vector.broadcast %840 : vector<1x128xf32> to vector<16x128xf32>
    %842 = arith.addf %837, %841 : vector<16x128xf32>
    %cst_558 = arith.constant 5.000000e-01 : f32
    %843 = vector.broadcast %cst_558 : f32 to vector<16x128xf32>
    %844 = arith.mulf %843, %842 : vector<16x128xf32>
    %cst_559 = arith.constant 0.636619746 : f32
    %845 = math.sqrt %cst_559 : f32
    %cst_560 = arith.constant 4.471500e-02 : f32
    %846 = vector.broadcast %cst_560 : f32 to vector<16x128xf32>
    %847 = arith.mulf %846, %842 : vector<16x128xf32>
    %848 = arith.mulf %847, %842 : vector<16x128xf32>
    %849 = arith.mulf %848, %842 : vector<16x128xf32>
    %850 = arith.addf %842, %849 : vector<16x128xf32>
    %851 = vector.broadcast %845 : f32 to vector<16x128xf32>
    %852 = arith.mulf %851, %850 : vector<16x128xf32>
    %853 = math.tanh %852 : vector<16x128xf32>
    %cst_561 = arith.constant 1.000000e+00 : f32
    %854 = vector.broadcast %cst_561 : f32 to vector<16x128xf32>
    %855 = arith.addf %854, %853 : vector<16x128xf32>
    %856 = arith.mulf %844, %855 : vector<16x128xf32>
    %857 = arith.truncf %856 : vector<16x128xf32> to vector<16x128xbf16>
    %c2_562 = arith.constant 2 : index
    %c0_563 = arith.constant 0 : index
    %c0_564 = arith.constant 0 : index
    %858 = vector.load %arg10[%c2_562, %c0_563, %c0_564] : memref<4x128x32xbf16, #tpu.memory_space<vmem>>, vector<1x128x32xbf16>
    %859 = vector.shape_cast %858 : vector<1x128x32xbf16> to vector<128x32xbf16>
    %cst_565 = arith.constant dense<0.000000e+00> : vector<16x32xf32>
    %860 = tpu.matmul %857, %859, %cst_565 {dimension_numbers = #tpu.dot_dimension_numbers<[1], [0], [0], [1], [0, 0, 1, 1], [], []>} : vector<16x128xbf16>, vector<128x32xbf16>, vector<16x32xf32> -> vector<16x32xf32>
    %c2_566 = arith.constant 2 : index
    %c2_567 = arith.constant 2 : index
    %c0_568 = arith.constant 0 : index
    %861 = vector.load %arg12[%c2_566, %c2_567, %c0_568] : memref<4x3x128xf32, #tpu.memory_space<vmem>>, vector<1x1x32xf32>
    %862 = vector.shape_cast %861 : vector<1x1x32xf32> to vector<32xf32>
    %863 = vector.shape_cast %862 : vector<32xf32> to vector<1x32xf32>
    %864 = vector.broadcast %863 : vector<1x32xf32> to vector<16x32xf32>
    %865 = arith.addf %860, %864 : vector<16x32xf32>
    %866 = arith.addf %805, %865 : vector<16x32xf32>
    %c3_569 = arith.constant 3 : index
    %c0_570 = arith.constant 0 : index
    %c0_571 = arith.constant 0 : index
    %867 = vector.load %arg4[%c3_569, %c0_570, %c0_571] : memref<4x4x32xf32, #tpu.memory_space<vmem>>, vector<1x1x32xf32>
    %868 = vector.shape_cast %867 : vector<1x1x32xf32> to vector<32xf32>
    %c3_572 = arith.constant 3 : index
    %c1_573 = arith.constant 1 : index
    %c0_574 = arith.constant 0 : index
    %869 = vector.load %arg4[%c3_572, %c1_573, %c0_574] : memref<4x4x32xf32, #tpu.memory_space<vmem>>, vector<1x1x32xf32>
    %870 = vector.shape_cast %869 : vector<1x1x32xf32> to vector<32xf32>
    %cst_575 = arith.constant dense<0.000000e+00> : vector<16xf32>
    %871 = vector.multi_reduction <add>, %866, %cst_575 [1] : vector<16x32xf32> to vector<16xf32>
    %872 = vector.shape_cast %871 : vector<16xf32> to vector<16x1xf32>
    %cst_576 = arith.constant 3.200000e+01 : f32
    %873 = vector.broadcast %cst_576 : f32 to vector<16x1xf32>
    %874 = arith.divf %872, %873 : vector<16x1xf32>
    %875 = vector.broadcast %874 : vector<16x1xf32> to vector<16x32xf32>
    %876 = arith.subf %866, %875 : vector<16x32xf32>
    %877 = arith.mulf %876, %876 : vector<16x32xf32>
    %cst_577 = arith.constant dense<0.000000e+00> : vector<16xf32>
    %878 = vector.multi_reduction <add>, %877, %cst_577 [1] : vector<16x32xf32> to vector<16xf32>
    %879 = vector.shape_cast %878 : vector<16xf32> to vector<16x1xf32>
    %cst_578 = arith.constant 3.200000e+01 : f32
    %880 = vector.broadcast %cst_578 : f32 to vector<16x1xf32>
    %881 = arith.divf %879, %880 : vector<16x1xf32>
    %882 = vector.broadcast %874 : vector<16x1xf32> to vector<16x32xf32>
    %883 = arith.subf %866, %882 : vector<16x32xf32>
    %cst_579 = arith.constant 9.99999974E-6 : f32
    %884 = vector.broadcast %cst_579 : f32 to vector<16x1xf32>
    %885 = arith.addf %881, %884 : vector<16x1xf32>
    %886 = math.rsqrt %885 : vector<16x1xf32>
    %887 = vector.broadcast %886 : vector<16x1xf32> to vector<16x32xf32>
    %888 = arith.mulf %883, %887 : vector<16x32xf32>
    %889 = vector.shape_cast %868 : vector<32xf32> to vector<1x32xf32>
    %890 = vector.broadcast %889 : vector<1x32xf32> to vector<16x32xf32>
    %891 = arith.mulf %888, %890 : vector<16x32xf32>
    %892 = vector.shape_cast %870 : vector<32xf32> to vector<1x32xf32>
    %893 = vector.broadcast %892 : vector<1x32xf32> to vector<16x32xf32>
    %894 = arith.addf %891, %893 : vector<16x32xf32>
    %895 = arith.truncf %894 : vector<16x32xf32> to vector<16x32xbf16>
    %cst_580 = arith.constant 0.000000e+00 : f32
    %896 = vector.broadcast %cst_580 : f32 to vector<16x32xf32>
    %c3_581 = arith.constant 3 : index
    %c0_582 = arith.constant 0 : index
    %c0_583 = arith.constant 0 : index
    %c0_584 = arith.constant 0 : index
    %897 = vector.load %arg5[%c3_581, %c0_582, %c0_583, %c0_584] : memref<4x4x32x8xbf16, #tpu.memory_space<vmem>>, vector<1x1x32x8xbf16>
    %898 = vector.shape_cast %897 : vector<1x1x32x8xbf16> to vector<32x8xbf16>
    %cst_585 = arith.constant dense<0.000000e+00> : vector<16x8xf32>
    %899 = tpu.matmul %895, %898, %cst_585 {dimension_numbers = #tpu.dot_dimension_numbers<[1], [0], [0], [1], [0, 0, 1, 1], [], []>} : vector<16x32xbf16>, vector<32x8xbf16>, vector<16x8xf32> -> vector<16x8xf32>
    %c3_586 = arith.constant 3 : index
    %c0_587 = arith.constant 0 : index
    %c0_588 = arith.constant 0 : index
    %c0_589 = arith.constant 0 : index
    %900 = vector.load %arg11[%c3_586, %c0_587, %c0_588, %c0_589] : memref<4x3x4x8xf32, #tpu.memory_space<vmem>>, vector<1x1x1x8xf32>
    %901 = vector.shape_cast %900 : vector<1x1x1x8xf32> to vector<8xf32>
    %902 = vector.shape_cast %901 : vector<8xf32> to vector<1x8xf32>
    %903 = vector.broadcast %902 : vector<1x8xf32> to vector<16x8xf32>
    %904 = arith.addf %899, %903 : vector<16x8xf32>
    %c3_590 = arith.constant 3 : index
    %c0_591 = arith.constant 0 : index
    %c0_592 = arith.constant 0 : index
    %c0_593 = arith.constant 0 : index
    %905 = vector.load %arg6[%c3_590, %c0_591, %c0_592, %c0_593] : memref<4x4x32x8xbf16, #tpu.memory_space<vmem>>, vector<1x1x32x8xbf16>
    %906 = vector.shape_cast %905 : vector<1x1x32x8xbf16> to vector<32x8xbf16>
    %cst_594 = arith.constant dense<0.000000e+00> : vector<16x8xf32>
    %907 = tpu.matmul %895, %906, %cst_594 {dimension_numbers = #tpu.dot_dimension_numbers<[1], [0], [0], [1], [0, 0, 1, 1], [], []>} : vector<16x32xbf16>, vector<32x8xbf16>, vector<16x8xf32> -> vector<16x8xf32>
    %c3_595 = arith.constant 3 : index
    %c1_596 = arith.constant 1 : index
    %c0_597 = arith.constant 0 : index
    %c0_598 = arith.constant 0 : index
    %908 = vector.load %arg11[%c3_595, %c1_596, %c0_597, %c0_598] : memref<4x3x4x8xf32, #tpu.memory_space<vmem>>, vector<1x1x1x8xf32>
    %909 = vector.shape_cast %908 : vector<1x1x1x8xf32> to vector<8xf32>
    %910 = vector.shape_cast %909 : vector<8xf32> to vector<1x8xf32>
    %911 = vector.broadcast %910 : vector<1x8xf32> to vector<16x8xf32>
    %912 = arith.addf %907, %911 : vector<16x8xf32>
    %c3_599 = arith.constant 3 : index
    %c0_600 = arith.constant 0 : index
    %c0_601 = arith.constant 0 : index
    %c0_602 = arith.constant 0 : index
    %913 = vector.load %arg7[%c3_599, %c0_600, %c0_601, %c0_602] : memref<4x4x32x8xbf16, #tpu.memory_space<vmem>>, vector<1x1x32x8xbf16>
    %914 = vector.shape_cast %913 : vector<1x1x32x8xbf16> to vector<32x8xbf16>
    %cst_603 = arith.constant dense<0.000000e+00> : vector<16x8xf32>
    %915 = tpu.matmul %895, %914, %cst_603 {dimension_numbers = #tpu.dot_dimension_numbers<[1], [0], [0], [1], [0, 0, 1, 1], [], []>} : vector<16x32xbf16>, vector<32x8xbf16>, vector<16x8xf32> -> vector<16x8xf32>
    %c3_604 = arith.constant 3 : index
    %c2_605 = arith.constant 2 : index
    %c0_606 = arith.constant 0 : index
    %c0_607 = arith.constant 0 : index
    %916 = vector.load %arg11[%c3_604, %c2_605, %c0_606, %c0_607] : memref<4x3x4x8xf32, #tpu.memory_space<vmem>>, vector<1x1x1x8xf32>
    %917 = vector.shape_cast %916 : vector<1x1x1x8xf32> to vector<8xf32>
    %918 = vector.shape_cast %917 : vector<8xf32> to vector<1x8xf32>
    %919 = vector.broadcast %918 : vector<1x8xf32> to vector<16x8xf32>
    %920 = arith.addf %915, %919 : vector<16x8xf32>
    %921 = vector.shape_cast %904 : vector<16x8xf32> to vector<2x8x8xf32>
    %922 = vector.shape_cast %912 : vector<16x8xf32> to vector<2x8x8xf32>
    %923 = vector.shape_cast %920 : vector<16x8xf32> to vector<2x8x8xf32>
    "tpu.trace_start"() <{level = 10 : i32, message = "btd,bsd->bts"}> : () -> ()
    %cst_608 = arith.constant dense<0.000000e+00> : vector<2x8x8xf32>
    %924 = tpu.matmul %921, %922, %cst_608 {dimension_numbers = #tpu.dot_dimension_numbers<[2], [2], [1], [1], [0, 0, 0, 1, 1, 1], [0], [0]>} : vector<2x8x8xf32>, vector<2x8x8xf32>, vector<2x8x8xf32> -> vector<2x8x8xf32>
    "tpu.trace_stop"() : () -> ()
    %925 = arith.addf %924, %23 : vector<2x8x8xf32>
    %cst_609 = arith.constant dense<0xFF800000> : vector<2x8xf32>
    %926 = vector.multi_reduction <maximumf>, %925, %cst_609 [2] : vector<2x8x8xf32> to vector<2x8xf32>
    %927 = vector.shape_cast %926 : vector<2x8xf32> to vector<2x8x1xf32>
    %928 = vector.broadcast %927 : vector<2x8x1xf32> to vector<2x8x8xf32>
    %929 = arith.subf %925, %928 : vector<2x8x8xf32>
    %930 = math.exp %929 : vector<2x8x8xf32>
    %cst_610 = arith.constant dense<0.000000e+00> : vector<2x8xf32>
    %931 = vector.multi_reduction <add>, %930, %cst_610 [2] : vector<2x8x8xf32> to vector<2x8xf32>
    %932 = vector.shape_cast %931 : vector<2x8xf32> to vector<2x8x1xf32>
    %933 = tpu.reciprocal %932 {approx = true} : vector<2x8x1xf32> -> vector<2x8x1xf32>
    %934 = vector.broadcast %933 : vector<2x8x1xf32> to vector<2x8x8xf32>
    %935 = arith.mulf %930, %934 : vector<2x8x8xf32>
    "tpu.trace_start"() <{level = 10 : i32, message = "bts,bsd->btd"}> : () -> ()
    %cst_611 = arith.constant dense<0.000000e+00> : vector<2x8x8xf32>
    %936 = tpu.matmul %935, %923, %cst_611 {dimension_numbers = #tpu.dot_dimension_numbers<[2], [1], [1], [2], [0, 0, 0, 1, 1, 2], [0], [0]>} : vector<2x8x8xf32>, vector<2x8x8xf32>, vector<2x8x8xf32> -> vector<2x8x8xf32>
    "tpu.trace_stop"() : () -> ()
    %937 = vector.shape_cast %936 : vector<2x8x8xf32> to vector<16x8xf32>
    %938 = arith.truncf %937 : vector<16x8xf32> to vector<16x8xbf16>
    %c3_612 = arith.constant 3 : index
    %c0_613 = arith.constant 0 : index
    %c0_614 = arith.constant 0 : index
    %c0_615 = arith.constant 0 : index
    %939 = vector.load %arg8[%c3_612, %c0_613, %c0_614, %c0_615] : memref<4x4x8x32xbf16, #tpu.memory_space<vmem>>, vector<1x1x8x32xbf16>
    %940 = vector.shape_cast %939 : vector<1x1x8x32xbf16> to vector<8x32xbf16>
    %cst_616 = arith.constant dense<0.000000e+00> : vector<16x32xf32>
    %941 = tpu.matmul %938, %940, %cst_616 {dimension_numbers = #tpu.dot_dimension_numbers<[1], [0], [0], [1], [0, 0, 1, 1], [], []>} : vector<16x8xbf16>, vector<8x32xbf16>, vector<16x32xf32> -> vector<16x32xf32>
    %942 = arith.addf %896, %941 : vector<16x32xf32>
    %c3_617 = arith.constant 3 : index
    %c1_618 = arith.constant 1 : index
    %c0_619 = arith.constant 0 : index
    %c0_620 = arith.constant 0 : index
    %943 = vector.load %arg5[%c3_617, %c1_618, %c0_619, %c0_620] : memref<4x4x32x8xbf16, #tpu.memory_space<vmem>>, vector<1x1x32x8xbf16>
    %944 = vector.shape_cast %943 : vector<1x1x32x8xbf16> to vector<32x8xbf16>
    %cst_621 = arith.constant dense<0.000000e+00> : vector<16x8xf32>
    %945 = tpu.matmul %895, %944, %cst_621 {dimension_numbers = #tpu.dot_dimension_numbers<[1], [0], [0], [1], [0, 0, 1, 1], [], []>} : vector<16x32xbf16>, vector<32x8xbf16>, vector<16x8xf32> -> vector<16x8xf32>
    %c3_622 = arith.constant 3 : index
    %c0_623 = arith.constant 0 : index
    %c1_624 = arith.constant 1 : index
    %c0_625 = arith.constant 0 : index
    %946 = vector.load %arg11[%c3_622, %c0_623, %c1_624, %c0_625] : memref<4x3x4x8xf32, #tpu.memory_space<vmem>>, vector<1x1x1x8xf32>
    %947 = vector.shape_cast %946 : vector<1x1x1x8xf32> to vector<8xf32>
    %948 = vector.shape_cast %947 : vector<8xf32> to vector<1x8xf32>
    %949 = vector.broadcast %948 : vector<1x8xf32> to vector<16x8xf32>
    %950 = arith.addf %945, %949 : vector<16x8xf32>
    %c3_626 = arith.constant 3 : index
    %c1_627 = arith.constant 1 : index
    %c0_628 = arith.constant 0 : index
    %c0_629 = arith.constant 0 : index
    %951 = vector.load %arg6[%c3_626, %c1_627, %c0_628, %c0_629] : memref<4x4x32x8xbf16, #tpu.memory_space<vmem>>, vector<1x1x32x8xbf16>
    %952 = vector.shape_cast %951 : vector<1x1x32x8xbf16> to vector<32x8xbf16>
    %cst_630 = arith.constant dense<0.000000e+00> : vector<16x8xf32>
    %953 = tpu.matmul %895, %952, %cst_630 {dimension_numbers = #tpu.dot_dimension_numbers<[1], [0], [0], [1], [0, 0, 1, 1], [], []>} : vector<16x32xbf16>, vector<32x8xbf16>, vector<16x8xf32> -> vector<16x8xf32>
    %c3_631 = arith.constant 3 : index
    %c1_632 = arith.constant 1 : index
    %c1_633 = arith.constant 1 : index
    %c0_634 = arith.constant 0 : index
    %954 = vector.load %arg11[%c3_631, %c1_632, %c1_633, %c0_634] : memref<4x3x4x8xf32, #tpu.memory_space<vmem>>, vector<1x1x1x8xf32>
    %955 = vector.shape_cast %954 : vector<1x1x1x8xf32> to vector<8xf32>
    %956 = vector.shape_cast %955 : vector<8xf32> to vector<1x8xf32>
    %957 = vector.broadcast %956 : vector<1x8xf32> to vector<16x8xf32>
    %958 = arith.addf %953, %957 : vector<16x8xf32>
    %c3_635 = arith.constant 3 : index
    %c1_636 = arith.constant 1 : index
    %c0_637 = arith.constant 0 : index
    %c0_638 = arith.constant 0 : index
    %959 = vector.load %arg7[%c3_635, %c1_636, %c0_637, %c0_638] : memref<4x4x32x8xbf16, #tpu.memory_space<vmem>>, vector<1x1x32x8xbf16>
    %960 = vector.shape_cast %959 : vector<1x1x32x8xbf16> to vector<32x8xbf16>
    %cst_639 = arith.constant dense<0.000000e+00> : vector<16x8xf32>
    %961 = tpu.matmul %895, %960, %cst_639 {dimension_numbers = #tpu.dot_dimension_numbers<[1], [0], [0], [1], [0, 0, 1, 1], [], []>} : vector<16x32xbf16>, vector<32x8xbf16>, vector<16x8xf32> -> vector<16x8xf32>
    %c3_640 = arith.constant 3 : index
    %c2_641 = arith.constant 2 : index
    %c1_642 = arith.constant 1 : index
    %c0_643 = arith.constant 0 : index
    %962 = vector.load %arg11[%c3_640, %c2_641, %c1_642, %c0_643] : memref<4x3x4x8xf32, #tpu.memory_space<vmem>>, vector<1x1x1x8xf32>
    %963 = vector.shape_cast %962 : vector<1x1x1x8xf32> to vector<8xf32>
    %964 = vector.shape_cast %963 : vector<8xf32> to vector<1x8xf32>
    %965 = vector.broadcast %964 : vector<1x8xf32> to vector<16x8xf32>
    %966 = arith.addf %961, %965 : vector<16x8xf32>
    %967 = vector.shape_cast %950 : vector<16x8xf32> to vector<2x8x8xf32>
    %968 = vector.shape_cast %958 : vector<16x8xf32> to vector<2x8x8xf32>
    %969 = vector.shape_cast %966 : vector<16x8xf32> to vector<2x8x8xf32>
    "tpu.trace_start"() <{level = 10 : i32, message = "btd,bsd->bts"}> : () -> ()
    %cst_644 = arith.constant dense<0.000000e+00> : vector<2x8x8xf32>
    %970 = tpu.matmul %967, %968, %cst_644 {dimension_numbers = #tpu.dot_dimension_numbers<[2], [2], [1], [1], [0, 0, 0, 1, 1, 1], [0], [0]>} : vector<2x8x8xf32>, vector<2x8x8xf32>, vector<2x8x8xf32> -> vector<2x8x8xf32>
    "tpu.trace_stop"() : () -> ()
    %971 = arith.addf %970, %23 : vector<2x8x8xf32>
    %cst_645 = arith.constant dense<0xFF800000> : vector<2x8xf32>
    %972 = vector.multi_reduction <maximumf>, %971, %cst_645 [2] : vector<2x8x8xf32> to vector<2x8xf32>
    %973 = vector.shape_cast %972 : vector<2x8xf32> to vector<2x8x1xf32>
    %974 = vector.broadcast %973 : vector<2x8x1xf32> to vector<2x8x8xf32>
    %975 = arith.subf %971, %974 : vector<2x8x8xf32>
    %976 = math.exp %975 : vector<2x8x8xf32>
    %cst_646 = arith.constant dense<0.000000e+00> : vector<2x8xf32>
    %977 = vector.multi_reduction <add>, %976, %cst_646 [2] : vector<2x8x8xf32> to vector<2x8xf32>
    %978 = vector.shape_cast %977 : vector<2x8xf32> to vector<2x8x1xf32>
    %979 = tpu.reciprocal %978 {approx = true} : vector<2x8x1xf32> -> vector<2x8x1xf32>
    %980 = vector.broadcast %979 : vector<2x8x1xf32> to vector<2x8x8xf32>
    %981 = arith.mulf %976, %980 : vector<2x8x8xf32>
    "tpu.trace_start"() <{level = 10 : i32, message = "bts,bsd->btd"}> : () -> ()
    %cst_647 = arith.constant dense<0.000000e+00> : vector<2x8x8xf32>
    %982 = tpu.matmul %981, %969, %cst_647 {dimension_numbers = #tpu.dot_dimension_numbers<[2], [1], [1], [2], [0, 0, 0, 1, 1, 2], [0], [0]>} : vector<2x8x8xf32>, vector<2x8x8xf32>, vector<2x8x8xf32> -> vector<2x8x8xf32>
    "tpu.trace_stop"() : () -> ()
    %983 = vector.shape_cast %982 : vector<2x8x8xf32> to vector<16x8xf32>
    %984 = arith.truncf %983 : vector<16x8xf32> to vector<16x8xbf16>
    %c3_648 = arith.constant 3 : index
    %c1_649 = arith.constant 1 : index
    %c0_650 = arith.constant 0 : index
    %c0_651 = arith.constant 0 : index
    %985 = vector.load %arg8[%c3_648, %c1_649, %c0_650, %c0_651] : memref<4x4x8x32xbf16, #tpu.memory_space<vmem>>, vector<1x1x8x32xbf16>
    %986 = vector.shape_cast %985 : vector<1x1x8x32xbf16> to vector<8x32xbf16>
    %cst_652 = arith.constant dense<0.000000e+00> : vector<16x32xf32>
    %987 = tpu.matmul %984, %986, %cst_652 {dimension_numbers = #tpu.dot_dimension_numbers<[1], [0], [0], [1], [0, 0, 1, 1], [], []>} : vector<16x8xbf16>, vector<8x32xbf16>, vector<16x32xf32> -> vector<16x32xf32>
    %988 = arith.addf %942, %987 : vector<16x32xf32>
    %c3_653 = arith.constant 3 : index
    %c2_654 = arith.constant 2 : index
    %c0_655 = arith.constant 0 : index
    %c0_656 = arith.constant 0 : index
    %989 = vector.load %arg5[%c3_653, %c2_654, %c0_655, %c0_656] : memref<4x4x32x8xbf16, #tpu.memory_space<vmem>>, vector<1x1x32x8xbf16>
    %990 = vector.shape_cast %989 : vector<1x1x32x8xbf16> to vector<32x8xbf16>
    %cst_657 = arith.constant dense<0.000000e+00> : vector<16x8xf32>
    %991 = tpu.matmul %895, %990, %cst_657 {dimension_numbers = #tpu.dot_dimension_numbers<[1], [0], [0], [1], [0, 0, 1, 1], [], []>} : vector<16x32xbf16>, vector<32x8xbf16>, vector<16x8xf32> -> vector<16x8xf32>
    %c3_658 = arith.constant 3 : index
    %c0_659 = arith.constant 0 : index
    %c2_660 = arith.constant 2 : index
    %c0_661 = arith.constant 0 : index
    %992 = vector.load %arg11[%c3_658, %c0_659, %c2_660, %c0_661] : memref<4x3x4x8xf32, #tpu.memory_space<vmem>>, vector<1x1x1x8xf32>
    %993 = vector.shape_cast %992 : vector<1x1x1x8xf32> to vector<8xf32>
    %994 = vector.shape_cast %993 : vector<8xf32> to vector<1x8xf32>
    %995 = vector.broadcast %994 : vector<1x8xf32> to vector<16x8xf32>
    %996 = arith.addf %991, %995 : vector<16x8xf32>
    %c3_662 = arith.constant 3 : index
    %c2_663 = arith.constant 2 : index
    %c0_664 = arith.constant 0 : index
    %c0_665 = arith.constant 0 : index
    %997 = vector.load %arg6[%c3_662, %c2_663, %c0_664, %c0_665] : memref<4x4x32x8xbf16, #tpu.memory_space<vmem>>, vector<1x1x32x8xbf16>
    %998 = vector.shape_cast %997 : vector<1x1x32x8xbf16> to vector<32x8xbf16>
    %cst_666 = arith.constant dense<0.000000e+00> : vector<16x8xf32>
    %999 = tpu.matmul %895, %998, %cst_666 {dimension_numbers = #tpu.dot_dimension_numbers<[1], [0], [0], [1], [0, 0, 1, 1], [], []>} : vector<16x32xbf16>, vector<32x8xbf16>, vector<16x8xf32> -> vector<16x8xf32>
    %c3_667 = arith.constant 3 : index
    %c1_668 = arith.constant 1 : index
    %c2_669 = arith.constant 2 : index
    %c0_670 = arith.constant 0 : index
    %1000 = vector.load %arg11[%c3_667, %c1_668, %c2_669, %c0_670] : memref<4x3x4x8xf32, #tpu.memory_space<vmem>>, vector<1x1x1x8xf32>
    %1001 = vector.shape_cast %1000 : vector<1x1x1x8xf32> to vector<8xf32>
    %1002 = vector.shape_cast %1001 : vector<8xf32> to vector<1x8xf32>
    %1003 = vector.broadcast %1002 : vector<1x8xf32> to vector<16x8xf32>
    %1004 = arith.addf %999, %1003 : vector<16x8xf32>
    %c3_671 = arith.constant 3 : index
    %c2_672 = arith.constant 2 : index
    %c0_673 = arith.constant 0 : index
    %c0_674 = arith.constant 0 : index
    %1005 = vector.load %arg7[%c3_671, %c2_672, %c0_673, %c0_674] : memref<4x4x32x8xbf16, #tpu.memory_space<vmem>>, vector<1x1x32x8xbf16>
    %1006 = vector.shape_cast %1005 : vector<1x1x32x8xbf16> to vector<32x8xbf16>
    %cst_675 = arith.constant dense<0.000000e+00> : vector<16x8xf32>
    %1007 = tpu.matmul %895, %1006, %cst_675 {dimension_numbers = #tpu.dot_dimension_numbers<[1], [0], [0], [1], [0, 0, 1, 1], [], []>} : vector<16x32xbf16>, vector<32x8xbf16>, vector<16x8xf32> -> vector<16x8xf32>
    %c3_676 = arith.constant 3 : index
    %c2_677 = arith.constant 2 : index
    %c2_678 = arith.constant 2 : index
    %c0_679 = arith.constant 0 : index
    %1008 = vector.load %arg11[%c3_676, %c2_677, %c2_678, %c0_679] : memref<4x3x4x8xf32, #tpu.memory_space<vmem>>, vector<1x1x1x8xf32>
    %1009 = vector.shape_cast %1008 : vector<1x1x1x8xf32> to vector<8xf32>
    %1010 = vector.shape_cast %1009 : vector<8xf32> to vector<1x8xf32>
    %1011 = vector.broadcast %1010 : vector<1x8xf32> to vector<16x8xf32>
    %1012 = arith.addf %1007, %1011 : vector<16x8xf32>
    %1013 = vector.shape_cast %996 : vector<16x8xf32> to vector<2x8x8xf32>
    %1014 = vector.shape_cast %1004 : vector<16x8xf32> to vector<2x8x8xf32>
    %1015 = vector.shape_cast %1012 : vector<16x8xf32> to vector<2x8x8xf32>
    "tpu.trace_start"() <{level = 10 : i32, message = "btd,bsd->bts"}> : () -> ()
    %cst_680 = arith.constant dense<0.000000e+00> : vector<2x8x8xf32>
    %1016 = tpu.matmul %1013, %1014, %cst_680 {dimension_numbers = #tpu.dot_dimension_numbers<[2], [2], [1], [1], [0, 0, 0, 1, 1, 1], [0], [0]>} : vector<2x8x8xf32>, vector<2x8x8xf32>, vector<2x8x8xf32> -> vector<2x8x8xf32>
    "tpu.trace_stop"() : () -> ()
    %1017 = arith.addf %1016, %23 : vector<2x8x8xf32>
    %cst_681 = arith.constant dense<0xFF800000> : vector<2x8xf32>
    %1018 = vector.multi_reduction <maximumf>, %1017, %cst_681 [2] : vector<2x8x8xf32> to vector<2x8xf32>
    %1019 = vector.shape_cast %1018 : vector<2x8xf32> to vector<2x8x1xf32>
    %1020 = vector.broadcast %1019 : vector<2x8x1xf32> to vector<2x8x8xf32>
    %1021 = arith.subf %1017, %1020 : vector<2x8x8xf32>
    %1022 = math.exp %1021 : vector<2x8x8xf32>
    %cst_682 = arith.constant dense<0.000000e+00> : vector<2x8xf32>
    %1023 = vector.multi_reduction <add>, %1022, %cst_682 [2] : vector<2x8x8xf32> to vector<2x8xf32>
    %1024 = vector.shape_cast %1023 : vector<2x8xf32> to vector<2x8x1xf32>
    %1025 = tpu.reciprocal %1024 {approx = true} : vector<2x8x1xf32> -> vector<2x8x1xf32>
    %1026 = vector.broadcast %1025 : vector<2x8x1xf32> to vector<2x8x8xf32>
    %1027 = arith.mulf %1022, %1026 : vector<2x8x8xf32>
    "tpu.trace_start"() <{level = 10 : i32, message = "bts,bsd->btd"}> : () -> ()
    %cst_683 = arith.constant dense<0.000000e+00> : vector<2x8x8xf32>
    %1028 = tpu.matmul %1027, %1015, %cst_683 {dimension_numbers = #tpu.dot_dimension_numbers<[2], [1], [1], [2], [0, 0, 0, 1, 1, 2], [0], [0]>} : vector<2x8x8xf32>, vector<2x8x8xf32>, vector<2x8x8xf32> -> vector<2x8x8xf32>
    "tpu.trace_stop"() : () -> ()
    %1029 = vector.shape_cast %1028 : vector<2x8x8xf32> to vector<16x8xf32>
    %1030 = arith.truncf %1029 : vector<16x8xf32> to vector<16x8xbf16>
    %c3_684 = arith.constant 3 : index
    %c2_685 = arith.constant 2 : index
    %c0_686 = arith.constant 0 : index
    %c0_687 = arith.constant 0 : index
    %1031 = vector.load %arg8[%c3_684, %c2_685, %c0_686, %c0_687] : memref<4x4x8x32xbf16, #tpu.memory_space<vmem>>, vector<1x1x8x32xbf16>
    %1032 = vector.shape_cast %1031 : vector<1x1x8x32xbf16> to vector<8x32xbf16>
    %cst_688 = arith.constant dense<0.000000e+00> : vector<16x32xf32>
    %1033 = tpu.matmul %1030, %1032, %cst_688 {dimension_numbers = #tpu.dot_dimension_numbers<[1], [0], [0], [1], [0, 0, 1, 1], [], []>} : vector<16x8xbf16>, vector<8x32xbf16>, vector<16x32xf32> -> vector<16x32xf32>
    %1034 = arith.addf %988, %1033 : vector<16x32xf32>
    %c3_689 = arith.constant 3 : index
    %c3_690 = arith.constant 3 : index
    %c0_691 = arith.constant 0 : index
    %c0_692 = arith.constant 0 : index
    %1035 = vector.load %arg5[%c3_689, %c3_690, %c0_691, %c0_692] : memref<4x4x32x8xbf16, #tpu.memory_space<vmem>>, vector<1x1x32x8xbf16>
    %1036 = vector.shape_cast %1035 : vector<1x1x32x8xbf16> to vector<32x8xbf16>
    %cst_693 = arith.constant dense<0.000000e+00> : vector<16x8xf32>
    %1037 = tpu.matmul %895, %1036, %cst_693 {dimension_numbers = #tpu.dot_dimension_numbers<[1], [0], [0], [1], [0, 0, 1, 1], [], []>} : vector<16x32xbf16>, vector<32x8xbf16>, vector<16x8xf32> -> vector<16x8xf32>
    %c3_694 = arith.constant 3 : index
    %c0_695 = arith.constant 0 : index
    %c3_696 = arith.constant 3 : index
    %c0_697 = arith.constant 0 : index
    %1038 = vector.load %arg11[%c3_694, %c0_695, %c3_696, %c0_697] : memref<4x3x4x8xf32, #tpu.memory_space<vmem>>, vector<1x1x1x8xf32>
    %1039 = vector.shape_cast %1038 : vector<1x1x1x8xf32> to vector<8xf32>
    %1040 = vector.shape_cast %1039 : vector<8xf32> to vector<1x8xf32>
    %1041 = vector.broadcast %1040 : vector<1x8xf32> to vector<16x8xf32>
    %1042 = arith.addf %1037, %1041 : vector<16x8xf32>
    %c3_698 = arith.constant 3 : index
    %c3_699 = arith.constant 3 : index
    %c0_700 = arith.constant 0 : index
    %c0_701 = arith.constant 0 : index
    %1043 = vector.load %arg6[%c3_698, %c3_699, %c0_700, %c0_701] : memref<4x4x32x8xbf16, #tpu.memory_space<vmem>>, vector<1x1x32x8xbf16>
    %1044 = vector.shape_cast %1043 : vector<1x1x32x8xbf16> to vector<32x8xbf16>
    %cst_702 = arith.constant dense<0.000000e+00> : vector<16x8xf32>
    %1045 = tpu.matmul %895, %1044, %cst_702 {dimension_numbers = #tpu.dot_dimension_numbers<[1], [0], [0], [1], [0, 0, 1, 1], [], []>} : vector<16x32xbf16>, vector<32x8xbf16>, vector<16x8xf32> -> vector<16x8xf32>
    %c3_703 = arith.constant 3 : index
    %c1_704 = arith.constant 1 : index
    %c3_705 = arith.constant 3 : index
    %c0_706 = arith.constant 0 : index
    %1046 = vector.load %arg11[%c3_703, %c1_704, %c3_705, %c0_706] : memref<4x3x4x8xf32, #tpu.memory_space<vmem>>, vector<1x1x1x8xf32>
    %1047 = vector.shape_cast %1046 : vector<1x1x1x8xf32> to vector<8xf32>
    %1048 = vector.shape_cast %1047 : vector<8xf32> to vector<1x8xf32>
    %1049 = vector.broadcast %1048 : vector<1x8xf32> to vector<16x8xf32>
    %1050 = arith.addf %1045, %1049 : vector<16x8xf32>
    %c3_707 = arith.constant 3 : index
    %c3_708 = arith.constant 3 : index
    %c0_709 = arith.constant 0 : index
    %c0_710 = arith.constant 0 : index
    %1051 = vector.load %arg7[%c3_707, %c3_708, %c0_709, %c0_710] : memref<4x4x32x8xbf16, #tpu.memory_space<vmem>>, vector<1x1x32x8xbf16>
    %1052 = vector.shape_cast %1051 : vector<1x1x32x8xbf16> to vector<32x8xbf16>
    %cst_711 = arith.constant dense<0.000000e+00> : vector<16x8xf32>
    %1053 = tpu.matmul %895, %1052, %cst_711 {dimension_numbers = #tpu.dot_dimension_numbers<[1], [0], [0], [1], [0, 0, 1, 1], [], []>} : vector<16x32xbf16>, vector<32x8xbf16>, vector<16x8xf32> -> vector<16x8xf32>
    %c3_712 = arith.constant 3 : index
    %c2_713 = arith.constant 2 : index
    %c3_714 = arith.constant 3 : index
    %c0_715 = arith.constant 0 : index
    %1054 = vector.load %arg11[%c3_712, %c2_713, %c3_714, %c0_715] : memref<4x3x4x8xf32, #tpu.memory_space<vmem>>, vector<1x1x1x8xf32>
    %1055 = vector.shape_cast %1054 : vector<1x1x1x8xf32> to vector<8xf32>
    %1056 = vector.shape_cast %1055 : vector<8xf32> to vector<1x8xf32>
    %1057 = vector.broadcast %1056 : vector<1x8xf32> to vector<16x8xf32>
    %1058 = arith.addf %1053, %1057 : vector<16x8xf32>
    %1059 = vector.shape_cast %1042 : vector<16x8xf32> to vector<2x8x8xf32>
    %1060 = vector.shape_cast %1050 : vector<16x8xf32> to vector<2x8x8xf32>
    %1061 = vector.shape_cast %1058 : vector<16x8xf32> to vector<2x8x8xf32>
    "tpu.trace_start"() <{level = 10 : i32, message = "btd,bsd->bts"}> : () -> ()
    %cst_716 = arith.constant dense<0.000000e+00> : vector<2x8x8xf32>
    %1062 = tpu.matmul %1059, %1060, %cst_716 {dimension_numbers = #tpu.dot_dimension_numbers<[2], [2], [1], [1], [0, 0, 0, 1, 1, 1], [0], [0]>} : vector<2x8x8xf32>, vector<2x8x8xf32>, vector<2x8x8xf32> -> vector<2x8x8xf32>
    "tpu.trace_stop"() : () -> ()
    %1063 = arith.addf %1062, %23 : vector<2x8x8xf32>
    %cst_717 = arith.constant dense<0xFF800000> : vector<2x8xf32>
    %1064 = vector.multi_reduction <maximumf>, %1063, %cst_717 [2] : vector<2x8x8xf32> to vector<2x8xf32>
    %1065 = vector.shape_cast %1064 : vector<2x8xf32> to vector<2x8x1xf32>
    %1066 = vector.broadcast %1065 : vector<2x8x1xf32> to vector<2x8x8xf32>
    %1067 = arith.subf %1063, %1066 : vector<2x8x8xf32>
    %1068 = math.exp %1067 : vector<2x8x8xf32>
    %cst_718 = arith.constant dense<0.000000e+00> : vector<2x8xf32>
    %1069 = vector.multi_reduction <add>, %1068, %cst_718 [2] : vector<2x8x8xf32> to vector<2x8xf32>
    %1070 = vector.shape_cast %1069 : vector<2x8xf32> to vector<2x8x1xf32>
    %1071 = tpu.reciprocal %1070 {approx = true} : vector<2x8x1xf32> -> vector<2x8x1xf32>
    %1072 = vector.broadcast %1071 : vector<2x8x1xf32> to vector<2x8x8xf32>
    %1073 = arith.mulf %1068, %1072 : vector<2x8x8xf32>
    "tpu.trace_start"() <{level = 10 : i32, message = "bts,bsd->btd"}> : () -> ()
    %cst_719 = arith.constant dense<0.000000e+00> : vector<2x8x8xf32>
    %1074 = tpu.matmul %1073, %1061, %cst_719 {dimension_numbers = #tpu.dot_dimension_numbers<[2], [1], [1], [2], [0, 0, 0, 1, 1, 2], [0], [0]>} : vector<2x8x8xf32>, vector<2x8x8xf32>, vector<2x8x8xf32> -> vector<2x8x8xf32>
    "tpu.trace_stop"() : () -> ()
    %1075 = vector.shape_cast %1074 : vector<2x8x8xf32> to vector<16x8xf32>
    %1076 = arith.truncf %1075 : vector<16x8xf32> to vector<16x8xbf16>
    %c3_720 = arith.constant 3 : index
    %c3_721 = arith.constant 3 : index
    %c0_722 = arith.constant 0 : index
    %c0_723 = arith.constant 0 : index
    %1077 = vector.load %arg8[%c3_720, %c3_721, %c0_722, %c0_723] : memref<4x4x8x32xbf16, #tpu.memory_space<vmem>>, vector<1x1x8x32xbf16>
    %1078 = vector.shape_cast %1077 : vector<1x1x8x32xbf16> to vector<8x32xbf16>
    %cst_724 = arith.constant dense<0.000000e+00> : vector<16x32xf32>
    %1079 = tpu.matmul %1076, %1078, %cst_724 {dimension_numbers = #tpu.dot_dimension_numbers<[1], [0], [0], [1], [0, 0, 1, 1], [], []>} : vector<16x8xbf16>, vector<8x32xbf16>, vector<16x32xf32> -> vector<16x32xf32>
    %1080 = arith.addf %1034, %1079 : vector<16x32xf32>
    %1081 = arith.addf %866, %1080 : vector<16x32xf32>
    %c3_725 = arith.constant 3 : index
    %c0_726 = arith.constant 0 : index
    %c0_727 = arith.constant 0 : index
    %1082 = vector.load %arg12[%c3_725, %c0_726, %c0_727] : memref<4x3x128xf32, #tpu.memory_space<vmem>>, vector<1x1x32xf32>
    %1083 = vector.shape_cast %1082 : vector<1x1x32xf32> to vector<32xf32>
    %1084 = vector.shape_cast %1083 : vector<32xf32> to vector<1x32xf32>
    %1085 = vector.broadcast %1084 : vector<1x32xf32> to vector<16x32xf32>
    %1086 = arith.addf %1081, %1085 : vector<16x32xf32>
    %c3_728 = arith.constant 3 : index
    %c2_729 = arith.constant 2 : index
    %c0_730 = arith.constant 0 : index
    %1087 = vector.load %arg4[%c3_728, %c2_729, %c0_730] : memref<4x4x32xf32, #tpu.memory_space<vmem>>, vector<1x1x32xf32>
    %1088 = vector.shape_cast %1087 : vector<1x1x32xf32> to vector<32xf32>
    %c3_731 = arith.constant 3 : index
    %c3_732 = arith.constant 3 : index
    %c0_733 = arith.constant 0 : index
    %1089 = vector.load %arg4[%c3_731, %c3_732, %c0_733] : memref<4x4x32xf32, #tpu.memory_space<vmem>>, vector<1x1x32xf32>
    %1090 = vector.shape_cast %1089 : vector<1x1x32xf32> to vector<32xf32>
    %cst_734 = arith.constant dense<0.000000e+00> : vector<16xf32>
    %1091 = vector.multi_reduction <add>, %1086, %cst_734 [1] : vector<16x32xf32> to vector<16xf32>
    %1092 = vector.shape_cast %1091 : vector<16xf32> to vector<16x1xf32>
    %cst_735 = arith.constant 3.200000e+01 : f32
    %1093 = vector.broadcast %cst_735 : f32 to vector<16x1xf32>
    %1094 = arith.divf %1092, %1093 : vector<16x1xf32>
    %1095 = vector.broadcast %1094 : vector<16x1xf32> to vector<16x32xf32>
    %1096 = arith.subf %1086, %1095 : vector<16x32xf32>
    %1097 = arith.mulf %1096, %1096 : vector<16x32xf32>
    %cst_736 = arith.constant dense<0.000000e+00> : vector<16xf32>
    %1098 = vector.multi_reduction <add>, %1097, %cst_736 [1] : vector<16x32xf32> to vector<16xf32>
    %1099 = vector.shape_cast %1098 : vector<16xf32> to vector<16x1xf32>
    %cst_737 = arith.constant 3.200000e+01 : f32
    %1100 = vector.broadcast %cst_737 : f32 to vector<16x1xf32>
    %1101 = arith.divf %1099, %1100 : vector<16x1xf32>
    %1102 = vector.broadcast %1094 : vector<16x1xf32> to vector<16x32xf32>
    %1103 = arith.subf %1086, %1102 : vector<16x32xf32>
    %cst_738 = arith.constant 9.99999974E-6 : f32
    %1104 = vector.broadcast %cst_738 : f32 to vector<16x1xf32>
    %1105 = arith.addf %1101, %1104 : vector<16x1xf32>
    %1106 = math.rsqrt %1105 : vector<16x1xf32>
    %1107 = vector.broadcast %1106 : vector<16x1xf32> to vector<16x32xf32>
    %1108 = arith.mulf %1103, %1107 : vector<16x32xf32>
    %1109 = vector.shape_cast %1088 : vector<32xf32> to vector<1x32xf32>
    %1110 = vector.broadcast %1109 : vector<1x32xf32> to vector<16x32xf32>
    %1111 = arith.mulf %1108, %1110 : vector<16x32xf32>
    %1112 = vector.shape_cast %1090 : vector<32xf32> to vector<1x32xf32>
    %1113 = vector.broadcast %1112 : vector<1x32xf32> to vector<16x32xf32>
    %1114 = arith.addf %1111, %1113 : vector<16x32xf32>
    %1115 = arith.truncf %1114 : vector<16x32xf32> to vector<16x32xbf16>
    %c3_739 = arith.constant 3 : index
    %c0_740 = arith.constant 0 : index
    %c0_741 = arith.constant 0 : index
    %1116 = vector.load %arg9[%c3_739, %c0_740, %c0_741] : memref<4x32x128xbf16, #tpu.memory_space<vmem>>, vector<1x32x128xbf16>
    %1117 = vector.shape_cast %1116 : vector<1x32x128xbf16> to vector<32x128xbf16>
    %cst_742 = arith.constant dense<0.000000e+00> : vector<16x128xf32>
    %1118 = tpu.matmul %1115, %1117, %cst_742 {dimension_numbers = #tpu.dot_dimension_numbers<[1], [0], [0], [1], [0, 0, 1, 1], [], []>} : vector<16x32xbf16>, vector<32x128xbf16>, vector<16x128xf32> -> vector<16x128xf32>
    %c3_743 = arith.constant 3 : index
    %c1_744 = arith.constant 1 : index
    %c0_745 = arith.constant 0 : index
    %1119 = vector.load %arg12[%c3_743, %c1_744, %c0_745] : memref<4x3x128xf32, #tpu.memory_space<vmem>>, vector<1x1x128xf32>
    %1120 = vector.shape_cast %1119 : vector<1x1x128xf32> to vector<128xf32>
    %1121 = vector.shape_cast %1120 : vector<128xf32> to vector<1x128xf32>
    %1122 = vector.broadcast %1121 : vector<1x128xf32> to vector<16x128xf32>
    %1123 = arith.addf %1118, %1122 : vector<16x128xf32>
    %cst_746 = arith.constant 5.000000e-01 : f32
    %1124 = vector.broadcast %cst_746 : f32 to vector<16x128xf32>
    %1125 = arith.mulf %1124, %1123 : vector<16x128xf32>
    %cst_747 = arith.constant 0.636619746 : f32
    %1126 = math.sqrt %cst_747 : f32
    %cst_748 = arith.constant 4.471500e-02 : f32
    %1127 = vector.broadcast %cst_748 : f32 to vector<16x128xf32>
    %1128 = arith.mulf %1127, %1123 : vector<16x128xf32>
    %1129 = arith.mulf %1128, %1123 : vector<16x128xf32>
    %1130 = arith.mulf %1129, %1123 : vector<16x128xf32>
    %1131 = arith.addf %1123, %1130 : vector<16x128xf32>
    %1132 = vector.broadcast %1126 : f32 to vector<16x128xf32>
    %1133 = arith.mulf %1132, %1131 : vector<16x128xf32>
    %1134 = math.tanh %1133 : vector<16x128xf32>
    %cst_749 = arith.constant 1.000000e+00 : f32
    %1135 = vector.broadcast %cst_749 : f32 to vector<16x128xf32>
    %1136 = arith.addf %1135, %1134 : vector<16x128xf32>
    %1137 = arith.mulf %1125, %1136 : vector<16x128xf32>
    %1138 = arith.truncf %1137 : vector<16x128xf32> to vector<16x128xbf16>
    %c3_750 = arith.constant 3 : index
    %c0_751 = arith.constant 0 : index
    %c0_752 = arith.constant 0 : index
    %1139 = vector.load %arg10[%c3_750, %c0_751, %c0_752] : memref<4x128x32xbf16, #tpu.memory_space<vmem>>, vector<1x128x32xbf16>
    %1140 = vector.shape_cast %1139 : vector<1x128x32xbf16> to vector<128x32xbf16>
    %cst_753 = arith.constant dense<0.000000e+00> : vector<16x32xf32>
    %1141 = tpu.matmul %1138, %1140, %cst_753 {dimension_numbers = #tpu.dot_dimension_numbers<[1], [0], [0], [1], [0, 0, 1, 1], [], []>} : vector<16x128xbf16>, vector<128x32xbf16>, vector<16x32xf32> -> vector<16x32xf32>
    %c3_754 = arith.constant 3 : index
    %c2_755 = arith.constant 2 : index
    %c0_756 = arith.constant 0 : index
    %1142 = vector.load %arg12[%c3_754, %c2_755, %c0_756] : memref<4x3x128xf32, #tpu.memory_space<vmem>>, vector<1x1x32xf32>
    %1143 = vector.shape_cast %1142 : vector<1x1x32xf32> to vector<32xf32>
    %1144 = vector.shape_cast %1143 : vector<32xf32> to vector<1x32xf32>
    %1145 = vector.broadcast %1144 : vector<1x32xf32> to vector<16x32xf32>
    %1146 = arith.addf %1141, %1145 : vector<16x32xf32>
    %1147 = arith.addf %1086, %1146 : vector<16x32xf32>
    %c0_757 = arith.constant 0 : index
    %c0_758 = arith.constant 0 : index
    %1148 = vector.load %arg13[%c0_757, %c0_758] : memref<2x32xf32, #tpu.memory_space<vmem>>, vector<1x32xf32>
    %1149 = vector.shape_cast %1148 : vector<1x32xf32> to vector<32xf32>
    %c1_759 = arith.constant 1 : index
    %c0_760 = arith.constant 0 : index
    %1150 = vector.load %arg13[%c1_759, %c0_760] : memref<2x32xf32, #tpu.memory_space<vmem>>, vector<1x32xf32>
    %1151 = vector.shape_cast %1150 : vector<1x32xf32> to vector<32xf32>
    %cst_761 = arith.constant dense<0.000000e+00> : vector<16xf32>
    %1152 = vector.multi_reduction <add>, %1147, %cst_761 [1] : vector<16x32xf32> to vector<16xf32>
    %1153 = vector.shape_cast %1152 : vector<16xf32> to vector<16x1xf32>
    %cst_762 = arith.constant 3.200000e+01 : f32
    %1154 = vector.broadcast %cst_762 : f32 to vector<16x1xf32>
    %1155 = arith.divf %1153, %1154 : vector<16x1xf32>
    %1156 = vector.broadcast %1155 : vector<16x1xf32> to vector<16x32xf32>
    %1157 = arith.subf %1147, %1156 : vector<16x32xf32>
    %1158 = arith.mulf %1157, %1157 : vector<16x32xf32>
    %cst_763 = arith.constant dense<0.000000e+00> : vector<16xf32>
    %1159 = vector.multi_reduction <add>, %1158, %cst_763 [1] : vector<16x32xf32> to vector<16xf32>
    %1160 = vector.shape_cast %1159 : vector<16xf32> to vector<16x1xf32>
    %cst_764 = arith.constant 3.200000e+01 : f32
    %1161 = vector.broadcast %cst_764 : f32 to vector<16x1xf32>
    %1162 = arith.divf %1160, %1161 : vector<16x1xf32>
    %1163 = vector.broadcast %1155 : vector<16x1xf32> to vector<16x32xf32>
    %1164 = arith.subf %1147, %1163 : vector<16x32xf32>
    %cst_765 = arith.constant 9.99999974E-6 : f32
    %1165 = vector.broadcast %cst_765 : f32 to vector<16x1xf32>
    %1166 = arith.addf %1162, %1165 : vector<16x1xf32>
    %1167 = math.rsqrt %1166 : vector<16x1xf32>
    %1168 = vector.broadcast %1167 : vector<16x1xf32> to vector<16x32xf32>
    %1169 = arith.mulf %1164, %1168 : vector<16x32xf32>
    %1170 = vector.shape_cast %1149 : vector<32xf32> to vector<1x32xf32>
    %1171 = vector.broadcast %1170 : vector<1x32xf32> to vector<16x32xf32>
    %1172 = arith.mulf %1169, %1171 : vector<16x32xf32>
    %1173 = vector.shape_cast %1151 : vector<32xf32> to vector<1x32xf32>
    %1174 = vector.broadcast %1173 : vector<1x32xf32> to vector<16x32xf32>
    %1175 = arith.addf %1172, %1174 : vector<16x32xf32>
    %1176 = arith.truncf %1175 : vector<16x32xf32> to vector<16x32xbf16>
    %c0_766 = arith.constant 0 : index
    %c0_767 = arith.constant 0 : index
    %1177 = vector.load %arg14[%c0_766, %c0_767] : memref<32x128xbf16, #tpu.memory_space<vmem>>, vector<32x128xbf16>
    %cst_768 = arith.constant dense<0.000000e+00> : vector<16x128xf32>
    %1178 = tpu.matmul %1176, %1177, %cst_768 {dimension_numbers = #tpu.dot_dimension_numbers<[1], [0], [0], [1], [0, 0, 1, 1], [], []>} : vector<16x32xbf16>, vector<32x128xbf16>, vector<16x128xf32> -> vector<16x128xf32>
    %1179 = vector.shape_cast %1178 : vector<16x128xf32> to vector<2x8x128xf32>
    %c0_769 = arith.constant 0 : index
    %c0_770 = arith.constant 0 : index
    %c0_771 = arith.constant 0 : index
    %1180 = vector.load %arg15[%c0_769, %c0_770, %c0_771] : memref<2x8x128xf32, #tpu.memory_space<vmem>>, vector<2x8x128xf32>
    tpu.vector_store %arg15[%c0_769, %c0_770, %c0_771], %1179 {strides = array<i32>} : memref<2x8x128xf32, #tpu.memory_space<vmem>>, vector<2x8x128xf32>,
    return
  }
  func.func @transform_0(%arg0: i32) -> (i32, i32, i32) {
    %c0_i32 = arith.constant 0 : i32
    %c0_i32_0 = arith.constant 0 : i32
    %c0_i32_1 = arith.constant 0 : i32
    return %arg0, %c0_i32, %c0_i32_0 : i32, i32, i32
  }
  func.func @transform_1(%arg0: i32) -> (i32, i32) {
    %c0_i32 = arith.constant 0 : i32
    %c0_i32_0 = arith.constant 0 : i32
    %c0_i32_1 = arith.constant 0 : i32
    return %c0_i32, %c0_i32_0 : i32, i32
  }
  func.func @transform_2(%arg0: i32) -> (i32, i32) {
    %c0_i32 = arith.constant 0 : i32
    %c0_i32_0 = arith.constant 0 : i32
    %c0_i32_1 = arith.constant 0 : i32
    return %c0_i32, %c0_i32_0 : i32, i32
  }
  func.func @transform_3(%arg0: i32) -> (i32, i32, i32) {
    %c0_i32 = arith.constant 0 : i32
    %c0_i32_0 = arith.constant 0 : i32
    %c0_i32_1 = arith.constant 0 : i32
    %c0_i32_2 = arith.constant 0 : i32
    return %c0_i32, %c0_i32_0, %c0_i32_1 : i32, i32, i32
  }
  func.func @transform_4(%arg0: i32) -> (i32, i32, i32, i32) {
    %c0_i32 = arith.constant 0 : i32
    %c0_i32_0 = arith.constant 0 : i32
    %c0_i32_1 = arith.constant 0 : i32
    %c0_i32_2 = arith.constant 0 : i32
    %c0_i32_3 = arith.constant 0 : i32
    return %c0_i32, %c0_i32_0, %c0_i32_1, %c0_i32_2 : i32, i32, i32, i32
  }
  func.func @transform_5(%arg0: i32) -> (i32, i32, i32, i32) {
    %c0_i32 = arith.constant 0 : i32
    %c0_i32_0 = arith.constant 0 : i32
    %c0_i32_1 = arith.constant 0 : i32
    %c0_i32_2 = arith.constant 0 : i32
    %c0_i32_3 = arith.constant 0 : i32
    return %c0_i32, %c0_i32_0, %c0_i32_1, %c0_i32_2 : i32, i32, i32, i32
  }
  func.func @transform_6(%arg0: i32) -> (i32, i32, i32, i32) {
    %c0_i32 = arith.constant 0 : i32
    %c0_i32_0 = arith.constant 0 : i32
    %c0_i32_1 = arith.constant 0 : i32
    %c0_i32_2 = arith.constant 0 : i32
    %c0_i32_3 = arith.constant 0 : i32
    return %c0_i32, %c0_i32_0, %c0_i32_1, %c0_i32_2 : i32, i32, i32, i32
  }
  func.func @transform_7(%arg0: i32) -> (i32, i32, i32, i32) {
    %c0_i32 = arith.constant 0 : i32
    %c0_i32_0 = arith.constant 0 : i32
    %c0_i32_1 = arith.constant 0 : i32
    %c0_i32_2 = arith.constant 0 : i32
    %c0_i32_3 = arith.constant 0 : i32
    return %c0_i32, %c0_i32_0, %c0_i32_1, %c0_i32_2 : i32, i32, i32, i32
  }
  func.func @transform_8(%arg0: i32) -> (i32, i32, i32) {
    %c0_i32 = arith.constant 0 : i32
    %c0_i32_0 = arith.constant 0 : i32
    %c0_i32_1 = arith.constant 0 : i32
    %c0_i32_2 = arith.constant 0 : i32
    return %c0_i32, %c0_i32_0, %c0_i32_1 : i32, i32, i32
  }
  func.func @transform_9(%arg0: i32) -> (i32, i32, i32) {
    %c0_i32 = arith.constant 0 : i32
    %c0_i32_0 = arith.constant 0 : i32
    %c0_i32_1 = arith.constant 0 : i32
    %c0_i32_2 = arith.constant 0 : i32
    return %c0_i32, %c0_i32_0, %c0_i32_1 : i32, i32, i32
  }
  func.func @transform_10(%arg0: i32) -> (i32, i32, i32, i32) {
    %c0_i32 = arith.constant 0 : i32
    %c0_i32_0 = arith.constant 0 : i32
    %c0_i32_1 = arith.constant 0 : i32
    %c0_i32_2 = arith.constant 0 : i32
    %c0_i32_3 = arith.constant 0 : i32
    return %c0_i32, %c0_i32_0, %c0_i32_1, %c0_i32_2 : i32, i32, i32, i32
  }
  func.func @transform_11(%arg0: i32) -> (i32, i32, i32) {
    %c0_i32 = arith.constant 0 : i32
    %c0_i32_0 = arith.constant 0 : i32
    %c0_i32_1 = arith.constant 0 : i32
    %c0_i32_2 = arith.constant 0 : i32
    return %c0_i32, %c0_i32_0, %c0_i32_1 : i32, i32, i32
  }
  func.func @transform_12(%arg0: i32) -> (i32, i32) {
    %c0_i32 = arith.constant 0 : i32
    %c0_i32_0 = arith.constant 0 : i32
    %c0_i32_1 = arith.constant 0 : i32
    return %c0_i32, %c0_i32_0 : i32, i32
  }
  func.func @transform_13(%arg0: i32) -> (i32, i32) {
    %c0_i32 = arith.constant 0 : i32
    %c0_i32_0 = arith.constant 0 : i32
    %c0_i32_1 = arith.constant 0 : i32
    return %c0_i32, %c0_i32_0 : i32, i32
  }
  func.func @transform_14(%arg0: i32) -> (i32, i32, i32) {
    %c0_i32 = arith.constant 0 : i32
    %c0_i32_0 = arith.constant 0 : i32
    %c0_i32_1 = arith.constant 0 : i32
    return %arg0, %c0_i32, %c0_i32_0 : i32, i32, i32
  }
}

</mosaic_0001>

<bundles_post_ra>
// kernel: lightweight_gpt2_forward.1
= control target key start
LH: loop header
LB: loop body
LE: loop exit
PB: predicated region body
PF: predicated region fallthrough
CT: control target
= control target key end

     0   :  { %v12841_v2 = vmov 0   ;;  %s14717_s0 = inlined_call_operand.vmem [shape: s32[2,8,1], index: 0, kind: input, shape index: {}]   ;;  %s14718_s1 = inlined_call_operand.vmem [shape: f32[128,32], index: 1, kind: input, shape index: {}]   ;;  %s14719_s2 = inlined_call_operand.vmem [shape: f32[512,32], index: 2, kind: input, shape index: {}]   ;;  %s14720_s3 = inlined_call_operand.vmem [shape: f32[4,4,32], index: 3, kind: input, shape index: {}]   ;;  %s14721_s4 = inlined_call_operand.vmem [shape: bf16[4,4,32,8], index: 4, kind: input, shape index: {}]   ;;  %s14722_s5 = inlined_call_operand.vmem [shape: bf16[4,4,32,8], index: 5, kind: input, shape index: {}]   ;;  %s14723_s6 = inlined_call_operand.vmem [shape: bf16[4,4,32,8], index: 6, kind: input, shape index: {}]   ;;  %s14724_s7 = inlined_call_operand.vmem [shape: bf16[4,4,8,32], index: 7, kind: input, shape index: {}]   ;;  %s14725_s8 = inlined_call_operand.vmem [shape: bf16[4,32,128], index: 8, kind: input, shape index: {}]   ;;  %s14726_s9 = inlined_call_operand.vmem [shape: bf16[4,128,32], index: 9, kind: input, shape index: {}]   ;;  %s14727_s10 = inlined_call_operand.vmem [shape: f32[4,3,4,8], index: 10, kind: input, shape index: {}]   ;;  %s14728_s11 = inlined_call_operand.vmem [shape: f32[4,3,128], index: 11, kind: input, shape index: {}]   ;;  %s14729_s12 = inlined_call_operand.vmem [shape: f32[2,32], index: 12, kind: input, shape index: {}]   ;;  %s14730_s13 = inlined_call_operand.vmem [shape: bf16[32,128], index: 13, kind: input, shape index: {}]   ;;  %s14731_s14 = inlined_call_operand.hbm [shape: f32[2,8,128], index: 14, kind: output, shape index: {}]  }
   0x1   :  { %v49_v0 = vld [vmem:[%s14717_s0] sm:$0xff]  ;;  %12498 = vset.pattern.permute.xlu0 %v12841_v2  ;;  %v66_v3 = vld [vmem:[%s14718_s1 + $0x8] sm:$0xff]  ;;  %v67_v4 = vld [vmem:[%s14718_s1 + $0x10] sm:$0xff] }
   0x2   :  { %v65_v1 = vld [vmem:[%s14718_s1] sm:$0xff]  ;;  %v68_v5 = vld [vmem:[%s14718_s1 + $0x18] sm:$0xff]  ;;  %54 = vperm.xlu0 %12498, %v49_v0   ;;  %v50_v8 = vld [vmem:[%s14717_s0 + $0x8] sm:$0xff] }
   0x3   :  { %v12458_v6 = vpack.c.bf16 %v66_v3, %v65_v1  ;;  %v12462_v7 = vpack.c.bf16 %v68_v5, %v67_v4  ;;  %v69_v9 = vld [vmem:[%s14718_s1 + $0x20] sm:$0xff]  ;;  %v70_v10 = vld [vmem:[%s14718_s1 + $0x28] sm:$0xff]  ;;  %v71_v11 = vld [vmem:[%s14718_s1 + $0x30] sm:$0xff] }
   0x4   :  { %v12466_v12 = vpack.c.bf16 %v70_v10, %v69_v9  ;;  %v72_v13 = vld [vmem:[%s14718_s1 + $0x38] sm:$0xff]  ;;  %v73_v14 = vld [vmem:[%s14718_s1 + $0x40] sm:$0xff]  ;;  %v74_v15 = vld [vmem:[%s14718_s1 + $0x48] sm:$0xff] }
   0x5   :  { %12459 = vmatprep.subr.bf16.mxu0 %v12458_v6  ;;  %v12470_v16 = vpack.c.bf16 %v72_v13, %v71_v11  ;;  %v75_v17 = vld [vmem:[%s14718_s1 + $0x50] sm:$0xff]  ;;  %v76_v18 = vld [vmem:[%s14718_s1 + $0x58] sm:$0xff]  ;;  %v12474_v19 = vpack.c.bf16 %v74_v15, %v73_v14  ;;  %v77_v20 = vld [vmem:[%s14718_s1 + $0x60] sm:$0xff] }
   0x6   :  { %12461 = vmatpush3.bf16.msra.mxu0 %v12458_v6  ;;  %57 = vperm.xlu0 %12498, %v50_v8   ;;  %v78_v21 = vld [vmem:[%s14718_s1 + $0x68] sm:$0xff]  ;;  %v12478_v22 = vpack.c.bf16 %v76_v18, %v75_v17  ;;  %v79_v23 = vld [vmem:[%s14718_s1 + $0x70] sm:$0xff]  ;;  %v80_v24 = vld [vmem:[%s14718_s1 + $0x78] sm:$0xff] }
   0x7   :  { %12463 = vmatprep.subr.bf16.mxu0 %v12462_v7  ;;  %v12482_v25 = vpack.c.bf16 %v78_v21, %v77_v20  ;;  %v12486_v26 = vpack.c.bf16 %v80_v24, %v79_v23 }
   0xa   :  { %12465 = vmatpush3.bf16.msra.mxu0 %v12462_v7 }
   0xb   :  { %12467 = vmatprep.subr.bf16.mxu0 %v12466_v12 }
   0xe   :  { %12469 = vmatpush3.bf16.msra.mxu0 %v12466_v12 }
   0xf   :  { %12471 = vmatprep.subr.bf16.mxu0 %v12470_v16 }
  0x12   :  { %12473 = vmatpush3.bf16.msra.mxu0 %v12470_v16 }
  0x13   :  { %12475 = vmatprep.subr.bf16.mxu0 %v12474_v19 }
  0x16   :  { %12477 = vmatpush3.bf16.msra.mxu0 %v12474_v19 }
  0x17   :  { %12479 = vmatprep.subr.bf16.mxu0 %v12478_v22 }
  0x1a   :  { %12481 = vmatpush3.bf16.msra.mxu0 %v12478_v22 }
  0x1b   :  { %12483 = vmatprep.subr.bf16.mxu0 %v12482_v25 }
  0x1e   :  { %12485 = vmatpush3.bf16.msra.mxu0 %v12482_v25 }
  0x1f   :  { %12487 = vmatprep.subr.bf16.mxu0 %v12486_v26 }
  0x22   :  { %12489 = vmatpush3.bf16.msra.mxu0 %v12486_v26 }
  0x23   :  { %19 = vsyncpa [#allocation3], 0  ;;  %v51_v27 = vlaneseq  ;;  %v12842_v30 = vmov 1.0   ;;  %v156_v32 = vld [vmem:[%s14719_s2] sm:$0xff]  ;;  %vm165_vm2 = vcmask 261120   ;;  %v12843_v50 = vmov 0.0  }
  0x24   :  { %v12499_v49 = vld [vmem:[%s14721_s4] sm:$0xff]   ;;  %11538 = vmatprep.subr.bf16.mxu1 %v12843_v50  ;;  %11567 = vmatprep.subr.mxu0 %v12843_v50  ;;  %v12500_v51 = vld [vmem:[%s14721_s4 + $0x8] sm:$0xff]   ;;  %vm12844_vm3 = vmmov 0   ;;  %vm397_vm4 = vcmask 64512   ;;  %vm1235_vm6 = vcmask 1043456   ;;  %s12846_s26 = smov [#allocation2]  }
  0x25   :  { %v12979_v28 = vand.u32 127, %v51_v27  ;;  %11539 = vmatpush3.bf16.msra.mxu1 %v12499_v49  ;;  %11542 = vmatprep.mubr.msk.bf16.mxu1 %vm12844_vm3, %v12843_v50  ;;  %v10429_v60 = vld [vmem:[%s14720_s3] ss:$0 sm:$0xff]  ;;  %v10430_v0 = vld [vmem:[%s14720_s3 + $0x1] ss:$0 sm:$0xff]  ;;  %v12502_v6 = vld [vmem:[%s14722_s5 + $0x8] sm:$0xff]  }
  0x26   :  { %11540 = vmatprep.subr.bf16.mxu1 %v12843_v50  ;;  %v12501_v4 = vld [vmem:[%s14722_s5] sm:$0xff]   ;;  %v12504_v8 = vld [vmem:[%s14723_s6 + $0x8] sm:$0xff]   ;;  %s10414_s27 = sshll.u32 %s12846_s26, 4  ;;  %s10415_s27 = int_to_ptr.vmem [resolvable:$true] %s10414_s27 }
  0x27   :  { %v12503_v7 = vld [vmem:[%s14723_s6] sm:$0xff]   ;;  %v10441_v23 = vld [vmem:[%s14727_s10 + $0x8] ss:$0 sm:$0xff]  ;;  %p12822_p1 = scmp.lt.s32.totalorder %s10415_s27, %s10415_s27 }
  0x28   :  { %v10436_v13 = vld [vmem:[%s14727_s10 + $0x4] ss:$0 sm:$0xff]  ;;  %v10431_v15 = vld [vmem:[%s14727_s10] ss:$0 sm:$0xff] }
  0x29   :  { %11541 = vmatpush3.bf16.msra.mxu1 %v12500_v51 }
  0x2a   :  { %11546 = vmatprep.subr.bf16.mxu1 %v12843_v50 }
  0x81   :  { %v55_v29 = vpop.permute.xlu0 %54 }
  0x82   :  { %vm59_vm0 = vcmp.eq.s32.totalorder %v12979_v28, %v55_v29 }
  0x83   :  { %11535 = vmatprep.mubr.msk.f32.mxu0 %vm59_vm0, %v12842_v30 }
  0x85   :  { %v58_v31 = vpop.permute.xlu0 %57 }
  0x86   :  { %vm60_vm1 = vcmp.eq.s32.totalorder %v12979_v28, %v58_v31 }
  0x87   :  { %11536 = vmatmul.mubr.msk.f32.vlgmr.msra.gmra.mrb[0].mxu0 %vm60_vm1, %v12842_v30 }
  0x88   :  { %11569 = vmatprep.mubr.msk.f32.mxu0 %vm12844_vm3, %v12843_v50 }
 0x15a   :  { %v11537_v33 = vpop.f32.mrb[0].mxu0 }
 0x15b   :  { %v147_v34 = vpop.f32.mrb[1].mxu0  ;;  %v12988_v36 = vadd.f32 %v11537_v33, %v156_v32  ;;  %v12845_v33 = vmov -1e+30  }
 0x15c   :  { %v12986_v35 = vadd.f32 %v156_v32, %v147_v34  ;;  %v160_v32 = vshrl.u32 %v51_v27, 7 }
 0x15d   :  { %v169_v38 = vsel %vm165_vm2, %v12988_v36, 0.0 }
 0x15e   :  { %v166_v37 = vsel %vm165_vm2, %v12986_v35, 0.0  ;;  %vm161_vm5 = vcmp.le.s32.totalorder %v12979_v28, %v160_v32 }
 0x15f   :  { %167 = vadd.xlane.f32.xlu1 %v166_v37  ;;  %v13071_v34 = vsel %vm161_vm5, 0.0, %v12845_v33 }
 0x163   :  { %170 = vadd.xlane.f32.xlu1 %v169_v38 }
 0x1ec   :  { %v168_v39 = vpop.xlane.xlu1 %167 }
 0x1ed   :  { %v173_v40 = vmul.f32 0.03125, %v168_v39 }
 0x1ef   :  { %v175_v41 = vsub.f32 %v12986_v35, %v173_v40 }
 0x1f0   :  { %v171_v42 = vpop.xlane.xlu1 %170 }
 0x1f1   :  { %v174_v43 = vmul.f32 0.03125, %v171_v42  ;;  %v177_v44 = vmul.f32 %v175_v41, %v175_v41 }
 0x1f3   :  { %v176_v45 = vsub.f32 %v12988_v36, %v174_v43  ;;  %v179_v46 = vsel %vm165_vm2, %v177_v44, 0.0 }
 0x1f4   :  { %180 = vadd.xlane.f32.xlu0 %v179_v46 }
 0x1f5   :  { %v178_v47 = vmul.f32 %v176_v45, %v176_v45 }
 0x1f7   :  { %v182_v48 = vsel %vm165_vm2, %v178_v47, 0.0 }
 0x1f8   :  { %183 = vadd.xlane.f32.xlu1 %v182_v48 }
 0x281   :  { %v181_v52 = vpop.xlane.xlu0 %180 }
 0x282   :  { %v185_v53 = vmul.f32 0.03125, %v181_v52 }
 0x284   :  { %v187_v54 = vadd.f32 1e-05, %v185_v53 }
 0x285   :  { %v184_v55 = vpop.xlane.xlu1 %183 }
 0x286   :  { %12637 = vrsqrt.f32 %v187_v54  ;;  %v186_v56 = vmul.f32 0.03125, %v184_v55  ;;  %v12505_v54 = vld [vmem:[%s14721_s4 + $0x10] sm:$0xff]  }
 0x288   :  { %v188_v57 = vadd.f32 1e-05, %v186_v56  ;;  %v12506_v56 = vld [vmem:[%s14721_s4 + $0x18] sm:$0xff]  }
 0x28a   :  { %12639 = vrsqrt.f32 %v188_v57 }
 0x290   :  { %v12638_v58 = vpop.eup %12637 }
 0x291   :  { %v191_v59 = vmul.f32 %v12638_v58, %v175_v41  ;;  %v12507_v58 = vld [vmem:[%s14722_s5 + $0x10] sm:$0xff]  }
 0x293   :  { %v197_v62 = vmul.f32 %v10429_v60, %v191_v59 }
 0x294   :  { %v12640_v61 = vpop.eup %12639 }
 0x295   :  { %v192_v63 = vmul.f32 %v12640_v61, %v176_v45  ;;  %v203_v2 = vadd.f32 %v10430_v0, %v197_v62  ;;  %v12509_v61 = vld [vmem:[%s14723_s6 + $0x10] sm:$0xff]   ;;  %v12510_v62 = vld [vmem:[%s14723_s6 + $0x18] sm:$0xff]  }
 0x297   :  { %v198_v1 = vmul.f32 %v10429_v60, %v192_v63  ;;  %v12508_v60 = vld [vmem:[%s14722_s5 + $0x18] sm:$0xff]  }
 0x299   :  { %v204_v3 = vadd.f32 %v10430_v0, %v198_v1 }
 0x29b   :  { %v13021_v5 = vpack.c.bf16 %v204_v3, %v203_v2 }
 0x29d   :  { %11543 = vmatmul.mubr.msk.bf16.vlgmr.msra.gmra.mrb[0].mxu1 %vm165_vm2, %v13021_v5 }
 0x29e   :  { %11547 = vmatpush3.bf16.msra.mxu1 %v12501_v4  ;;  %11550 = vmatprep.mubr.msk.bf16.mxu1 %vm12844_vm3, %v12843_v50 }
 0x29f   :  { %11548 = vmatprep.subr.bf16.mxu1 %v12843_v50 }
 0x2a2   :  { %11549 = vmatpush3.bf16.msra.mxu1 %v12502_v6 }
 0x2a3   :  { %11554 = vmatprep.subr.bf16.mxu1 %v12843_v50 }
 0x2a5   :  { %11551 = vmatmul.mubr.msk.bf16.vlgmr.msra.gmra.mrb[4].mxu1 %vm165_vm2, %v13021_v5 }
 0x2a6   :  { %11555 = vmatpush3.bf16.msra.mxu1 %v12503_v7  ;;  %11558 = vmatprep.mubr.msk.bf16.mxu1 %vm12844_vm3, %v12843_v50 }
 0x2a7   :  { %11556 = vmatprep.subr.bf16.mxu1 %v12843_v50 }
 0x2aa   :  { %11557 = vmatpush3.bf16.msra.mxu1 %v12504_v8 }
 0x2ab   :  { %11562 = vmatprep.subr.mxu1 %v12843_v50 }
 0x2ad   :  { %11559 = vmatmul.mubr.msk.bf16.vlgmr.msra.gmra.mrb[8].mxu1 %vm165_vm2, %v13021_v5 }
 0x2ae   :  { %11564 = vmatprep.mubr.msk.f32.mxu1 %vm12844_vm3, %v12843_v50 }
 0x370   :  { %v264_v9 = vpop.f32.mrb[0].mxu1 }
 0x371   :  { %v11544_v10 = vpop.f32.mrb[1].mxu1  ;;  %v265_v21 = vadd.f32 %v10431_v15, %v264_v9  ;;  %v10464_v9 = vld [vmem:[%s14727_s10 + $0x5] ss:$0 sm:$0xff] }
 0x372   :  { %v267_v11 = vpop.f32.mrb[2].mxu1 }
 0x373   :  { %v11545_v12 = vpop.f32.mrb[3].mxu1  ;;  %v268_v22 = vadd.f32 %v10431_v15, %v267_v11  ;;  %v10455_v11 = vld [vmem:[%s14727_s10 + $0x1] ss:$0 sm:$0xff] }
 0x378   :  { %v327_v14 = vpop.f32.mrb[4].mxu1 }
 0x379   :  { %v328_v16 = vadd.f32 %v10436_v13, %v327_v14  ;;  %v11552_v17 = vpop.f32.mrb[5].mxu1 }
 0x37a   :  { %v330_v18 = vpop.f32.mrb[6].mxu1 }
 0x37b   :  { %v331_v19 = vadd.f32 %v10436_v13, %v330_v18  ;;  %v11553_v20 = vpop.f32.mrb[7].mxu1  ;;  %11563 = vmatpush3.xpose.msk.msra.mxu1 %vm397_vm4, %v328_v16  ;;  %v10473_v18 = vld [vmem:[%s14727_s10 + $0x9] ss:$0 sm:$0xff] }
 0x37c   :  { %11572 = vmatprep.subr.mxu1 %v12843_v50 }
 0x37d   :  { %11568 = vmatpush3.xpose.msk.msra.mxu0 %vm397_vm4, %v331_v19 }
 0x37e   :  { %11565 = vmatmul.mubr.msk.f32.vlgmr.msra.gmra.mrb[12].mxu1 %vm397_vm4, %v265_v21  ;;  %11577 = vmatprep.subr.mxu0 %v12843_v50 }
 0x37f   :  { %11574 = vmatprep.mubr.msk.f32.mxu1 %vm12844_vm3, %v12843_v50 }
 0x380   :  { %v390_v24 = vpop.f32.mrb[8].mxu1  ;;  %11570 = vmatmul.mubr.msk.f32.vlgmr.msra.gmra.mrb[2].mxu0 %vm397_vm4, %v268_v22 }
 0x381   :  { %v391_v25 = vadd.f32 %v10441_v23, %v390_v24  ;;  %v11560_v26 = vpop.f32.mrb[9].mxu1  ;;  %11579 = vmatprep.mubr.msk.f32.mxu0 %vm12844_vm3, %v12843_v50 }
 0x382   :  { %v393_v29 = vpop.f32.mrb[10].mxu1 }
 0x383   :  { %v394_v30 = vadd.f32 %v10441_v23, %v393_v29  ;;  %v11561_v31 = vpop.f32.mrb[11].mxu1  ;;  %11573 = vmatpush3.msra.mxu1 %v391_v25 }
 0x384   :  { %11582 = vmatprep.subr.bf16.mxu1 %v12843_v50 }
 0x385   :  { %11578 = vmatpush3.msra.mxu0 %v394_v30 }
 0x386   :  { %11606 = vmatprep.subr.mxu0 %v12843_v50 }
 0x451   :  { %v470_v37 = vpop.f32.mrb[12].mxu1 }
 0x452   :  { %v471_v38 = vadd.f32 %v470_v37, %v13071_v34  ;;  %v11566_v39 = vpop.f32.mrb[13].mxu1 }
 0x453   :  { %v546_v40 = vpop.f32.mrb[2].mxu0 }
 0x454   :  { %v11571_v41 = vpop.f32.mrb[3].mxu0  ;;  %v550_v42 = vsel %vm397_vm4, %v471_v38, -inf  ;;  %v547_v27 = vadd.f32 %v546_v40, %v13071_v34 }
 0x455   :  { %551 = vmax.xlane.f32.xlu1 %v550_v42 }
 0x456   :  { %v553_v47 = vsel %vm397_vm4, %v547_v27, -inf }
 0x4e2   :  { %v552_v43 = vpop.xlane.xlu1 %551 }
 0x4e3   :  { %v556_v44 = vsub.f32 %v471_v38, %v552_v43 }
 0x4e5   :  { %v558_v45 = vmul.f32 1.442695, %v556_v44 }
 0x4e7   :  { %12641 = vpow2.f32 %v558_v45 }
 0x4f1   :  { %v12642_v46 = vpop.eup %12641 }
 0x4f2   :  { %v562_v28 = vsel %vm397_vm4, %v12642_v46, 0.0 }
 0x4f3   :  { %563 = vadd.xlane.f32.xlu1 %v562_v28 }
 0x4f7   :  { %554 = vmax.xlane.f32.xlu1 %v553_v47 }
 0x580   :  { %v564_v48 = vpop.xlane.xlu1 %563 }
 0x581   :  { %12643 = vrcp.f32 %v564_v48 }
 0x584   :  { %v555_v49 = vpop.xlane.xlu1 %554 }
 0x585   :  { %v557_v51 = vsub.f32 %v547_v27, %v555_v49 }
 0x587   :  { %v560_v52 = vmul.f32 1.442695, %v557_v51 }
 0x589   :  { %12645 = vpow2.f32 %v560_v52 }
 0x58b   :  { %v12644_v53 = vpop.eup %12643 }
 0x58c   :  { %v570_v55 = vmul.f32 %v12644_v53, %v12642_v46 }
 0x58e   :  { %11575 = vmatmul.mubr.msk.f32.vlgmr.msra.gmra.mrb[14].mxu1 %vm397_vm4, %v570_v55  ;;  %v719_v55 = vld [vmem:[%s14724_s7] sm:$0xf] }
 0x58f   :  { %11583 = vmatpush3.bf16.msra.mxu1 %v12505_v54  ;;  %11586 = vmatprep.mubr.msk.bf16.mxu1 %vm12844_vm3, %v12843_v50 }
 0x590   :  { %11584 = vmatprep.subr.bf16.mxu1 %v12843_v50 }
 0x593   :  { %v12646_v57 = vpop.eup %12645  ;;  %11585 = vmatpush3.bf16.msra.mxu1 %v12506_v56 }
 0x594   :  { %11590 = vmatprep.subr.bf16.mxu1 %v12843_v50  ;;  %v565_v59 = vsel %vm397_vm4, %v12646_v57, 0.0 }
 0x595   :  { %566 = vadd.xlane.f32.xlu1 %v565_v59  ;;  %v12511_v59 = vld [vmem:[%s14722_s5 + $0x20] sm:$0xff]  }
 0x596   :  { %11587 = vmatmul.mubr.msk.bf16.vlgmr.msra.gmra.mrb[16].mxu1 %vm165_vm2, %v13021_v5 }
 0x597   :  { %11591 = vmatpush3.bf16.msra.mxu1 %v12507_v58  ;;  %11594 = vmatprep.mubr.msk.bf16.mxu1 %vm12844_vm3, %v12843_v50  ;;  %v1284_v58 = vsel %vm1235_vm6, %v719_v55, 0 }
 0x598   :  { %11592 = vmatprep.subr.bf16.mxu1 %v12843_v50 }
 0x59b   :  { %11593 = vmatpush3.bf16.msra.mxu1 %v12508_v60  ;;  %v12512_v60 = vld [vmem:[%s14722_s5 + $0x28] sm:$0xff]  }
 0x59c   :  { %11598 = vmatprep.subr.bf16.mxu1 %v12843_v50 }
 0x59e   :  { %11595 = vmatmul.mubr.msk.bf16.vlgmr.msra.gmra.mrb[20].mxu1 %vm165_vm2, %v13021_v5 }
 0x59f   :  { %11599 = vmatpush3.bf16.msra.mxu1 %v12509_v61  ;;  %11602 = vmatprep.mubr.msk.bf16.mxu1 %vm12844_vm3, %v12843_v50  ;;  %v10483_v61 = vld [vmem:[%s14724_s7 + $0x4] sm:$0xf] }
 0x5a0   :  { %11600 = vmatprep.subr.bf16.mxu1 %v12843_v50 }
 0x5a3   :  { %11601 = vmatpush3.bf16.msra.mxu1 %v12510_v62  ;;  %v1237_v62 = vsel %vm1235_vm6, %v10483_v61, 0 }
 0x5a4   :  { %11616 = vmatprep.subr.mxu1 %v12843_v50 }
 0x5a6   :  { %11603 = vmatmul.mubr.msk.bf16.vlgmr.msra.gmra.mrb[24].mxu1 %vm165_vm2, %v13021_v5 }
 0x5a7   :  { %11618 = vmatprep.mubr.msk.f32.mxu1 %vm12844_vm3, %v12843_v50 }
 0x622   :  { %v567_v63 = vpop.xlane.xlu1 %566 }
 0x623   :  { %12647 = vrcp.f32 %v567_v63 }
 0x62d   :  { %v12648_v0 = vpop.eup %12647 }
 0x62e   :  { %v571_v1 = vmul.f32 %v12648_v0, %v12646_v57 }
 0x630   :  { %11580 = vmatmul.mubr.msk.f32.vlgmr.msra.gmra.mrb[4].mxu0 %vm397_vm4, %v571_v1 }
 0x631   :  { %11608 = vmatprep.mubr.msk.f32.mxu0 %vm12844_vm3, %v12843_v50 }
 0x661   :  { %v13121_v2 = vpop.f32.mrb[14].mxu1 }
 0x662   :  { %v11576_v3 = vpop.f32.mrb[15].mxu1 }
 0x669   :  { %v776_v4 = vpop.f32.mrb[16].mxu1 }
 0x66a   :  { %v11588_v6 = vpop.f32.mrb[17].mxu1  ;;  %v777_v16 = vadd.f32 %v10455_v11, %v776_v4 }
 0x66b   :  { %v779_v7 = vpop.f32.mrb[18].mxu1 }
 0x66c   :  { %v11589_v8 = vpop.f32.mrb[19].mxu1  ;;  %v780_v19 = vadd.f32 %v10455_v11, %v779_v7  ;;  %v12514_v7 = vld [vmem:[%s14721_s4 + $0x28] sm:$0xff]   ;;  %v12515_v11 = vld [vmem:[%s14723_s6 + $0x20] sm:$0xff]  }
 0x671   :  { %v839_v10 = vpop.f32.mrb[20].mxu1 }
 0x672   :  { %v840_v12 = vadd.f32 %v10464_v9, %v839_v10  ;;  %v11596_v13 = vpop.f32.mrb[21].mxu1 }
 0x673   :  { %v842_v14 = vpop.f32.mrb[22].mxu1 }
 0x674   :  { %v11597_v15 = vpop.f32.mrb[23].mxu1  ;;  %11607 = vmatpush3.xpose.msk.msra.mxu0 %vm397_vm4, %v840_v12  ;;  %v843_v17 = vadd.f32 %v10464_v9, %v842_v14  ;;  %v10499_v12 = vld [vmem:[%s14727_s10 + $0x6] ss:$0 sm:$0xff]  ;;  %v12516_v14 = vld [vmem:[%s14723_s6 + $0x28] sm:$0xff]  }
 0x675   :  { %11611 = vmatprep.subr.mxu0 %v12843_v50 }
 0x677   :  { %11609 = vmatmul.mubr.msk.f32.vlgmr.msra.gmra.mrb[6].mxu0 %vm397_vm4, %v777_v16 }
 0x678   :  { %11612 = vmatpush3.xpose.msk.msra.mxu0 %vm397_vm4, %v843_v17  ;;  %11613 = vmatprep.mubr.msk.f32.mxu0 %vm12844_vm3, %v12843_v50 }
 0x679   :  { %v902_v20 = vpop.f32.mrb[24].mxu1  ;;  %11621 = vmatprep.subr.mxu0 %v12843_v50 }
 0x67a   :  { %v903_v21 = vadd.f32 %v10473_v18, %v902_v20  ;;  %v11604_v22 = vpop.f32.mrb[25].mxu1 }
 0x67b   :  { %v905_v23 = vpop.f32.mrb[26].mxu1  ;;  %11614 = vmatmul.mubr.msk.f32.vlgmr.msra.gmra.mrb[8].mxu0 %vm397_vm4, %v780_v19 }
 0x67c   :  { %v906_v24 = vadd.f32 %v10473_v18, %v905_v23  ;;  %v11605_v25 = vpop.f32.mrb[27].mxu1  ;;  %11617 = vmatpush3.msra.mxu1 %v903_v21  ;;  %11623 = vmatprep.mubr.msk.f32.mxu0 %vm12844_vm3, %v12843_v50 }
 0x67d   :  { %11626 = vmatprep.subr.bf16.mxu1 %v12843_v50 }
 0x67e   :  { %11622 = vmatpush3.msra.mxu0 %v906_v24 }
 0x67f   :  { %11632 = vmatprep.subr.bf16.mxu0 %v12843_v50 }
 0x703   :  { %v714_v26 = vpop.f32.mrb[4].mxu0 }
 0x704   :  { %v718_v29 = vpack.c.bf16 %v714_v26, %v13121_v2  ;;  %v11581_v30 = vpop.f32.mrb[5].mxu0  ;;  %v12513_v2 = vld [vmem:[%s14721_s4 + $0x20] sm:$0xff]  }
 0x705   :  { %v10490_v26 = vld [vmem:[%s14727_s10 + $0x2] ss:$0 sm:$0xff] }
 0x74a   :  { %v981_v31 = vpop.f32.mrb[6].mxu0 }
 0x74b   :  { %v982_v32 = vadd.f32 %v981_v31, %v13071_v34  ;;  %v11610_v33 = vpop.f32.mrb[7].mxu0 }
 0x74d   :  { %v1061_v37 = vsel %vm397_vm4, %v982_v32, -inf }
 0x74e   :  { %1062 = vmax.xlane.f32.xlu1 %v1061_v37  ;;  %v1057_v38 = vpop.f32.mrb[8].mxu0 }
 0x74f   :  { %v1058_v39 = vadd.f32 %v1057_v38, %v13071_v34  ;;  %v11615_v40 = vpop.f32.mrb[9].mxu0  ;;  %v10508_v38 = vld [vmem:[%s14727_s10 + $0xa] ss:$0 sm:$0xff] }
 0x751   :  { %v1064_v41 = vsel %vm397_vm4, %v1058_v39, -inf }
 0x752   :  { %1065 = vmax.xlane.f32.xlu1 %v1064_v41 }
 0x7db   :  { %v1063_v42 = vpop.xlane.xlu1 %1062 }
 0x7dc   :  { %v1067_v43 = vsub.f32 %v982_v32, %v1063_v42 }
 0x7de   :  { %v1069_v44 = vmul.f32 1.442695, %v1067_v43 }
 0x7df   :  { %v1066_v45 = vpop.xlane.xlu1 %1065 }
 0x7e0   :  { %12649 = vpow2.f32 %v1069_v44  ;;  %v1068_v46 = vsub.f32 %v1058_v39, %v1066_v45 }
 0x7e2   :  { %v1071_v27 = vmul.f32 1.442695, %v1068_v46 }
 0x7e4   :  { %12651 = vpow2.f32 %v1071_v27 }
 0x7ea   :  { %v12650_v28 = vpop.eup %12649 }
 0x7eb   :  { %v1073_v47 = vsel %vm397_vm4, %v12650_v28, 0.0 }
 0x7ec   :  { %1074 = vadd.xlane.f32.xlu1 %v1073_v47 }
 0x7ee   :  { %v12652_v48 = vpop.eup %12651 }
 0x7ef   :  { %v1076_v49 = vsel %vm397_vm4, %v12652_v48, 0.0 }
 0x7f0   :  { %1077 = vadd.xlane.f32.xlu0 %v1076_v49 }
 0x879   :  { %v1075_v51 = vpop.xlane.xlu1 %1074 }
 0x87a   :  { %12653 = vrcp.f32 %v1075_v51 }
 0x87d   :  { %v1078_v52 = vpop.xlane.xlu0 %1077 }
 0x87e   :  { %12655 = vrcp.f32 %v1078_v52 }
 0x884   :  { %v12654_v53 = vpop.eup %12653 }
 0x885   :  { %v1081_v54 = vmul.f32 %v12654_v53, %v12650_v28 }
 0x887   :  { %11619 = vmatmul.mubr.msk.f32.vlgmr.msra.gmra.mrb[28].mxu1 %vm397_vm4, %v1081_v54 }
 0x888   :  { %v12656_v56 = vpop.eup %12655  ;;  %11628 = vmatprep.mubr.msk.bf16.mxu1 %vm12844_vm3, %v12843_v50  ;;  %11627 = vmatpush3.bf16.msra.mxu1 %v1237_v62 }
 0x889   :  { %v1082_v57 = vmul.f32 %v12656_v56, %v12652_v48  ;;  %11638 = vmatprep.subr.bf16.mxu1 %v12843_v50 }
 0x88b   :  { %11624 = vmatmul.mubr.msk.f32.vlgmr.msra.gmra.mrb[10].mxu0 %vm397_vm4, %v1082_v57 }
 0x88c   :  { %11633 = vmatpush3.bf16.msra.mxu0 %v1284_v58  ;;  %11634 = vmatprep.mubr.msk.bf16.mxu0 %vm12844_vm3, %v12843_v50 }
 0x88d   :  { %11646 = vmatprep.subr.bf16.mxu0 %v12843_v50 }
 0x88f   :  { %11635 = vmatmul.mubr.msk.bf16.vlgmr.msra.gmra.mrb[12].mxu0 %vm397_vm4, %v718_v29 }
 0x890   :  { %11647 = vmatpush3.bf16.msra.mxu0 %v12511_v59  ;;  %11650 = vmatprep.mubr.msk.bf16.mxu0 %vm12844_vm3, %v12843_v50 }
 0x891   :  { %11648 = vmatprep.subr.bf16.mxu0 %v12843_v50 }
 0x894   :  { %11649 = vmatpush3.bf16.msra.mxu0 %v12512_v60 }
 0x895   :  { %11662 = vmatprep.subr.mxu0 %v12843_v50 }
 0x897   :  { %11651 = vmatmul.mubr.msk.bf16.vlgmr.msra.gmra.mrb[16].mxu0 %vm165_vm2, %v13021_v5 }
 0x898   :  { %11664 = vmatprep.mubr.msk.f32.mxu0 %vm12844_vm3, %v12843_v50 }
 0x95a   :  { %v1152_v63 = vpop.f32.mrb[28].mxu1 }
 0x95b   :  { %v11620_v0 = vpop.f32.mrb[29].mxu1 }
 0x95e   :  { %v1225_v1 = vpop.f32.mrb[10].mxu0 }
 0x95f   :  { %v1229_v3 = vpack.c.bf16 %v1225_v1, %v1152_v63  ;;  %v11625_v4 = vpop.f32.mrb[11].mxu0 }
 0x961   :  { %11629 = vmatmul.mubr.msk.bf16.vlgmr.msra.gmra.mrb[32].mxu1 %vm397_vm4, %v1229_v3  ;;  %v12517_v3 = vld [vmem:[%s14721_s4 + $0x30] sm:$0xff]  }
 0x962   :  { %v1320_v6 = vpop.f32.mrb[12].mxu0  ;;  %11639 = vmatpush3.bf16.msra.mxu1 %v12513_v2  ;;  %11642 = vmatprep.mubr.msk.bf16.mxu1 %vm12844_vm3, %v12843_v50 }
 0x963   :  { %v11636_v8 = vpop.f32.mrb[13].mxu0  ;;  %11640 = vmatprep.subr.bf16.mxu1 %v12843_v50 }
 0x964   :  { %v1323_v9 = vpop.f32.mrb[14].mxu0  ;;  %v12520_v8 = vld [vmem:[%s14723_s6 + $0x38] sm:$0xff]  }
 0x965   :  { %v11637_v10 = vpop.f32.mrb[15].mxu0 }
 0x966   :  { %11641 = vmatpush3.bf16.msra.mxu1 %v12514_v7  ;;  %v12519_v7 = vld [vmem:[%s14723_s6 + $0x30] sm:$0xff]  }
 0x967   :  { %11654 = vmatprep.subr.bf16.mxu1 %v12843_v50 }
 0x969   :  { %11643 = vmatmul.mubr.msk.bf16.vlgmr.msra.gmra.mrb[36].mxu1 %vm165_vm2, %v13021_v5 }
 0x96a   :  { %v1446_v13 = vpop.f32.mrb[16].mxu0  ;;  %11655 = vmatpush3.bf16.msra.mxu1 %v12515_v11  ;;  %11658 = vmatprep.mubr.msk.bf16.mxu1 %vm12844_vm3, %v12843_v50 }
 0x96b   :  { %v1447_v15 = vadd.f32 %v10499_v12, %v1446_v13  ;;  %v11652_v16 = vpop.f32.mrb[17].mxu0  ;;  %11656 = vmatprep.subr.bf16.mxu1 %v12843_v50 }
 0x96c   :  { %v1449_v17 = vpop.f32.mrb[18].mxu0 }
 0x96d   :  { %v1450_v18 = vadd.f32 %v10499_v12, %v1449_v17  ;;  %v11653_v19 = vpop.f32.mrb[19].mxu0  ;;  %11663 = vmatpush3.xpose.msk.msra.mxu0 %vm397_vm4, %v1447_v15  ;;  %v12522_v17 = vld [vmem:[%s14722_s5 + $0x38] sm:$0xff]  }
 0x96e   :  { %11657 = vmatpush3.bf16.msra.mxu1 %v12516_v14  ;;  %11667 = vmatprep.subr.mxu0 %v12843_v50  ;;  %v12521_v14 = vld [vmem:[%s14722_s5 + $0x30] sm:$0xff]  }
 0x96f   :  { %11672 = vmatprep.subr.mxu1 %v12843_v50 }
 0x971   :  { %11659 = vmatmul.mubr.msk.bf16.vlgmr.msra.gmra.mrb[40].mxu1 %vm165_vm2, %v13021_v5 }
 0x972   :  { %11674 = vmatprep.mubr.msk.f32.mxu1 %vm12844_vm3, %v12843_v50 }
 0xa34   :  { %v1273_v20 = vpop.f32.mrb[32].mxu1 }
 0xa35   :  { %v13214_v21 = vadd.f32 %v1320_v6, %v1273_v20  ;;  %v11630_v22 = vpop.f32.mrb[33].mxu1  ;;  %v12518_v6 = vld [vmem:[%s14721_s4 + $0x38] sm:$0xff]  }
 0xa36   :  { %v1276_v23 = vpop.f32.mrb[34].mxu1 }
 0xa37   :  { %v13216_v24 = vadd.f32 %v1323_v9, %v1276_v23  ;;  %v11631_v25 = vpop.f32.mrb[35].mxu1  ;;  %v10518_v9 = vld [vmem:[%s14724_s7 + $0x8] sm:$0xf] }
 0xa38   :  { %v1843_v10 = vsel %vm1235_vm6, %v10518_v9, 0  ;;  %v10542_v23 = vld [vmem:[%s14727_s10 + $0xb] ss:$0 sm:$0xff]  ;;  %v10552_v9 = vld [vmem:[%s14724_s7 + $0xc] sm:$0xf] }
 0xa3c   :  { %v1383_v29 = vpop.f32.mrb[36].mxu1 }
 0xa3d   :  { %v1384_v30 = vadd.f32 %v10490_v26, %v1383_v29  ;;  %v11644_v31 = vpop.f32.mrb[37].mxu1 }
 0xa3e   :  { %v1386_v32 = vpop.f32.mrb[38].mxu1 }
 0xa3f   :  { %v11645_v33 = vpop.f32.mrb[39].mxu1  ;;  %11665 = vmatmul.mubr.msk.f32.vlgmr.msra.gmra.mrb[20].mxu0 %vm397_vm4, %v1384_v30  ;;  %v1387_v37 = vadd.f32 %v10490_v26, %v1386_v32 }
 0xa40   :  { %11668 = vmatpush3.xpose.msk.msra.mxu0 %vm397_vm4, %v1450_v18  ;;  %11669 = vmatprep.mubr.msk.f32.mxu0 %vm12844_vm3, %v12843_v50 }
 0xa41   :  { %11677 = vmatprep.subr.mxu0 %v12843_v50 }
 0xa43   :  { %11670 = vmatmul.mubr.msk.f32.vlgmr.msra.gmra.mrb[22].mxu0 %vm397_vm4, %v1387_v37 }
 0xa44   :  { %v1509_v39 = vpop.f32.mrb[40].mxu1  ;;  %11679 = vmatprep.mubr.msk.f32.mxu0 %vm12844_vm3, %v12843_v50 }
 0xa45   :  { %v1510_v40 = vadd.f32 %v10508_v38, %v1509_v39  ;;  %v11660_v41 = vpop.f32.mrb[41].mxu1 }
 0xa46   :  { %v1512_v42 = vpop.f32.mrb[42].mxu1  ;;  %v10533_v41 = vld [vmem:[%s14727_s10 + $0x7] ss:$0 sm:$0xff] }
 0xa47   :  { %v1513_v43 = vadd.f32 %v10508_v38, %v1512_v42  ;;  %v11661_v44 = vpop.f32.mrb[43].mxu1  ;;  %11673 = vmatpush3.msra.mxu1 %v1510_v40 }
 0xa48   :  { %11682 = vmatprep.subr.bf16.mxu1 %v12843_v50 }
 0xa49   :  { %11678 = vmatpush3.msra.mxu0 %v1513_v43  ;;  %v10524_v43 = vld [vmem:[%s14727_s10 + $0x3] ss:$0 sm:$0xff] }
 0xa4a   :  { %11688 = vmatprep.subr.bf16.mxu0 %v12843_v50 }
 0xb12   :  { %v1588_v45 = vpop.f32.mrb[20].mxu0 }
 0xb13   :  { %v1589_v46 = vadd.f32 %v1588_v45, %v13071_v34  ;;  %v11666_v27 = vpop.f32.mrb[21].mxu0 }
 0xb15   :  { %v1668_v28 = vsel %vm397_vm4, %v1589_v46, -inf }
 0xb16   :  { %1669 = vmax.xlane.f32.xlu1 %v1668_v28  ;;  %v1664_v47 = vpop.f32.mrb[22].mxu0 }
 0xb17   :  { %v1665_v48 = vadd.f32 %v1664_v47, %v13071_v34  ;;  %v11671_v49 = vpop.f32.mrb[23].mxu0 }
 0xb19   :  { %v1671_v51 = vsel %vm397_vm4, %v1665_v48, -inf }
 0xb1a   :  { %1672 = vmax.xlane.f32.xlu0 %v1671_v51 }
 0xba3   :  { %v1670_v52 = vpop.xlane.xlu1 %1669 }
 0xba4   :  { %v1674_v53 = vsub.f32 %v1589_v46, %v1670_v52 }
 0xba6   :  { %v1676_v54 = vmul.f32 1.442695, %v1674_v53 }
 0xba7   :  { %v1673_v55 = vpop.xlane.xlu0 %1672 }
 0xba8   :  { %12657 = vpow2.f32 %v1676_v54  ;;  %v1675_v56 = vsub.f32 %v1665_v48, %v1673_v55 }
 0xbaa   :  { %v1678_v57 = vmul.f32 1.442695, %v1675_v56 }
 0xbac   :  { %12659 = vpow2.f32 %v1678_v57 }
 0xbb2   :  { %v12658_v58 = vpop.eup %12657 }
 0xbb3   :  { %v1680_v59 = vsel %vm397_vm4, %v12658_v58, 0.0 }
 0xbb4   :  { %1681 = vadd.xlane.f32.xlu1 %v1680_v59 }
 0xbb6   :  { %v12660_v60 = vpop.eup %12659 }
 0xbb7   :  { %v1683_v61 = vsel %vm397_vm4, %v12660_v60, 0.0 }
 0xbb8   :  { %1684 = vadd.xlane.f32.xlu0 %v1683_v61 }
 0xc41   :  { %v1682_v62 = vpop.xlane.xlu1 %1681 }
 0xc42   :  { %12661 = vrcp.f32 %v1682_v62 }
 0xc45   :  { %v1685_v63 = vpop.xlane.xlu0 %1684 }
 0xc46   :  { %12663 = vrcp.f32 %v1685_v63 }
 0xc4c   :  { %v12662_v0 = vpop.eup %12661 }
 0xc4d   :  { %v1688_v1 = vmul.f32 %v12662_v0, %v12658_v58 }
 0xc4f   :  { %11675 = vmatmul.mubr.msk.f32.vlgmr.msra.gmra.mrb[30].mxu1 %vm397_vm4, %v1688_v1 }
 0xc50   :  { %v12664_v2 = vpop.eup %12663  ;;  %11684 = vmatprep.mubr.msk.bf16.mxu1 %vm12844_vm3, %v12843_v50  ;;  %11683 = vmatpush3.bf16.msra.mxu1 %v1843_v10  ;;  %v2404_v10 = vsel %vm1235_vm6, %v10552_v9, 0 }
 0xc51   :  { %v1689_v4 = vmul.f32 %v12664_v2, %v12660_v60  ;;  %11696 = vmatprep.subr.bf16.mxu1 %v12843_v50 }
 0xc53   :  { %11680 = vmatmul.mubr.msk.f32.vlgmr.msra.gmra.mrb[24].mxu0 %vm397_vm4, %v1689_v4 }
 0xc54   :  { %11689 = vmatpush3.bf16.msra.mxu0 %v12517_v3  ;;  %11692 = vmatprep.mubr.msk.bf16.mxu0 %vm12844_vm3, %v12843_v50 }
 0xc55   :  { %11690 = vmatprep.subr.bf16.mxu0 %v12843_v50 }
 0xc58   :  { %11691 = vmatpush3.bf16.msra.mxu0 %v12518_v6 }
 0xc59   :  { %11704 = vmatprep.subr.bf16.mxu0 %v12843_v50 }
 0xc5b   :  { %11693 = vmatmul.mubr.msk.bf16.vlgmr.msra.gmra.mrb[28].mxu0 %vm165_vm2, %v13021_v5 }
 0xc5c   :  { %11705 = vmatpush3.bf16.msra.mxu0 %v12519_v7  ;;  %11708 = vmatprep.mubr.msk.bf16.mxu0 %vm12844_vm3, %v12843_v50 }
 0xc5d   :  { %11706 = vmatprep.subr.bf16.mxu0 %v12843_v50 }
 0xc60   :  { %11707 = vmatpush3.bf16.msra.mxu0 %v12520_v8 }
 0xc61   :  { %11722 = vmatprep.subr.mxu0 %v12843_v50 }
 0xc63   :  { %11709 = vmatmul.mubr.msk.bf16.vlgmr.msra.gmra.mrb[32].mxu0 %vm165_vm2, %v13021_v5 }
 0xc64   :  { %11724 = vmatprep.mubr.msk.f32.mxu0 %vm12844_vm3, %v12843_v50 }
 0xd22   :  { %v1759_v11 = vpop.f32.mrb[30].mxu1 }
 0xd23   :  { %v11676_v12 = vpop.f32.mrb[31].mxu1 }
 0xd26   :  { %v1832_v13 = vpop.f32.mrb[24].mxu0 }
 0xd27   :  { %v1836_v15 = vpack.c.bf16 %v1832_v13, %v1759_v11  ;;  %v11681_v16 = vpop.f32.mrb[25].mxu0 }
 0xd29   :  { %11685 = vmatmul.mubr.msk.bf16.vlgmr.msra.gmra.mrb[44].mxu1 %vm397_vm4, %v1836_v15 }
 0xd2a   :  { %11697 = vmatpush3.bf16.msra.mxu1 %v12521_v14  ;;  %11700 = vmatprep.mubr.msk.bf16.mxu1 %vm12844_vm3, %v12843_v50 }
 0xd2b   :  { %11698 = vmatprep.subr.bf16.mxu1 %v12843_v50 }
 0xd2e   :  { %v1944_v18 = vpop.f32.mrb[28].mxu0  ;;  %11699 = vmatpush3.bf16.msra.mxu1 %v12522_v17 }
 0xd2f   :  { %v11694_v19 = vpop.f32.mrb[29].mxu0  ;;  %11712 = vmatprep.subr.mxu1 %v12843_v50  ;;  %v1945_v27 = vadd.f32 %v10524_v43, %v1944_v18 }
 0xd30   :  { %v1947_v20 = vpop.f32.mrb[30].mxu0  ;;  %v10554_v19 = vld [vmem:[%s14728_s11] ss:$0 sm:$0xff] }
 0xd31   :  { %v11695_v22 = vpop.f32.mrb[31].mxu0  ;;  %11701 = vmatmul.mubr.msk.bf16.vlgmr.msra.gmra.mrb[48].mxu1 %vm165_vm2, %v13021_v5  ;;  %v1948_v28 = vadd.f32 %v10524_v43, %v1947_v20  ;;  %v12523_v43 = vld [vmem:[%s14725_s8] sm:$0xff]  }
 0xd32   :  { %11714 = vmatprep.mubr.msk.f32.mxu1 %vm12844_vm3, %v12843_v50 }
 0xd36   :  { %v2070_v25 = vpop.f32.mrb[32].mxu0 }
 0xd37   :  { %v2071_v26 = vadd.f32 %v10542_v23, %v2070_v25  ;;  %v11710_v29 = vpop.f32.mrb[33].mxu0 }
 0xd38   :  { %v2073_v30 = vpop.f32.mrb[34].mxu0 }
 0xd39   :  { %v2074_v31 = vadd.f32 %v10542_v23, %v2073_v30  ;;  %v11711_v32 = vpop.f32.mrb[35].mxu0  ;;  %11723 = vmatpush3.msra.mxu0 %v2071_v26 }
 0xd3a   :  { %11732 = vmatprep.subr.bf16.mxu0 %v12843_v50 }
 0xdfc   :  { %v1879_v33 = vpop.f32.mrb[44].mxu1 }
 0xdfd   :  { %v13295_v37 = vadd.f32 %v1879_v33, %v13214_v21  ;;  %v11686_v5 = vpop.f32.mrb[45].mxu1 }
 0xdfe   :  { %v1882_v38 = vpop.f32.mrb[46].mxu1 }
 0xdff   :  { %v13298_v39 = vadd.f32 %v1882_v38, %v13216_v24  ;;  %v11687_v40 = vpop.f32.mrb[47].mxu1 }
 0xe04   :  { %v2007_v42 = vpop.f32.mrb[48].mxu1 }
 0xe05   :  { %v2008_v44 = vadd.f32 %v10533_v41, %v2007_v42  ;;  %v11702_v45 = vpop.f32.mrb[49].mxu1 }
 0xe06   :  { %v2010_v46 = vpop.f32.mrb[50].mxu1 }
 0xe07   :  { %v11703_v21 = vpop.f32.mrb[51].mxu1  ;;  %11713 = vmatpush3.xpose.msk.msra.mxu1 %vm397_vm4, %v2008_v44  ;;  %v2011_v24 = vadd.f32 %v10533_v41, %v2010_v46  ;;  %v12524_v44 = vld [vmem:[%s14725_s8 + $0x8] sm:$0xff]  }
 0xe08   :  { %11717 = vmatprep.subr.mxu1 %v12843_v50 }
 0xe0a   :  { %11715 = vmatmul.mubr.msk.f32.vlgmr.msra.gmra.mrb[52].mxu1 %vm397_vm4, %v1945_v27 }
 0xe0b   :  { %11718 = vmatpush3.xpose.msk.msra.mxu1 %vm397_vm4, %v2011_v24  ;;  %11719 = vmatprep.mubr.msk.f32.mxu1 %vm12844_vm3, %v12843_v50 }
 0xe0c   :  { %11727 = vmatprep.subr.mxu1 %v12843_v50 }
 0xe0e   :  { %11720 = vmatmul.mubr.msk.f32.vlgmr.msra.gmra.mrb[54].mxu1 %vm397_vm4, %v1948_v28 }
 0xe0f   :  { %11728 = vmatpush3.msra.mxu1 %v2074_v31  ;;  %11729 = vmatprep.mubr.msk.f32.mxu1 %vm12844_vm3, %v12843_v50 }
 0xe10   :  { %11738 = vmatprep.subr.bf16.mxu1 %v12843_v50 }
 0xedd   :  { %v2149_v47 = vpop.f32.mrb[52].mxu1 }
 0xede   :  { %v2150_v48 = vadd.f32 %v2149_v47, %v13071_v34  ;;  %v11716_v49 = vpop.f32.mrb[53].mxu1 }
 0xee0   :  { %v2229_v51 = vsel %vm397_vm4, %v2150_v48, -inf }
 0xee1   :  { %2230 = vmax.xlane.f32.xlu1 %v2229_v51  ;;  %v2225_v52 = vpop.f32.mrb[54].mxu1 }
 0xee2   :  { %v2226_v53 = vadd.f32 %v2225_v52, %v13071_v34  ;;  %v11721_v54 = vpop.f32.mrb[55].mxu1 }
 0xee3   :  { %v10556_v54 = vld [vmem:[%s14720_s3 + $0x3] ss:$0 sm:$0xff] }
 0xee4   :  { %v2232_v55 = vsel %vm397_vm4, %v2226_v53, -inf }
 0xee5   :  { %2233 = vmax.xlane.f32.xlu0 %v2232_v55 }
 0xf6e   :  { %v2231_v56 = vpop.xlane.xlu1 %2230 }
 0xf6f   :  { %v2235_v57 = vsub.f32 %v2150_v48, %v2231_v56  ;;  %v10555_v48 = vld [vmem:[%s14720_s3 + $0x2] ss:$0 sm:$0xff] }
 0xf71   :  { %v2237_v58 = vmul.f32 1.442695, %v2235_v57 }
 0xf72   :  { %v2234_v59 = vpop.xlane.xlu0 %2233 }
 0xf73   :  { %12665 = vpow2.f32 %v2237_v58  ;;  %v2236_v60 = vsub.f32 %v2226_v53, %v2234_v59  ;;  %v12525_v59 = vld [vmem:[%s14726_s9] sm:$0xff]  }
 0xf75   :  { %v2239_v61 = vmul.f32 1.442695, %v2236_v60  ;;  %v12526_v60 = vld [vmem:[%s14726_s9 + $0x8] sm:$0xff]  }
 0xf77   :  { %12667 = vpow2.f32 %v2239_v61  ;;  %v12527_v61 = vld [vmem:[%s14726_s9 + $0x10] sm:$0xff]  }
 0xf7d   :  { %v12666_v62 = vpop.eup %12665 }
 0xf7e   :  { %v2241_v63 = vsel %vm397_vm4, %v12666_v62, 0.0 }
 0xf7f   :  { %2242 = vadd.xlane.f32.xlu1 %v2241_v63  ;;  %v12529_v63 = vld [vmem:[%s14726_s9 + $0x20] sm:$0xff]  }
 0xf81   :  { %v12668_v0 = vpop.eup %12667 }
 0xf82   :  { %v2244_v1 = vsel %vm397_vm4, %v12668_v0, 0.0 }
 0xf83   :  { %2245 = vadd.xlane.f32.xlu0 %v2244_v1  ;;  %v12531_v1 = vld [vmem:[%s14726_s9 + $0x30] sm:$0xff]  }
0x100c   :  { %v2243_v2 = vpop.xlane.xlu1 %2242 }
0x100d   :  { %12669 = vrcp.f32 %v2243_v2  ;;  %v12532_v2 = vld [vmem:[%s14726_s9 + $0x38] sm:$0xff]  }
0x1010   :  { %v2246_v3 = vpop.xlane.xlu0 %2245 }
0x1011   :  { %12671 = vrcp.f32 %v2246_v3  ;;  %v10557_v3 = vld [vmem:[%s14728_s11 + $0x1] ss:$0 sm:$0xff] }
0x1017   :  { %v12670_v4 = vpop.eup %12669 }
0x1018   :  { %v2249_v6 = vmul.f32 %v12670_v4, %v12666_v62  ;;  %v12528_v62 = vld [vmem:[%s14726_s9 + $0x18] sm:$0xff]  }
0x101a   :  { %11725 = vmatmul.mubr.msk.f32.vlgmr.msra.gmra.mrb[26].mxu0 %vm397_vm4, %v2249_v6 }
0x101b   :  { %v12672_v7 = vpop.eup %12671  ;;  %11734 = vmatprep.mubr.msk.bf16.mxu0 %vm12844_vm3, %v12843_v50  ;;  %11733 = vmatpush3.bf16.msra.mxu0 %v2404_v10 }
0x101c   :  { %v2250_v8 = vmul.f32 %v12672_v7, %v12668_v0  ;;  %11746 = vmatprep.subr.bf16.mxu0 %v12843_v50  ;;  %v12530_v0 = vld [vmem:[%s14726_s9 + $0x28] sm:$0xff]  }
0x101e   :  { %11730 = vmatmul.mubr.msk.f32.vlgmr.msra.gmra.mrb[56].mxu1 %vm397_vm4, %v2250_v8 }
0x101f   :  { %11742 = vmatprep.mubr.msk.bf16.mxu1 %vm12844_vm3, %v12843_v50  ;;  %11739 = vmatpush3.bf16.msra.mxu1 %v12523_v43 }
0x1020   :  { %11740 = vmatprep.subr.bf16.mxu1 %v12843_v50 }
0x1023   :  { %11741 = vmatpush3.bf16.msra.mxu1 %v12524_v44 }
0x1024   :  { %11766 = vmatprep.subr.bf16.mxu1 %v12843_v50 }
0x10ed   :  { %v2320_v11 = vpop.f32.mrb[26].mxu0 }
0x10ee   :  { %v11726_v12 = vpop.f32.mrb[27].mxu0 }
0x10f1   :  { %v2393_v13 = vpop.f32.mrb[56].mxu1 }
0x10f2   :  { %v2397_v14 = vpack.c.bf16 %v2393_v13, %v2320_v11  ;;  %v11731_v15 = vpop.f32.mrb[57].mxu1 }
0x10f4   :  { %11735 = vmatmul.mubr.msk.bf16.vlgmr.msra.gmra.mrb[36].mxu0 %vm397_vm4, %v2397_v14 }
0x10f5   :  { %11762 = vmatprep.mubr.msk.bf16.mxu0 %vm12844_vm3, %v12843_v50  ;;  %11747 = vmatpush3.bf16.msra.mxu0 %v12525_v59 }
0x10f6   :  { %11748 = vmatprep.subr.bf16.mxu0 %v12843_v50 }
0x10f9   :  { %11749 = vmatpush3.bf16.msra.mxu0 %v12526_v60 }
0x10fa   :  { %11750 = vmatprep.subr.bf16.mxu0 %v12843_v50 }
0x10fd   :  { %11751 = vmatpush3.bf16.msra.mxu0 %v12527_v61  ;;  %v10572_v61 = vld [vmem:[%s14720_s3 + $0x4] ss:$0 sm:$0xff] }
0x10fe   :  { %11752 = vmatprep.subr.bf16.mxu0 %v12843_v50 }
0x1101   :  { %11753 = vmatpush3.bf16.msra.mxu0 %v12528_v62 }
0x1102   :  { %11754 = vmatprep.subr.bf16.mxu0 %v12843_v50 }
0x1105   :  { %11755 = vmatpush3.bf16.msra.mxu0 %v12529_v63 }
0x1106   :  { %11756 = vmatprep.subr.bf16.mxu0 %v12843_v50 }
0x1109   :  { %11757 = vmatpush3.bf16.msra.mxu0 %v12530_v0 }
0x110a   :  { %11758 = vmatprep.subr.bf16.mxu0 %v12843_v50 }
0x110d   :  { %11759 = vmatpush3.bf16.msra.mxu0 %v12531_v1 }
0x110e   :  { %11760 = vmatprep.subr.bf16.mxu0 %v12843_v50 }
0x1111   :  { %11761 = vmatpush3.bf16.msra.mxu0 %v12532_v2  ;;  %v10573_v2 = vld [vmem:[%s14720_s3 + $0x5] ss:$0 sm:$0xff] }
0x1112   :  { %11795 = vmatprep.subr.mxu0 %v12843_v50 }
0x11c7   :  { %v2440_v16 = vpop.f32.mrb[36].mxu0 }
0x11c8   :  { %v2447_v17 = vadd.f32 %v2440_v16, %v13295_v37  ;;  %v11736_v18 = vpop.f32.mrb[37].mxu0 }
0x11c9   :  { %v2443_v20 = vpop.f32.mrb[38].mxu0 }
0x11ca   :  { %v2449_v22 = vadd.f32 %v2447_v17, %v12986_v35  ;;  %v2448_v23 = vadd.f32 %v2443_v20, %v13298_v39  ;;  %v11737_v25 = vpop.f32.mrb[39].mxu0 }
0x11cc   :  { %v13343_v26 = vadd.f32 %v10554_v19, %v2449_v22  ;;  %v2450_v29 = vadd.f32 %v2448_v23, %v12988_v36 }
0x11ce   :  { %v13346_v30 = vadd.f32 %v10554_v19, %v2450_v29  ;;  %v2460_v31 = vsel %vm165_vm2, %v13343_v26, 0.0 }
0x11cf   :  { %2461 = vadd.xlane.f32.xlu1 %v2460_v31 }
0x11d0   :  { %v2463_v32 = vsel %vm165_vm2, %v13346_v30, 0.0 }
0x11d1   :  { %2464 = vadd.xlane.f32.xlu0 %v2463_v32 }
0x125c   :  { %v2462_v33 = vpop.xlane.xlu1 %2461 }
0x125d   :  { %v2466_v37 = vmul.f32 0.03125, %v2462_v33 }
0x125e   :  { %v2465_v35 = vpop.xlane.xlu0 %2464 }
0x125f   :  { %v2468_v5 = vsub.f32 %v13343_v26, %v2466_v37  ;;  %v2467_v38 = vmul.f32 0.03125, %v2465_v35 }
0x1261   :  { %v2469_v39 = vsub.f32 %v13346_v30, %v2467_v38  ;;  %v2470_v40 = vmul.f32 %v2468_v5, %v2468_v5 }
0x1263   :  { %v2472_v36 = vsel %vm165_vm2, %v2470_v40, 0.0  ;;  %v2471_v41 = vmul.f32 %v2469_v39, %v2469_v39 }
0x1264   :  { %2473 = vadd.xlane.f32.xlu1 %v2472_v36 }
0x1265   :  { %v2475_v42 = vsel %vm165_vm2, %v2471_v41, 0.0 }
0x1266   :  { %2476 = vadd.xlane.f32.xlu0 %v2475_v42 }
0x12f1   :  { %v2474_v45 = vpop.xlane.xlu1 %2473 }
0x12f2   :  { %v2478_v46 = vmul.f32 0.03125, %v2474_v45 }
0x12f3   :  { %v2477_v21 = vpop.xlane.xlu0 %2476 }
0x12f4   :  { %v2480_v27 = vadd.f32 1e-05, %v2478_v46  ;;  %v2479_v24 = vmul.f32 0.03125, %v2477_v21 }
0x12f6   :  { %12673 = vrsqrt.f32 %v2480_v27  ;;  %v2481_v28 = vadd.f32 1e-05, %v2479_v24 }
0x12f8   :  { %12675 = vrsqrt.f32 %v2481_v28 }
0x1300   :  { %v12674_v47 = vpop.eup %12673 }
0x1301   :  { %v2484_v49 = vmul.f32 %v12674_v47, %v2468_v5  ;;  %v10561_v5 = vld [vmem:[%s14728_s11 + $0x2] ss:$0 sm:$0xff] }
0x1302   :  { %v12676_v51 = vpop.eup %12675 }
0x1303   :  { %v2490_v52 = vmul.f32 %v10555_v48, %v2484_v49  ;;  %v2485_v53 = vmul.f32 %v12676_v51, %v2469_v39 }
0x1305   :  { %v2491_v55 = vmul.f32 %v10555_v48, %v2485_v53  ;;  %v2496_v56 = vadd.f32 %v10556_v54, %v2490_v52  ;;  %v12533_v52 = vld [vmem:[%s14721_s4 + $0x40] sm:$0xff]   ;;  %v12534_v53 = vld [vmem:[%s14721_s4 + $0x48] sm:$0xff]  }
0x1307   :  { %v2497_v57 = vadd.f32 %v10556_v54, %v2491_v55 }
0x1309   :  { %v2498_v58 = vpack.c.bf16 %v2497_v57, %v2496_v56 }
0x130b   :  { %11743 = vmatmul.mubr.msk.bf16.vlgmr.msra.gmra.mrb[60].mxu1 %vm165_vm2, %v2498_v58 }
0x130c   :  { %11770 = vmatprep.mubr.msk.bf16.mxu1 %vm12844_vm3, %v12843_v50  ;;  %11767 = vmatpush3.bf16.msra.mxu1 %v12533_v52 }
0x130d   :  { %11768 = vmatprep.subr.bf16.mxu1 %v12843_v50 }
0x1310   :  { %11769 = vmatpush3.bf16.msra.mxu1 %v12534_v53 }
0x1311   :  { %11774 = vmatprep.subr.bf16.mxu1 %v12843_v50 }
0x13de   :  { %v2557_v4 = vpop.f32.mrb[60].mxu1 }
0x13df   :  { %v2558_v6 = vadd.f32 %v10557_v3, %v2557_v4  ;;  %v11744_v7 = vpop.f32.mrb[61].mxu1 }
0x13e0   :  { %v2560_v8 = vpop.f32.mrb[62].mxu1  ;;  %v12535_v7 = vld [vmem:[%s14722_s5 + $0x40] sm:$0xff]  }
0x13e1   :  { %v2566_v9 = vmul.f32 0.044715, %v2558_v6  ;;  %v2561_v10 = vadd.f32 %v10557_v3, %v2560_v8  ;;  %v11745_v11 = vpop.f32.mrb[63].mxu1  ;;  %v2564_v29 = vmul.f32 0.5, %v2558_v6 }
0x13e2   :  { %v12538_v11 = vld [vmem:[%s14723_s6 + $0x48] sm:$0xff]  }
0x13e3   :  { %v2568_v12 = vmul.f32 %v2566_v9, %v2558_v6  ;;  %v2567_v13 = vmul.f32 0.044715, %v2561_v10  ;;  %v2565_v31 = vmul.f32 0.5, %v2561_v10  ;;  %v12536_v9 = vld [vmem:[%s14722_s5 + $0x48] sm:$0xff]  }
0x13e5   :  { %v2570_v14 = vmul.f32 %v2568_v12, %v2558_v6  ;;  %v2569_v15 = vmul.f32 %v2567_v13, %v2561_v10 }
0x13e7   :  { %v2572_v16 = vadd.f32 %v2570_v14, %v2558_v6  ;;  %v2571_v17 = vmul.f32 %v2569_v15, %v2561_v10 }
0x13e9   :  { %v2574_v18 = vmul.f32 0.7978845, %v2572_v16  ;;  %v2573_v19 = vadd.f32 %v2571_v17, %v2561_v10  ;;  %v12537_v10 = vld [vmem:[%s14723_s6 + $0x40] sm:$0xff]   ;;  %v10588_v16 = vld [vmem:[%s14727_s10 + $0x10] ss:$0 sm:$0xff] }
0x13eb   :  { %12677 = vtanh.f32 %v2574_v18  ;;  %v2575_v20 = vmul.f32 0.7978845, %v2573_v19  ;;  %v10579_v18 = vld [vmem:[%s14727_s10 + $0xc] ss:$0 sm:$0xff] }
0x13ed   :  { %12679 = vtanh.f32 %v2575_v20 }
0x13f5   :  { %v12678_v22 = vpop.eup %12677 }
0x13f6   :  { %v2578_v23 = vadd.f32 1.0, %v12678_v22 }
0x13f7   :  { %v12680_v25 = vpop.eup %12679 }
0x13f8   :  { %v2579_v32 = vadd.f32 1.0, %v12680_v25  ;;  %v2580_v33 = vmul.f32 %v2578_v23, %v2564_v29 }
0x13fa   :  { %v2581_v37 = vmul.f32 %v2579_v32, %v2565_v31  ;;  %v10597_v32 = vld [vmem:[%s14727_s10 + $0x14] ss:$0 sm:$0xff] }
0x13fc   :  { %v2582_v35 = vpack.c.bf16 %v2581_v37, %v2580_v33 }
0x13fe   :  { %11763 = vmatmul.mubr.bf16.vlgmr.msra.gmra.mrb[40].mxu0 %v2582_v35 }
0x13ff   :  { %11797 = vmatprep.mubr.msk.f32.mxu0 %vm12844_vm3, %v12843_v50 }
0x14d1   :  { %v2686_v38 = vpop.f32.mrb[40].mxu0 }
0x14d2   :  { %v2687_v39 = vadd.f32 %v10561_v5, %v2686_v38  ;;  %v11764_v40 = vpop.f32.mrb[41].mxu0 }
0x14d3   :  { %v2689_v36 = vpop.f32.mrb[42].mxu0 }
0x14d4   :  { %v13414_v41 = vadd.f32 %v2687_v39, %v13343_v26  ;;  %v2690_v42 = vadd.f32 %v10561_v5, %v2689_v36  ;;  %v11765_v43 = vpop.f32.mrb[43].mxu0 }
0x14d6   :  { %v13417_v44 = vadd.f32 %v2690_v42, %v13346_v30  ;;  %v2698_v45 = vsel %vm165_vm2, %v13414_v41, 0.0 }
0x14d7   :  { %2699 = vadd.xlane.f32.xlu1 %v2698_v45 }
0x14d8   :  { %v2701_v46 = vsel %vm165_vm2, %v13417_v44, 0.0 }
0x14d9   :  { %2702 = vadd.xlane.f32.xlu0 %v2701_v46 }
0x1564   :  { %v2700_v21 = vpop.xlane.xlu1 %2699 }
0x1565   :  { %v2704_v27 = vmul.f32 0.03125, %v2700_v21 }
0x1566   :  { %v2703_v24 = vpop.xlane.xlu0 %2702 }
0x1567   :  { %v2706_v28 = vsub.f32 %v13414_v41, %v2704_v27  ;;  %v2705_v26 = vmul.f32 0.03125, %v2703_v24 }
0x1569   :  { %v2707_v47 = vsub.f32 %v13417_v44, %v2705_v26  ;;  %v2708_v48 = vmul.f32 %v2706_v28, %v2706_v28 }
0x156b   :  { %v2710_v30 = vsel %vm165_vm2, %v2708_v48, 0.0  ;;  %v2709_v49 = vmul.f32 %v2707_v47, %v2707_v47 }
0x156c   :  { %2711 = vadd.xlane.f32.xlu1 %v2710_v30 }
0x156d   :  { %v2713_v51 = vsel %vm165_vm2, %v2709_v49, 0.0 }
0x156e   :  { %2714 = vadd.xlane.f32.xlu0 %v2713_v51 }
0x15f9   :  { %v2712_v54 = vpop.xlane.xlu1 %2711 }
0x15fa   :  { %v2716_v55 = vmul.f32 0.03125, %v2712_v54 }
0x15fb   :  { %v2715_v56 = vpop.xlane.xlu0 %2714 }
0x15fc   :  { %v2718_v57 = vadd.f32 1e-05, %v2716_v55  ;;  %v2717_v58 = vmul.f32 0.03125, %v2715_v56 }
0x15fe   :  { %12681 = vrsqrt.f32 %v2718_v57  ;;  %v2719_v59 = vadd.f32 1e-05, %v2717_v58  ;;  %v12539_v57 = vld [vmem:[%s14721_s4 + $0x50] sm:$0xff]  }
0x1600   :  { %12683 = vrsqrt.f32 %v2719_v59 }
0x1608   :  { %v12682_v60 = vpop.eup %12681 }
0x1609   :  { %v2722_v62 = vmul.f32 %v12682_v60, %v2706_v28  ;;  %v12540_v60 = vld [vmem:[%s14722_s5 + $0x50] sm:$0xff]  }
0x160a   :  { %v12684_v63 = vpop.eup %12683 }
0x160b   :  { %v2728_v0 = vmul.f32 %v10572_v61, %v2722_v62  ;;  %v2723_v1 = vmul.f32 %v12684_v63, %v2707_v47  ;;  %v12541_v62 = vld [vmem:[%s14721_s4 + $0x58] sm:$0xff]  }
0x160c   :  { %v12542_v63 = vld [vmem:[%s14722_s5 + $0x58] sm:$0xff]  }
0x160d   :  { %v2729_v3 = vmul.f32 %v10572_v61, %v2723_v1  ;;  %v2734_v4 = vadd.f32 %v10573_v2, %v2728_v0  ;;  %v12543_v0 = vld [vmem:[%s14723_s6 + $0x50] sm:$0xff]   ;;  %v12544_v1 = vld [vmem:[%s14723_s6 + $0x58] sm:$0xff]  }
0x160f   :  { %v2735_v6 = vadd.f32 %v10573_v2, %v2729_v3 }
0x1611   :  { %v13444_v8 = vpack.c.bf16 %v2735_v6, %v2734_v4 }
0x1613   :  { %11771 = vmatmul.mubr.msk.bf16.vlgmr.msra.gmra.mrb[64].mxu1 %vm165_vm2, %v13444_v8 }
0x1614   :  { %11775 = vmatpush3.bf16.msra.mxu1 %v12535_v7  ;;  %11778 = vmatprep.mubr.msk.bf16.mxu1 %vm12844_vm3, %v12843_v50 }
0x1615   :  { %11776 = vmatprep.subr.bf16.mxu1 %v12843_v50 }
0x1618   :  { %11777 = vmatpush3.bf16.msra.mxu1 %v12536_v9 }
0x1619   :  { %11782 = vmatprep.subr.bf16.mxu1 %v12843_v50 }
0x161b   :  { %11779 = vmatmul.mubr.msk.bf16.vlgmr.msra.gmra.mrb[68].mxu1 %vm165_vm2, %v13444_v8 }
0x161c   :  { %11783 = vmatpush3.bf16.msra.mxu1 %v12537_v10  ;;  %11786 = vmatprep.mubr.msk.bf16.mxu1 %vm12844_vm3, %v12843_v50  ;;  %v10622_v10 = vld [vmem:[%s14727_s10 + $0x11] ss:$0 sm:$0xff] }
0x161d   :  { %11784 = vmatprep.subr.bf16.mxu1 %v12843_v50 }
0x1620   :  { %11785 = vmatpush3.bf16.msra.mxu1 %v12538_v11 }
0x1621   :  { %11790 = vmatprep.subr.mxu1 %v12843_v50 }
0x1623   :  { %11787 = vmatmul.mubr.msk.bf16.vlgmr.msra.gmra.mrb[72].mxu1 %vm165_vm2, %v13444_v8 }
0x1624   :  { %11792 = vmatprep.mubr.msk.f32.mxu1 %vm12844_vm3, %v12843_v50 }
0x16e6   :  { %v2797_v12 = vpop.f32.mrb[64].mxu1 }
0x16e7   :  { %v11772_v13 = vpop.f32.mrb[65].mxu1  ;;  %v2798_v29 = vadd.f32 %v10579_v18, %v2797_v12 }
0x16e8   :  { %v2800_v14 = vpop.f32.mrb[66].mxu1 }
0x16e9   :  { %v11773_v15 = vpop.f32.mrb[67].mxu1  ;;  %v2801_v31 = vadd.f32 %v10579_v18, %v2800_v14  ;;  %v10613_v14 = vld [vmem:[%s14727_s10 + $0xd] ss:$0 sm:$0xff] }
0x16ee   :  { %v2861_v17 = vpop.f32.mrb[68].mxu1 }
0x16ef   :  { %v2862_v19 = vadd.f32 %v10588_v16, %v2861_v17  ;;  %v11780_v20 = vpop.f32.mrb[69].mxu1 }
0x16f0   :  { %v2864_v22 = vpop.f32.mrb[70].mxu1 }
0x16f1   :  { %v2865_v23 = vadd.f32 %v10588_v16, %v2864_v22  ;;  %v11781_v25 = vpop.f32.mrb[71].mxu1  ;;  %11791 = vmatpush3.xpose.msk.msra.mxu1 %vm397_vm4, %v2862_v19  ;;  %v10631_v22 = vld [vmem:[%s14727_s10 + $0x15] ss:$0 sm:$0xff] }
0x16f2   :  { %11800 = vmatprep.subr.mxu1 %v12843_v50 }
0x16f3   :  { %11796 = vmatpush3.xpose.msk.msra.mxu0 %vm397_vm4, %v2865_v23 }
0x16f4   :  { %11793 = vmatmul.mubr.msk.f32.vlgmr.msra.gmra.mrb[58].mxu1 %vm397_vm4, %v2798_v29  ;;  %11805 = vmatprep.subr.mxu0 %v12843_v50 }
0x16f5   :  { %11802 = vmatprep.mubr.msk.f32.mxu1 %vm12844_vm3, %v12843_v50 }
0x16f6   :  { %v2925_v33 = vpop.f32.mrb[72].mxu1  ;;  %11798 = vmatmul.mubr.msk.f32.vlgmr.msra.gmra.mrb[44].mxu0 %vm397_vm4, %v2801_v31 }
0x16f7   :  { %v2926_v37 = vadd.f32 %v10597_v32, %v2925_v33  ;;  %v11788_v35 = vpop.f32.mrb[73].mxu1  ;;  %11807 = vmatprep.mubr.msk.f32.mxu0 %vm12844_vm3, %v12843_v50 }
0x16f8   :  { %v2928_v5 = vpop.f32.mrb[74].mxu1 }
0x16f9   :  { %v2929_v38 = vadd.f32 %v10597_v32, %v2928_v5  ;;  %v11789_v39 = vpop.f32.mrb[75].mxu1  ;;  %11801 = vmatpush3.msra.mxu1 %v2926_v37 }
0x16fa   :  { %11810 = vmatprep.subr.bf16.mxu1 %v12843_v50 }
0x16fb   :  { %11806 = vmatpush3.msra.mxu0 %v2929_v38 }
0x16fc   :  { %11818 = vmatprep.subr.bf16.mxu0 %v12843_v50 }
0x17c7   :  { %v3004_v40 = vpop.f32.mrb[58].mxu1 }
0x17c8   :  { %v3005_v36 = vadd.f32 %v3004_v40, %v13071_v34  ;;  %v11794_v42 = vpop.f32.mrb[59].mxu1 }
0x17c9   :  { %v3080_v43 = vpop.f32.mrb[44].mxu0 }
0x17ca   :  { %v3081_v45 = vadd.f32 %v3080_v43, %v13071_v34  ;;  %v11799_v46 = vpop.f32.mrb[45].mxu0  ;;  %v3084_v21 = vsel %vm397_vm4, %v3005_v36, -inf }
0x17cb   :  { %3085 = vmax.xlane.f32.xlu0 %v3084_v21 }
0x17cc   :  { %v3087_v27 = vsel %vm397_vm4, %v3081_v45, -inf }
0x17cd   :  { %3088 = vmax.xlane.f32.xlu1 %v3087_v27 }
0x1858   :  { %v3086_v24 = vpop.xlane.xlu0 %3085 }
0x1859   :  { %v3090_v28 = vsub.f32 %v3005_v36, %v3086_v24 }
0x185a   :  { %v3089_v26 = vpop.xlane.xlu1 %3088 }
0x185b   :  { %v3092_v47 = vmul.f32 1.442695, %v3090_v28  ;;  %v3091_v48 = vsub.f32 %v3081_v45, %v3089_v26 }
0x185d   :  { %12685 = vpow2.f32 %v3092_v47  ;;  %v3094_v30 = vmul.f32 1.442695, %v3091_v48 }
0x185f   :  { %12687 = vpow2.f32 %v3094_v30 }
0x1867   :  { %v12686_v49 = vpop.eup %12685 }
0x1868   :  { %v3096_v51 = vsel %vm397_vm4, %v12686_v49, 0.0 }
0x1869   :  { %v12688_v52 = vpop.eup %12687  ;;  %3097 = vadd.xlane.f32.xlu0 %v3096_v51 }
0x186a   :  { %v3099_v53 = vsel %vm397_vm4, %v12688_v52, 0.0 }
0x186b   :  { %3100 = vadd.xlane.f32.xlu1 %v3099_v53 }
0x18f6   :  { %v3098_v54 = vpop.xlane.xlu0 %3097 }
0x18f7   :  { %12689 = vrcp.f32 %v3098_v54 }
0x18f8   :  { %v3101_v55 = vpop.xlane.xlu1 %3100 }
0x18f9   :  { %12691 = vrcp.f32 %v3101_v55  ;;  %v10607_v55 = vld [vmem:[%s14724_s7 + $0x10] sm:$0xf] }
0x1901   :  { %v12690_v56 = vpop.eup %12689 }
0x1902   :  { %v3104_v58 = vmul.f32 %v12690_v56, %v12686_v49 }
0x1903   :  { %v12692_v59 = vpop.eup %12691 }
0x1904   :  { %v3105_v61 = vmul.f32 %v12692_v59, %v12688_v52  ;;  %11803 = vmatmul.mubr.msk.f32.vlgmr.msra.gmra.mrb[76].mxu1 %vm397_vm4, %v3104_v58  ;;  %v3818_v58 = vsel %vm1235_vm6, %v10607_v55, 0  ;;  %v12545_v59 = vld [vmem:[%s14722_s5 + $0x60] sm:$0xff]  }
0x1905   :  { %11811 = vmatpush3.bf16.msra.mxu1 %v12539_v57  ;;  %11814 = vmatprep.mubr.msk.bf16.mxu1 %vm12844_vm3, %v12843_v50 }
0x1906   :  { %11808 = vmatmul.mubr.msk.f32.vlgmr.msra.gmra.mrb[46].mxu0 %vm397_vm4, %v3105_v61  ;;  %11812 = vmatprep.subr.bf16.mxu1 %v12843_v50  ;;  %v10641_v61 = vld [vmem:[%s14724_s7 + $0x14] sm:$0xf] }
0x1907   :  { %11819 = vmatpush3.bf16.msra.mxu0 %v12540_v60  ;;  %11822 = vmatprep.mubr.msk.bf16.mxu0 %vm12844_vm3, %v12843_v50  ;;  %v12546_v60 = vld [vmem:[%s14722_s5 + $0x68] sm:$0xff]  }
0x1908   :  { %11820 = vmatprep.subr.bf16.mxu0 %v12843_v50 }
0x1909   :  { %11813 = vmatpush3.bf16.msra.mxu1 %v12541_v62  ;;  %v3771_v62 = vsel %vm1235_vm6, %v10641_v61, 0 }
0x190a   :  { %11826 = vmatprep.subr.bf16.mxu1 %v12843_v50 }
0x190b   :  { %11821 = vmatpush3.bf16.msra.mxu0 %v12542_v63 }
0x190c   :  { %11815 = vmatmul.mubr.msk.bf16.vlgmr.msra.gmra.mrb[80].mxu1 %vm165_vm2, %v13444_v8  ;;  %11834 = vmatprep.subr.mxu0 %v12843_v50 }
0x190d   :  { %11827 = vmatpush3.bf16.msra.mxu1 %v12543_v0  ;;  %11830 = vmatprep.mubr.msk.bf16.mxu1 %vm12844_vm3, %v12843_v50 }
0x190e   :  { %11823 = vmatmul.mubr.msk.bf16.vlgmr.msra.gmra.mrb[48].mxu0 %vm165_vm2, %v13444_v8  ;;  %11828 = vmatprep.subr.bf16.mxu1 %v12843_v50 }
0x190f   :  { %11836 = vmatprep.mubr.msk.f32.mxu0 %vm12844_vm3, %v12843_v50 }
0x1911   :  { %11829 = vmatpush3.bf16.msra.mxu1 %v12544_v1 }
0x1912   :  { %11844 = vmatprep.subr.mxu1 %v12843_v50 }
0x1914   :  { %11831 = vmatmul.mubr.msk.bf16.vlgmr.msra.gmra.mrb[84].mxu1 %vm165_vm2, %v13444_v8 }
0x1915   :  { %11846 = vmatprep.mubr.msk.f32.mxu1 %vm12844_vm3, %v12843_v50 }
0x19d7   :  { %v13540_v2 = vpop.f32.mrb[76].mxu1 }
0x19d8   :  { %v11804_v3 = vpop.f32.mrb[77].mxu1 }
0x19d9   :  { %v13542_v4 = vpop.f32.mrb[46].mxu0 }
0x19da   :  { %v3252_v6 = vpack.c.bf16 %v13542_v4, %v13540_v2  ;;  %v11809_v7 = vpop.f32.mrb[47].mxu0  ;;  %v12547_v2 = vld [vmem:[%s14721_s4 + $0x60] sm:$0xff]  }
0x19db   :  { %v12548_v7 = vld [vmem:[%s14721_s4 + $0x68] sm:$0xff]  }
0x19df   :  { %v3311_v9 = vpop.f32.mrb[80].mxu1 }
0x19e0   :  { %v11816_v11 = vpop.f32.mrb[81].mxu1  ;;  %v3312_v20 = vadd.f32 %v10613_v14, %v3311_v9 }
0x19e1   :  { %v3314_v12 = vpop.f32.mrb[82].mxu1  ;;  %v3374_v13 = vpop.f32.mrb[48].mxu0 }
0x19e2   :  { %v3375_v15 = vadd.f32 %v10622_v10, %v3374_v13  ;;  %v11817_v16 = vpop.f32.mrb[83].mxu1  ;;  %v11824_v17 = vpop.f32.mrb[49].mxu0  ;;  %v3315_v32 = vadd.f32 %v10613_v14, %v3314_v12  ;;  %v12549_v12 = vld [vmem:[%s14723_s6 + $0x60] sm:$0xff]   ;;  %v10658_v13 = vld [vmem:[%s14727_s10 + $0x12] ss:$0 sm:$0xff] }
0x19e3   :  { %v3377_v18 = vpop.f32.mrb[50].mxu0 }
0x19e4   :  { %v11825_v19 = vpop.f32.mrb[51].mxu0  ;;  %11835 = vmatpush3.xpose.msk.msra.mxu0 %vm397_vm4, %v3375_v15  ;;  %v3378_v23 = vadd.f32 %v10622_v10, %v3377_v18  ;;  %v12550_v15 = vld [vmem:[%s14723_s6 + $0x68] sm:$0xff]  }
0x19e5   :  { %11839 = vmatprep.subr.mxu0 %v12843_v50 }
0x19e7   :  { %v3437_v25 = vpop.f32.mrb[84].mxu1  ;;  %11837 = vmatmul.mubr.msk.f32.vlgmr.msra.gmra.mrb[52].mxu0 %vm397_vm4, %v3312_v20 }
0x19e8   :  { %v3438_v29 = vadd.f32 %v10631_v22, %v3437_v25  ;;  %v11832_v31 = vpop.f32.mrb[85].mxu1  ;;  %11840 = vmatpush3.xpose.msk.msra.mxu0 %vm397_vm4, %v3378_v23  ;;  %11841 = vmatprep.mubr.msk.f32.mxu0 %vm12844_vm3, %v12843_v50 }
0x19e9   :  { %v3440_v33 = vpop.f32.mrb[86].mxu1  ;;  %11849 = vmatprep.subr.mxu0 %v12843_v50 }
0x19ea   :  { %v3441_v37 = vadd.f32 %v10631_v22, %v3440_v33  ;;  %v11833_v35 = vpop.f32.mrb[87].mxu1  ;;  %11845 = vmatpush3.msra.mxu1 %v3438_v29  ;;  %v10649_v33 = vld [vmem:[%s14727_s10 + $0xe] ss:$0 sm:$0xff] }
0x19eb   :  { %11842 = vmatmul.mubr.msk.f32.vlgmr.msra.gmra.mrb[54].mxu0 %vm397_vm4, %v3315_v32  ;;  %11854 = vmatprep.subr.bf16.mxu1 %v12843_v50 }
0x19ec   :  { %11850 = vmatpush3.msra.mxu0 %v3441_v37  ;;  %11851 = vmatprep.mubr.msk.f32.mxu0 %vm12844_vm3, %v12843_v50 }
0x19ed   :  { %11860 = vmatprep.subr.bf16.mxu0 %v12843_v50 }
0x1aba   :  { %v3516_v5 = vpop.f32.mrb[52].mxu0 }
0x1abb   :  { %v3517_v38 = vadd.f32 %v3516_v5, %v13071_v34  ;;  %v11838_v39 = vpop.f32.mrb[53].mxu0 }
0x1abd   :  { %v3596_v40 = vsel %vm397_vm4, %v3517_v38, -inf }
0x1abe   :  { %3597 = vmax.xlane.f32.xlu1 %v3596_v40  ;;  %v3592_v36 = vpop.f32.mrb[54].mxu0 }
0x1abf   :  { %v3593_v42 = vadd.f32 %v3592_v36, %v13071_v34  ;;  %v11843_v43 = vpop.f32.mrb[55].mxu0  ;;  %v10667_v36 = vld [vmem:[%s14727_s10 + $0x16] ss:$0 sm:$0xff] }
0x1ac1   :  { %v3599_v45 = vsel %vm397_vm4, %v3593_v42, -inf }
0x1ac2   :  { %3600 = vmax.xlane.f32.xlu0 %v3599_v45 }
0x1b4b   :  { %v3598_v46 = vpop.xlane.xlu1 %3597 }
0x1b4c   :  { %v3602_v21 = vsub.f32 %v3517_v38, %v3598_v46 }
0x1b4e   :  { %v3604_v27 = vmul.f32 1.442695, %v3602_v21 }
0x1b4f   :  { %v3601_v24 = vpop.xlane.xlu0 %3600 }
0x1b50   :  { %12693 = vpow2.f32 %v3604_v27  ;;  %v3603_v28 = vsub.f32 %v3593_v42, %v3601_v24 }
0x1b52   :  { %v3606_v26 = vmul.f32 1.442695, %v3603_v28 }
0x1b54   :  { %12695 = vpow2.f32 %v3606_v26 }
0x1b5a   :  { %v12694_v47 = vpop.eup %12693 }
0x1b5b   :  { %v3608_v48 = vsel %vm397_vm4, %v12694_v47, 0.0 }
0x1b5c   :  { %3609 = vadd.xlane.f32.xlu1 %v3608_v48 }
0x1b5e   :  { %v12696_v30 = vpop.eup %12695 }
0x1b5f   :  { %v3611_v49 = vsel %vm397_vm4, %v12696_v30, 0.0 }
0x1b60   :  { %3612 = vadd.xlane.f32.xlu0 %v3611_v49 }
0x1be9   :  { %v3610_v51 = vpop.xlane.xlu1 %3609 }
0x1bea   :  { %12697 = vrcp.f32 %v3610_v51 }
0x1bed   :  { %v3613_v52 = vpop.xlane.xlu0 %3612 }
0x1bee   :  { %12699 = vrcp.f32 %v3613_v52 }
0x1bf4   :  { %v12698_v53 = vpop.eup %12697 }
0x1bf5   :  { %v3616_v54 = vmul.f32 %v12698_v53, %v12694_v47 }
0x1bf7   :  { %11847 = vmatmul.mubr.msk.f32.vlgmr.msra.gmra.mrb[78].mxu1 %vm397_vm4, %v3616_v54 }
0x1bf8   :  { %v12700_v56 = vpop.eup %12699  ;;  %11856 = vmatprep.mubr.msk.bf16.mxu1 %vm12844_vm3, %v12843_v50  ;;  %11855 = vmatpush3.bf16.msra.mxu1 %v3771_v62 }
0x1bf9   :  { %v3617_v57 = vmul.f32 %v12700_v56, %v12696_v30  ;;  %11866 = vmatprep.subr.bf16.mxu1 %v12843_v50 }
0x1bfb   :  { %11852 = vmatmul.mubr.msk.f32.vlgmr.msra.gmra.mrb[56].mxu0 %vm397_vm4, %v3617_v57 }
0x1bfc   :  { %11861 = vmatpush3.bf16.msra.mxu0 %v3818_v58  ;;  %11862 = vmatprep.mubr.msk.bf16.mxu0 %vm12844_vm3, %v12843_v50 }
0x1bfd   :  { %11874 = vmatprep.subr.bf16.mxu0 %v12843_v50 }
0x1bff   :  { %11863 = vmatmul.mubr.msk.bf16.vlgmr.msra.gmra.mrb[60].mxu0 %vm397_vm4, %v3252_v6 }
0x1c00   :  { %11875 = vmatpush3.bf16.msra.mxu0 %v12545_v59  ;;  %11878 = vmatprep.mubr.msk.bf16.mxu0 %vm12844_vm3, %v12843_v50 }
0x1c01   :  { %11876 = vmatprep.subr.bf16.mxu0 %v12843_v50 }
0x1c04   :  { %11877 = vmatpush3.bf16.msra.mxu0 %v12546_v60 }
0x1c05   :  { %11890 = vmatprep.subr.mxu0 %v12843_v50 }
0x1c07   :  { %11879 = vmatmul.mubr.msk.bf16.vlgmr.msra.gmra.mrb[64].mxu0 %vm165_vm2, %v13444_v8 }
0x1c08   :  { %11892 = vmatprep.mubr.msk.f32.mxu0 %vm12844_vm3, %v12843_v50 }
0x1cca   :  { %v3687_v63 = vpop.f32.mrb[78].mxu1 }
0x1ccb   :  { %v11848_v0 = vpop.f32.mrb[79].mxu1 }
0x1cce   :  { %v3760_v1 = vpop.f32.mrb[56].mxu0 }
0x1ccf   :  { %v3764_v3 = vpack.c.bf16 %v3760_v1, %v3687_v63  ;;  %v11853_v4 = vpop.f32.mrb[57].mxu0 }
0x1cd1   :  { %11857 = vmatmul.mubr.msk.bf16.vlgmr.msra.gmra.mrb[88].mxu1 %vm397_vm4, %v3764_v3  ;;  %v12551_v3 = vld [vmem:[%s14721_s4 + $0x70] sm:$0xff]  }
0x1cd2   :  { %v3854_v6 = vpop.f32.mrb[60].mxu0  ;;  %11867 = vmatpush3.bf16.msra.mxu1 %v12547_v2  ;;  %11870 = vmatprep.mubr.msk.bf16.mxu1 %vm12844_vm3, %v12843_v50 }
0x1cd3   :  { %v11864_v9 = vpop.f32.mrb[61].mxu0  ;;  %11868 = vmatprep.subr.bf16.mxu1 %v12843_v50 }
0x1cd4   :  { %v3857_v10 = vpop.f32.mrb[62].mxu0  ;;  %v12554_v9 = vld [vmem:[%s14723_s6 + $0x78] sm:$0xff]  }
0x1cd5   :  { %v11865_v11 = vpop.f32.mrb[63].mxu0 }
0x1cd6   :  { %11869 = vmatpush3.bf16.msra.mxu1 %v12548_v7  ;;  %v12553_v7 = vld [vmem:[%s14723_s6 + $0x70] sm:$0xff]  }
0x1cd7   :  { %11882 = vmatprep.subr.bf16.mxu1 %v12843_v50 }
0x1cd9   :  { %11871 = vmatmul.mubr.msk.bf16.vlgmr.msra.gmra.mrb[92].mxu1 %vm165_vm2, %v13444_v8 }
0x1cda   :  { %v3980_v14 = vpop.f32.mrb[64].mxu0  ;;  %11883 = vmatpush3.bf16.msra.mxu1 %v12549_v12  ;;  %11886 = vmatprep.mubr.msk.bf16.mxu1 %vm12844_vm3, %v12843_v50 }
0x1cdb   :  { %v3981_v16 = vadd.f32 %v10658_v13, %v3980_v14  ;;  %v11880_v17 = vpop.f32.mrb[65].mxu0  ;;  %11884 = vmatprep.subr.bf16.mxu1 %v12843_v50 }
0x1cdc   :  { %v3983_v18 = vpop.f32.mrb[66].mxu0 }
0x1cdd   :  { %v3984_v19 = vadd.f32 %v10658_v13, %v3983_v18  ;;  %v11881_v20 = vpop.f32.mrb[67].mxu0  ;;  %11891 = vmatpush3.xpose.msk.msra.mxu0 %vm397_vm4, %v3981_v16  ;;  %v12556_v18 = vld [vmem:[%s14722_s5 + $0x78] sm:$0xff]  }
0x1cde   :  { %11885 = vmatpush3.bf16.msra.mxu1 %v12550_v15  ;;  %11895 = vmatprep.subr.mxu0 %v12843_v50  ;;  %v12555_v15 = vld [vmem:[%s14722_s5 + $0x70] sm:$0xff]  }
0x1cdf   :  { %11900 = vmatprep.subr.mxu1 %v12843_v50 }
0x1ce1   :  { %11887 = vmatmul.mubr.msk.bf16.vlgmr.msra.gmra.mrb[96].mxu1 %vm165_vm2, %v13444_v8 }
0x1ce2   :  { %11902 = vmatprep.mubr.msk.f32.mxu1 %vm12844_vm3, %v12843_v50 }
0x1da4   :  { %v3807_v22 = vpop.f32.mrb[88].mxu1 }
0x1da5   :  { %v13639_v23 = vadd.f32 %v3854_v6, %v3807_v22  ;;  %v11858_v25 = vpop.f32.mrb[89].mxu1  ;;  %v12552_v6 = vld [vmem:[%s14721_s4 + $0x78] sm:$0xff]  }
0x1da6   :  { %v3810_v29 = vpop.f32.mrb[90].mxu1 }
0x1da7   :  { %v13641_v31 = vadd.f32 %v3857_v10, %v3810_v29  ;;  %v11859_v32 = vpop.f32.mrb[91].mxu1  ;;  %v10677_v10 = vld [vmem:[%s14724_s7 + $0x18] sm:$0xf]  ;;  %v10702_v29 = vld [vmem:[%s14727_s10 + $0x17] ss:$0 sm:$0xff] }
0x1da8   :  { %v4377_v11 = vsel %vm1235_vm6, %v10677_v10, 0  ;;  %v10712_v10 = vld [vmem:[%s14724_s7 + $0x1c] sm:$0xf] }
0x1dac   :  { %v3917_v37 = vpop.f32.mrb[92].mxu1 }
0x1dad   :  { %v3918_v35 = vadd.f32 %v10649_v33, %v3917_v37  ;;  %v11872_v5 = vpop.f32.mrb[93].mxu1 }
0x1dae   :  { %v3920_v38 = vpop.f32.mrb[94].mxu1 }
0x1daf   :  { %v11873_v39 = vpop.f32.mrb[95].mxu1  ;;  %11893 = vmatmul.mubr.msk.f32.vlgmr.msra.gmra.mrb[58].mxu0 %vm397_vm4, %v3918_v35  ;;  %v3921_v40 = vadd.f32 %v10649_v33, %v3920_v38 }
0x1db0   :  { %11896 = vmatpush3.xpose.msk.msra.mxu0 %vm397_vm4, %v3984_v19  ;;  %11897 = vmatprep.mubr.msk.f32.mxu0 %vm12844_vm3, %v12843_v50 }
0x1db1   :  { %11905 = vmatprep.subr.mxu0 %v12843_v50 }
0x1db3   :  { %11898 = vmatmul.mubr.msk.f32.vlgmr.msra.gmra.mrb[68].mxu0 %vm397_vm4, %v3921_v40 }
0x1db4   :  { %v4043_v42 = vpop.f32.mrb[96].mxu1  ;;  %11907 = vmatprep.mubr.msk.f32.mxu0 %vm12844_vm3, %v12843_v50 }
0x1db5   :  { %v4044_v43 = vadd.f32 %v10667_v36, %v4043_v42  ;;  %v11888_v45 = vpop.f32.mrb[97].mxu1 }
0x1db6   :  { %v4046_v46 = vpop.f32.mrb[98].mxu1  ;;  %v10693_v45 = vld [vmem:[%s14727_s10 + $0x13] ss:$0 sm:$0xff] }
0x1db7   :  { %v4047_v21 = vadd.f32 %v10667_v36, %v4046_v46  ;;  %v11889_v27 = vpop.f32.mrb[99].mxu1  ;;  %11901 = vmatpush3.msra.mxu1 %v4044_v43 }
0x1db8   :  { %11910 = vmatprep.subr.bf16.mxu1 %v12843_v50 }
0x1db9   :  { %11906 = vmatpush3.msra.mxu0 %v4047_v21  ;;  %v10684_v21 = vld [vmem:[%s14727_s10 + $0xf] ss:$0 sm:$0xff] }
0x1dba   :  { %11916 = vmatprep.subr.bf16.mxu0 %v12843_v50 }
0x1e82   :  { %v4122_v24 = vpop.f32.mrb[58].mxu0 }
0x1e83   :  { %v4123_v28 = vadd.f32 %v4122_v24, %v13071_v34  ;;  %v11894_v26 = vpop.f32.mrb[59].mxu0 }
0x1e85   :  { %v4202_v47 = vsel %vm397_vm4, %v4123_v28, -inf }
0x1e86   :  { %4203 = vmax.xlane.f32.xlu1 %v4202_v47  ;;  %v4198_v48 = vpop.f32.mrb[68].mxu0 }
0x1e87   :  { %v4199_v30 = vadd.f32 %v4198_v48, %v13071_v34  ;;  %v11899_v49 = vpop.f32.mrb[69].mxu0 }
0x1e89   :  { %v4205_v51 = vsel %vm397_vm4, %v4199_v30, -inf }
0x1e8a   :  { %4206 = vmax.xlane.f32.xlu0 %v4205_v51 }
0x1f13   :  { %v4204_v52 = vpop.xlane.xlu1 %4203 }
0x1f14   :  { %v4208_v53 = vsub.f32 %v4123_v28, %v4204_v52 }
0x1f16   :  { %v4210_v54 = vmul.f32 1.442695, %v4208_v53 }
0x1f17   :  { %v4207_v55 = vpop.xlane.xlu0 %4206 }
0x1f18   :  { %12701 = vpow2.f32 %v4210_v54  ;;  %v4209_v56 = vsub.f32 %v4199_v30, %v4207_v55 }
0x1f1a   :  { %v4212_v57 = vmul.f32 1.442695, %v4209_v56 }
0x1f1c   :  { %12703 = vpow2.f32 %v4212_v57 }
0x1f22   :  { %v12702_v58 = vpop.eup %12701 }
0x1f23   :  { %v4214_v59 = vsel %vm397_vm4, %v12702_v58, 0.0 }
0x1f24   :  { %4215 = vadd.xlane.f32.xlu1 %v4214_v59 }
0x1f26   :  { %v12704_v60 = vpop.eup %12703 }
0x1f27   :  { %v4217_v61 = vsel %vm397_vm4, %v12704_v60, 0.0 }
0x1f28   :  { %4218 = vadd.xlane.f32.xlu0 %v4217_v61 }
0x1fb1   :  { %v4216_v62 = vpop.xlane.xlu1 %4215 }
0x1fb2   :  { %12705 = vrcp.f32 %v4216_v62 }
0x1fb5   :  { %v4219_v63 = vpop.xlane.xlu0 %4218 }
0x1fb6   :  { %12707 = vrcp.f32 %v4219_v63 }
0x1fbc   :  { %v12706_v0 = vpop.eup %12705 }
0x1fbd   :  { %v4222_v1 = vmul.f32 %v12706_v0, %v12702_v58 }
0x1fbf   :  { %11903 = vmatmul.mubr.msk.f32.vlgmr.msra.gmra.mrb[100].mxu1 %vm397_vm4, %v4222_v1 }
0x1fc0   :  { %v12708_v2 = vpop.eup %12707  ;;  %11912 = vmatprep.mubr.msk.bf16.mxu1 %vm12844_vm3, %v12843_v50  ;;  %11911 = vmatpush3.bf16.msra.mxu1 %v4377_v11  ;;  %v4938_v11 = vsel %vm1235_vm6, %v10712_v10, 0 }
0x1fc1   :  { %v4223_v4 = vmul.f32 %v12708_v2, %v12704_v60  ;;  %11924 = vmatprep.subr.bf16.mxu1 %v12843_v50 }
0x1fc3   :  { %11908 = vmatmul.mubr.msk.f32.vlgmr.msra.gmra.mrb[70].mxu0 %vm397_vm4, %v4223_v4 }
0x1fc4   :  { %11917 = vmatpush3.bf16.msra.mxu0 %v12551_v3  ;;  %11920 = vmatprep.mubr.msk.bf16.mxu0 %vm12844_vm3, %v12843_v50 }
0x1fc5   :  { %11918 = vmatprep.subr.bf16.mxu0 %v12843_v50 }
0x1fc8   :  { %11919 = vmatpush3.bf16.msra.mxu0 %v12552_v6 }
0x1fc9   :  { %11932 = vmatprep.subr.bf16.mxu0 %v12843_v50 }
0x1fcb   :  { %11921 = vmatmul.mubr.msk.bf16.vlgmr.msra.gmra.mrb[72].mxu0 %vm165_vm2, %v13444_v8 }
0x1fcc   :  { %11933 = vmatpush3.bf16.msra.mxu0 %v12553_v7  ;;  %11936 = vmatprep.mubr.msk.bf16.mxu0 %vm12844_vm3, %v12843_v50 }
0x1fcd   :  { %11934 = vmatprep.subr.bf16.mxu0 %v12843_v50 }
0x1fd0   :  { %11935 = vmatpush3.bf16.msra.mxu0 %v12554_v9 }
0x1fd1   :  { %11950 = vmatprep.subr.mxu0 %v12843_v50 }
0x1fd3   :  { %11937 = vmatmul.mubr.msk.bf16.vlgmr.msra.gmra.mrb[76].mxu0 %vm165_vm2, %v13444_v8 }
0x1fd4   :  { %11952 = vmatprep.mubr.msk.f32.mxu0 %vm12844_vm3, %v12843_v50 }
0x2092   :  { %v4293_v12 = vpop.f32.mrb[100].mxu1 }
0x2093   :  { %v11904_v13 = vpop.f32.mrb[101].mxu1 }
0x2096   :  { %v4366_v14 = vpop.f32.mrb[70].mxu0 }
0x2097   :  { %v4370_v16 = vpack.c.bf16 %v4366_v14, %v4293_v12  ;;  %v11909_v17 = vpop.f32.mrb[71].mxu0 }
0x2099   :  { %11913 = vmatmul.mubr.msk.bf16.vlgmr.msra.gmra.mrb[104].mxu1 %vm397_vm4, %v4370_v16 }
0x209a   :  { %11925 = vmatpush3.bf16.msra.mxu1 %v12555_v15  ;;  %11928 = vmatprep.mubr.msk.bf16.mxu1 %vm12844_vm3, %v12843_v50 }
0x209b   :  { %11926 = vmatprep.subr.bf16.mxu1 %v12843_v50 }
0x209e   :  { %v4478_v19 = vpop.f32.mrb[72].mxu0  ;;  %11927 = vmatpush3.bf16.msra.mxu1 %v12556_v18 }
0x209f   :  { %v11922_v20 = vpop.f32.mrb[73].mxu0  ;;  %11940 = vmatprep.subr.mxu1 %v12843_v50  ;;  %v4479_v26 = vadd.f32 %v10684_v21, %v4478_v19 }
0x20a0   :  { %v4481_v22 = vpop.f32.mrb[74].mxu0  ;;  %v10715_v20 = vld [vmem:[%s14728_s11 + $0x4] ss:$0 sm:$0xff] }
0x20a1   :  { %v11923_v25 = vpop.f32.mrb[75].mxu0  ;;  %11929 = vmatmul.mubr.msk.bf16.vlgmr.msra.gmra.mrb[108].mxu1 %vm165_vm2, %v13444_v8  ;;  %v4482_v47 = vadd.f32 %v10684_v21, %v4481_v22  ;;  %v12557_v21 = vld [vmem:[%s14725_s8 + $0x10] sm:$0xff]  }
0x20a2   :  { %11942 = vmatprep.mubr.msk.f32.mxu1 %vm12844_vm3, %v12843_v50 }
0x20a6   :  { %v4604_v32 = vpop.f32.mrb[76].mxu0 }
0x20a7   :  { %v4605_v33 = vadd.f32 %v10702_v29, %v4604_v32  ;;  %v11938_v37 = vpop.f32.mrb[77].mxu0 }
0x20a8   :  { %v4607_v35 = vpop.f32.mrb[78].mxu0 }
0x20a9   :  { %v4608_v5 = vadd.f32 %v10702_v29, %v4607_v35  ;;  %v11939_v38 = vpop.f32.mrb[79].mxu0  ;;  %11951 = vmatpush3.msra.mxu0 %v4605_v33 }
0x20aa   :  { %11960 = vmatprep.subr.bf16.mxu0 %v12843_v50 }
0x216c   :  { %v4413_v39 = vpop.f32.mrb[104].mxu1 }
0x216d   :  { %v13720_v40 = vadd.f32 %v4413_v39, %v13639_v23  ;;  %v11914_v8 = vpop.f32.mrb[105].mxu1 }
0x216e   :  { %v4416_v36 = vpop.f32.mrb[106].mxu1 }
0x216f   :  { %v13723_v42 = vadd.f32 %v4416_v36, %v13641_v31  ;;  %v11915_v43 = vpop.f32.mrb[107].mxu1 }
0x2174   :  { %v4541_v46 = vpop.f32.mrb[108].mxu1 }
0x2175   :  { %v4542_v27 = vadd.f32 %v10693_v45, %v4541_v46  ;;  %v11930_v24 = vpop.f32.mrb[109].mxu1 }
0x2176   :  { %v4544_v28 = vpop.f32.mrb[110].mxu1 }
0x2177   :  { %v11931_v23 = vpop.f32.mrb[111].mxu1  ;;  %11941 = vmatpush3.xpose.msk.msra.mxu1 %vm397_vm4, %v4542_v27  ;;  %v4545_v31 = vadd.f32 %v10693_v45, %v4544_v28  ;;  %v12558_v27 = vld [vmem:[%s14725_s8 + $0x18] sm:$0xff]  }
0x2178   :  { %11945 = vmatprep.subr.mxu1 %v12843_v50 }
0x217a   :  { %11943 = vmatmul.mubr.msk.f32.vlgmr.msra.gmra.mrb[102].mxu1 %vm397_vm4, %v4479_v26 }
0x217b   :  { %11946 = vmatpush3.xpose.msk.msra.mxu1 %vm397_vm4, %v4545_v31  ;;  %11947 = vmatprep.mubr.msk.f32.mxu1 %vm12844_vm3, %v12843_v50 }
0x217c   :  { %11955 = vmatprep.subr.mxu1 %v12843_v50 }
0x217e   :  { %11948 = vmatmul.mubr.msk.f32.vlgmr.msra.gmra.mrb[112].mxu1 %vm397_vm4, %v4482_v47 }
0x217f   :  { %11956 = vmatpush3.msra.mxu1 %v4608_v5  ;;  %11957 = vmatprep.mubr.msk.f32.mxu1 %vm12844_vm3, %v12843_v50 }
0x2180   :  { %11966 = vmatprep.subr.bf16.mxu1 %v12843_v50 }
0x224d   :  { %v4683_v48 = vpop.f32.mrb[102].mxu1 }
0x224e   :  { %v4684_v30 = vadd.f32 %v4683_v48, %v13071_v34  ;;  %v11944_v49 = vpop.f32.mrb[103].mxu1 }
0x2250   :  { %v4763_v51 = vsel %vm397_vm4, %v4684_v30, -inf }
0x2251   :  { %4764 = vmax.xlane.f32.xlu1 %v4763_v51  ;;  %v4759_v52 = vpop.f32.mrb[112].mxu1 }
0x2252   :  { %v4760_v53 = vadd.f32 %v4759_v52, %v13071_v34  ;;  %v11949_v54 = vpop.f32.mrb[113].mxu1 }
0x2253   :  { %v10719_v54 = vld [vmem:[%s14720_s3 + $0x7] ss:$0 sm:$0xff] }
0x2254   :  { %v4766_v55 = vsel %vm397_vm4, %v4760_v53, -inf }
0x2255   :  { %4767 = vmax.xlane.f32.xlu0 %v4766_v55 }
0x22de   :  { %v4765_v56 = vpop.xlane.xlu1 %4764 }
0x22df   :  { %v4769_v57 = vsub.f32 %v4684_v30, %v4765_v56  ;;  %v10718_v30 = vld [vmem:[%s14720_s3 + $0x6] ss:$0 sm:$0xff] }
0x22e1   :  { %v4771_v58 = vmul.f32 1.442695, %v4769_v57 }
0x22e2   :  { %v4768_v59 = vpop.xlane.xlu0 %4767 }
0x22e3   :  { %12709 = vpow2.f32 %v4771_v58  ;;  %v4770_v60 = vsub.f32 %v4760_v53, %v4768_v59  ;;  %v12559_v59 = vld [vmem:[%s14726_s9 + $0x40] sm:$0xff]  }
0x22e5   :  { %v4773_v61 = vmul.f32 1.442695, %v4770_v60  ;;  %v12560_v60 = vld [vmem:[%s14726_s9 + $0x48] sm:$0xff]  }
0x22e7   :  { %12711 = vpow2.f32 %v4773_v61  ;;  %v12561_v61 = vld [vmem:[%s14726_s9 + $0x50] sm:$0xff]  }
0x22ed   :  { %v12710_v62 = vpop.eup %12709 }
0x22ee   :  { %v4775_v63 = vsel %vm397_vm4, %v12710_v62, 0.0 }
0x22ef   :  { %4776 = vadd.xlane.f32.xlu1 %v4775_v63  ;;  %v12563_v63 = vld [vmem:[%s14726_s9 + $0x60] sm:$0xff]  }
0x22f1   :  { %v12712_v0 = vpop.eup %12711 }
0x22f2   :  { %v4778_v1 = vsel %vm397_vm4, %v12712_v0, 0.0 }
0x22f3   :  { %4779 = vadd.xlane.f32.xlu0 %v4778_v1  ;;  %v12565_v1 = vld [vmem:[%s14726_s9 + $0x70] sm:$0xff]  }
0x237c   :  { %v4777_v2 = vpop.xlane.xlu1 %4776 }
0x237d   :  { %12713 = vrcp.f32 %v4777_v2  ;;  %v12566_v2 = vld [vmem:[%s14726_s9 + $0x78] sm:$0xff]  }
0x2380   :  { %v4780_v3 = vpop.xlane.xlu0 %4779 }
0x2381   :  { %12715 = vrcp.f32 %v4780_v3  ;;  %v10725_v3 = vld [vmem:[%s14728_s11 + $0x5] ss:$0 sm:$0xff] }
0x2387   :  { %v12714_v4 = vpop.eup %12713 }
0x2388   :  { %v4783_v6 = vmul.f32 %v12714_v4, %v12710_v62  ;;  %v12562_v62 = vld [vmem:[%s14726_s9 + $0x58] sm:$0xff]  }
0x238a   :  { %11953 = vmatmul.mubr.msk.f32.vlgmr.msra.gmra.mrb[80].mxu0 %vm397_vm4, %v4783_v6 }
0x238b   :  { %v12716_v7 = vpop.eup %12715  ;;  %11962 = vmatprep.mubr.msk.bf16.mxu0 %vm12844_vm3, %v12843_v50  ;;  %11961 = vmatpush3.bf16.msra.mxu0 %v4938_v11 }
0x238c   :  { %v4784_v9 = vmul.f32 %v12716_v7, %v12712_v0  ;;  %11974 = vmatprep.subr.bf16.mxu0 %v12843_v50  ;;  %v12564_v0 = vld [vmem:[%s14726_s9 + $0x68] sm:$0xff]  }
0x238e   :  { %11958 = vmatmul.mubr.msk.f32.vlgmr.msra.gmra.mrb[114].mxu1 %vm397_vm4, %v4784_v9 }
0x238f   :  { %11970 = vmatprep.mubr.msk.bf16.mxu1 %vm12844_vm3, %v12843_v50  ;;  %11967 = vmatpush3.bf16.msra.mxu1 %v12557_v21 }
0x2390   :  { %11968 = vmatprep.subr.bf16.mxu1 %v12843_v50 }
0x2393   :  { %11969 = vmatpush3.bf16.msra.mxu1 %v12558_v27 }
0x2394   :  { %11994 = vmatprep.subr.bf16.mxu1 %v12843_v50 }
0x245d   :  { %v4854_v12 = vpop.f32.mrb[80].mxu0 }
0x245e   :  { %v11954_v13 = vpop.f32.mrb[81].mxu0 }
0x2461   :  { %v4927_v14 = vpop.f32.mrb[114].mxu1 }
0x2462   :  { %v4931_v15 = vpack.c.bf16 %v4927_v14, %v4854_v12  ;;  %v11959_v16 = vpop.f32.mrb[115].mxu1 }
0x2464   :  { %11963 = vmatmul.mubr.msk.bf16.vlgmr.msra.gmra.mrb[84].mxu0 %vm397_vm4, %v4931_v15 }
0x2465   :  { %11990 = vmatprep.mubr.msk.bf16.mxu0 %vm12844_vm3, %v12843_v50  ;;  %11975 = vmatpush3.bf16.msra.mxu0 %v12559_v59 }
0x2466   :  { %11976 = vmatprep.subr.bf16.mxu0 %v12843_v50 }
0x2469   :  { %11977 = vmatpush3.bf16.msra.mxu0 %v12560_v60 }
0x246a   :  { %11978 = vmatprep.subr.bf16.mxu0 %v12843_v50 }
0x246d   :  { %11979 = vmatpush3.bf16.msra.mxu0 %v12561_v61  ;;  %v10757_v61 = vld [vmem:[%s14720_s3 + $0x8] ss:$0 sm:$0xff] }
0x246e   :  { %11980 = vmatprep.subr.bf16.mxu0 %v12843_v50 }
0x2471   :  { %11981 = vmatpush3.bf16.msra.mxu0 %v12562_v62 }
0x2472   :  { %11982 = vmatprep.subr.bf16.mxu0 %v12843_v50 }
0x2475   :  { %11983 = vmatpush3.bf16.msra.mxu0 %v12563_v63 }
0x2476   :  { %11984 = vmatprep.subr.bf16.mxu0 %v12843_v50 }
0x2479   :  { %11985 = vmatpush3.bf16.msra.mxu0 %v12564_v0 }
0x247a   :  { %11986 = vmatprep.subr.bf16.mxu0 %v12843_v50 }
0x247d   :  { %11987 = vmatpush3.bf16.msra.mxu0 %v12565_v1 }
0x247e   :  { %11988 = vmatprep.subr.bf16.mxu0 %v12843_v50 }
0x2481   :  { %11989 = vmatpush3.bf16.msra.mxu0 %v12566_v2  ;;  %v10758_v2 = vld [vmem:[%s14720_s3 + $0x9] ss:$0 sm:$0xff] }
0x2482   :  { %12023 = vmatprep.subr.mxu0 %v12843_v50 }
0x2537   :  { %v4974_v17 = vpop.f32.mrb[84].mxu0 }
0x2538   :  { %v4981_v18 = vadd.f32 %v4974_v17, %v13720_v40  ;;  %v11964_v19 = vpop.f32.mrb[85].mxu0 }
0x2539   :  { %v4977_v22 = vpop.f32.mrb[86].mxu0 }
0x253a   :  { %v4983_v25 = vadd.f32 %v4981_v18, %v13414_v41  ;;  %v4982_v29 = vadd.f32 %v4977_v22, %v13723_v42  ;;  %v11965_v32 = vpop.f32.mrb[87].mxu0 }
0x253c   :  { %v13768_v33 = vadd.f32 %v10715_v20, %v4983_v25  ;;  %v4984_v37 = vadd.f32 %v4982_v29, %v13417_v44 }
0x253e   :  { %v13771_v35 = vadd.f32 %v10715_v20, %v4984_v37  ;;  %v4995_v5 = vsel %vm165_vm2, %v13768_v33, 0.0 }
0x253f   :  { %4996 = vadd.xlane.f32.xlu1 %v4995_v5 }
0x2540   :  { %v4998_v38 = vsel %vm165_vm2, %v13771_v35, 0.0 }
0x2541   :  { %4999 = vadd.xlane.f32.xlu0 %v4998_v38 }
0x25cc   :  { %v4997_v39 = vpop.xlane.xlu1 %4996 }
0x25cd   :  { %v5001_v40 = vmul.f32 0.03125, %v4997_v39 }
0x25ce   :  { %v5000_v41 = vpop.xlane.xlu0 %4999 }
0x25cf   :  { %v5003_v8 = vsub.f32 %v13768_v33, %v5001_v40  ;;  %v5002_v36 = vmul.f32 0.03125, %v5000_v41 }
0x25d1   :  { %v5004_v42 = vsub.f32 %v13771_v35, %v5002_v36  ;;  %v5005_v43 = vmul.f32 %v5003_v8, %v5003_v8 }
0x25d3   :  { %v5007_v44 = vsel %vm165_vm2, %v5005_v43, 0.0  ;;  %v5006_v45 = vmul.f32 %v5004_v42, %v5004_v42 }
0x25d4   :  { %5008 = vadd.xlane.f32.xlu1 %v5007_v44 }
0x25d5   :  { %v5010_v46 = vsel %vm165_vm2, %v5006_v45, 0.0 }
0x25d6   :  { %5011 = vadd.xlane.f32.xlu0 %v5010_v46 }
0x2661   :  { %v5009_v24 = vpop.xlane.xlu1 %5008 }
0x2662   :  { %v5013_v28 = vmul.f32 0.03125, %v5009_v24 }
0x2663   :  { %v5012_v23 = vpop.xlane.xlu0 %5011 }
0x2664   :  { %v5015_v26 = vadd.f32 1e-05, %v5013_v28  ;;  %v5014_v31 = vmul.f32 0.03125, %v5012_v23 }
0x2666   :  { %12717 = vrsqrt.f32 %v5015_v26  ;;  %v5016_v47 = vadd.f32 1e-05, %v5014_v31 }
0x2668   :  { %12719 = vrsqrt.f32 %v5016_v47 }
0x2670   :  { %v12718_v48 = vpop.eup %12717 }
0x2671   :  { %v5019_v49 = vmul.f32 %v12718_v48, %v5003_v8  ;;  %v10746_v8 = vld [vmem:[%s14728_s11 + $0x6] ss:$0 sm:$0xff] }
0x2672   :  { %v12720_v51 = vpop.eup %12719 }
0x2673   :  { %v5025_v52 = vmul.f32 %v10718_v30, %v5019_v49  ;;  %v5020_v53 = vmul.f32 %v12720_v51, %v5004_v42 }
0x2675   :  { %v5026_v55 = vmul.f32 %v10718_v30, %v5020_v53  ;;  %v5031_v56 = vadd.f32 %v10719_v54, %v5025_v52  ;;  %v12567_v52 = vld [vmem:[%s14721_s4 + $0x80] sm:$0xff]   ;;  %v12568_v53 = vld [vmem:[%s14721_s4 + $0x88] sm:$0xff]  }
0x2677   :  { %v5032_v57 = vadd.f32 %v10719_v54, %v5026_v55 }
0x2679   :  { %v5033_v58 = vpack.c.bf16 %v5032_v57, %v5031_v56 }
0x267b   :  { %11971 = vmatmul.mubr.msk.bf16.vlgmr.msra.gmra.mrb[116].mxu1 %vm165_vm2, %v5033_v58 }
0x267c   :  { %11998 = vmatprep.mubr.msk.bf16.mxu1 %vm12844_vm3, %v12843_v50  ;;  %11995 = vmatpush3.bf16.msra.mxu1 %v12567_v52 }
0x267d   :  { %11996 = vmatprep.subr.bf16.mxu1 %v12843_v50 }
0x2680   :  { %11997 = vmatpush3.bf16.msra.mxu1 %v12568_v53 }
0x2681   :  { %12002 = vmatprep.subr.bf16.mxu1 %v12843_v50 }
0x274e   :  { %v5093_v4 = vpop.f32.mrb[116].mxu1 }
0x274f   :  { %v5094_v6 = vadd.f32 %v10725_v3, %v5093_v4  ;;  %v11972_v7 = vpop.f32.mrb[117].mxu1 }
0x2750   :  { %v5096_v9 = vpop.f32.mrb[118].mxu1  ;;  %v12569_v7 = vld [vmem:[%s14722_s5 + $0x80] sm:$0xff]  }
0x2751   :  { %v5102_v10 = vmul.f32 0.044715, %v5094_v6  ;;  %v5097_v11 = vadd.f32 %v10725_v3, %v5096_v9  ;;  %v11973_v12 = vpop.f32.mrb[119].mxu1  ;;  %v5100_v37 = vmul.f32 0.5, %v5094_v6 }
0x2752   :  { %v12572_v12 = vld [vmem:[%s14723_s6 + $0x88] sm:$0xff]  }
0x2753   :  { %v5104_v13 = vmul.f32 %v5102_v10, %v5094_v6  ;;  %v5103_v14 = vmul.f32 0.044715, %v5097_v11  ;;  %v5101_v5 = vmul.f32 0.5, %v5097_v11  ;;  %v12570_v10 = vld [vmem:[%s14722_s5 + $0x88] sm:$0xff]  }
0x2755   :  { %v5106_v15 = vmul.f32 %v5104_v13, %v5094_v6  ;;  %v5105_v16 = vmul.f32 %v5103_v14, %v5097_v11 }
0x2757   :  { %v5108_v17 = vadd.f32 %v5106_v15, %v5094_v6  ;;  %v5107_v18 = vmul.f32 %v5105_v16, %v5097_v11 }
0x2759   :  { %v5110_v19 = vmul.f32 0.7978845, %v5108_v17  ;;  %v5109_v20 = vadd.f32 %v5107_v18, %v5097_v11  ;;  %v12571_v11 = vld [vmem:[%s14723_s6 + $0x80] sm:$0xff]   ;;  %v10773_v17 = vld [vmem:[%s14727_s10 + $0x1c] ss:$0 sm:$0xff] }
0x275b   :  { %12721 = vtanh.f32 %v5110_v19  ;;  %v5111_v22 = vmul.f32 0.7978845, %v5109_v20  ;;  %v10764_v19 = vld [vmem:[%s14727_s10 + $0x18] ss:$0 sm:$0xff] }
0x275d   :  { %12723 = vtanh.f32 %v5111_v22 }
0x2765   :  { %v12722_v25 = vpop.eup %12721 }
0x2766   :  { %v5114_v29 = vadd.f32 1.0, %v12722_v25 }
0x2767   :  { %v12724_v32 = vpop.eup %12723 }
0x2768   :  { %v5115_v38 = vadd.f32 1.0, %v12724_v32  ;;  %v5116_v39 = vmul.f32 %v5114_v29, %v5100_v37 }
0x276a   :  { %v5117_v40 = vmul.f32 %v5115_v38, %v5101_v5  ;;  %v10782_v38 = vld [vmem:[%s14727_s10 + $0x20] ss:$0 sm:$0xff] }
0x276c   :  { %v5118_v41 = vpack.c.bf16 %v5117_v40, %v5116_v39 }
0x276e   :  { %11991 = vmatmul.mubr.bf16.vlgmr.msra.gmra.mrb[88].mxu0 %v5118_v41 }
0x276f   :  { %12025 = vmatprep.mubr.msk.f32.mxu0 %vm12844_vm3, %v12843_v50 }
0x2841   :  { %v5223_v36 = vpop.f32.mrb[88].mxu0 }
0x2842   :  { %v5224_v42 = vadd.f32 %v10746_v8, %v5223_v36  ;;  %v11992_v43 = vpop.f32.mrb[89].mxu0 }
0x2843   :  { %v5226_v44 = vpop.f32.mrb[90].mxu0 }
0x2844   :  { %v13839_v45 = vadd.f32 %v5224_v42, %v13768_v33  ;;  %v5227_v46 = vadd.f32 %v10746_v8, %v5226_v44  ;;  %v11993_v21 = vpop.f32.mrb[91].mxu0 }
0x2846   :  { %v13842_v27 = vadd.f32 %v5227_v46, %v13771_v35  ;;  %v5235_v24 = vsel %vm165_vm2, %v13839_v45, 0.0 }
0x2847   :  { %5236 = vadd.xlane.f32.xlu1 %v5235_v24 }
0x2848   :  { %v5238_v28 = vsel %vm165_vm2, %v13842_v27, 0.0 }
0x2849   :  { %5239 = vadd.xlane.f32.xlu0 %v5238_v28 }
0x28d4   :  { %v5237_v23 = vpop.xlane.xlu1 %5236 }
0x28d5   :  { %v5241_v26 = vmul.f32 0.03125, %v5237_v23 }
0x28d6   :  { %v5240_v31 = vpop.xlane.xlu0 %5239 }
0x28d7   :  { %v5243_v47 = vsub.f32 %v13839_v45, %v5241_v26  ;;  %v5242_v33 = vmul.f32 0.03125, %v5240_v31 }
0x28d9   :  { %v5244_v48 = vsub.f32 %v13842_v27, %v5242_v33  ;;  %v5245_v30 = vmul.f32 %v5243_v47, %v5243_v47 }
0x28db   :  { %v5247_v35 = vsel %vm165_vm2, %v5245_v30, 0.0  ;;  %v5246_v49 = vmul.f32 %v5244_v48, %v5244_v48 }
0x28dc   :  { %5248 = vadd.xlane.f32.xlu1 %v5247_v35 }
0x28dd   :  { %v5250_v51 = vsel %vm165_vm2, %v5246_v49, 0.0 }
0x28de   :  { %5251 = vadd.xlane.f32.xlu0 %v5250_v51 }
0x2969   :  { %v5249_v54 = vpop.xlane.xlu1 %5248 }
0x296a   :  { %v5253_v55 = vmul.f32 0.03125, %v5249_v54 }
0x296b   :  { %v5252_v56 = vpop.xlane.xlu0 %5251 }
0x296c   :  { %v5255_v57 = vadd.f32 1e-05, %v5253_v55  ;;  %v5254_v58 = vmul.f32 0.03125, %v5252_v56 }
0x296e   :  { %12725 = vrsqrt.f32 %v5255_v57  ;;  %v5256_v59 = vadd.f32 1e-05, %v5254_v58  ;;  %v12573_v57 = vld [vmem:[%s14721_s4 + $0x90] sm:$0xff]  }
0x2970   :  { %12727 = vrsqrt.f32 %v5256_v59 }
0x2978   :  { %v12726_v60 = vpop.eup %12725 }
0x2979   :  { %v5259_v62 = vmul.f32 %v12726_v60, %v5243_v47  ;;  %v12574_v60 = vld [vmem:[%s14722_s5 + $0x90] sm:$0xff]  }
0x297a   :  { %v12728_v63 = vpop.eup %12727 }
0x297b   :  { %v5265_v0 = vmul.f32 %v10757_v61, %v5259_v62  ;;  %v5260_v1 = vmul.f32 %v12728_v63, %v5244_v48  ;;  %v12575_v62 = vld [vmem:[%s14721_s4 + $0x98] sm:$0xff]  }
0x297c   :  { %v12576_v63 = vld [vmem:[%s14722_s5 + $0x98] sm:$0xff]  }
0x297d   :  { %v5266_v3 = vmul.f32 %v10757_v61, %v5260_v1  ;;  %v5271_v4 = vadd.f32 %v10758_v2, %v5265_v0  ;;  %v12577_v0 = vld [vmem:[%s14723_s6 + $0x90] sm:$0xff]   ;;  %v12578_v1 = vld [vmem:[%s14723_s6 + $0x98] sm:$0xff]  }
0x297f   :  { %v5272_v6 = vadd.f32 %v10758_v2, %v5266_v3 }
0x2981   :  { %v13869_v9 = vpack.c.bf16 %v5272_v6, %v5271_v4 }
0x2983   :  { %11999 = vmatmul.mubr.msk.bf16.vlgmr.msra.gmra.mrb[120].mxu1 %vm165_vm2, %v13869_v9 }
0x2984   :  { %12003 = vmatpush3.bf16.msra.mxu1 %v12569_v7  ;;  %12006 = vmatprep.mubr.msk.bf16.mxu1 %vm12844_vm3, %v12843_v50 }
0x2985   :  { %12004 = vmatprep.subr.bf16.mxu1 %v12843_v50 }
0x2988   :  { %12005 = vmatpush3.bf16.msra.mxu1 %v12570_v10 }
0x2989   :  { %12010 = vmatprep.subr.bf16.mxu1 %v12843_v50 }
0x298b   :  { %12007 = vmatmul.mubr.msk.bf16.vlgmr.msra.gmra.mrb[124].mxu1 %vm165_vm2, %v13869_v9 }
0x298c   :  { %12011 = vmatpush3.bf16.msra.mxu1 %v12571_v11  ;;  %12014 = vmatprep.mubr.msk.bf16.mxu1 %vm12844_vm3, %v12843_v50  ;;  %v10807_v11 = vld [vmem:[%s14727_s10 + $0x1d] ss:$0 sm:$0xff] }
0x298d   :  { %12012 = vmatprep.subr.bf16.mxu1 %v12843_v50 }
0x2990   :  { %12013 = vmatpush3.bf16.msra.mxu1 %v12572_v12 }
0x2991   :  { %12018 = vmatprep.subr.mxu1 %v12843_v50 }
0x2993   :  { %12015 = vmatmul.mubr.msk.bf16.vlgmr.msra.gmra.mrb[128].mxu1 %vm165_vm2, %v13869_v9 }
0x2994   :  { %12020 = vmatprep.mubr.msk.f32.mxu1 %vm12844_vm3, %v12843_v50 }
0x2a56   :  { %v5334_v13 = vpop.f32.mrb[120].mxu1 }
0x2a57   :  { %v12000_v14 = vpop.f32.mrb[121].mxu1  ;;  %v5335_v37 = vadd.f32 %v10764_v19, %v5334_v13 }
0x2a58   :  { %v5337_v15 = vpop.f32.mrb[122].mxu1 }
0x2a59   :  { %v12001_v16 = vpop.f32.mrb[123].mxu1  ;;  %v5338_v5 = vadd.f32 %v10764_v19, %v5337_v15  ;;  %v10798_v15 = vld [vmem:[%s14727_s10 + $0x19] ss:$0 sm:$0xff] }
0x2a5e   :  { %v5398_v18 = vpop.f32.mrb[124].mxu1 }
0x2a5f   :  { %v5399_v20 = vadd.f32 %v10773_v17, %v5398_v18  ;;  %v12008_v22 = vpop.f32.mrb[125].mxu1 }
0x2a60   :  { %v5401_v25 = vpop.f32.mrb[126].mxu1 }
0x2a61   :  { %v5402_v29 = vadd.f32 %v10773_v17, %v5401_v25  ;;  %v12009_v32 = vpop.f32.mrb[127].mxu1  ;;  %12019 = vmatpush3.xpose.msk.msra.mxu1 %vm397_vm4, %v5399_v20  ;;  %v10816_v25 = vld [vmem:[%s14727_s10 + $0x21] ss:$0 sm:$0xff] }
0x2a62   :  { %12028 = vmatprep.subr.mxu1 %v12843_v50 }
0x2a63   :  { %12024 = vmatpush3.xpose.msk.msra.mxu0 %vm397_vm4, %v5402_v29 }
0x2a64   :  { %12021 = vmatmul.mubr.msk.f32.vlgmr.msra.gmra.mrb[132].mxu1 %vm397_vm4, %v5335_v37  ;;  %12033 = vmatprep.subr.mxu0 %v12843_v50 }
0x2a65   :  { %12030 = vmatprep.mubr.msk.f32.mxu1 %vm12844_vm3, %v12843_v50 }
0x2a66   :  { %v5462_v39 = vpop.f32.mrb[128].mxu1  ;;  %12026 = vmatmul.mubr.msk.f32.vlgmr.msra.gmra.mrb[82].mxu0 %vm397_vm4, %v5338_v5 }
0x2a67   :  { %v5463_v40 = vadd.f32 %v10782_v38, %v5462_v39  ;;  %v12016_v41 = vpop.f32.mrb[129].mxu1  ;;  %12035 = vmatprep.mubr.msk.f32.mxu0 %vm12844_vm3, %v12843_v50 }
0x2a68   :  { %v5465_v8 = vpop.f32.mrb[130].mxu1 }
0x2a69   :  { %v5466_v36 = vadd.f32 %v10782_v38, %v5465_v8  ;;  %v12017_v42 = vpop.f32.mrb[131].mxu1  ;;  %12029 = vmatpush3.msra.mxu1 %v5463_v40 }
0x2a6a   :  { %12038 = vmatprep.subr.bf16.mxu1 %v12843_v50 }
0x2a6b   :  { %12034 = vmatpush3.msra.mxu0 %v5466_v36 }
0x2a6c   :  { %12046 = vmatprep.subr.bf16.mxu0 %v12843_v50 }
0x2b37   :  { %v5541_v43 = vpop.f32.mrb[132].mxu1 }
0x2b38   :  { %v5542_v44 = vadd.f32 %v5541_v43, %v13071_v34  ;;  %v12022_v46 = vpop.f32.mrb[133].mxu1 }
0x2b39   :  { %v5617_v21 = vpop.f32.mrb[82].mxu0 }
0x2b3a   :  { %v5618_v24 = vadd.f32 %v5617_v21, %v13071_v34  ;;  %v12027_v28 = vpop.f32.mrb[83].mxu0  ;;  %v5621_v23 = vsel %vm397_vm4, %v5542_v44, -inf }
0x2b3b   :  { %5622 = vmax.xlane.f32.xlu0 %v5621_v23 }
0x2b3c   :  { %v5624_v26 = vsel %vm397_vm4, %v5618_v24, -inf }
0x2b3d   :  { %5625 = vmax.xlane.f32.xlu1 %v5624_v26 }
0x2bc8   :  { %v5623_v31 = vpop.xlane.xlu0 %5622 }
0x2bc9   :  { %v5627_v47 = vsub.f32 %v5542_v44, %v5623_v31 }
0x2bca   :  { %v5626_v33 = vpop.xlane.xlu1 %5625 }
0x2bcb   :  { %v5629_v48 = vmul.f32 1.442695, %v5627_v47  ;;  %v5628_v30 = vsub.f32 %v5618_v24, %v5626_v33 }
0x2bcd   :  { %12729 = vpow2.f32 %v5629_v48  ;;  %v5631_v35 = vmul.f32 1.442695, %v5628_v30 }
0x2bcf   :  { %12731 = vpow2.f32 %v5631_v35 }
0x2bd7   :  { %v12730_v49 = vpop.eup %12729 }
0x2bd8   :  { %v5633_v51 = vsel %vm397_vm4, %v12730_v49, 0.0 }
0x2bd9   :  { %v12732_v52 = vpop.eup %12731  ;;  %5634 = vadd.xlane.f32.xlu0 %v5633_v51 }
0x2bda   :  { %v5636_v53 = vsel %vm397_vm4, %v12732_v52, 0.0 }
0x2bdb   :  { %5637 = vadd.xlane.f32.xlu1 %v5636_v53 }
0x2c66   :  { %v5635_v54 = vpop.xlane.xlu0 %5634 }
0x2c67   :  { %12733 = vrcp.f32 %v5635_v54 }
0x2c68   :  { %v5638_v55 = vpop.xlane.xlu1 %5637 }
0x2c69   :  { %12735 = vrcp.f32 %v5638_v55  ;;  %v10792_v55 = vld [vmem:[%s14724_s7 + $0x20] sm:$0xf] }
0x2c71   :  { %v12734_v56 = vpop.eup %12733 }
0x2c72   :  { %v5641_v58 = vmul.f32 %v12734_v56, %v12730_v49 }
0x2c73   :  { %v12736_v59 = vpop.eup %12735 }
0x2c74   :  { %v5642_v61 = vmul.f32 %v12736_v59, %v12732_v52  ;;  %12031 = vmatmul.mubr.msk.f32.vlgmr.msra.gmra.mrb[134].mxu1 %vm397_vm4, %v5641_v58  ;;  %v6355_v58 = vsel %vm1235_vm6, %v10792_v55, 0  ;;  %v12579_v59 = vld [vmem:[%s14722_s5 + $0xa0] sm:$0xff]  }
0x2c75   :  { %12039 = vmatpush3.bf16.msra.mxu1 %v12573_v57  ;;  %12042 = vmatprep.mubr.msk.bf16.mxu1 %vm12844_vm3, %v12843_v50 }
0x2c76   :  { %12036 = vmatmul.mubr.msk.f32.vlgmr.msra.gmra.mrb[92].mxu0 %vm397_vm4, %v5642_v61  ;;  %12040 = vmatprep.subr.bf16.mxu1 %v12843_v50  ;;  %v10826_v61 = vld [vmem:[%s14724_s7 + $0x24] sm:$0xf] }
0x2c77   :  { %12047 = vmatpush3.bf16.msra.mxu0 %v12574_v60  ;;  %12050 = vmatprep.mubr.msk.bf16.mxu0 %vm12844_vm3, %v12843_v50  ;;  %v12580_v60 = vld [vmem:[%s14722_s5 + $0xa8] sm:$0xff]  }
0x2c78   :  { %12048 = vmatprep.subr.bf16.mxu0 %v12843_v50 }
0x2c79   :  { %12041 = vmatpush3.bf16.msra.mxu1 %v12575_v62  ;;  %v6308_v62 = vsel %vm1235_vm6, %v10826_v61, 0 }
0x2c7a   :  { %12054 = vmatprep.subr.bf16.mxu1 %v12843_v50 }
0x2c7b   :  { %12049 = vmatpush3.bf16.msra.mxu0 %v12576_v63 }
0x2c7c   :  { %12043 = vmatmul.mubr.msk.bf16.vlgmr.msra.gmra.mrb[136].mxu1 %vm165_vm2, %v13869_v9  ;;  %12062 = vmatprep.subr.mxu0 %v12843_v50 }
0x2c7d   :  { %12055 = vmatpush3.bf16.msra.mxu1 %v12577_v0  ;;  %12058 = vmatprep.mubr.msk.bf16.mxu1 %vm12844_vm3, %v12843_v50 }
0x2c7e   :  { %12051 = vmatmul.mubr.msk.bf16.vlgmr.msra.gmra.mrb[96].mxu0 %vm165_vm2, %v13869_v9  ;;  %12056 = vmatprep.subr.bf16.mxu1 %v12843_v50 }
0x2c7f   :  { %12064 = vmatprep.mubr.msk.f32.mxu0 %vm12844_vm3, %v12843_v50 }
0x2c81   :  { %12057 = vmatpush3.bf16.msra.mxu1 %v12578_v1 }
0x2c82   :  { %12072 = vmatprep.subr.mxu1 %v12843_v50 }
0x2c84   :  { %12059 = vmatmul.mubr.msk.bf16.vlgmr.msra.gmra.mrb[140].mxu1 %vm165_vm2, %v13869_v9 }
0x2c85   :  { %12074 = vmatprep.mubr.msk.f32.mxu1 %vm12844_vm3, %v12843_v50 }
0x2d47   :  { %v13965_v2 = vpop.f32.mrb[134].mxu1 }
0x2d48   :  { %v12032_v3 = vpop.f32.mrb[135].mxu1 }
0x2d49   :  { %v13967_v4 = vpop.f32.mrb[92].mxu0 }
0x2d4a   :  { %v5789_v6 = vpack.c.bf16 %v13967_v4, %v13965_v2  ;;  %v12037_v7 = vpop.f32.mrb[93].mxu0  ;;  %v12581_v2 = vld [vmem:[%s14721_s4 + $0xa0] sm:$0xff]  }
0x2d4b   :  { %v12582_v7 = vld [vmem:[%s14721_s4 + $0xa8] sm:$0xff]  }
0x2d4f   :  { %v5848_v10 = vpop.f32.mrb[136].mxu1 }
0x2d50   :  { %v12044_v12 = vpop.f32.mrb[137].mxu1  ;;  %v5849_v22 = vadd.f32 %v10798_v15, %v5848_v10 }
0x2d51   :  { %v5851_v13 = vpop.f32.mrb[138].mxu1  ;;  %v5911_v14 = vpop.f32.mrb[96].mxu0 }
0x2d52   :  { %v5912_v16 = vadd.f32 %v10807_v11, %v5911_v14  ;;  %v12045_v17 = vpop.f32.mrb[139].mxu1  ;;  %v12052_v18 = vpop.f32.mrb[97].mxu0  ;;  %v5852_v38 = vadd.f32 %v10798_v15, %v5851_v13  ;;  %v12583_v13 = vld [vmem:[%s14723_s6 + $0xa0] sm:$0xff]   ;;  %v10843_v14 = vld [vmem:[%s14727_s10 + $0x1e] ss:$0 sm:$0xff] }
0x2d53   :  { %v5914_v19 = vpop.f32.mrb[98].mxu0 }
0x2d54   :  { %v12053_v20 = vpop.f32.mrb[99].mxu0  ;;  %12063 = vmatpush3.xpose.msk.msra.mxu0 %vm397_vm4, %v5912_v16  ;;  %v5915_v29 = vadd.f32 %v10807_v11, %v5914_v19  ;;  %v12584_v16 = vld [vmem:[%s14723_s6 + $0xa8] sm:$0xff]  }
0x2d55   :  { %12067 = vmatprep.subr.mxu0 %v12843_v50 }
0x2d57   :  { %v5974_v32 = vpop.f32.mrb[140].mxu1  ;;  %12065 = vmatmul.mubr.msk.f32.vlgmr.msra.gmra.mrb[94].mxu0 %vm397_vm4, %v5849_v22 }
0x2d58   :  { %v5975_v37 = vadd.f32 %v10816_v25, %v5974_v32  ;;  %v12060_v5 = vpop.f32.mrb[141].mxu1  ;;  %12068 = vmatpush3.xpose.msk.msra.mxu0 %vm397_vm4, %v5915_v29  ;;  %12069 = vmatprep.mubr.msk.f32.mxu0 %vm12844_vm3, %v12843_v50 }
0x2d59   :  { %v5977_v39 = vpop.f32.mrb[142].mxu1  ;;  %12077 = vmatprep.subr.mxu0 %v12843_v50 }
0x2d5a   :  { %v5978_v40 = vadd.f32 %v10816_v25, %v5977_v39  ;;  %v12061_v41 = vpop.f32.mrb[143].mxu1  ;;  %12073 = vmatpush3.msra.mxu1 %v5975_v37  ;;  %v10834_v39 = vld [vmem:[%s14727_s10 + $0x1a] ss:$0 sm:$0xff] }
0x2d5b   :  { %12070 = vmatmul.mubr.msk.f32.vlgmr.msra.gmra.mrb[100].mxu0 %vm397_vm4, %v5852_v38  ;;  %12082 = vmatprep.subr.bf16.mxu1 %v12843_v50 }
0x2d5c   :  { %12078 = vmatpush3.msra.mxu0 %v5978_v40  ;;  %12079 = vmatprep.mubr.msk.f32.mxu0 %vm12844_vm3, %v12843_v50 }
0x2d5d   :  { %12088 = vmatprep.subr.bf16.mxu0 %v12843_v50 }
0x2e2a   :  { %v6053_v8 = vpop.f32.mrb[94].mxu0 }
0x2e2b   :  { %v6054_v36 = vadd.f32 %v6053_v8, %v13071_v34  ;;  %v12066_v42 = vpop.f32.mrb[95].mxu0 }
0x2e2d   :  { %v6133_v43 = vsel %vm397_vm4, %v6054_v36, -inf }
0x2e2e   :  { %6134 = vmax.xlane.f32.xlu1 %v6133_v43  ;;  %v6129_v44 = vpop.f32.mrb[100].mxu0 }
0x2e2f   :  { %v6130_v46 = vadd.f32 %v6129_v44, %v13071_v34  ;;  %v12071_v21 = vpop.f32.mrb[101].mxu0  ;;  %v10852_v44 = vld [vmem:[%s14727_s10 + $0x22] ss:$0 sm:$0xff] }
0x2e31   :  { %v6136_v24 = vsel %vm397_vm4, %v6130_v46, -inf }
0x2e32   :  { %6137 = vmax.xlane.f32.xlu0 %v6136_v24 }
0x2ebb   :  { %v6135_v28 = vpop.xlane.xlu1 %6134 }
0x2ebc   :  { %v6139_v23 = vsub.f32 %v6054_v36, %v6135_v28 }
0x2ebe   :  { %v6141_v26 = vmul.f32 1.442695, %v6139_v23 }
0x2ebf   :  { %v6138_v31 = vpop.xlane.xlu0 %6137 }
0x2ec0   :  { %12737 = vpow2.f32 %v6141_v26  ;;  %v6140_v47 = vsub.f32 %v6130_v46, %v6138_v31 }
0x2ec2   :  { %v6143_v33 = vmul.f32 1.442695, %v6140_v47 }
0x2ec4   :  { %12739 = vpow2.f32 %v6143_v33 }
0x2eca   :  { %v12738_v48 = vpop.eup %12737 }
0x2ecb   :  { %v6145_v30 = vsel %vm397_vm4, %v12738_v48, 0.0 }
0x2ecc   :  { %6146 = vadd.xlane.f32.xlu1 %v6145_v30 }
0x2ece   :  { %v12740_v35 = vpop.eup %12739 }
0x2ecf   :  { %v6148_v49 = vsel %vm397_vm4, %v12740_v35, 0.0 }
0x2ed0   :  { %6149 = vadd.xlane.f32.xlu0 %v6148_v49 }
0x2f59   :  { %v6147_v51 = vpop.xlane.xlu1 %6146 }
0x2f5a   :  { %12741 = vrcp.f32 %v6147_v51 }
0x2f5d   :  { %v6150_v52 = vpop.xlane.xlu0 %6149 }
0x2f5e   :  { %12743 = vrcp.f32 %v6150_v52 }
0x2f64   :  { %v12742_v53 = vpop.eup %12741 }
0x2f65   :  { %v6153_v54 = vmul.f32 %v12742_v53, %v12738_v48 }
0x2f67   :  { %12075 = vmatmul.mubr.msk.f32.vlgmr.msra.gmra.mrb[144].mxu1 %vm397_vm4, %v6153_v54 }
0x2f68   :  { %v12744_v56 = vpop.eup %12743  ;;  %12084 = vmatprep.mubr.msk.bf16.mxu1 %vm12844_vm3, %v12843_v50  ;;  %12083 = vmatpush3.bf16.msra.mxu1 %v6308_v62 }
0x2f69   :  { %v6154_v57 = vmul.f32 %v12744_v56, %v12740_v35  ;;  %12094 = vmatprep.subr.bf16.mxu1 %v12843_v50 }
0x2f6b   :  { %12080 = vmatmul.mubr.msk.f32.vlgmr.msra.gmra.mrb[102].mxu0 %vm397_vm4, %v6154_v57 }
0x2f6c   :  { %12089 = vmatpush3.bf16.msra.mxu0 %v6355_v58  ;;  %12090 = vmatprep.mubr.msk.bf16.mxu0 %vm12844_vm3, %v12843_v50 }
0x2f6d   :  { %12102 = vmatprep.subr.bf16.mxu0 %v12843_v50 }
0x2f6f   :  { %12091 = vmatmul.mubr.msk.bf16.vlgmr.msra.gmra.mrb[104].mxu0 %vm397_vm4, %v5789_v6 }
0x2f70   :  { %12103 = vmatpush3.bf16.msra.mxu0 %v12579_v59  ;;  %12106 = vmatprep.mubr.msk.bf16.mxu0 %vm12844_vm3, %v12843_v50 }
0x2f71   :  { %12104 = vmatprep.subr.bf16.mxu0 %v12843_v50 }
0x2f74   :  { %12105 = vmatpush3.bf16.msra.mxu0 %v12580_v60 }
0x2f75   :  { %12118 = vmatprep.subr.mxu0 %v12843_v50 }
0x2f77   :  { %12107 = vmatmul.mubr.msk.bf16.vlgmr.msra.gmra.mrb[108].mxu0 %vm165_vm2, %v13869_v9 }
0x2f78   :  { %12120 = vmatprep.mubr.msk.f32.mxu0 %vm12844_vm3, %v12843_v50 }
0x303a   :  { %v6224_v63 = vpop.f32.mrb[144].mxu1 }
0x303b   :  { %v12076_v0 = vpop.f32.mrb[145].mxu1 }
0x303e   :  { %v6297_v1 = vpop.f32.mrb[102].mxu0 }
0x303f   :  { %v6301_v3 = vpack.c.bf16 %v6297_v1, %v6224_v63  ;;  %v12081_v4 = vpop.f32.mrb[103].mxu0 }
0x3041   :  { %12085 = vmatmul.mubr.msk.bf16.vlgmr.msra.gmra.mrb[148].mxu1 %vm397_vm4, %v6301_v3  ;;  %v12585_v3 = vld [vmem:[%s14721_s4 + $0xb0] sm:$0xff]  }
0x3042   :  { %v6391_v6 = vpop.f32.mrb[104].mxu0  ;;  %12095 = vmatpush3.bf16.msra.mxu1 %v12581_v2  ;;  %12098 = vmatprep.mubr.msk.bf16.mxu1 %vm12844_vm3, %v12843_v50 }
0x3043   :  { %v12092_v10 = vpop.f32.mrb[105].mxu0  ;;  %12096 = vmatprep.subr.bf16.mxu1 %v12843_v50 }
0x3044   :  { %v6394_v11 = vpop.f32.mrb[106].mxu0  ;;  %v12588_v10 = vld [vmem:[%s14723_s6 + $0xb8] sm:$0xff]  }
0x3045   :  { %v12093_v12 = vpop.f32.mrb[107].mxu0 }
0x3046   :  { %12097 = vmatpush3.bf16.msra.mxu1 %v12582_v7  ;;  %v12587_v7 = vld [vmem:[%s14723_s6 + $0xb0] sm:$0xff]  }
0x3047   :  { %12110 = vmatprep.subr.bf16.mxu1 %v12843_v50 }
0x3049   :  { %12099 = vmatmul.mubr.msk.bf16.vlgmr.msra.gmra.mrb[152].mxu1 %vm165_vm2, %v13869_v9 }
0x304a   :  { %v6517_v15 = vpop.f32.mrb[108].mxu0  ;;  %12111 = vmatpush3.bf16.msra.mxu1 %v12583_v13  ;;  %12114 = vmatprep.mubr.msk.bf16.mxu1 %vm12844_vm3, %v12843_v50 }
0x304b   :  { %v6518_v17 = vadd.f32 %v10843_v14, %v6517_v15  ;;  %v12108_v18 = vpop.f32.mrb[109].mxu0  ;;  %12112 = vmatprep.subr.bf16.mxu1 %v12843_v50 }
0x304c   :  { %v6520_v19 = vpop.f32.mrb[110].mxu0 }
0x304d   :  { %v6521_v20 = vadd.f32 %v10843_v14, %v6520_v19  ;;  %v12109_v22 = vpop.f32.mrb[111].mxu0  ;;  %12119 = vmatpush3.xpose.msk.msra.mxu0 %vm397_vm4, %v6518_v17  ;;  %v12590_v19 = vld [vmem:[%s14722_s5 + $0xb8] sm:$0xff]  }
0x304e   :  { %12113 = vmatpush3.bf16.msra.mxu1 %v12584_v16  ;;  %12123 = vmatprep.subr.mxu0 %v12843_v50  ;;  %v12589_v16 = vld [vmem:[%s14722_s5 + $0xb0] sm:$0xff]  }
0x304f   :  { %12128 = vmatprep.subr.mxu1 %v12843_v50 }
0x3051   :  { %12115 = vmatmul.mubr.msk.bf16.vlgmr.msra.gmra.mrb[156].mxu1 %vm165_vm2, %v13869_v9 }
0x3052   :  { %12130 = vmatprep.mubr.msk.f32.mxu1 %vm12844_vm3, %v12843_v50 }
0x3114   :  { %v6344_v25 = vpop.f32.mrb[148].mxu1 }
0x3115   :  { %v14064_v29 = vadd.f32 %v6391_v6, %v6344_v25  ;;  %v12086_v32 = vpop.f32.mrb[149].mxu1  ;;  %v12586_v6 = vld [vmem:[%s14721_s4 + $0xb8] sm:$0xff]  }
0x3116   :  { %v6347_v37 = vpop.f32.mrb[150].mxu1 }
0x3117   :  { %v14066_v5 = vadd.f32 %v6394_v11, %v6347_v37  ;;  %v12087_v38 = vpop.f32.mrb[151].mxu1  ;;  %v10862_v11 = vld [vmem:[%s14724_s7 + $0x28] sm:$0xf]  ;;  %v10887_v37 = vld [vmem:[%s14727_s10 + $0x23] ss:$0 sm:$0xff] }
0x3118   :  { %v6914_v12 = vsel %vm1235_vm6, %v10862_v11, 0  ;;  %v10897_v11 = vld [vmem:[%s14724_s7 + $0x2c] sm:$0xf] }
0x311c   :  { %v6454_v40 = vpop.f32.mrb[152].mxu1 }
0x311d   :  { %v6455_v41 = vadd.f32 %v10834_v39, %v6454_v40  ;;  %v12100_v8 = vpop.f32.mrb[153].mxu1 }
0x311e   :  { %v6457_v36 = vpop.f32.mrb[154].mxu1 }
0x311f   :  { %v12101_v42 = vpop.f32.mrb[155].mxu1  ;;  %12121 = vmatmul.mubr.msk.f32.vlgmr.msra.gmra.mrb[112].mxu0 %vm397_vm4, %v6455_v41  ;;  %v6458_v43 = vadd.f32 %v10834_v39, %v6457_v36 }
0x3120   :  { %12124 = vmatpush3.xpose.msk.msra.mxu0 %vm397_vm4, %v6521_v20  ;;  %12125 = vmatprep.mubr.msk.f32.mxu0 %vm12844_vm3, %v12843_v50 }
0x3121   :  { %12133 = vmatprep.subr.mxu0 %v12843_v50 }
0x3123   :  { %12126 = vmatmul.mubr.msk.f32.vlgmr.msra.gmra.mrb[114].mxu0 %vm397_vm4, %v6458_v43 }
0x3124   :  { %v6580_v46 = vpop.f32.mrb[156].mxu1  ;;  %12135 = vmatprep.mubr.msk.f32.mxu0 %vm12844_vm3, %v12843_v50 }
0x3125   :  { %v6581_v21 = vadd.f32 %v10852_v44, %v6580_v46  ;;  %v12116_v24 = vpop.f32.mrb[157].mxu1 }
0x3126   :  { %v6583_v28 = vpop.f32.mrb[158].mxu1  ;;  %v10878_v24 = vld [vmem:[%s14727_s10 + $0x1f] ss:$0 sm:$0xff] }
0x3127   :  { %v6584_v23 = vadd.f32 %v10852_v44, %v6583_v28  ;;  %v12117_v26 = vpop.f32.mrb[159].mxu1  ;;  %12129 = vmatpush3.msra.mxu1 %v6581_v21 }
0x3128   :  { %12138 = vmatprep.subr.bf16.mxu1 %v12843_v50 }
0x3129   :  { %12134 = vmatpush3.msra.mxu0 %v6584_v23  ;;  %v10869_v23 = vld [vmem:[%s14727_s10 + $0x1b] ss:$0 sm:$0xff] }
0x312a   :  { %12144 = vmatprep.subr.bf16.mxu0 %v12843_v50 }
0x31f2   :  { %v6659_v31 = vpop.f32.mrb[112].mxu0 }
0x31f3   :  { %v6660_v47 = vadd.f32 %v6659_v31, %v13071_v34  ;;  %v12122_v33 = vpop.f32.mrb[113].mxu0 }
0x31f5   :  { %v6739_v48 = vsel %vm397_vm4, %v6660_v47, -inf }
0x31f6   :  { %6740 = vmax.xlane.f32.xlu1 %v6739_v48  ;;  %v6735_v30 = vpop.f32.mrb[114].mxu0 }
0x31f7   :  { %v6736_v35 = vadd.f32 %v6735_v30, %v13071_v34  ;;  %v12127_v49 = vpop.f32.mrb[115].mxu0 }
0x31f9   :  { %v6742_v51 = vsel %vm397_vm4, %v6736_v35, -inf }
0x31fa   :  { %6743 = vmax.xlane.f32.xlu0 %v6742_v51 }
0x3283   :  { %v6741_v52 = vpop.xlane.xlu1 %6740 }
0x3284   :  { %v6745_v53 = vsub.f32 %v6660_v47, %v6741_v52 }
0x3286   :  { %v6747_v54 = vmul.f32 1.442695, %v6745_v53 }
0x3287   :  { %v6744_v55 = vpop.xlane.xlu0 %6743 }
0x3288   :  { %12745 = vpow2.f32 %v6747_v54  ;;  %v6746_v56 = vsub.f32 %v6736_v35, %v6744_v55 }
0x328a   :  { %v6749_v57 = vmul.f32 1.442695, %v6746_v56 }
0x328c   :  { %12747 = vpow2.f32 %v6749_v57 }
0x3292   :  { %v12746_v58 = vpop.eup %12745 }
0x3293   :  { %v6751_v59 = vsel %vm397_vm4, %v12746_v58, 0.0 }
0x3294   :  { %6752 = vadd.xlane.f32.xlu1 %v6751_v59 }
0x3296   :  { %v12748_v60 = vpop.eup %12747 }
0x3297   :  { %v6754_v61 = vsel %vm397_vm4, %v12748_v60, 0.0 }
0x3298   :  { %6755 = vadd.xlane.f32.xlu0 %v6754_v61 }
0x3321   :  { %v6753_v62 = vpop.xlane.xlu1 %6752 }
0x3322   :  { %12749 = vrcp.f32 %v6753_v62 }
0x3325   :  { %v6756_v63 = vpop.xlane.xlu0 %6755 }
0x3326   :  { %12751 = vrcp.f32 %v6756_v63 }
0x332c   :  { %v12750_v0 = vpop.eup %12749 }
0x332d   :  { %v6759_v1 = vmul.f32 %v12750_v0, %v12746_v58 }
0x332f   :  { %12131 = vmatmul.mubr.msk.f32.vlgmr.msra.gmra.mrb[146].mxu1 %vm397_vm4, %v6759_v1 }
0x3330   :  { %v12752_v2 = vpop.eup %12751  ;;  %12140 = vmatprep.mubr.msk.bf16.mxu1 %vm12844_vm3, %v12843_v50  ;;  %12139 = vmatpush3.bf16.msra.mxu1 %v6914_v12  ;;  %v7475_v12 = vsel %vm1235_vm6, %v10897_v11, 0 }
0x3331   :  { %v6760_v4 = vmul.f32 %v12752_v2, %v12748_v60  ;;  %12152 = vmatprep.subr.bf16.mxu1 %v12843_v50 }
0x3333   :  { %12136 = vmatmul.mubr.msk.f32.vlgmr.msra.gmra.mrb[116].mxu0 %vm397_vm4, %v6760_v4 }
0x3334   :  { %12145 = vmatpush3.bf16.msra.mxu0 %v12585_v3  ;;  %12148 = vmatprep.mubr.msk.bf16.mxu0 %vm12844_vm3, %v12843_v50 }
0x3335   :  { %12146 = vmatprep.subr.bf16.mxu0 %v12843_v50 }
0x3338   :  { %12147 = vmatpush3.bf16.msra.mxu0 %v12586_v6 }
0x3339   :  { %12160 = vmatprep.subr.bf16.mxu0 %v12843_v50 }
0x333b   :  { %12149 = vmatmul.mubr.msk.bf16.vlgmr.msra.gmra.mrb[120].mxu0 %vm165_vm2, %v13869_v9 }
0x333c   :  { %12161 = vmatpush3.bf16.msra.mxu0 %v12587_v7  ;;  %12164 = vmatprep.mubr.msk.bf16.mxu0 %vm12844_vm3, %v12843_v50 }
0x333d   :  { %12162 = vmatprep.subr.bf16.mxu0 %v12843_v50 }
0x3340   :  { %12163 = vmatpush3.bf16.msra.mxu0 %v12588_v10 }
0x3341   :  { %12178 = vmatprep.subr.mxu0 %v12843_v50 }
0x3343   :  { %12165 = vmatmul.mubr.msk.bf16.vlgmr.msra.gmra.mrb[124].mxu0 %vm165_vm2, %v13869_v9 }
0x3344   :  { %12180 = vmatprep.mubr.msk.f32.mxu0 %vm12844_vm3, %v12843_v50 }
0x3402   :  { %v6830_v13 = vpop.f32.mrb[146].mxu1 }
0x3403   :  { %v12132_v14 = vpop.f32.mrb[147].mxu1 }
0x3406   :  { %v6903_v15 = vpop.f32.mrb[116].mxu0 }
0x3407   :  { %v6907_v17 = vpack.c.bf16 %v6903_v15, %v6830_v13  ;;  %v12137_v18 = vpop.f32.mrb[117].mxu0 }
0x3409   :  { %12141 = vmatmul.mubr.msk.bf16.vlgmr.msra.gmra.mrb[160].mxu1 %vm397_vm4, %v6907_v17 }
0x340a   :  { %12153 = vmatpush3.bf16.msra.mxu1 %v12589_v16  ;;  %12156 = vmatprep.mubr.msk.bf16.mxu1 %vm12844_vm3, %v12843_v50 }
0x340b   :  { %12154 = vmatprep.subr.bf16.mxu1 %v12843_v50 }
0x340e   :  { %v7015_v20 = vpop.f32.mrb[120].mxu0  ;;  %12155 = vmatpush3.bf16.msra.mxu1 %v12590_v19 }
0x340f   :  { %v12150_v22 = vpop.f32.mrb[121].mxu0  ;;  %12168 = vmatprep.subr.mxu1 %v12843_v50  ;;  %v7016_v33 = vadd.f32 %v10869_v23, %v7015_v20 }
0x3410   :  { %v7018_v25 = vpop.f32.mrb[122].mxu0  ;;  %v10900_v22 = vld [vmem:[%s14728_s11 + $0x8] ss:$0 sm:$0xff] }
0x3411   :  { %v12151_v32 = vpop.f32.mrb[123].mxu0  ;;  %12157 = vmatmul.mubr.msk.bf16.vlgmr.msra.gmra.mrb[164].mxu1 %vm165_vm2, %v13869_v9  ;;  %v7019_v48 = vadd.f32 %v10869_v23, %v7018_v25  ;;  %v12591_v23 = vld [vmem:[%s14725_s8 + $0x20] sm:$0xff]  }
0x3412   :  { %12170 = vmatprep.mubr.msk.f32.mxu1 %vm12844_vm3, %v12843_v50 }
0x3416   :  { %v7141_v38 = vpop.f32.mrb[124].mxu0 }
0x3417   :  { %v7142_v39 = vadd.f32 %v10887_v37, %v7141_v38  ;;  %v12166_v40 = vpop.f32.mrb[125].mxu0 }
0x3418   :  { %v7144_v41 = vpop.f32.mrb[126].mxu0 }
0x3419   :  { %v7145_v8 = vadd.f32 %v10887_v37, %v7144_v41  ;;  %v12167_v36 = vpop.f32.mrb[127].mxu0  ;;  %12179 = vmatpush3.msra.mxu0 %v7142_v39 }
0x341a   :  { %12188 = vmatprep.subr.bf16.mxu0 %v12843_v50 }
0x34dc   :  { %v6950_v42 = vpop.f32.mrb[160].mxu1 }
0x34dd   :  { %v14145_v43 = vadd.f32 %v6950_v42, %v14064_v29  ;;  %v12142_v9 = vpop.f32.mrb[161].mxu1 }
0x34de   :  { %v6953_v44 = vpop.f32.mrb[162].mxu1 }
0x34df   :  { %v14148_v46 = vadd.f32 %v6953_v44, %v14066_v5  ;;  %v12143_v21 = vpop.f32.mrb[163].mxu1 }
0x34e4   :  { %v7078_v28 = vpop.f32.mrb[164].mxu1 }
0x34e5   :  { %v7079_v26 = vadd.f32 %v10878_v24, %v7078_v28  ;;  %v12158_v31 = vpop.f32.mrb[165].mxu1 }
0x34e6   :  { %v7081_v47 = vpop.f32.mrb[166].mxu1 }
0x34e7   :  { %v12159_v29 = vpop.f32.mrb[167].mxu1  ;;  %12169 = vmatpush3.xpose.msk.msra.mxu1 %vm397_vm4, %v7079_v26  ;;  %v7082_v5 = vadd.f32 %v10878_v24, %v7081_v47  ;;  %v12592_v26 = vld [vmem:[%s14725_s8 + $0x28] sm:$0xff]  }
0x34e8   :  { %12173 = vmatprep.subr.mxu1 %v12843_v50 }
0x34ea   :  { %12171 = vmatmul.mubr.msk.f32.vlgmr.msra.gmra.mrb[168].mxu1 %vm397_vm4, %v7016_v33 }
0x34eb   :  { %12174 = vmatpush3.xpose.msk.msra.mxu1 %vm397_vm4, %v7082_v5  ;;  %12175 = vmatprep.mubr.msk.f32.mxu1 %vm12844_vm3, %v12843_v50 }
0x34ec   :  { %12183 = vmatprep.subr.mxu1 %v12843_v50 }
0x34ee   :  { %12176 = vmatmul.mubr.msk.f32.vlgmr.msra.gmra.mrb[170].mxu1 %vm397_vm4, %v7019_v48 }
0x34ef   :  { %12184 = vmatpush3.msra.mxu1 %v7145_v8  ;;  %12185 = vmatprep.mubr.msk.f32.mxu1 %vm12844_vm3, %v12843_v50 }
0x34f0   :  { %12194 = vmatprep.subr.bf16.mxu1 %v12843_v50 }
0x35bd   :  { %v7220_v30 = vpop.f32.mrb[168].mxu1 }
0x35be   :  { %v7221_v35 = vadd.f32 %v7220_v30, %v13071_v34  ;;  %v12172_v49 = vpop.f32.mrb[169].mxu1 }
0x35c0   :  { %v7300_v51 = vsel %vm397_vm4, %v7221_v35, -inf }
0x35c1   :  { %7301 = vmax.xlane.f32.xlu1 %v7300_v51  ;;  %v7296_v52 = vpop.f32.mrb[170].mxu1 }
0x35c2   :  { %v7297_v53 = vadd.f32 %v7296_v52, %v13071_v34  ;;  %v12177_v54 = vpop.f32.mrb[171].mxu1 }
0x35c3   :  { %v10904_v54 = vld [vmem:[%s14720_s3 + $0xb] ss:$0 sm:$0xff] }
0x35c4   :  { %v7303_v55 = vsel %vm397_vm4, %v7297_v53, -inf }
0x35c5   :  { %7304 = vmax.xlane.f32.xlu0 %v7303_v55 }
0x364e   :  { %v7302_v56 = vpop.xlane.xlu1 %7301 }
0x364f   :  { %v7306_v57 = vsub.f32 %v7221_v35, %v7302_v56  ;;  %v10903_v35 = vld [vmem:[%s14720_s3 + $0xa] ss:$0 sm:$0xff] }
0x3651   :  { %v7308_v58 = vmul.f32 1.442695, %v7306_v57 }
0x3652   :  { %v7305_v59 = vpop.xlane.xlu0 %7304 }
0x3653   :  { %12753 = vpow2.f32 %v7308_v58  ;;  %v7307_v60 = vsub.f32 %v7297_v53, %v7305_v59  ;;  %v12593_v59 = vld [vmem:[%s14726_s9 + $0x80] sm:$0xff]  }
0x3655   :  { %v7310_v61 = vmul.f32 1.442695, %v7307_v60  ;;  %v12594_v60 = vld [vmem:[%s14726_s9 + $0x88] sm:$0xff]  }
0x3657   :  { %12755 = vpow2.f32 %v7310_v61  ;;  %v12595_v61 = vld [vmem:[%s14726_s9 + $0x90] sm:$0xff]  }
0x365d   :  { %v12754_v62 = vpop.eup %12753 }
0x365e   :  { %v7312_v63 = vsel %vm397_vm4, %v12754_v62, 0.0 }
0x365f   :  { %7313 = vadd.xlane.f32.xlu1 %v7312_v63  ;;  %v12597_v63 = vld [vmem:[%s14726_s9 + $0xa0] sm:$0xff]  }
0x3661   :  { %v12756_v0 = vpop.eup %12755 }
0x3662   :  { %v7315_v1 = vsel %vm397_vm4, %v12756_v0, 0.0 }
0x3663   :  { %7316 = vadd.xlane.f32.xlu0 %v7315_v1  ;;  %v12599_v1 = vld [vmem:[%s14726_s9 + $0xb0] sm:$0xff]  }
0x36ec   :  { %v7314_v2 = vpop.xlane.xlu1 %7313 }
0x36ed   :  { %12757 = vrcp.f32 %v7314_v2  ;;  %v12600_v2 = vld [vmem:[%s14726_s9 + $0xb8] sm:$0xff]  }
0x36f0   :  { %v7317_v3 = vpop.xlane.xlu0 %7316 }
0x36f1   :  { %12759 = vrcp.f32 %v7317_v3  ;;  %v10910_v3 = vld [vmem:[%s14728_s11 + $0x9] ss:$0 sm:$0xff] }
0x36f7   :  { %v12758_v4 = vpop.eup %12757 }
0x36f8   :  { %v7320_v6 = vmul.f32 %v12758_v4, %v12754_v62  ;;  %v12596_v62 = vld [vmem:[%s14726_s9 + $0x98] sm:$0xff]  }
0x36fa   :  { %12181 = vmatmul.mubr.msk.f32.vlgmr.msra.gmra.mrb[118].mxu0 %vm397_vm4, %v7320_v6 }
0x36fb   :  { %v12760_v7 = vpop.eup %12759  ;;  %12190 = vmatprep.mubr.msk.bf16.mxu0 %vm12844_vm3, %v12843_v50  ;;  %12189 = vmatpush3.bf16.msra.mxu0 %v7475_v12 }
0x36fc   :  { %v7321_v10 = vmul.f32 %v12760_v7, %v12756_v0  ;;  %12202 = vmatprep.subr.bf16.mxu0 %v12843_v50  ;;  %v12598_v0 = vld [vmem:[%s14726_s9 + $0xa8] sm:$0xff]  }
0x36fe   :  { %12186 = vmatmul.mubr.msk.f32.vlgmr.msra.gmra.mrb[172].mxu1 %vm397_vm4, %v7321_v10 }
0x36ff   :  { %12198 = vmatprep.mubr.msk.bf16.mxu1 %vm12844_vm3, %v12843_v50  ;;  %12195 = vmatpush3.bf16.msra.mxu1 %v12591_v23 }
0x3700   :  { %12196 = vmatprep.subr.bf16.mxu1 %v12843_v50 }
0x3703   :  { %12197 = vmatpush3.bf16.msra.mxu1 %v12592_v26 }
0x3704   :  { %12222 = vmatprep.subr.bf16.mxu1 %v12843_v50 }
0x37cd   :  { %v7391_v13 = vpop.f32.mrb[118].mxu0 }
0x37ce   :  { %v12182_v14 = vpop.f32.mrb[119].mxu0 }
0x37d1   :  { %v7464_v15 = vpop.f32.mrb[172].mxu1 }
0x37d2   :  { %v7468_v16 = vpack.c.bf16 %v7464_v15, %v7391_v13  ;;  %v12187_v17 = vpop.f32.mrb[173].mxu1 }
0x37d4   :  { %12191 = vmatmul.mubr.msk.bf16.vlgmr.msra.gmra.mrb[128].mxu0 %vm397_vm4, %v7468_v16 }
0x37d5   :  { %12218 = vmatprep.mubr.msk.bf16.mxu0 %vm12844_vm3, %v12843_v50  ;;  %12203 = vmatpush3.bf16.msra.mxu0 %v12593_v59 }
0x37d6   :  { %12204 = vmatprep.subr.bf16.mxu0 %v12843_v50 }
0x37d9   :  { %12205 = vmatpush3.bf16.msra.mxu0 %v12594_v60 }
0x37da   :  { %12206 = vmatprep.subr.bf16.mxu0 %v12843_v50 }
0x37dd   :  { %12207 = vmatpush3.bf16.msra.mxu0 %v12595_v61  ;;  %v10942_v61 = vld [vmem:[%s14720_s3 + $0xc] ss:$0 sm:$0xff] }
0x37de   :  { %12208 = vmatprep.subr.bf16.mxu0 %v12843_v50 }
0x37e1   :  { %12209 = vmatpush3.bf16.msra.mxu0 %v12596_v62 }
0x37e2   :  { %12210 = vmatprep.subr.bf16.mxu0 %v12843_v50 }
0x37e5   :  { %12211 = vmatpush3.bf16.msra.mxu0 %v12597_v63 }
0x37e6   :  { %12212 = vmatprep.subr.bf16.mxu0 %v12843_v50 }
0x37e9   :  { %12213 = vmatpush3.bf16.msra.mxu0 %v12598_v0 }
0x37ea   :  { %12214 = vmatprep.subr.bf16.mxu0 %v12843_v50 }
0x37ed   :  { %12215 = vmatpush3.bf16.msra.mxu0 %v12599_v1 }
0x37ee   :  { %12216 = vmatprep.subr.bf16.mxu0 %v12843_v50 }
0x37f1   :  { %12217 = vmatpush3.bf16.msra.mxu0 %v12600_v2  ;;  %v10943_v2 = vld [vmem:[%s14720_s3 + $0xd] ss:$0 sm:$0xff] }
0x37f2   :  { %12251 = vmatprep.subr.mxu0 %v12843_v50 }
0x38a7   :  { %v7511_v18 = vpop.f32.mrb[128].mxu0 }
0x38a8   :  { %v7518_v19 = vadd.f32 %v7511_v18, %v14145_v43  ;;  %v12192_v20 = vpop.f32.mrb[129].mxu0 }
0x38a9   :  { %v7514_v25 = vpop.f32.mrb[130].mxu0 }
0x38aa   :  { %v7520_v32 = vadd.f32 %v7518_v19, %v13839_v45  ;;  %v7519_v37 = vadd.f32 %v7514_v25, %v14148_v46  ;;  %v12193_v38 = vpop.f32.mrb[131].mxu0 }
0x38ac   :  { %v14193_v39 = vadd.f32 %v10900_v22, %v7520_v32  ;;  %v7521_v40 = vadd.f32 %v7519_v37, %v13842_v27 }
0x38ae   :  { %v14196_v41 = vadd.f32 %v10900_v22, %v7521_v40  ;;  %v7532_v8 = vsel %vm165_vm2, %v14193_v39, 0.0 }
0x38af   :  { %7533 = vadd.xlane.f32.xlu1 %v7532_v8 }
0x38b0   :  { %v7535_v36 = vsel %vm165_vm2, %v14196_v41, 0.0 }
0x38b1   :  { %7536 = vadd.xlane.f32.xlu0 %v7535_v36 }
0x393c   :  { %v7534_v42 = vpop.xlane.xlu1 %7533 }
0x393d   :  { %v7538_v43 = vmul.f32 0.03125, %v7534_v42 }
0x393e   :  { %v7537_v45 = vpop.xlane.xlu0 %7536 }
0x393f   :  { %v7540_v9 = vsub.f32 %v14193_v39, %v7538_v43  ;;  %v7539_v44 = vmul.f32 0.03125, %v7537_v45 }
0x3941   :  { %v7541_v46 = vsub.f32 %v14196_v41, %v7539_v44  ;;  %v7542_v21 = vmul.f32 %v7540_v9, %v7540_v9 }
0x3943   :  { %v7544_v27 = vsel %vm165_vm2, %v7542_v21, 0.0  ;;  %v7543_v24 = vmul.f32 %v7541_v46, %v7541_v46 }
0x3944   :  { %7545 = vadd.xlane.f32.xlu1 %v7544_v27 }
0x3945   :  { %v7547_v28 = vsel %vm165_vm2, %v7543_v24, 0.0 }
0x3946   :  { %7548 = vadd.xlane.f32.xlu0 %v7547_v28 }
0x39d1   :  { %v7546_v31 = vpop.xlane.xlu1 %7545 }
0x39d2   :  { %v7550_v47 = vmul.f32 0.03125, %v7546_v31 }
0x39d3   :  { %v7549_v29 = vpop.xlane.xlu0 %7548 }
0x39d4   :  { %v7552_v33 = vadd.f32 1e-05, %v7550_v47  ;;  %v7551_v5 = vmul.f32 0.03125, %v7549_v29 }
0x39d6   :  { %12761 = vrsqrt.f32 %v7552_v33  ;;  %v7553_v48 = vadd.f32 1e-05, %v7551_v5 }
0x39d8   :  { %12763 = vrsqrt.f32 %v7553_v48 }
0x39e0   :  { %v12762_v30 = vpop.eup %12761 }
0x39e1   :  { %v7556_v49 = vmul.f32 %v12762_v30, %v7540_v9  ;;  %v10931_v9 = vld [vmem:[%s14728_s11 + $0xa] ss:$0 sm:$0xff] }
0x39e2   :  { %v12764_v51 = vpop.eup %12763 }
0x39e3   :  { %v7562_v52 = vmul.f32 %v10903_v35, %v7556_v49  ;;  %v7557_v53 = vmul.f32 %v12764_v51, %v7541_v46 }
0x39e5   :  { %v7563_v55 = vmul.f32 %v10903_v35, %v7557_v53  ;;  %v7568_v56 = vadd.f32 %v10904_v54, %v7562_v52  ;;  %v12601_v52 = vld [vmem:[%s14721_s4 + $0xc0] sm:$0xff]   ;;  %v12602_v53 = vld [vmem:[%s14721_s4 + $0xc8] sm:$0xff]  }
0x39e7   :  { %v7569_v57 = vadd.f32 %v10904_v54, %v7563_v55 }
0x39e9   :  { %v7570_v58 = vpack.c.bf16 %v7569_v57, %v7568_v56 }
0x39eb   :  { %12199 = vmatmul.mubr.msk.bf16.vlgmr.msra.gmra.mrb[176].mxu1 %vm165_vm2, %v7570_v58 }
0x39ec   :  { %12226 = vmatprep.mubr.msk.bf16.mxu1 %vm12844_vm3, %v12843_v50  ;;  %12223 = vmatpush3.bf16.msra.mxu1 %v12601_v52 }
0x39ed   :  { %12224 = vmatprep.subr.bf16.mxu1 %v12843_v50 }
0x39f0   :  { %12225 = vmatpush3.bf16.msra.mxu1 %v12602_v53 }
0x39f1   :  { %12230 = vmatprep.subr.bf16.mxu1 %v12843_v50 }
0x3abe   :  { %v7630_v4 = vpop.f32.mrb[176].mxu1 }
0x3abf   :  { %v7631_v6 = vadd.f32 %v10910_v3, %v7630_v4  ;;  %v12200_v7 = vpop.f32.mrb[177].mxu1 }
0x3ac0   :  { %v7633_v10 = vpop.f32.mrb[178].mxu1  ;;  %v12603_v7 = vld [vmem:[%s14722_s5 + $0xc0] sm:$0xff]  }
0x3ac1   :  { %v7639_v11 = vmul.f32 0.044715, %v7631_v6  ;;  %v7634_v12 = vadd.f32 %v10910_v3, %v7633_v10  ;;  %v12201_v13 = vpop.f32.mrb[179].mxu1  ;;  %v7637_v40 = vmul.f32 0.5, %v7631_v6 }
0x3ac2   :  { %v12606_v13 = vld [vmem:[%s14723_s6 + $0xc8] sm:$0xff]  }
0x3ac3   :  { %v7641_v14 = vmul.f32 %v7639_v11, %v7631_v6  ;;  %v7640_v15 = vmul.f32 0.044715, %v7634_v12  ;;  %v7638_v8 = vmul.f32 0.5, %v7634_v12  ;;  %v12604_v11 = vld [vmem:[%s14722_s5 + $0xc8] sm:$0xff]  }
0x3ac5   :  { %v7643_v16 = vmul.f32 %v7641_v14, %v7631_v6  ;;  %v7642_v17 = vmul.f32 %v7640_v15, %v7634_v12 }
0x3ac7   :  { %v7645_v18 = vadd.f32 %v7643_v16, %v7631_v6  ;;  %v7644_v19 = vmul.f32 %v7642_v17, %v7634_v12 }
0x3ac9   :  { %v7647_v20 = vmul.f32 0.7978845, %v7645_v18  ;;  %v7646_v22 = vadd.f32 %v7644_v19, %v7634_v12  ;;  %v12605_v12 = vld [vmem:[%s14723_s6 + $0xc0] sm:$0xff]   ;;  %v10958_v18 = vld [vmem:[%s14727_s10 + $0x28] ss:$0 sm:$0xff] }
0x3acb   :  { %12765 = vtanh.f32 %v7647_v20  ;;  %v7648_v25 = vmul.f32 0.7978845, %v7646_v22  ;;  %v10949_v20 = vld [vmem:[%s14727_s10 + $0x24] ss:$0 sm:$0xff] }
0x3acd   :  { %12767 = vtanh.f32 %v7648_v25 }
0x3ad5   :  { %v12766_v32 = vpop.eup %12765 }
0x3ad6   :  { %v7651_v37 = vadd.f32 1.0, %v12766_v32 }
0x3ad7   :  { %v12768_v38 = vpop.eup %12767 }
0x3ad8   :  { %v7652_v36 = vadd.f32 1.0, %v12768_v38  ;;  %v7653_v42 = vmul.f32 %v7651_v37, %v7637_v40 }
0x3ada   :  { %v7654_v43 = vmul.f32 %v7652_v36, %v7638_v8  ;;  %v10967_v36 = vld [vmem:[%s14727_s10 + $0x2c] ss:$0 sm:$0xff] }
0x3adc   :  { %v7655_v45 = vpack.c.bf16 %v7654_v43, %v7653_v42 }
0x3ade   :  { %12219 = vmatmul.mubr.bf16.vlgmr.msra.gmra.mrb[132].mxu0 %v7655_v45 }
0x3adf   :  { %12253 = vmatprep.mubr.msk.f32.mxu0 %vm12844_vm3, %v12843_v50 }
0x3bb1   :  { %v7760_v44 = vpop.f32.mrb[132].mxu0 }
0x3bb2   :  { %v7761_v46 = vadd.f32 %v10931_v9, %v7760_v44  ;;  %v12220_v21 = vpop.f32.mrb[133].mxu0 }
0x3bb3   :  { %v7763_v27 = vpop.f32.mrb[134].mxu0 }
0x3bb4   :  { %v14264_v24 = vadd.f32 %v7761_v46, %v14193_v39  ;;  %v7764_v28 = vadd.f32 %v10931_v9, %v7763_v27  ;;  %v12221_v23 = vpop.f32.mrb[135].mxu0 }
0x3bb6   :  { %v14267_v26 = vadd.f32 %v7764_v28, %v14196_v41  ;;  %v7772_v31 = vsel %vm165_vm2, %v14264_v24, 0.0 }
0x3bb7   :  { %7773 = vadd.xlane.f32.xlu1 %v7772_v31 }
0x3bb8   :  { %v7775_v47 = vsel %vm165_vm2, %v14267_v26, 0.0 }
0x3bb9   :  { %7776 = vadd.xlane.f32.xlu0 %v7775_v47 }
0x3c44   :  { %v7774_v29 = vpop.xlane.xlu1 %7773 }
0x3c45   :  { %v7778_v33 = vmul.f32 0.03125, %v7774_v29 }
0x3c46   :  { %v7777_v5 = vpop.xlane.xlu0 %7776 }
0x3c47   :  { %v7780_v48 = vsub.f32 %v14264_v24, %v7778_v33  ;;  %v7779_v39 = vmul.f32 0.03125, %v7777_v5 }
0x3c49   :  { %v7781_v30 = vsub.f32 %v14267_v26, %v7779_v39  ;;  %v7782_v35 = vmul.f32 %v7780_v48, %v7780_v48 }
0x3c4b   :  { %v7784_v41 = vsel %vm165_vm2, %v7782_v35, 0.0  ;;  %v7783_v49 = vmul.f32 %v7781_v30, %v7781_v30 }
0x3c4c   :  { %7785 = vadd.xlane.f32.xlu1 %v7784_v41 }
0x3c4d   :  { %v7787_v51 = vsel %vm165_vm2, %v7783_v49, 0.0 }
0x3c4e   :  { %7788 = vadd.xlane.f32.xlu0 %v7787_v51 }
0x3cd9   :  { %v7786_v54 = vpop.xlane.xlu1 %7785 }
0x3cda   :  { %v7790_v55 = vmul.f32 0.03125, %v7786_v54 }
0x3cdb   :  { %v7789_v56 = vpop.xlane.xlu0 %7788 }
0x3cdc   :  { %v7792_v57 = vadd.f32 1e-05, %v7790_v55  ;;  %v7791_v58 = vmul.f32 0.03125, %v7789_v56 }
0x3cde   :  { %12769 = vrsqrt.f32 %v7792_v57  ;;  %v7793_v59 = vadd.f32 1e-05, %v7791_v58  ;;  %v12607_v57 = vld [vmem:[%s14721_s4 + $0xd0] sm:$0xff]  }
0x3ce0   :  { %12771 = vrsqrt.f32 %v7793_v59 }
0x3ce8   :  { %v12770_v60 = vpop.eup %12769 }
0x3ce9   :  { %v7796_v62 = vmul.f32 %v12770_v60, %v7780_v48  ;;  %v12608_v60 = vld [vmem:[%s14722_s5 + $0xd0] sm:$0xff]  }
0x3cea   :  { %v12772_v63 = vpop.eup %12771 }
0x3ceb   :  { %v7802_v0 = vmul.f32 %v10942_v61, %v7796_v62  ;;  %v7797_v1 = vmul.f32 %v12772_v63, %v7781_v30  ;;  %v12609_v62 = vld [vmem:[%s14721_s4 + $0xd8] sm:$0xff]  }
0x3cec   :  { %v12610_v63 = vld [vmem:[%s14722_s5 + $0xd8] sm:$0xff]  }
0x3ced   :  { %v7803_v3 = vmul.f32 %v10942_v61, %v7797_v1  ;;  %v7808_v4 = vadd.f32 %v10943_v2, %v7802_v0  ;;  %v12611_v0 = vld [vmem:[%s14723_s6 + $0xd0] sm:$0xff]   ;;  %v12612_v1 = vld [vmem:[%s14723_s6 + $0xd8] sm:$0xff]  }
0x3cef   :  { %v7809_v6 = vadd.f32 %v10943_v2, %v7803_v3 }
0x3cf1   :  { %v14294_v10 = vpack.c.bf16 %v7809_v6, %v7808_v4 }
0x3cf3   :  { %12227 = vmatmul.mubr.msk.bf16.vlgmr.msra.gmra.mrb[180].mxu1 %vm165_vm2, %v14294_v10 }
0x3cf4   :  { %12231 = vmatpush3.bf16.msra.mxu1 %v12603_v7  ;;  %12234 = vmatprep.mubr.msk.bf16.mxu1 %vm12844_vm3, %v12843_v50 }
0x3cf5   :  { %12232 = vmatprep.subr.bf16.mxu1 %v12843_v50 }
0x3cf8   :  { %12233 = vmatpush3.bf16.msra.mxu1 %v12604_v11 }
0x3cf9   :  { %12238 = vmatprep.subr.bf16.mxu1 %v12843_v50 }
0x3cfb   :  { %12235 = vmatmul.mubr.msk.bf16.vlgmr.msra.gmra.mrb[184].mxu1 %vm165_vm2, %v14294_v10 }
0x3cfc   :  { %12239 = vmatpush3.bf16.msra.mxu1 %v12605_v12  ;;  %12242 = vmatprep.mubr.msk.bf16.mxu1 %vm12844_vm3, %v12843_v50  ;;  %v10992_v12 = vld [vmem:[%s14727_s10 + $0x29] ss:$0 sm:$0xff] }
0x3cfd   :  { %12240 = vmatprep.subr.bf16.mxu1 %v12843_v50 }
0x3d00   :  { %12241 = vmatpush3.bf16.msra.mxu1 %v12606_v13 }
0x3d01   :  { %12246 = vmatprep.subr.mxu1 %v12843_v50 }
0x3d03   :  { %12243 = vmatmul.mubr.msk.bf16.vlgmr.msra.gmra.mrb[188].mxu1 %vm165_vm2, %v14294_v10 }
0x3d04   :  { %12248 = vmatprep.mubr.msk.f32.mxu1 %vm12844_vm3, %v12843_v50 }
0x3dc6   :  { %v7871_v14 = vpop.f32.mrb[180].mxu1 }
0x3dc7   :  { %v12228_v15 = vpop.f32.mrb[181].mxu1  ;;  %v7872_v40 = vadd.f32 %v10949_v20, %v7871_v14 }
0x3dc8   :  { %v7874_v16 = vpop.f32.mrb[182].mxu1 }
0x3dc9   :  { %v12229_v17 = vpop.f32.mrb[183].mxu1  ;;  %v7875_v8 = vadd.f32 %v10949_v20, %v7874_v16  ;;  %v10983_v16 = vld [vmem:[%s14727_s10 + $0x25] ss:$0 sm:$0xff] }
0x3dce   :  { %v7935_v19 = vpop.f32.mrb[184].mxu1 }
0x3dcf   :  { %v7936_v22 = vadd.f32 %v10958_v18, %v7935_v19  ;;  %v12236_v25 = vpop.f32.mrb[185].mxu1 }
0x3dd0   :  { %v7938_v32 = vpop.f32.mrb[186].mxu1 }
0x3dd1   :  { %v7939_v37 = vadd.f32 %v10958_v18, %v7938_v32  ;;  %v12237_v38 = vpop.f32.mrb[187].mxu1  ;;  %12247 = vmatpush3.xpose.msk.msra.mxu1 %vm397_vm4, %v7936_v22  ;;  %v11001_v32 = vld [vmem:[%s14727_s10 + $0x2d] ss:$0 sm:$0xff] }
0x3dd2   :  { %12256 = vmatprep.subr.mxu1 %v12843_v50 }
0x3dd3   :  { %12252 = vmatpush3.xpose.msk.msra.mxu0 %vm397_vm4, %v7939_v37 }
0x3dd4   :  { %12249 = vmatmul.mubr.msk.f32.vlgmr.msra.gmra.mrb[174].mxu1 %vm397_vm4, %v7872_v40  ;;  %12261 = vmatprep.subr.mxu0 %v12843_v50 }
0x3dd5   :  { %12258 = vmatprep.mubr.msk.f32.mxu1 %vm12844_vm3, %v12843_v50 }
0x3dd6   :  { %v7999_v42 = vpop.f32.mrb[188].mxu1  ;;  %12254 = vmatmul.mubr.msk.f32.vlgmr.msra.gmra.mrb[136].mxu0 %vm397_vm4, %v7875_v8 }
0x3dd7   :  { %v8000_v43 = vadd.f32 %v10967_v36, %v7999_v42  ;;  %v12244_v45 = vpop.f32.mrb[189].mxu1  ;;  %12263 = vmatprep.mubr.msk.f32.mxu0 %vm12844_vm3, %v12843_v50 }
0x3dd8   :  { %v8002_v9 = vpop.f32.mrb[190].mxu1 }
0x3dd9   :  { %v8003_v44 = vadd.f32 %v10967_v36, %v8002_v9  ;;  %v12245_v46 = vpop.f32.mrb[191].mxu1  ;;  %12257 = vmatpush3.msra.mxu1 %v8000_v43 }
0x3dda   :  { %12266 = vmatprep.subr.bf16.mxu1 %v12843_v50 }
0x3ddb   :  { %12262 = vmatpush3.msra.mxu0 %v8003_v44 }
0x3ddc   :  { %12274 = vmatprep.subr.bf16.mxu0 %v12843_v50 }
0x3ea7   :  { %v8078_v21 = vpop.f32.mrb[174].mxu1 }
0x3ea8   :  { %v8079_v27 = vadd.f32 %v8078_v21, %v13071_v34  ;;  %v12250_v28 = vpop.f32.mrb[175].mxu1 }
0x3ea9   :  { %v8154_v23 = vpop.f32.mrb[136].mxu0 }
0x3eaa   :  { %v8155_v31 = vadd.f32 %v8154_v23, %v13071_v34  ;;  %v12255_v47 = vpop.f32.mrb[137].mxu0  ;;  %v8158_v29 = vsel %vm397_vm4, %v8079_v27, -inf }
0x3eab   :  { %8159 = vmax.xlane.f32.xlu0 %v8158_v29 }
0x3eac   :  { %v8161_v33 = vsel %vm397_vm4, %v8155_v31, -inf }
0x3ead   :  { %8162 = vmax.xlane.f32.xlu1 %v8161_v33 }
0x3f38   :  { %v8160_v5 = vpop.xlane.xlu0 %8159 }
0x3f39   :  { %v8164_v48 = vsub.f32 %v8079_v27, %v8160_v5 }
0x3f3a   :  { %v8163_v39 = vpop.xlane.xlu1 %8162 }
0x3f3b   :  { %v8166_v30 = vmul.f32 1.442695, %v8164_v48  ;;  %v8165_v35 = vsub.f32 %v8155_v31, %v8163_v39 }
0x3f3d   :  { %12773 = vpow2.f32 %v8166_v30  ;;  %v8168_v41 = vmul.f32 1.442695, %v8165_v35 }
0x3f3f   :  { %12775 = vpow2.f32 %v8168_v41 }
0x3f47   :  { %v12774_v49 = vpop.eup %12773 }
0x3f48   :  { %v8170_v51 = vsel %vm397_vm4, %v12774_v49, 0.0 }
0x3f49   :  { %v12776_v52 = vpop.eup %12775  ;;  %8171 = vadd.xlane.f32.xlu0 %v8170_v51 }
0x3f4a   :  { %v8173_v53 = vsel %vm397_vm4, %v12776_v52, 0.0 }
0x3f4b   :  { %8174 = vadd.xlane.f32.xlu1 %v8173_v53 }
0x3fd6   :  { %v8172_v54 = vpop.xlane.xlu0 %8171 }
0x3fd7   :  { %12777 = vrcp.f32 %v8172_v54 }
0x3fd8   :  { %v8175_v55 = vpop.xlane.xlu1 %8174 }
0x3fd9   :  { %12779 = vrcp.f32 %v8175_v55  ;;  %v10977_v55 = vld [vmem:[%s14724_s7 + $0x30] sm:$0xf] }
0x3fe1   :  { %v12778_v56 = vpop.eup %12777 }
0x3fe2   :  { %v8178_v58 = vmul.f32 %v12778_v56, %v12774_v49 }
0x3fe3   :  { %v12780_v59 = vpop.eup %12779 }
0x3fe4   :  { %v8179_v61 = vmul.f32 %v12780_v59, %v12776_v52  ;;  %12259 = vmatmul.mubr.msk.f32.vlgmr.msra.gmra.mrb[192].mxu1 %vm397_vm4, %v8178_v58  ;;  %v8892_v58 = vsel %vm1235_vm6, %v10977_v55, 0  ;;  %v12613_v59 = vld [vmem:[%s14722_s5 + $0xe0] sm:$0xff]  }
0x3fe5   :  { %12267 = vmatpush3.bf16.msra.mxu1 %v12607_v57  ;;  %12270 = vmatprep.mubr.msk.bf16.mxu1 %vm12844_vm3, %v12843_v50 }
0x3fe6   :  { %12264 = vmatmul.mubr.msk.f32.vlgmr.msra.gmra.mrb[138].mxu0 %vm397_vm4, %v8179_v61  ;;  %12268 = vmatprep.subr.bf16.mxu1 %v12843_v50  ;;  %v11011_v61 = vld [vmem:[%s14724_s7 + $0x34] sm:$0xf] }
0x3fe7   :  { %12275 = vmatpush3.bf16.msra.mxu0 %v12608_v60  ;;  %12278 = vmatprep.mubr.msk.bf16.mxu0 %vm12844_vm3, %v12843_v50  ;;  %v12614_v60 = vld [vmem:[%s14722_s5 + $0xe8] sm:$0xff]  }
0x3fe8   :  { %12276 = vmatprep.subr.bf16.mxu0 %v12843_v50 }
0x3fe9   :  { %12269 = vmatpush3.bf16.msra.mxu1 %v12609_v62  ;;  %v8845_v62 = vsel %vm1235_vm6, %v11011_v61, 0 }
0x3fea   :  { %12282 = vmatprep.subr.bf16.mxu1 %v12843_v50 }
0x3feb   :  { %12277 = vmatpush3.bf16.msra.mxu0 %v12610_v63 }
0x3fec   :  { %12271 = vmatmul.mubr.msk.bf16.vlgmr.msra.gmra.mrb[196].mxu1 %vm165_vm2, %v14294_v10  ;;  %12290 = vmatprep.subr.mxu0 %v12843_v50 }
0x3fed   :  { %12283 = vmatpush3.bf16.msra.mxu1 %v12611_v0  ;;  %12286 = vmatprep.mubr.msk.bf16.mxu1 %vm12844_vm3, %v12843_v50 }
0x3fee   :  { %12279 = vmatmul.mubr.msk.bf16.vlgmr.msra.gmra.mrb[140].mxu0 %vm165_vm2, %v14294_v10  ;;  %12284 = vmatprep.subr.bf16.mxu1 %v12843_v50 }
0x3fef   :  { %12292 = vmatprep.mubr.msk.f32.mxu0 %vm12844_vm3, %v12843_v50 }
0x3ff1   :  { %12285 = vmatpush3.bf16.msra.mxu1 %v12612_v1 }
0x3ff2   :  { %12300 = vmatprep.subr.mxu1 %v12843_v50 }
0x3ff4   :  { %12287 = vmatmul.mubr.msk.bf16.vlgmr.msra.gmra.mrb[200].mxu1 %vm165_vm2, %v14294_v10 }
0x3ff5   :  { %12302 = vmatprep.mubr.msk.f32.mxu1 %vm12844_vm3, %v12843_v50 }
0x40b7   :  { %v14390_v2 = vpop.f32.mrb[192].mxu1 }
0x40b8   :  { %v12260_v3 = vpop.f32.mrb[193].mxu1 }
0x40b9   :  { %v14392_v4 = vpop.f32.mrb[138].mxu0 }
0x40ba   :  { %v8326_v6 = vpack.c.bf16 %v14392_v4, %v14390_v2  ;;  %v12265_v7 = vpop.f32.mrb[139].mxu0  ;;  %v12615_v2 = vld [vmem:[%s14721_s4 + $0xe0] sm:$0xff]  }
0x40bb   :  { %v12616_v7 = vld [vmem:[%s14721_s4 + $0xe8] sm:$0xff]  }
0x40bf   :  { %v8385_v11 = vpop.f32.mrb[196].mxu1 }
0x40c0   :  { %v12272_v13 = vpop.f32.mrb[197].mxu1  ;;  %v8386_v25 = vadd.f32 %v10983_v16, %v8385_v11 }
0x40c1   :  { %v8388_v14 = vpop.f32.mrb[198].mxu1  ;;  %v8448_v15 = vpop.f32.mrb[140].mxu0 }
0x40c2   :  { %v8449_v17 = vadd.f32 %v10992_v12, %v8448_v15  ;;  %v12273_v18 = vpop.f32.mrb[199].mxu1  ;;  %v12280_v19 = vpop.f32.mrb[141].mxu0  ;;  %v8389_v36 = vadd.f32 %v10983_v16, %v8388_v14  ;;  %v12617_v14 = vld [vmem:[%s14723_s6 + $0xe0] sm:$0xff]   ;;  %v11028_v15 = vld [vmem:[%s14727_s10 + $0x2a] ss:$0 sm:$0xff] }
0x40c3   :  { %v8451_v20 = vpop.f32.mrb[142].mxu0 }
0x40c4   :  { %v12281_v22 = vpop.f32.mrb[143].mxu0  ;;  %12291 = vmatpush3.xpose.msk.msra.mxu0 %vm397_vm4, %v8449_v17  ;;  %v8452_v37 = vadd.f32 %v10992_v12, %v8451_v20  ;;  %v12618_v17 = vld [vmem:[%s14723_s6 + $0xe8] sm:$0xff]  }
0x40c5   :  { %12295 = vmatprep.subr.mxu0 %v12843_v50 }
0x40c7   :  { %v8511_v38 = vpop.f32.mrb[200].mxu1  ;;  %12293 = vmatmul.mubr.msk.f32.vlgmr.msra.gmra.mrb[144].mxu0 %vm397_vm4, %v8386_v25 }
0x40c8   :  { %v8512_v40 = vadd.f32 %v11001_v32, %v8511_v38  ;;  %v12288_v8 = vpop.f32.mrb[201].mxu1  ;;  %12296 = vmatpush3.xpose.msk.msra.mxu0 %vm397_vm4, %v8452_v37  ;;  %12297 = vmatprep.mubr.msk.f32.mxu0 %vm12844_vm3, %v12843_v50 }
0x40c9   :  { %v8514_v42 = vpop.f32.mrb[202].mxu1  ;;  %12305 = vmatprep.subr.mxu0 %v12843_v50 }
0x40ca   :  { %v8515_v43 = vadd.f32 %v11001_v32, %v8514_v42  ;;  %v12289_v45 = vpop.f32.mrb[203].mxu1  ;;  %12301 = vmatpush3.msra.mxu1 %v8512_v40  ;;  %v11019_v42 = vld [vmem:[%s14727_s10 + $0x26] ss:$0 sm:$0xff] }
0x40cb   :  { %12298 = vmatmul.mubr.msk.f32.vlgmr.msra.gmra.mrb[146].mxu0 %vm397_vm4, %v8389_v36  ;;  %12310 = vmatprep.subr.bf16.mxu1 %v12843_v50 }
0x40cc   :  { %12306 = vmatpush3.msra.mxu0 %v8515_v43  ;;  %12307 = vmatprep.mubr.msk.f32.mxu0 %vm12844_vm3, %v12843_v50 }
0x40cd   :  { %12316 = vmatprep.subr.bf16.mxu0 %v12843_v50 }
0x419a   :  { %v8590_v9 = vpop.f32.mrb[144].mxu0 }
0x419b   :  { %v8591_v44 = vadd.f32 %v8590_v9, %v13071_v34  ;;  %v12294_v46 = vpop.f32.mrb[145].mxu0 }
0x419d   :  { %v8670_v21 = vsel %vm397_vm4, %v8591_v44, -inf }
0x419e   :  { %8671 = vmax.xlane.f32.xlu1 %v8670_v21  ;;  %v8666_v27 = vpop.f32.mrb[146].mxu0 }
0x419f   :  { %v8667_v28 = vadd.f32 %v8666_v27, %v13071_v34  ;;  %v12299_v23 = vpop.f32.mrb[147].mxu0  ;;  %v11037_v27 = vld [vmem:[%s14727_s10 + $0x2e] ss:$0 sm:$0xff] }
0x41a1   :  { %v8673_v31 = vsel %vm397_vm4, %v8667_v28, -inf }
0x41a2   :  { %8674 = vmax.xlane.f32.xlu0 %v8673_v31 }
0x422b   :  { %v8672_v47 = vpop.xlane.xlu1 %8671 }
0x422c   :  { %v8676_v29 = vsub.f32 %v8591_v44, %v8672_v47 }
0x422e   :  { %v8678_v33 = vmul.f32 1.442695, %v8676_v29 }
0x422f   :  { %v8675_v5 = vpop.xlane.xlu0 %8674 }
0x4230   :  { %12781 = vpow2.f32 %v8678_v33  ;;  %v8677_v48 = vsub.f32 %v8667_v28, %v8675_v5 }
0x4232   :  { %v8680_v39 = vmul.f32 1.442695, %v8677_v48 }
0x4234   :  { %12783 = vpow2.f32 %v8680_v39 }
0x423a   :  { %v12782_v30 = vpop.eup %12781 }
0x423b   :  { %v8682_v35 = vsel %vm397_vm4, %v12782_v30, 0.0 }
0x423c   :  { %8683 = vadd.xlane.f32.xlu1 %v8682_v35 }
0x423e   :  { %v12784_v41 = vpop.eup %12783 }
0x423f   :  { %v8685_v49 = vsel %vm397_vm4, %v12784_v41, 0.0 }
0x4240   :  { %8686 = vadd.xlane.f32.xlu0 %v8685_v49 }
0x42c9   :  { %v8684_v51 = vpop.xlane.xlu1 %8683 }
0x42ca   :  { %12785 = vrcp.f32 %v8684_v51 }
0x42cd   :  { %v8687_v52 = vpop.xlane.xlu0 %8686 }
0x42ce   :  { %12787 = vrcp.f32 %v8687_v52 }
0x42d4   :  { %v12786_v53 = vpop.eup %12785 }
0x42d5   :  { %v8690_v54 = vmul.f32 %v12786_v53, %v12782_v30 }
0x42d7   :  { %12303 = vmatmul.mubr.msk.f32.vlgmr.msra.gmra.mrb[194].mxu1 %vm397_vm4, %v8690_v54 }
0x42d8   :  { %v12788_v56 = vpop.eup %12787  ;;  %12312 = vmatprep.mubr.msk.bf16.mxu1 %vm12844_vm3, %v12843_v50  ;;  %12311 = vmatpush3.bf16.msra.mxu1 %v8845_v62 }
0x42d9   :  { %v8691_v57 = vmul.f32 %v12788_v56, %v12784_v41  ;;  %12322 = vmatprep.subr.bf16.mxu1 %v12843_v50 }
0x42db   :  { %12308 = vmatmul.mubr.msk.f32.vlgmr.msra.gmra.mrb[148].mxu0 %vm397_vm4, %v8691_v57 }
0x42dc   :  { %12317 = vmatpush3.bf16.msra.mxu0 %v8892_v58  ;;  %12318 = vmatprep.mubr.msk.bf16.mxu0 %vm12844_vm3, %v12843_v50 }
0x42dd   :  { %12330 = vmatprep.subr.bf16.mxu0 %v12843_v50 }
0x42df   :  { %12319 = vmatmul.mubr.msk.bf16.vlgmr.msra.gmra.mrb[152].mxu0 %vm397_vm4, %v8326_v6 }
0x42e0   :  { %12331 = vmatpush3.bf16.msra.mxu0 %v12613_v59  ;;  %12334 = vmatprep.mubr.msk.bf16.mxu0 %vm12844_vm3, %v12843_v50 }
0x42e1   :  { %12332 = vmatprep.subr.bf16.mxu0 %v12843_v50 }
0x42e4   :  { %12333 = vmatpush3.bf16.msra.mxu0 %v12614_v60 }
0x42e5   :  { %12346 = vmatprep.subr.mxu0 %v12843_v50 }
0x42e7   :  { %12335 = vmatmul.mubr.msk.bf16.vlgmr.msra.gmra.mrb[156].mxu0 %vm165_vm2, %v14294_v10 }
0x42e8   :  { %12348 = vmatprep.mubr.msk.f32.mxu0 %vm12844_vm3, %v12843_v50 }
0x43aa   :  { %v8761_v63 = vpop.f32.mrb[194].mxu1 }
0x43ab   :  { %v12304_v0 = vpop.f32.mrb[195].mxu1 }
0x43ae   :  { %v8834_v1 = vpop.f32.mrb[148].mxu0 }
0x43af   :  { %v8838_v3 = vpack.c.bf16 %v8834_v1, %v8761_v63  ;;  %v12309_v4 = vpop.f32.mrb[149].mxu0 }
0x43b1   :  { %12313 = vmatmul.mubr.msk.bf16.vlgmr.msra.gmra.mrb[204].mxu1 %vm397_vm4, %v8838_v3  ;;  %v12619_v3 = vld [vmem:[%s14721_s4 + $0xf0] sm:$0xff]  }
0x43b2   :  { %v8928_v6 = vpop.f32.mrb[152].mxu0  ;;  %12323 = vmatpush3.bf16.msra.mxu1 %v12615_v2  ;;  %12326 = vmatprep.mubr.msk.bf16.mxu1 %vm12844_vm3, %v12843_v50 }
0x43b3   :  { %v12320_v11 = vpop.f32.mrb[153].mxu0  ;;  %12324 = vmatprep.subr.bf16.mxu1 %v12843_v50 }
0x43b4   :  { %v8931_v12 = vpop.f32.mrb[154].mxu0  ;;  %v12622_v11 = vld [vmem:[%s14723_s6 + $0xf8] sm:$0xff]  }
0x43b5   :  { %v12321_v13 = vpop.f32.mrb[155].mxu0 }
0x43b6   :  { %12325 = vmatpush3.bf16.msra.mxu1 %v12616_v7  ;;  %v12621_v7 = vld [vmem:[%s14723_s6 + $0xf0] sm:$0xff]  }
0x43b7   :  { %12338 = vmatprep.subr.bf16.mxu1 %v12843_v50 }
0x43b9   :  { %12327 = vmatmul.mubr.msk.bf16.vlgmr.msra.gmra.mrb[208].mxu1 %vm165_vm2, %v14294_v10 }
0x43ba   :  { %v9054_v16 = vpop.f32.mrb[156].mxu0  ;;  %12339 = vmatpush3.bf16.msra.mxu1 %v12617_v14  ;;  %12342 = vmatprep.mubr.msk.bf16.mxu1 %vm12844_vm3, %v12843_v50 }
0x43bb   :  { %v9055_v18 = vadd.f32 %v11028_v15, %v9054_v16  ;;  %v12336_v19 = vpop.f32.mrb[157].mxu0  ;;  %12340 = vmatprep.subr.bf16.mxu1 %v12843_v50 }
0x43bc   :  { %v9057_v20 = vpop.f32.mrb[158].mxu0 }
0x43bd   :  { %v9058_v22 = vadd.f32 %v11028_v15, %v9057_v20  ;;  %v12337_v25 = vpop.f32.mrb[159].mxu0  ;;  %12347 = vmatpush3.xpose.msk.msra.mxu0 %vm397_vm4, %v9055_v18  ;;  %v12624_v20 = vld [vmem:[%s14722_s5 + $0xf8] sm:$0xff]  }
0x43be   :  { %12341 = vmatpush3.bf16.msra.mxu1 %v12618_v17  ;;  %12351 = vmatprep.subr.mxu0 %v12843_v50  ;;  %v12623_v17 = vld [vmem:[%s14722_s5 + $0xf0] sm:$0xff]  }
0x43bf   :  { %12356 = vmatprep.subr.mxu1 %v12843_v50 }
0x43c1   :  { %12343 = vmatmul.mubr.msk.bf16.vlgmr.msra.gmra.mrb[212].mxu1 %vm165_vm2, %v14294_v10 }
0x43c2   :  { %12358 = vmatprep.mubr.msk.f32.mxu1 %vm12844_vm3, %v12843_v50 }
0x4484   :  { %v8881_v32 = vpop.f32.mrb[204].mxu1 }
0x4485   :  { %v14489_v37 = vadd.f32 %v8928_v6, %v8881_v32  ;;  %v12314_v38 = vpop.f32.mrb[205].mxu1  ;;  %v12620_v6 = vld [vmem:[%s14721_s4 + $0xf8] sm:$0xff]   ;;  %s12817_s4 = scalar_lea.vmem %s10415_s27, 256 }
0x4486   :  { %v8884_v40 = vpop.f32.mrb[206].mxu1  ;;  %p12818_p0 = scmp.ne.s32.totalorder %s10415_s27, %s12817_s4  ;;  %p12823_p2 = scmp.lt.s32.totalorder %s12817_s4, %s12817_s4 }
0x4487   :  { %v14491_v8 = vadd.f32 %v8931_v12, %v8884_v40  ;;  %v12315_v36 = vpop.f32.mrb[207].mxu1  ;;  %v11047_v12 = vld [vmem:[%s14724_s7 + $0x38] sm:$0xf]  ;;  %v11072_v40 = vld [vmem:[%s14727_s10 + $0x2f] ss:$0 sm:$0xff] }
0x4488   :  { %v9451_v13 = vsel %vm1235_vm6, %v11047_v12, 0  ;;  %p12824_p3 = por %p12823_p2, %p12822_p1 }
0x448a   :  { %p12825_p4 = pnand %p12824_p3, %p12818_p0 }
0x448c   :  { %v8991_v43 = vpop.f32.mrb[208].mxu1 }
0x448d   :  { %v8992_v45 = vadd.f32 %v11019_v42, %v8991_v43  ;;  %v12328_v9 = vpop.f32.mrb[209].mxu1 }
0x448e   :  { %v8994_v44 = vpop.f32.mrb[210].mxu1 }
0x448f   :  { %v12329_v46 = vpop.f32.mrb[211].mxu1  ;;  %12349 = vmatmul.mubr.msk.f32.vlgmr.msra.gmra.mrb[150].mxu0 %vm397_vm4, %v8992_v45  ;;  %v8995_v21 = vadd.f32 %v11019_v42, %v8994_v44 }
0x4490   :  { %12352 = vmatpush3.xpose.msk.msra.mxu0 %vm397_vm4, %v9058_v22  ;;  %12353 = vmatprep.mubr.msk.f32.mxu0 %vm12844_vm3, %v12843_v50 }
0x4491   :  { %12361 = vmatprep.subr.mxu0 %v12843_v50 }
0x4493   :  { %12354 = vmatmul.mubr.msk.f32.vlgmr.msra.gmra.mrb[160].mxu0 %vm397_vm4, %v8995_v21 }
0x4494   :  { %v9117_v28 = vpop.f32.mrb[212].mxu1  ;;  %12363 = vmatprep.mubr.msk.f32.mxu0 %vm12844_vm3, %v12843_v50 }
0x4495   :  { %v9118_v23 = vadd.f32 %v11037_v27, %v9117_v28  ;;  %v12344_v31 = vpop.f32.mrb[213].mxu1 }
0x4496   :  { %v9120_v47 = vpop.f32.mrb[214].mxu1  ;;  %v11063_v31 = vld [vmem:[%s14727_s10 + $0x2b] ss:$0 sm:$0xff] }
0x4497   :  { %v9121_v29 = vadd.f32 %v11037_v27, %v9120_v47  ;;  %v12345_v33 = vpop.f32.mrb[215].mxu1  ;;  %12357 = vmatpush3.msra.mxu1 %v9118_v23 }
0x4498   :  { %12366 = vmatprep.subr.bf16.mxu1 %v12843_v50 }
0x4499   :  { %12362 = vmatpush3.msra.mxu0 %v9121_v29  ;;  %v11054_v29 = vld [vmem:[%s14727_s10 + $0x27] ss:$0 sm:$0xff] }
0x449a   :  { %12372 = vmatprep.subr.bf16.mxu0 %v12843_v50 }
0x4562   :  { %v9196_v5 = vpop.f32.mrb[150].mxu0 }
0x4563   :  { %v9197_v48 = vadd.f32 %v9196_v5, %v13071_v34  ;;  %v12350_v39 = vpop.f32.mrb[151].mxu0 }
0x4565   :  { %v9276_v30 = vsel %vm397_vm4, %v9197_v48, -inf }
0x4566   :  { %9277 = vmax.xlane.f32.xlu1 %v9276_v30  ;;  %v9272_v35 = vpop.f32.mrb[160].mxu0 }
0x4567   :  { %v9273_v41 = vadd.f32 %v9272_v35, %v13071_v34  ;;  %v12355_v49 = vpop.f32.mrb[161].mxu0 }
0x4569   :  { %v9279_v51 = vsel %vm397_vm4, %v9273_v41, -inf }
0x456a   :  { %9280 = vmax.xlane.f32.xlu0 %v9279_v51 }
0x45f3   :  { %v9278_v52 = vpop.xlane.xlu1 %9277 }
0x45f4   :  { %v9282_v53 = vsub.f32 %v9197_v48, %v9278_v52 }
0x45f6   :  { %v9284_v54 = vmul.f32 1.442695, %v9282_v53 }
0x45f7   :  { %v9281_v55 = vpop.xlane.xlu0 %9280 }
0x45f8   :  { %12789 = vpow2.f32 %v9284_v54  ;;  %v9283_v56 = vsub.f32 %v9273_v41, %v9281_v55 }
0x45fa   :  { %v9286_v57 = vmul.f32 1.442695, %v9283_v56 }
0x45fc   :  { %12791 = vpow2.f32 %v9286_v57 }
0x4602   :  { %v12790_v58 = vpop.eup %12789 }
0x4603   :  { %v9288_v59 = vsel %vm397_vm4, %v12790_v58, 0.0 }
0x4604   :  { %9289 = vadd.xlane.f32.xlu1 %v9288_v59 }
0x4606   :  { %v12792_v60 = vpop.eup %12791 }
0x4607   :  { %v9291_v61 = vsel %vm397_vm4, %v12792_v60, 0.0 }
0x4608   :  { %9292 = vadd.xlane.f32.xlu0 %v9291_v61 }
0x4691   :  { %v9290_v62 = vpop.xlane.xlu1 %9289 }
0x4692   :  { %12793 = vrcp.f32 %v9290_v62 }
0x4695   :  { %v9293_v63 = vpop.xlane.xlu0 %9292 }
0x4696   :  { %12795 = vrcp.f32 %v9293_v63 }
0x469c   :  { %v12794_v0 = vpop.eup %12793 }
0x469d   :  { %v9296_v1 = vmul.f32 %v12794_v0, %v12790_v58 }
0x469f   :  { %12359 = vmatmul.mubr.msk.f32.vlgmr.msra.gmra.mrb[216].mxu1 %vm397_vm4, %v9296_v1 }
0x46a0   :  { %v12796_v2 = vpop.eup %12795  ;;  %12368 = vmatprep.mubr.msk.bf16.mxu1 %vm12844_vm3, %v12843_v50  ;;  %12367 = vmatpush3.bf16.msra.mxu1 %v9451_v13 }
0x46a1   :  { %v9297_v4 = vmul.f32 %v12796_v2, %v12792_v60  ;;  %12380 = vmatprep.subr.bf16.mxu1 %v12843_v50 }
0x46a3   :  { %12364 = vmatmul.mubr.msk.f32.vlgmr.msra.gmra.mrb[162].mxu0 %vm397_vm4, %v9297_v4 }
0x46a4   :  { %12373 = vmatpush3.bf16.msra.mxu0 %v12619_v3  ;;  %12376 = vmatprep.mubr.msk.bf16.mxu0 %vm12844_vm3, %v12843_v50 }
0x46a5   :  { %12374 = vmatprep.subr.bf16.mxu0 %v12843_v50 }
0x46a8   :  { %12375 = vmatpush3.bf16.msra.mxu0 %v12620_v6 }
0x46a9   :  { %12388 = vmatprep.subr.bf16.mxu0 %v12843_v50 }
0x46ab   :  { %12377 = vmatmul.mubr.msk.bf16.vlgmr.msra.gmra.mrb[164].mxu0 %vm165_vm2, %v14294_v10 }
0x46ac   :  { %12389 = vmatpush3.bf16.msra.mxu0 %v12621_v7  ;;  %12392 = vmatprep.mubr.msk.bf16.mxu0 %vm12844_vm3, %v12843_v50 }
0x46ad   :  { %12390 = vmatprep.subr.bf16.mxu0 %v12843_v50 }
0x46b0   :  { %12391 = vmatpush3.bf16.msra.mxu0 %v12622_v11  ;;  %v11082_v11 = vld [vmem:[%s14724_s7 + $0x3c] sm:$0xf] }
0x46b1   :  { %12406 = vmatprep.subr.mxu0 %v12843_v50  ;;  %v10012_v12 = vsel %vm1235_vm6, %v11082_v11, 0 }
0x46b3   :  { %12393 = vmatmul.mubr.msk.bf16.vlgmr.msra.gmra.mrb[168].mxu0 %vm165_vm2, %v14294_v10 }
0x46b4   :  { %12408 = vmatprep.mubr.msk.f32.mxu0 %vm12844_vm3, %v12843_v50 }
0x4772   :  { %v9367_v14 = vpop.f32.mrb[216].mxu1 }
0x4773   :  { %v12360_v15 = vpop.f32.mrb[217].mxu1 }
0x4776   :  { %v9440_v16 = vpop.f32.mrb[162].mxu0 }
0x4777   :  { %v9444_v18 = vpack.c.bf16 %v9440_v16, %v9367_v14  ;;  %v12365_v19 = vpop.f32.mrb[163].mxu0 }
0x4779   :  { %12369 = vmatmul.mubr.msk.bf16.vlgmr.msra.gmra.mrb[220].mxu1 %vm397_vm4, %v9444_v18 }
0x477a   :  { %12381 = vmatpush3.bf16.msra.mxu1 %v12623_v17  ;;  %12384 = vmatprep.mubr.msk.bf16.mxu1 %vm12844_vm3, %v12843_v50 }
0x477b   :  { %12382 = vmatprep.subr.bf16.mxu1 %v12843_v50 }
0x477e   :  { %v9552_v22 = vpop.f32.mrb[164].mxu0  ;;  %12383 = vmatpush3.bf16.msra.mxu1 %v12624_v20 }
0x477f   :  { %v12378_v25 = vpop.f32.mrb[165].mxu0  ;;  %12396 = vmatprep.subr.mxu1 %v12843_v50  ;;  %v9553_v39 = vadd.f32 %v11054_v29, %v9552_v22  ;;  %v11085_v22 = vld [vmem:[%s14728_s11 + $0xc] ss:$0 sm:$0xff] }
0x4780   :  { %v9555_v32 = vpop.f32.mrb[166].mxu0 }
0x4781   :  { %v12379_v38 = vpop.f32.mrb[167].mxu0  ;;  %12385 = vmatmul.mubr.msk.bf16.vlgmr.msra.gmra.mrb[224].mxu1 %vm165_vm2, %v14294_v10  ;;  %v9556_v30 = vadd.f32 %v11054_v29, %v9555_v32  ;;  %v12626_v29 = vld [vmem:[%s14725_s8 + $0x38] sm:$0xff]  }
0x4782   :  { %12398 = vmatprep.mubr.msk.f32.mxu1 %vm12844_vm3, %v12843_v50 }
0x4786   :  { %v9678_v36 = vpop.f32.mrb[168].mxu0 }
0x4787   :  { %v9679_v42 = vadd.f32 %v11072_v40, %v9678_v36  ;;  %v12394_v43 = vpop.f32.mrb[169].mxu0 }
0x4788   :  { %v9681_v45 = vpop.f32.mrb[170].mxu0 }
0x4789   :  { %v9682_v9 = vadd.f32 %v11072_v40, %v9681_v45  ;;  %v12395_v44 = vpop.f32.mrb[171].mxu0  ;;  %12407 = vmatpush3.msra.mxu0 %v9679_v42 }
0x478a   :  { %12416 = vmatprep.subr.bf16.mxu0 %v12843_v50 }
0x484c   :  { %v9487_v46 = vpop.f32.mrb[220].mxu1 }
0x484d   :  { %v14570_v21 = vadd.f32 %v9487_v46, %v14489_v37  ;;  %v12370_v10 = vpop.f32.mrb[221].mxu1 }
0x484e   :  { %v9490_v27 = vpop.f32.mrb[222].mxu1 }
0x484f   :  { %v14573_v28 = vadd.f32 %v9490_v27, %v14491_v8  ;;  %v12371_v23 = vpop.f32.mrb[223].mxu1 }
0x4854   :  { %v9615_v47 = vpop.f32.mrb[224].mxu1 }
0x4855   :  { %v9616_v33 = vadd.f32 %v11063_v31, %v9615_v47  ;;  %v12386_v5 = vpop.f32.mrb[225].mxu1  ;;  %v12625_v47 = vld [vmem:[%s14725_s8 + $0x30] sm:$0xff]  }
0x4856   :  { %v9618_v48 = vpop.f32.mrb[226].mxu1 }
0x4857   :  { %v12387_v37 = vpop.f32.mrb[227].mxu1  ;;  %12397 = vmatpush3.xpose.msk.msra.mxu1 %vm397_vm4, %v9616_v33  ;;  %v9619_v8 = vadd.f32 %v11063_v31, %v9618_v48 }
0x4858   :  { %12401 = vmatprep.subr.mxu1 %v12843_v50 }
0x485a   :  { %12399 = vmatmul.mubr.msk.f32.vlgmr.msra.gmra.mrb[218].mxu1 %vm397_vm4, %v9553_v39 }
0x485b   :  { %12402 = vmatpush3.xpose.msk.msra.mxu1 %vm397_vm4, %v9619_v8  ;;  %12403 = vmatprep.mubr.msk.f32.mxu1 %vm12844_vm3, %v12843_v50 }
0x485c   :  { %12411 = vmatprep.subr.mxu1 %v12843_v50 }
0x485e   :  { %12404 = vmatmul.mubr.msk.f32.vlgmr.msra.gmra.mrb[228].mxu1 %vm397_vm4, %v9556_v30 }
0x485f   :  { %12412 = vmatpush3.msra.mxu1 %v9682_v9  ;;  %12413 = vmatprep.mubr.msk.f32.mxu1 %vm12844_vm3, %v12843_v50 }
0x4860   :  { %12422 = vmatprep.subr.bf16.mxu1 %v12843_v50 }
0x492d   :  { %v9757_v35 = vpop.f32.mrb[218].mxu1 }
0x492e   :  { %v9758_v41 = vadd.f32 %v9757_v35, %v13071_v34  ;;  %v12400_v49 = vpop.f32.mrb[219].mxu1  ;;  %v11088_v35 = vld [vmem:[%s14720_s3 + $0xe] ss:$0 sm:$0xff] }
0x4930   :  { %v9837_v51 = vsel %vm397_vm4, %v9758_v41, -inf }
0x4931   :  { %9838 = vmax.xlane.f32.xlu1 %v9837_v51  ;;  %v9833_v52 = vpop.f32.mrb[228].mxu1 }
0x4932   :  { %v9834_v53 = vadd.f32 %v9833_v52, %v13071_v34  ;;  %v12405_v54 = vpop.f32.mrb[229].mxu1 }
0x4934   :  { %v9840_v55 = vsel %vm397_vm4, %v9834_v53, -inf }
0x4935   :  { %9841 = vmax.xlane.f32.xlu0 %v9840_v55 }
0x49be   :  { %v9839_v56 = vpop.xlane.xlu1 %9838 }
0x49bf   :  { %v9843_v57 = vsub.f32 %v9758_v41, %v9839_v56 }
0x49c1   :  { %v9845_v58 = vmul.f32 1.442695, %v9843_v57 }
0x49c2   :  { %v9842_v59 = vpop.xlane.xlu0 %9841 }
0x49c3   :  { %12797 = vpow2.f32 %v9845_v58  ;;  %v9844_v60 = vsub.f32 %v9834_v53, %v9842_v59  ;;  %v11089_v53 = vld [vmem:[%s14720_s3 + $0xf] ss:$0 sm:$0xff]  ;;  %v12627_v58 = vld [vmem:[%s14726_s9 + $0xc0] sm:$0xff]  }
0x49c4   :  { %v12628_v59 = vld [vmem:[%s14726_s9 + $0xc8] sm:$0xff]  }
0x49c5   :  { %v9847_v61 = vmul.f32 1.442695, %v9844_v60  ;;  %v12629_v60 = vld [vmem:[%s14726_s9 + $0xd0] sm:$0xff]  }
0x49c7   :  { %12799 = vpow2.f32 %v9847_v61  ;;  %v12630_v61 = vld [vmem:[%s14726_s9 + $0xd8] sm:$0xff]  }
0x49cd   :  { %v12798_v62 = vpop.eup %12797 }
0x49ce   :  { %v9849_v63 = vsel %vm397_vm4, %v12798_v62, 0.0 }
0x49cf   :  { %9850 = vadd.xlane.f32.xlu1 %v9849_v63  ;;  %v12632_v63 = vld [vmem:[%s14726_s9 + $0xe8] sm:$0xff]  }
0x49d1   :  { %v12800_v0 = vpop.eup %12799 }
0x49d2   :  { %v9852_v1 = vsel %vm397_vm4, %v12800_v0, 0.0 }
0x49d3   :  { %9853 = vadd.xlane.f32.xlu0 %v9852_v1  ;;  %v12634_v1 = vld [vmem:[%s14726_s9 + $0xf8] sm:$0xff]  }
0x4a5c   :  { %v9851_v34 = vpop.xlane.xlu1 %9850 }
0x4a5d   :  { %12801 = vrcp.f32 %v9851_v34  ;;  %v11095_v34 = vld [vmem:[%s14728_s11 + $0xd] ss:$0 sm:$0xff] }
0x4a60   :  { %v9854_v2 = vpop.xlane.xlu0 %9853 }
0x4a61   :  { %12803 = vrcp.f32 %v9854_v2 }
0x4a67   :  { %v12802_v3 = vpop.eup %12801 }
0x4a68   :  { %v9857_v4 = vmul.f32 %v12802_v3, %v12798_v62  ;;  %v12631_v62 = vld [vmem:[%s14726_s9 + $0xe0] sm:$0xff]  }
0x4a6a   :  { %12409 = vmatmul.mubr.msk.f32.vlgmr.msra.gmra.mrb[172].mxu0 %vm397_vm4, %v9857_v4 }
0x4a6b   :  { %v12804_v6 = vpop.eup %12803  ;;  %12418 = vmatprep.mubr.msk.bf16.mxu0 %vm12844_vm3, %v12843_v50  ;;  %12417 = vmatpush3.bf16.msra.mxu0 %v10012_v12 }
0x4a6c   :  { %v9858_v7 = vmul.f32 %v12804_v6, %v12800_v0  ;;  %12430 = vmatprep.subr.bf16.mxu0 %v12843_v50  ;;  %v12633_v0 = vld [vmem:[%s14726_s9 + $0xf0] sm:$0xff]  }
0x4a6e   :  { %12414 = vmatmul.mubr.msk.f32.vlgmr.msra.gmra.mrb[230].mxu1 %vm397_vm4, %v9858_v7 }
0x4a6f   :  { %12426 = vmatprep.mubr.msk.bf16.mxu1 %vm12844_vm3, %v12843_v50  ;;  %12423 = vmatpush3.bf16.msra.mxu1 %v12625_v47 }
0x4a70   :  { %12424 = vmatprep.subr.bf16.mxu1 %v12843_v50 }
0x4a73   :  { %12425 = vmatpush3.bf16.msra.mxu1 %v12626_v29 }
0x4a74   :  { %12450 = vmatprep.subr.bf16.mxu1 %v12843_v50 }
0x4b3d   :  { %v9928_v13 = vpop.f32.mrb[172].mxu0 }
0x4b3e   :  { %v12410_v14 = vpop.f32.mrb[173].mxu0 }
0x4b41   :  { %v10001_v15 = vpop.f32.mrb[230].mxu1 }
0x4b42   :  { %v10005_v16 = vpack.c.bf16 %v10001_v15, %v9928_v13  ;;  %v12415_v17 = vpop.f32.mrb[231].mxu1 }
0x4b44   :  { %12419 = vmatmul.mubr.msk.bf16.vlgmr.msra.gmra.mrb[176].mxu0 %vm397_vm4, %v10005_v16 }
0x4b45   :  { %12446 = vmatprep.mubr.msk.bf16.mxu0 %vm12844_vm3, %v12843_v50  ;;  %12431 = vmatpush3.bf16.msra.mxu0 %v12627_v58 }
0x4b46   :  { %12432 = vmatprep.subr.bf16.mxu0 %v12843_v50 }
0x4b49   :  { %12433 = vmatpush3.bf16.msra.mxu0 %v12628_v59  ;;  %v11125_v59 = vld [vmem:[%s14729_s12] ss:$0 sm:$0xff] }
0x4b4a   :  { %12434 = vmatprep.subr.bf16.mxu0 %v12843_v50 }
0x4b4d   :  { %12435 = vmatpush3.bf16.msra.mxu0 %v12629_v60 }
0x4b4e   :  { %12436 = vmatprep.subr.bf16.mxu0 %v12843_v50 }
0x4b51   :  { %12437 = vmatpush3.bf16.msra.mxu0 %v12630_v61 }
0x4b52   :  { %12438 = vmatprep.subr.bf16.mxu0 %v12843_v50 }
0x4b55   :  { %12439 = vmatpush3.bf16.msra.mxu0 %v12631_v62 }
0x4b56   :  { %12440 = vmatprep.subr.bf16.mxu0 %v12843_v50 }
0x4b59   :  { %12441 = vmatpush3.bf16.msra.mxu0 %v12632_v63 }
0x4b5a   :  { %12442 = vmatprep.subr.bf16.mxu0 %v12843_v50 }
0x4b5d   :  { %12443 = vmatpush3.bf16.msra.mxu0 %v12633_v0 }
0x4b5e   :  { %12444 = vmatprep.subr.bf16.mxu0 %v12843_v50 }
0x4b61   :  { %12445 = vmatpush3.bf16.msra.mxu0 %v12634_v1 }
0x4c17   :  { %v10048_v18 = vpop.f32.mrb[176].mxu0 }
0x4c18   :  { %v10055_v19 = vadd.f32 %v10048_v18, %v14570_v21  ;;  %v12420_v20 = vpop.f32.mrb[177].mxu0 }
0x4c19   :  { %v10051_v25 = vpop.f32.mrb[178].mxu0 }
0x4c1a   :  { %v10057_v32 = vadd.f32 %v10055_v19, %v14264_v24  ;;  %v10056_v38 = vadd.f32 %v10051_v25, %v14573_v28  ;;  %v12421_v40 = vpop.f32.mrb[179].mxu0 }
0x4c1c   :  { %v14618_v36 = vadd.f32 %v11085_v22, %v10057_v32  ;;  %v10058_v42 = vadd.f32 %v10056_v38, %v14267_v26 }
0x4c1e   :  { %v14621_v43 = vadd.f32 %v11085_v22, %v10058_v42  ;;  %v10069_v45 = vsel %vm165_vm2, %v14618_v36, 0.0 }
0x4c1f   :  { %10070 = vadd.xlane.f32.xlu1 %v10069_v45 }
0x4c20   :  { %v10072_v9 = vsel %vm165_vm2, %v14621_v43, 0.0 }
0x4c21   :  { %10073 = vadd.xlane.f32.xlu0 %v10072_v9 }
0x4cac   :  { %v10071_v44 = vpop.xlane.xlu1 %10070 }
0x4cad   :  { %v10075_v46 = vmul.f32 0.03125, %v10071_v44 }
0x4cae   :  { %v10074_v24 = vpop.xlane.xlu0 %10073 }
0x4caf   :  { %v10077_v21 = vsub.f32 %v14618_v36, %v10075_v46  ;;  %v10076_v10 = vmul.f32 0.03125, %v10074_v24  ;;  %v11116_v24 = vld [vmem:[%s14728_s11 + $0xe] ss:$0 sm:$0xff] }
0x4cb1   :  { %v10078_v27 = vsub.f32 %v14621_v43, %v10076_v10  ;;  %v10079_v28 = vmul.f32 %v10077_v21, %v10077_v21 }
0x4cb3   :  { %v10081_v26 = vsel %vm165_vm2, %v10079_v28, 0.0  ;;  %v10080_v23 = vmul.f32 %v10078_v27, %v10078_v27 }
0x4cb4   :  { %10082 = vadd.xlane.f32.xlu1 %v10081_v26 }
0x4cb5   :  { %v10084_v31 = vsel %vm165_vm2, %v10080_v23, 0.0 }
0x4cb6   :  { %10085 = vadd.xlane.f32.xlu0 %v10084_v31 }
0x4d41   :  { %v10083_v33 = vpop.xlane.xlu1 %10082 }
0x4d42   :  { %v10087_v5 = vmul.f32 0.03125, %v10083_v33 }
0x4d43   :  { %v10086_v48 = vpop.xlane.xlu0 %10085 }
0x4d44   :  { %v10089_v37 = vadd.f32 1e-05, %v10087_v5  ;;  %v10088_v39 = vmul.f32 0.03125, %v10086_v48 }
0x4d46   :  { %12805 = vrsqrt.f32 %v10089_v37  ;;  %v10090_v8 = vadd.f32 1e-05, %v10088_v39 }
0x4d48   :  { %12807 = vrsqrt.f32 %v10090_v8 }
0x4d50   :  { %v12806_v30 = vpop.eup %12805 }
0x4d51   :  { %v10093_v41 = vmul.f32 %v12806_v30, %v10077_v21 }
0x4d52   :  { %v12808_v49 = vpop.eup %12807 }
0x4d53   :  { %v10099_v51 = vmul.f32 %v11088_v35, %v10093_v41  ;;  %v10094_v52 = vmul.f32 %v12808_v49, %v10078_v27 }
0x4d55   :  { %v10100_v54 = vmul.f32 %v11088_v35, %v10094_v52  ;;  %v10105_v55 = vadd.f32 %v11089_v53, %v10099_v51  ;;  %v12636_v51 = vld [vmem:[%s14730_s13 + $0x8] sm:$0xff]  }
0x4d57   :  { %v10106_v56 = vadd.f32 %v11089_v53, %v10100_v54 }
0x4d59   :  { %v10107_v57 = vpack.c.bf16 %v10106_v56, %v10105_v55 }
0x4d5b   :  { %12427 = vmatmul.mubr.msk.bf16.vlgmr.msra.gmra.mrb[232].mxu1 %vm165_vm2, %v10107_v57 }
0x4d5c   :  { %12454 = vmatprep.mubr.msk.bf16.mxu1 %vm12844_vm3, %v12843_v50 }
0x4e2e   :  { %v10167_v2 = vpop.f32.mrb[232].mxu1 }
0x4e2f   :  { %v10168_v3 = vadd.f32 %v11095_v34, %v10167_v2  ;;  %v12428_v4 = vpop.f32.mrb[233].mxu1 }
0x4e30   :  { %v10170_v6 = vpop.f32.mrb[234].mxu1 }
0x4e31   :  { %v10176_v7 = vmul.f32 0.044715, %v10168_v3  ;;  %v10171_v11 = vadd.f32 %v11095_v34, %v10170_v6  ;;  %v12429_v12 = vpop.f32.mrb[235].mxu1  ;;  %v10174_v40 = vmul.f32 0.5, %v10168_v3 }
0x4e33   :  { %v10178_v13 = vmul.f32 %v10176_v7, %v10168_v3  ;;  %v10177_v14 = vmul.f32 0.044715, %v10171_v11  ;;  %v10175_v42 = vmul.f32 0.5, %v10171_v11 }
0x4e35   :  { %v10180_v15 = vmul.f32 %v10178_v13, %v10168_v3  ;;  %v10179_v16 = vmul.f32 %v10177_v14, %v10171_v11 }
0x4e37   :  { %v10182_v17 = vadd.f32 %v10180_v15, %v10168_v3  ;;  %v10181_v18 = vmul.f32 %v10179_v16, %v10171_v11 }
0x4e39   :  { %v10184_v19 = vmul.f32 0.7978845, %v10182_v17  ;;  %v10183_v20 = vadd.f32 %v10181_v18, %v10171_v11 }
0x4e3b   :  { %12809 = vtanh.f32 %v10184_v19  ;;  %v10185_v22 = vmul.f32 0.7978845, %v10183_v20 }
0x4e3d   :  { %12811 = vtanh.f32 %v10185_v22 }
0x4e45   :  { %v12810_v25 = vpop.eup %12809 }
0x4e46   :  { %v10188_v32 = vadd.f32 1.0, %v12810_v25 }
0x4e47   :  { %v12812_v38 = vpop.eup %12811 }
0x4e48   :  { %v10189_v45 = vadd.f32 1.0, %v12812_v38  ;;  %v10190_v9 = vmul.f32 %v10188_v32, %v10174_v40 }
0x4e4a   :  { %v10191_v44 = vmul.f32 %v10189_v45, %v10175_v42 }
0x4e4c   :  { %v10192_v46 = vpack.c.bf16 %v10191_v44, %v10190_v9 }
0x4e4e   :  { %12447 = vmatmul.mubr.bf16.vlgmr.msra.gmra.mrb[180].mxu0 %v10192_v46 }
0x4f21   :  { %v10297_v21 = vpop.f32.mrb[180].mxu0 }
0x4f22   :  { %v10298_v10 = vadd.f32 %v11116_v24, %v10297_v21  ;;  %v12448_v27 = vpop.f32.mrb[181].mxu0 }
0x4f23   :  { %v10300_v28 = vpop.f32.mrb[182].mxu0 }
0x4f24   :  { %v10304_v26 = vadd.f32 %v10298_v10, %v14618_v36  ;;  %v10301_v23 = vadd.f32 %v11116_v24, %v10300_v28  ;;  %v12449_v31 = vpop.f32.mrb[183].mxu0 }
0x4f26   :  { %v10308_v47 = vsel %vm165_vm2, %v10304_v26, 0.0  ;;  %v10305_v29 = vadd.f32 %v10301_v23, %v14621_v43  ;;  %v12635_v43 = vld [vmem:[%s14730_s13] sm:$0xff]  }
0x4f27   :  { %10309 = vadd.xlane.f32.xlu1 %v10308_v47  ;;  %12451 = vmatpush3.bf16.msra.mxu1 %v12635_v43 }
0x4f28   :  { %v10311_v33 = vsel %vm165_vm2, %v10305_v29, 0.0  ;;  %12452 = vmatprep.subr.bf16.mxu1 %v12843_v50  ;;  %v11126_v50 = vld [vmem:[%s14729_s12 + $0x1] ss:$0 sm:$0xff] }
0x4f29   :  { %10312 = vadd.xlane.f32.xlu0 %v10311_v33 }
0x4f2b   :  { %12453 = vmatpush3.bf16.msra.mxu1 %v12636_v51 }
0x4fb4   :  { %v10310_v5 = vpop.xlane.xlu1 %10309 }
0x4fb5   :  { %v10314_v48 = vmul.f32 0.03125, %v10310_v5 }
0x4fb6   :  { %v10313_v37 = vpop.xlane.xlu0 %10312 }
0x4fb7   :  { %v10316_v39 = vsub.f32 %v10304_v26, %v10314_v48  ;;  %v10315_v8 = vmul.f32 0.03125, %v10313_v37 }
0x4fb9   :  { %v10317_v30 = vsub.f32 %v10305_v29, %v10315_v8  ;;  %v10318_v35 = vmul.f32 %v10316_v39, %v10316_v39 }
0x4fbb   :  { %v10320_v41 = vsel %vm165_vm2, %v10318_v35, 0.0  ;;  %v10319_v36 = vmul.f32 %v10317_v30, %v10317_v30 }
0x4fbc   :  { %10321 = vadd.xlane.f32.xlu1 %v10320_v41 }
0x4fbd   :  { %v10323_v49 = vsel %vm165_vm2, %v10319_v36, 0.0 }
0x4fbe   :  { %10324 = vadd.xlane.f32.xlu0 %v10323_v49 }
0x5049   :  { %v10322_v52 = vpop.xlane.xlu1 %10321 }
0x504a   :  { %v10326_v53 = vmul.f32 0.03125, %v10322_v52 }
0x504b   :  { %v10325_v54 = vpop.xlane.xlu0 %10324 }
0x504c   :  { %v10328_v55 = vadd.f32 1e-05, %v10326_v53  ;;  %v10327_v56 = vmul.f32 0.03125, %v10325_v54 }
0x504e   :  { %12813 = vrsqrt.f32 %v10328_v55  ;;  %v10329_v57 = vadd.f32 1e-05, %v10327_v56 }
0x5050   :  { %12815 = vrsqrt.f32 %v10329_v57 }
0x5058   :  { %v12814_v58 = vpop.eup %12813 }
0x5059   :  { %v10332_v60 = vmul.f32 %v12814_v58, %v10316_v39 }
0x505a   :  { %v12816_v61 = vpop.eup %12815 }
0x505b   :  { %v10338_v62 = vmul.f32 %v11125_v59, %v10332_v60  ;;  %v10333_v63 = vmul.f32 %v12816_v61, %v10317_v30 }
0x505d   :  { %v10339_v0 = vmul.f32 %v11125_v59, %v10333_v63  ;;  %v10344_v1 = vadd.f32 %v11126_v50, %v10338_v62 }
0x505f   :  { %v10345_v34 = vadd.f32 %v11126_v50, %v10339_v0 }
0x5061   :  { %v10346_v2 = vpack.c.bf16 %v10345_v34, %v10344_v1 }
0x5063   :  { %12455 = vmatmul.mubr.msk.bf16.vlgmr.msra.gmra.mrb[236].mxu1 %vm165_vm2, %v10346_v2 }
0x5136   :  { %v10400_v3 = vpop.f32.mrb[236].mxu1 }
0x5137   :  { %10407 = vst [vmem:[#allocation2] sm:$0xff] %v10400_v3  ;;  %v12456_v4 = vpop.f32.mrb[237].mxu1 }
0x5138   :  { %v10403_v6 = vpop.f32.mrb[238].mxu1 }
0x5139   :  { %10408 = vst [vmem:[#allocation2 + $0x8] sm:$0xff] %v10403_v6  ;;  %v12457_v7 = vpop.f32.mrb[239].mxu1 }
0x513a   :  { %12828 = shalt.err (!%p12825_p4)
}
0x513b   :  { %s12829_s6 = scalar_lea.hbm %s14731_s14, 256 }
0x513c   :  { %p12830_p5 = scmp.ne.s32.totalorder %s14731_s14, %s12829_s6  ;;  %p12833_p6 = scmp.lt.u32.totalorder %s12829_s6, %s14731_s14 }
0x513e   :  { %p12835_p7 = pnand %p12833_p6, %p12830_p5 }
0x5140   :  { %12838 = shalt.err (!%p12835_p7)
}
0x5141   :  { %s12847_s1 = smov 128   ;;  %s12848_s5 = smov 8  }
0x5142   :  { %10420 = dma.vmem_to_hbm [thread:$0]  %s10415_s27, 256, %s14731_s14, [#allocation3], %s12847_s1, %s12847_s1, %s12848_s5  }
0x5143   :  { %12839 = dma.done.wait [#allocation3], 256  }
0x5144   :  { %12840 = vsyncadd [#allocation3], 4294967040 }
0x5145   :  { %10424 = vsyncpa [#allocation3], 1 }

</bundles_post_ra>
